<compile_context>
chip_gen: v6e
topology: v6e:2x2x1
jax: 0.10.0
libtpu: 0.0.40
codegen_flags: <defaults>
</compile_context>

<pallas_src>
import functools

import jax
import jax.numpy as jnp
from jax.experimental import pallas as pl
from jax.experimental.pallas import tpu as pltpu


# ------------------------- Pallas kernels -------------------------

def _conv_matmul_relu_kernel(cols_ref, w_ref, o_ref):
    # cols: (M, K) resident; w: (K, TILE_N) streamed per grid step -> relu(cols @ w_tile)
    acc = jnp.dot(cols_ref[...], w_ref[...], preferred_element_type=jnp.float32)
    o_ref[...] = jnp.maximum(acc, 0.0).astype(o_ref.dtype)


def _conv2_pool_fc_kernel(cols_ref, w2_ref, w3_ref, b_ref, o_ref, *, n_batch, n_spatial):
    # Fused: conv2 (as matmul over a Cout tile) -> ReLU -> mean over spatial
    #        -> partial 1x1-conv (fc) contribution, accumulated into o_ref.
    j = pl.program_id(0)

    h = jnp.dot(cols_ref[...], w2_ref[...], preferred_element_type=jnp.float32)
    h = jnp.maximum(h, 0.0)                                   # (n_batch*n_spatial, TILE_C)
    pooled = jnp.mean(h.reshape(n_batch, n_spatial, -1), axis=1)      # (n_batch, TILE_C)
    partial = jnp.dot(pooled, w3_ref[...], preferred_element_type=jnp.float32)  # (n_batch, O)

    @pl.when(j == 0)
    def _init():
        # Fold the bias into the accumulator init (fused epilogue, written only once).
        o_ref[...] = jnp.broadcast_to(b_ref[...], o_ref.shape).astype(o_ref.dtype)

    o_ref[...] += partial.astype(o_ref.dtype)


# ------------------------- pallas_call wrappers -------------------------

def conv_matmul_relu(cols, w_mat, *, tile_n=128):
    M, K = cols.shape
    K2, N = w_mat.shape
    assert K == K2 and N % tile_n == 0 and M % 8 == 0 and K % 128 == 0
    n_tiles = N // tile_n
    return pl.pallas_call(
        _conv_matmul_relu_kernel,
        out_shape=jax.ShapeDtypeStruct((M, N), jnp.float32),
        grid_spec=pltpu.PrefetchScalarGridSpec(
            num_scalar_prefetch=0,
            grid=(n_tiles,),
            in_specs=[
                pl.BlockSpec((M, K), lambda j: (0, 0)),        # activations: resident
                pl.BlockSpec((K, tile_n), lambda j: (0, j)),   # weights: streamed per tile
            ],
            out_specs=pl.BlockSpec((M, tile_n), lambda j: (0, j)),
        ),
        compiler_params=pltpu.CompilerParams(
            dimension_semantics=("parallel",),                 # v7x: split weight stream over 2 TCs
            vmem_limit_bytes=32 << 20,
        ),
    )(cols, w_mat)


def conv2_pool_fc(cols2, w2m, w3m, b3, *, n_batch, n_spatial, tile_c=128):
    M2, K2 = cols2.shape
    K2b, C2 = w2m.shape
    C2b, O = w3m.shape
    assert K2 == K2b and C2 == C2b and C2 % tile_c == 0
    assert M2 == n_batch * n_spatial and M2 % 8 == 0 and K2 % 128 == 0
    n_tiles = C2 // tile_c
    kern = functools.partial(_conv2_pool_fc_kernel, n_batch=n_batch, n_spatial=n_spatial)
    return pl.pallas_call(
        kern,
        out_shape=jax.ShapeDtypeStruct((n_batch, O), jnp.float32),
        grid_spec=pltpu.PrefetchScalarGridSpec(
            num_scalar_prefetch=0,
            grid=(n_tiles,),
            in_specs=[
                pl.BlockSpec((M2, K2), lambda j: (0, 0)),      # conv2 im2col cols: resident
                pl.BlockSpec((K2, tile_c), lambda j: (0, j)),  # conv2 weight tile: streamed
                pl.BlockSpec((tile_c, O), lambda j: (j, 0)),   # matching fc-weight rows
                pl.BlockSpec((1, O), lambda j: (0, 0)),        # bias
            ],
            out_specs=pl.BlockSpec((n_batch, O), lambda j: (0, 0)),   # accumulator output
        ),
        compiler_params=pltpu.CompilerParams(
            dimension_semantics=("arbitrary",),                # reduction over Cout tiles
            vmem_limit_bytes=32 << 20,
        ),
    )(cols2, w2m, w3m, b3)


# ------------------------- JAX glue -------------------------

def im2col(x_nhwc, ksize=3, stride=2, pad=1):
    N, H, W, C = x_nhwc.shape
    xp = jnp.pad(x_nhwc, ((0, 0), (pad, pad), (pad, pad), (0, 0)))
    Ho = (H + 2 * pad - ksize) // stride + 1
    Wo = (W + 2 * pad - ksize) // stride + 1
    patches = []
    for kh in range(ksize):
        for kw in range(ksize):
            patches.append(
                xp[:, kh:kh + stride * Ho:stride, kw:kw + stride * Wo:stride, :])
    cols = jnp.stack(patches, axis=3)                          # (N, Ho, Wo, K*K, C)
    return cols.reshape(N * Ho * Wo, ksize * ksize * C), (N, Ho, Wo)


def net_gcr_forward(x_nhwc, params):
    """Hot path: expects NHWC input and pre-laid-out weight matrices."""
    cols1, (N, H1, W1) = im2col(x_nhwc, ksize=3, stride=2, pad=1)
    a1 = conv_matmul_relu(cols1, params["w1m"], tile_n=128)    # (N*H1*W1, 512), ReLU'd
    a1 = a1.reshape(N, H1, W1, -1)

    cols2, (N2, H2, W2) = im2col(a1, ksize=3, stride=2, pad=1)
    out = conv2_pool_fc(cols2, params["w2m"], params["w3m"], params["b3"],
                        n_batch=N, n_spatial=H2 * W2, tile_c=128)   # (N, out_channels)
    return out


def net_gcr_forward_nchw(x_nchw, params):
    """Spec-compatible entry point (PyTorch NCHW)."""
    return net_gcr_forward(jnp.transpose(x_nchw, (0, 2, 3, 1)), params)


def init_params(key, out_channels=12):
    # Matches net_gcr._init_weights: normal(0, 0.01) for all conv weights (OIHW), then the
    # weights are re-laid-out ONCE here as matmul matrices -- never inside the forward.
    k1, k2, k3, k4 = jax.random.split(key, 4)
    w1 = 0.01 * jax.random.normal(k1, (512, 512, 3, 3), jnp.float32)
    w2 = 0.01 * jax.random.normal(k2, (256, 512, 3, 3), jnp.float32)
    w3 = 0.01 * jax.random.normal(k3, (out_channels, 256, 1, 1), jnp.float32)
    # conv3 bias keeps the PyTorch default init: U(-1/sqrt(fan_in), 1/sqrt(fan_in)), fan_in = 256
    bound = 1.0 / (256.0 ** 0.5)
    b3 = jax.random.uniform(k4, (out_channels,), jnp.float32, -bound, bound)

    def to_mat(w_oihw):
        # (Cout, Cin, KH, KW) -> (KH*KW*Cin, Cout), matching im2col's (kh, kw, cin) ordering.
        Cout, Cin, KH, KW = w_oihw.shape
        return jnp.transpose(w_oihw, (2, 3, 1, 0)).reshape(KH * KW * Cin, Cout)

    return {
        "w1m": to_mat(w1),                                        # (4608, 512)
        "w2m": to_mat(w2),                                        # (4608, 256)
        "w3m": jnp.transpose(w3.reshape(out_channels, 256)),      # (256, out_channels)
        "b3": b3.reshape(1, out_channels),                        # (1, out_channels)
    }


if __name__ == "__main__":
    key = jax.random.PRNGKey(0)
    kx, kp = jax.random.split(key)
    # Channel dims are fixed by the module (512 in-channels); small batch/spatial extent.
    x_nchw = jax.random.normal(kx, (2, 512, 8, 8), jnp.float32)   # PyTorch-style NCHW
    params = init_params(kp, out_channels=12)

    # NCHW -> NHWC once, outside the jitted hot path.
    x_nhwc = jnp.transpose(x_nchw, (0, 2, 3, 1))

    fwd = jax.jit(net_gcr_forward)
    out = jax.block_until_ready(fwd(x_nhwc, params))
    assert out.shape == (2, 12), out.shape
    print("KERNEL_OK")
</pallas_src>

<mosaic_0001>
module attributes {stable_mosaic.version = 11 : i64} {
  func.func @_conv_matmul_relu_kernel(%arg0: i32, %arg1: memref<32x4608xf32, #tpu.memory_space<vmem>>, %arg2: memref<4608x128xf32, #tpu.memory_space<vmem>>, %arg3: memref<32x128xf32, #tpu.memory_space<vmem>>) attributes {dimension_semantics = [#tpu.dimension_semantics<parallel>], iteration_bounds = array<i64: 4>, scalar_prefetch = 0 : i64, scratch_operands = 0 : i64, tpu.core_type = #tpu.core_type<tc>, window_params = [{pipeline_mode = #tpu.pipeline_mode<synchronous>, transform_indices = @transform_0, window_bounds = array<i64: 32, 4608>}, {transform_indices = @transform_1, window_bounds = array<i64: 4608, 128>}, {transform_indices = @transform_2, window_bounds = array<i64: 32, 128>}]} {
    %c0 = arith.constant 0 : index
    %c0_0 = arith.constant 0 : index
    %0 = vector.load %arg1[%c0, %c0_0] : memref<32x4608xf32, #tpu.memory_space<vmem>>, vector<32x4608xf32>
    %c0_1 = arith.constant 0 : index
    %c0_2 = arith.constant 0 : index
    %1 = vector.load %arg2[%c0_1, %c0_2] : memref<4608x128xf32, #tpu.memory_space<vmem>>, vector<4608x128xf32>
    %cst = arith.constant dense<0.000000e+00> : vector<32x128xf32>
    %2 = tpu.matmul %0, %1, %cst {dimension_numbers = #tpu.dot_dimension_numbers<[1], [0], [0], [1], [0, 0, 1, 1], [], []>} : vector<32x4608xf32>, vector<4608x128xf32>, vector<32x128xf32> -> vector<32x128xf32>
    %cst_3 = arith.constant 0.000000e+00 : f32
    %3 = vector.broadcast %cst_3 : f32 to vector<32x128xf32>
    %4 = arith.maximumf %2, %3 : vector<32x128xf32>
    %c0_4 = arith.constant 0 : index
    %c0_5 = arith.constant 0 : index
    %5 = vector.load %arg3[%c0_4, %c0_5] : memref<32x128xf32, #tpu.memory_space<vmem>>, vector<32x128xf32>
    tpu.vector_store %arg3[%c0_4, %c0_5], %4 {strides = array<i32>} : memref<32x128xf32, #tpu.memory_space<vmem>>, vector<32x128xf32>,
    return
  }
  func.func @transform_0(%arg0: i32) -> (i32, i32) {
    %c0_i32 = arith.constant 0 : i32
    %c0_i32_0 = arith.constant 0 : i32
    %c0_i32_1 = arith.constant 0 : i32
    return %c0_i32, %c0_i32_0 : i32, i32
  }
  func.func @transform_1(%arg0: i32) -> (i32, i32) {
    %c0_i32 = arith.constant 0 : i32
    %c0_i32_0 = arith.constant 0 : i32
    return %c0_i32, %arg0 : i32, i32
  }
  func.func @transform_2(%arg0: i32) -> (i32, i32) {
    %c0_i32 = arith.constant 0 : i32
    %c0_i32_0 = arith.constant 0 : i32
    return %c0_i32, %arg0 : i32, i32
  }
}

module attributes {stable_mosaic.version = 11 : i64} {
  func.func @_conv2_pool_fc_kernel(%arg0: i32, %arg1: memref<8x4608xf32, #tpu.memory_space<vmem>>, %arg2: memref<4608x128xf32, #tpu.memory_space<vmem>>, %arg3: memref<128x12xf32, #tpu.memory_space<vmem>>, %arg4: memref<1x12xf32, #tpu.memory_space<vmem>>, %arg5: memref<2x12xf32, #tpu.memory_space<vmem>>) attributes {dimension_semantics = [#tpu.dimension_semantics<arbitrary>], iteration_bounds = array<i64: 2>, scalar_prefetch = 0 : i64, scratch_operands = 0 : i64, tpu.core_type = #tpu.core_type<tc>, window_params = [{pipeline_mode = #tpu.pipeline_mode<synchronous>, transform_indices = @transform_0, window_bounds = array<i64: 8, 4608>}, {transform_indices = @transform_1, window_bounds = array<i64: 4608, 128>}, {transform_indices = @transform_2, window_bounds = array<i64: 128, 12>}, {pipeline_mode = #tpu.pipeline_mode<synchronous>, transform_indices = @transform_3, window_bounds = array<i64: 1, 12>}, {pipeline_mode = #tpu.pipeline_mode<synchronous>, transform_indices = @transform_4, window_bounds = array<i64: 2, 12>}]} {
    %c0 = arith.constant 0 : index
    %c0_0 = arith.constant 0 : index
    %0 = vector.load %arg1[%c0, %c0_0] : memref<8x4608xf32, #tpu.memory_space<vmem>>, vector<8x4608xf32>
    %c0_1 = arith.constant 0 : index
    %c0_2 = arith.constant 0 : index
    %1 = vector.load %arg2[%c0_1, %c0_2] : memref<4608x128xf32, #tpu.memory_space<vmem>>, vector<4608x128xf32>
    %cst = arith.constant dense<0.000000e+00> : vector<8x128xf32>
    %2 = tpu.matmul %0, %1, %cst {dimension_numbers = #tpu.dot_dimension_numbers<[1], [0], [0], [1], [0, 0, 1, 1], [], []>} : vector<8x4608xf32>, vector<4608x128xf32>, vector<8x128xf32> -> vector<8x128xf32>
    %cst_3 = arith.constant 0.000000e+00 : f32
    %3 = vector.broadcast %cst_3 : f32 to vector<8x128xf32>
    %4 = arith.maximumf %2, %3 : vector<8x128xf32>
    %5 = vector.shape_cast %4 : vector<8x128xf32> to vector<2x4x128xf32>
    %cst_4 = arith.constant dense<0.000000e+00> : vector<2x128xf32>
    %6 = vector.multi_reduction <add>, %5, %cst_4 [1] : vector<2x4x128xf32> to vector<2x128xf32>
    %cst_5 = arith.constant 4.000000e+00 : f32
    %7 = vector.broadcast %cst_5 : f32 to vector<2x128xf32>
    %8 = arith.divf %6, %7 : vector<2x128xf32>
    %c0_6 = arith.constant 0 : index
    %c0_7 = arith.constant 0 : index
    %9 = vector.load %arg3[%c0_6, %c0_7] : memref<128x12xf32, #tpu.memory_space<vmem>>, vector<128x12xf32>
    %cst_8 = arith.constant dense<0.000000e+00> : vector<2x12xf32>
    %10 = tpu.matmul %8, %9, %cst_8 {dimension_numbers = #tpu.dot_dimension_numbers<[1], [0], [0], [1], [0, 0, 1, 1], [], []>} : vector<2x128xf32>, vector<128x12xf32>, vector<2x12xf32> -> vector<2x12xf32>
    %c0_i32 = arith.constant 0 : i32
    %11 = arith.cmpi eq, %arg0, %c0_i32 : i32
    %12 = arith.extui %11 : i1 to i32
    %c0_i32_9 = arith.constant 0 : i32
    %13 = arith.cmpi ne, %12, %c0_i32_9 : i32
    scf.if %13 {
      %c0_14 = arith.constant 0 : index
      %c0_15 = arith.constant 0 : index
      %17 = vector.load %arg4[%c0_14, %c0_15] : memref<1x12xf32, #tpu.memory_space<vmem>>, vector<1x12xf32>
      %18 = vector.shape_cast %17 : vector<1x12xf32> to vector<1x12xf32>
      %19 = vector.broadcast %18 : vector<1x12xf32> to vector<2x12xf32>
      %c0_16 = arith.constant 0 : index
      %c0_17 = arith.constant 0 : index
      %20 = vector.load %arg5[%c0_16, %c0_17] : memref<2x12xf32, #tpu.memory_space<vmem>>, vector<2x12xf32>
      tpu.vector_store %arg5[%c0_16, %c0_17], %19 {strides = array<i32>} : memref<2x12xf32, #tpu.memory_space<vmem>>, vector<2x12xf32>,
    } else {
    }
    %c0_10 = arith.constant 0 : index
    %c0_11 = arith.constant 0 : index
    %14 = vector.load %arg5[%c0_10, %c0_11] : memref<2x12xf32, #tpu.memory_space<vmem>>, vector<2x12xf32>
    %15 = arith.addf %14, %10 : vector<2x12xf32>
    %c0_12 = arith.constant 0 : index
    %c0_13 = arith.constant 0 : index
    %16 = vector.load %arg5[%c0_12, %c0_13] : memref<2x12xf32, #tpu.memory_space<vmem>>, vector<2x12xf32>
    tpu.vector_store %arg5[%c0_12, %c0_13], %15 {strides = array<i32>} : memref<2x12xf32, #tpu.memory_space<vmem>>, vector<2x12xf32>,
    return
  }
  func.func @transform_0(%arg0: i32) -> (i32, i32) {
    %c0_i32 = arith.constant 0 : i32
    %c0_i32_0 = arith.constant 0 : i32
    %c0_i32_1 = arith.constant 0 : i32
    return %c0_i32, %c0_i32_0 : i32, i32
  }
  func.func @transform_1(%arg0: i32) -> (i32, i32) {
    %c0_i32 = arith.constant 0 : i32
    %c0_i32_0 = arith.constant 0 : i32
    return %c0_i32, %arg0 : i32, i32
  }
  func.func @transform_2(%arg0: i32) -> (i32, i32) {
    %c0_i32 = arith.constant 0 : i32
    %c0_i32_0 = arith.constant 0 : i32
    return %arg0, %c0_i32 : i32, i32
  }
  func.func @transform_3(%arg0: i32) -> (i32, i32) {
    %c0_i32 = arith.constant 0 : i32
    %c0_i32_0 = arith.constant 0 : i32
    %c0_i32_1 = arith.constant 0 : i32
    return %c0_i32, %c0_i32_0 : i32, i32
  }
  func.func @transform_4(%arg0: i32) -> (i32, i32) {
    %c0_i32 = arith.constant 0 : i32
    %c0_i32_0 = arith.constant 0 : i32
    %c0_i32_1 = arith.constant 0 : i32
    return %c0_i32, %c0_i32_0 : i32, i32
  }
}

</mosaic_0001>

<bundles_post_ra>
// kernel: net_gcr_forward.3
= control target key start
LH: loop header
LB: loop body
LE: loop exit
PB: predicated region body
PF: predicated region fallthrough
CT: control target
= control target key end

     0   :  { %9 = vsyncpa [#allocation4], 0  ;;  %s7770_s15 = smov 0   ;;  %s7772_s16 = smov 0   ;;  %s9699_s0 = inlined_call_operand.vmem [shape: f32[8,4608], index: 0, kind: input, shape index: {}]   ;;  %s9700_s1 = inlined_call_operand.vmem [shape: f32[4608,256], index: 1, kind: input, shape index: {}]   ;;  %s9701_s2 = inlined_call_operand.vmem [shape: f32[256,12], index: 2, kind: input, shape index: {}]   ;;  %s9702_s3 = inlined_call_operand.vmem [shape: f32[1,12], index: 3, kind: input, shape index: {}]   ;;  %s9703_s4 = inlined_call_operand.hbm [shape: f32[2,12], index: 4, kind: output, shape index: {}]  }
   0x1   :  { %s7774_s17 = smov 0  }
   0x2 LB: > { %s7786_s18 = sadd.s32 4294967295, %s7740_s17   ;;  %s7789_s19 = sadd.s32 1, %s7740_s17   ;;  %s7740_s17 = sphi %s7774_s17, %s9706_s17   ;;  %s7736_s16 = sphi %s7772_s16, %s9705_s16   ;;  %s7732_s15 = sphi %s7770_s15, %s9704_s15  }
   0x3   : > { %s40_s20 = ssub.s32 %s7740_s17, %s7789_s19  ;;  %s43_s21 = sadd.s32 1, %s7736_s16 }
   0x4   : > { %p41_p0 = scmp.eq.s32.totalorder %s40_s20, 0  ;;  %p50_p1 = scmp.ne.s32.totalorder %s7736_s16, %s7732_s15 }
   0x5   : > { %p51_p2 = scmp.eq.s32.totalorder %s7740_s17, 0  ;;  %p6962_p4 = scmp.ge.s32.totalorder %s7740_s17, 2 }
   0x6   : > { %s7798_s22 = scalar_select %p41_p0, %s7736_s16, %s43_s21  }
   0x7   : > { %p52_p3 = por %p51_p2, %p50_p1  ;;  %150 = sbr.rel (%p6962_p4) target bundleno = 304 (0x130), region = 24 }
   0xc   : > { %153 = sbr.rel (!%p52_p3) target bundleno = 304 (0x130), region = 28  ;;  %s155_s23 = sand.u32 (%p52_p3), 1, %s7736_s16  }
   0xd   : > { %s6963_s24 = sshll.u32 (%p52_p3), %s7740_s17, 3  ;;  %s7655_s25 = smul.u32 (%p52_p3), 4608, %s155_s23 }
   0xe   : > { %s7806_s28 = scalar_lea.vmem (%p52_p3), %s9700_s1, %s6963_s24 }
   0xf   : > { %v1341_v0 = vld [vmem:[%s7806_s28] sm:$0xff] (%p52_p3)  ;;  %v1343_v1 = vld [vmem:[%s7806_s28 + $0x10] sm:$0xff] (%p52_p3)  ;;  %s7814_s29 = scalar_lea.vmem (%p52_p3), [#allocation2], %s7655_s25 }
  0x10   : > { %v1345_v2 = vld [vmem:[%s7806_s28 + $0x20] sm:$0xff] (%p52_p3)  ;;  %v1347_v3 = vld [vmem:[%s7806_s28 + $0x30] sm:$0xff] (%p52_p3)  ;;  %1342 = vst [vmem:[%s7814_s29] sm:$0xff] (%p52_p3), %v1341_v0  ;;  %1344 = vst [vmem:[%s7814_s29 + $0x8] sm:$0xff] (%p52_p3), %v1343_v1 }
  0x11   : > { %v1349_v4 = vld [vmem:[%s7806_s28 + $0x40] sm:$0xff]  ;;  %v1351_v5 = vld [vmem:[%s7806_s28 + $0x50] sm:$0xff]  ;;  %1346 = vst [vmem:[%s7814_s29 + $0x10] sm:$0xff] %v1345_v2  ;;  %1348 = vst [vmem:[%s7814_s29 + $0x18] sm:$0xff] %v1347_v3 }
  0x12   : > { %1350 = vst [vmem:[%s7814_s29 + $0x20] sm:$0xff] %v1349_v4  ;;  %1352 = vst [vmem:[%s7814_s29 + $0x28] sm:$0xff] %v1351_v5  ;;  %v1353_v6 = vld [vmem:[%s7806_s28 + $0x60] sm:$0xff]  ;;  %v1355_v7 = vld [vmem:[%s7806_s28 + $0x70] sm:$0xff] }
  0x13   : > { %v1357_v8 = vld [vmem:[%s7806_s28 + $0x80] sm:$0xff]  ;;  %1354 = vst [vmem:[%s7814_s29 + $0x30] sm:$0xff] %v1353_v6  ;;  %1356 = vst [vmem:[%s7814_s29 + $0x38] sm:$0xff] %v1355_v7  ;;  %v1359_v9 = vld [vmem:[%s7806_s28 + $0x90] sm:$0xff] }
  0x14   : > { %1358 = vst [vmem:[%s7814_s29 + $0x40] sm:$0xff] %v1357_v8  ;;  %v1361_v10 = vld [vmem:[%s7806_s28 + $0xa0] sm:$0xff]  ;;  %v1363_v11 = vld [vmem:[%s7806_s28 + $0xb0] sm:$0xff]  ;;  %1360 = vst [vmem:[%s7814_s29 + $0x48] sm:$0xff] %v1359_v9 }
  0x15   : > { %1362 = vst [vmem:[%s7814_s29 + $0x50] sm:$0xff] %v1361_v10  ;;  %1364 = vst [vmem:[%s7814_s29 + $0x58] sm:$0xff] %v1363_v11  ;;  %v1365_v12 = vld [vmem:[%s7806_s28 + $0xc0] sm:$0xff]  ;;  %v1367_v13 = vld [vmem:[%s7806_s28 + $0xd0] sm:$0xff] }
  0x16   : > { %v1369_v14 = vld [vmem:[%s7806_s28 + $0xe0] sm:$0xff]  ;;  %1366 = vst [vmem:[%s7814_s29 + $0x60] sm:$0xff] %v1365_v12  ;;  %1368 = vst [vmem:[%s7814_s29 + $0x68] sm:$0xff] %v1367_v13  ;;  %v1371_v15 = vld [vmem:[%s7806_s28 + $0xf0] sm:$0xff] }
  0x17   : > { %1370 = vst [vmem:[%s7814_s29 + $0x70] sm:$0xff] %v1369_v14  ;;  %v1373_v16 = vld [vmem:[%s7806_s28 + $0x100] sm:$0xff]  ;;  %v1375_v17 = vld [vmem:[%s7806_s28 + $0x110] sm:$0xff]  ;;  %1372 = vst [vmem:[%s7814_s29 + $0x78] sm:$0xff] %v1371_v15 }
  0x18   : > { %1374 = vst [vmem:[%s7814_s29 + $0x80] sm:$0xff] %v1373_v16  ;;  %1376 = vst [vmem:[%s7814_s29 + $0x88] sm:$0xff] %v1375_v17  ;;  %v1377_v18 = vld [vmem:[%s7806_s28 + $0x120] sm:$0xff]  ;;  %v1379_v19 = vld [vmem:[%s7806_s28 + $0x130] sm:$0xff] }
  0x19   : > { %v1381_v20 = vld [vmem:[%s7806_s28 + $0x140] sm:$0xff]  ;;  %1378 = vst [vmem:[%s7814_s29 + $0x90] sm:$0xff] %v1377_v18  ;;  %1380 = vst [vmem:[%s7814_s29 + $0x98] sm:$0xff] %v1379_v19  ;;  %v1383_v21 = vld [vmem:[%s7806_s28 + $0x150] sm:$0xff] }
  0x1a   : > { %1382 = vst [vmem:[%s7814_s29 + $0xa0] sm:$0xff] %v1381_v20  ;;  %v1385_v22 = vld [vmem:[%s7806_s28 + $0x160] sm:$0xff]  ;;  %v1387_v23 = vld [vmem:[%s7806_s28 + $0x170] sm:$0xff]  ;;  %1384 = vst [vmem:[%s7814_s29 + $0xa8] sm:$0xff] %v1383_v21 }
  0x1b   : > { %1386 = vst [vmem:[%s7814_s29 + $0xb0] sm:$0xff] %v1385_v22  ;;  %1388 = vst [vmem:[%s7814_s29 + $0xb8] sm:$0xff] %v1387_v23  ;;  %v1389_v24 = vld [vmem:[%s7806_s28 + $0x180] sm:$0xff]  ;;  %v1391_v25 = vld [vmem:[%s7806_s28 + $0x190] sm:$0xff] }
  0x1c   : > { %v1393_v26 = vld [vmem:[%s7806_s28 + $0x1a0] sm:$0xff]  ;;  %1390 = vst [vmem:[%s7814_s29 + $0xc0] sm:$0xff] %v1389_v24  ;;  %1392 = vst [vmem:[%s7814_s29 + $0xc8] sm:$0xff] %v1391_v25  ;;  %v1395_v27 = vld [vmem:[%s7806_s28 + $0x1b0] sm:$0xff] }
  0x1d   : > { %1394 = vst [vmem:[%s7814_s29 + $0xd0] sm:$0xff] %v1393_v26  ;;  %v1397_v28 = vld [vmem:[%s7806_s28 + $0x1c0] sm:$0xff]  ;;  %v1399_v29 = vld [vmem:[%s7806_s28 + $0x1d0] sm:$0xff]  ;;  %1396 = vst [vmem:[%s7814_s29 + $0xd8] sm:$0xff] %v1395_v27 }
  0x1e   : > { %1398 = vst [vmem:[%s7814_s29 + $0xe0] sm:$0xff] %v1397_v28  ;;  %1400 = vst [vmem:[%s7814_s29 + $0xe8] sm:$0xff] %v1399_v29  ;;  %v1401_v30 = vld [vmem:[%s7806_s28 + $0x1e0] sm:$0xff]  ;;  %v1403_v31 = vld [vmem:[%s7806_s28 + $0x1f0] sm:$0xff] }
  0x1f   : > { %v1405_v32 = vld [vmem:[%s7806_s28 + $0x200] sm:$0xff]  ;;  %1402 = vst [vmem:[%s7814_s29 + $0xf0] sm:$0xff] %v1401_v30  ;;  %1404 = vst [vmem:[%s7814_s29 + $0xf8] sm:$0xff] %v1403_v31  ;;  %v1407_v33 = vld [vmem:[%s7806_s28 + $0x210] sm:$0xff] }
  0x20   : > { %1406 = vst [vmem:[%s7814_s29 + $0x100] sm:$0xff] %v1405_v32  ;;  %v1409_v34 = vld [vmem:[%s7806_s28 + $0x220] sm:$0xff]  ;;  %v1411_v35 = vld [vmem:[%s7806_s28 + $0x230] sm:$0xff]  ;;  %1408 = vst [vmem:[%s7814_s29 + $0x108] sm:$0xff] %v1407_v33 }
  0x21   : > { %1410 = vst [vmem:[%s7814_s29 + $0x110] sm:$0xff] %v1409_v34  ;;  %1412 = vst [vmem:[%s7814_s29 + $0x118] sm:$0xff] %v1411_v35  ;;  %v1413_v36 = vld [vmem:[%s7806_s28 + $0x240] sm:$0xff]  ;;  %v1415_v37 = vld [vmem:[%s7806_s28 + $0x250] sm:$0xff] }
  0x22   : > { %v1417_v38 = vld [vmem:[%s7806_s28 + $0x260] sm:$0xff]  ;;  %1414 = vst [vmem:[%s7814_s29 + $0x120] sm:$0xff] %v1413_v36  ;;  %1416 = vst [vmem:[%s7814_s29 + $0x128] sm:$0xff] %v1415_v37  ;;  %v1419_v39 = vld [vmem:[%s7806_s28 + $0x270] sm:$0xff] }
  0x23   : > { %1418 = vst [vmem:[%s7814_s29 + $0x130] sm:$0xff] %v1417_v38  ;;  %v1421_v40 = vld [vmem:[%s7806_s28 + $0x280] sm:$0xff]  ;;  %v1423_v41 = vld [vmem:[%s7806_s28 + $0x290] sm:$0xff]  ;;  %1420 = vst [vmem:[%s7814_s29 + $0x138] sm:$0xff] %v1419_v39 }
  0x24   : > { %1422 = vst [vmem:[%s7814_s29 + $0x140] sm:$0xff] %v1421_v40  ;;  %1424 = vst [vmem:[%s7814_s29 + $0x148] sm:$0xff] %v1423_v41  ;;  %v1425_v42 = vld [vmem:[%s7806_s28 + $0x2a0] sm:$0xff]  ;;  %v1427_v43 = vld [vmem:[%s7806_s28 + $0x2b0] sm:$0xff] }
  0x25   : > { %v1429_v44 = vld [vmem:[%s7806_s28 + $0x2c0] sm:$0xff]  ;;  %1426 = vst [vmem:[%s7814_s29 + $0x150] sm:$0xff] %v1425_v42  ;;  %1428 = vst [vmem:[%s7814_s29 + $0x158] sm:$0xff] %v1427_v43  ;;  %v1431_v45 = vld [vmem:[%s7806_s28 + $0x2d0] sm:$0xff] }
  0x26   : > { %1430 = vst [vmem:[%s7814_s29 + $0x160] sm:$0xff] %v1429_v44  ;;  %v1433_v46 = vld [vmem:[%s7806_s28 + $0x2e0] sm:$0xff]  ;;  %v1435_v47 = vld [vmem:[%s7806_s28 + $0x2f0] sm:$0xff]  ;;  %1432 = vst [vmem:[%s7814_s29 + $0x168] sm:$0xff] %v1431_v45 }
  0x27   : > { %1434 = vst [vmem:[%s7814_s29 + $0x170] sm:$0xff] %v1433_v46  ;;  %1436 = vst [vmem:[%s7814_s29 + $0x178] sm:$0xff] %v1435_v47  ;;  %v1437_v48 = vld [vmem:[%s7806_s28 + $0x300] sm:$0xff]  ;;  %v1439_v49 = vld [vmem:[%s7806_s28 + $0x310] sm:$0xff] }
  0x28   : > { %v1441_v50 = vld [vmem:[%s7806_s28 + $0x320] sm:$0xff]  ;;  %1438 = vst [vmem:[%s7814_s29 + $0x180] sm:$0xff] %v1437_v48  ;;  %1440 = vst [vmem:[%s7814_s29 + $0x188] sm:$0xff] %v1439_v49  ;;  %v1443_v51 = vld [vmem:[%s7806_s28 + $0x330] sm:$0xff] }
  0x29   : > { %1442 = vst [vmem:[%s7814_s29 + $0x190] sm:$0xff] %v1441_v50  ;;  %v1445_v52 = vld [vmem:[%s7806_s28 + $0x340] sm:$0xff]  ;;  %v1447_v53 = vld [vmem:[%s7806_s28 + $0x350] sm:$0xff]  ;;  %1444 = vst [vmem:[%s7814_s29 + $0x198] sm:$0xff] %v1443_v51 }
  0x2a   : > { %1446 = vst [vmem:[%s7814_s29 + $0x1a0] sm:$0xff] %v1445_v52  ;;  %1448 = vst [vmem:[%s7814_s29 + $0x1a8] sm:$0xff] %v1447_v53  ;;  %v1449_v54 = vld [vmem:[%s7806_s28 + $0x360] sm:$0xff]  ;;  %v1451_v55 = vld [vmem:[%s7806_s28 + $0x370] sm:$0xff] }
  0x2b   : > { %v1453_v56 = vld [vmem:[%s7806_s28 + $0x380] sm:$0xff]  ;;  %1450 = vst [vmem:[%s7814_s29 + $0x1b0] sm:$0xff] %v1449_v54  ;;  %1452 = vst [vmem:[%s7814_s29 + $0x1b8] sm:$0xff] %v1451_v55  ;;  %v1455_v57 = vld [vmem:[%s7806_s28 + $0x390] sm:$0xff] }
  0x2c   : > { %1454 = vst [vmem:[%s7814_s29 + $0x1c0] sm:$0xff] %v1453_v56  ;;  %v1457_v58 = vld [vmem:[%s7806_s28 + $0x3a0] sm:$0xff]  ;;  %v1459_v59 = vld [vmem:[%s7806_s28 + $0x3b0] sm:$0xff]  ;;  %1456 = vst [vmem:[%s7814_s29 + $0x1c8] sm:$0xff] %v1455_v57 }
  0x2d   : > { %1458 = vst [vmem:[%s7814_s29 + $0x1d0] sm:$0xff] %v1457_v58  ;;  %1460 = vst [vmem:[%s7814_s29 + $0x1d8] sm:$0xff] %v1459_v59  ;;  %v1461_v60 = vld [vmem:[%s7806_s28 + $0x3c0] sm:$0xff]  ;;  %v1463_v61 = vld [vmem:[%s7806_s28 + $0x3d0] sm:$0xff] }
  0x2e   : > { %v1465_v62 = vld [vmem:[%s7806_s28 + $0x3e0] sm:$0xff]  ;;  %1462 = vst [vmem:[%s7814_s29 + $0x1e0] sm:$0xff] %v1461_v60  ;;  %1464 = vst [vmem:[%s7814_s29 + $0x1e8] sm:$0xff] %v1463_v61  ;;  %v1467_v63 = vld [vmem:[%s7806_s28 + $0x3f0] sm:$0xff] }
  0x2f   : > { %1466 = vst [vmem:[%s7814_s29 + $0x1f0] sm:$0xff] %v1465_v62  ;;  %v1469_v0 = vld [vmem:[%s7806_s28 + $0x400] sm:$0xff]  ;;  %v1471_v1 = vld [vmem:[%s7806_s28 + $0x410] sm:$0xff]  ;;  %1468 = vst [vmem:[%s7814_s29 + $0x1f8] sm:$0xff] %v1467_v63 }
  0x30   : > { %1470 = vst [vmem:[%s7814_s29 + $0x200] sm:$0xff] %v1469_v0  ;;  %1472 = vst [vmem:[%s7814_s29 + $0x208] sm:$0xff] %v1471_v1  ;;  %v1473_v2 = vld [vmem:[%s7806_s28 + $0x420] sm:$0xff]  ;;  %v1475_v3 = vld [vmem:[%s7806_s28 + $0x430] sm:$0xff] }
  0x31   : > { %v1477_v4 = vld [vmem:[%s7806_s28 + $0x440] sm:$0xff]  ;;  %1474 = vst [vmem:[%s7814_s29 + $0x210] sm:$0xff] %v1473_v2  ;;  %1476 = vst [vmem:[%s7814_s29 + $0x218] sm:$0xff] %v1475_v3  ;;  %v1479_v5 = vld [vmem:[%s7806_s28 + $0x450] sm:$0xff] }
  0x32   : > { %1478 = vst [vmem:[%s7814_s29 + $0x220] sm:$0xff] %v1477_v4  ;;  %v1481_v6 = vld [vmem:[%s7806_s28 + $0x460] sm:$0xff]  ;;  %v1483_v7 = vld [vmem:[%s7806_s28 + $0x470] sm:$0xff]  ;;  %1480 = vst [vmem:[%s7814_s29 + $0x228] sm:$0xff] %v1479_v5 }
  0x33   : > { %1482 = vst [vmem:[%s7814_s29 + $0x230] sm:$0xff] %v1481_v6  ;;  %1484 = vst [vmem:[%s7814_s29 + $0x238] sm:$0xff] %v1483_v7  ;;  %v1485_v8 = vld [vmem:[%s7806_s28 + $0x480] sm:$0xff]  ;;  %v1487_v9 = vld [vmem:[%s7806_s28 + $0x490] sm:$0xff] }
  0x34   : > { %v1489_v10 = vld [vmem:[%s7806_s28 + $0x4a0] sm:$0xff]  ;;  %1486 = vst [vmem:[%s7814_s29 + $0x240] sm:$0xff] %v1485_v8  ;;  %1488 = vst [vmem:[%s7814_s29 + $0x248] sm:$0xff] %v1487_v9  ;;  %v1491_v11 = vld [vmem:[%s7806_s28 + $0x4b0] sm:$0xff] }
  0x35   : > { %1490 = vst [vmem:[%s7814_s29 + $0x250] sm:$0xff] %v1489_v10  ;;  %v1493_v12 = vld [vmem:[%s7806_s28 + $0x4c0] sm:$0xff]  ;;  %v1495_v13 = vld [vmem:[%s7806_s28 + $0x4d0] sm:$0xff]  ;;  %1492 = vst [vmem:[%s7814_s29 + $0x258] sm:$0xff] %v1491_v11 }
  0x36   : > { %1494 = vst [vmem:[%s7814_s29 + $0x260] sm:$0xff] %v1493_v12  ;;  %1496 = vst [vmem:[%s7814_s29 + $0x268] sm:$0xff] %v1495_v13  ;;  %v1497_v14 = vld [vmem:[%s7806_s28 + $0x4e0] sm:$0xff]  ;;  %v1499_v15 = vld [vmem:[%s7806_s28 + $0x4f0] sm:$0xff] }
  0x37   : > { %v1501_v16 = vld [vmem:[%s7806_s28 + $0x500] sm:$0xff]  ;;  %1498 = vst [vmem:[%s7814_s29 + $0x270] sm:$0xff] %v1497_v14  ;;  %1500 = vst [vmem:[%s7814_s29 + $0x278] sm:$0xff] %v1499_v15  ;;  %v1503_v17 = vld [vmem:[%s7806_s28 + $0x510] sm:$0xff] }
  0x38   : > { %1502 = vst [vmem:[%s7814_s29 + $0x280] sm:$0xff] %v1501_v16  ;;  %v1505_v18 = vld [vmem:[%s7806_s28 + $0x520] sm:$0xff]  ;;  %v1507_v19 = vld [vmem:[%s7806_s28 + $0x530] sm:$0xff]  ;;  %1504 = vst [vmem:[%s7814_s29 + $0x288] sm:$0xff] %v1503_v17 }
  0x39   : > { %1506 = vst [vmem:[%s7814_s29 + $0x290] sm:$0xff] %v1505_v18  ;;  %1508 = vst [vmem:[%s7814_s29 + $0x298] sm:$0xff] %v1507_v19  ;;  %v1509_v20 = vld [vmem:[%s7806_s28 + $0x540] sm:$0xff]  ;;  %v1511_v21 = vld [vmem:[%s7806_s28 + $0x550] sm:$0xff] }
  0x3a   : > { %v1513_v22 = vld [vmem:[%s7806_s28 + $0x560] sm:$0xff]  ;;  %1510 = vst [vmem:[%s7814_s29 + $0x2a0] sm:$0xff] %v1509_v20  ;;  %1512 = vst [vmem:[%s7814_s29 + $0x2a8] sm:$0xff] %v1511_v21  ;;  %v1515_v23 = vld [vmem:[%s7806_s28 + $0x570] sm:$0xff] }
  0x3b   : > { %1514 = vst [vmem:[%s7814_s29 + $0x2b0] sm:$0xff] %v1513_v22  ;;  %v1517_v24 = vld [vmem:[%s7806_s28 + $0x580] sm:$0xff]  ;;  %v1519_v25 = vld [vmem:[%s7806_s28 + $0x590] sm:$0xff]  ;;  %1516 = vst [vmem:[%s7814_s29 + $0x2b8] sm:$0xff] %v1515_v23 }
  0x3c   : > { %1518 = vst [vmem:[%s7814_s29 + $0x2c0] sm:$0xff] %v1517_v24  ;;  %1520 = vst [vmem:[%s7814_s29 + $0x2c8] sm:$0xff] %v1519_v25  ;;  %v1521_v26 = vld [vmem:[%s7806_s28 + $0x5a0] sm:$0xff]  ;;  %v1523_v27 = vld [vmem:[%s7806_s28 + $0x5b0] sm:$0xff] }
  0x3d   : > { %v1525_v28 = vld [vmem:[%s7806_s28 + $0x5c0] sm:$0xff]  ;;  %1522 = vst [vmem:[%s7814_s29 + $0x2d0] sm:$0xff] %v1521_v26  ;;  %1524 = vst [vmem:[%s7814_s29 + $0x2d8] sm:$0xff] %v1523_v27  ;;  %v1527_v29 = vld [vmem:[%s7806_s28 + $0x5d0] sm:$0xff] }
  0x3e   : > { %1526 = vst [vmem:[%s7814_s29 + $0x2e0] sm:$0xff] %v1525_v28  ;;  %v1529_v30 = vld [vmem:[%s7806_s28 + $0x5e0] sm:$0xff]  ;;  %v1531_v31 = vld [vmem:[%s7806_s28 + $0x5f0] sm:$0xff]  ;;  %1528 = vst [vmem:[%s7814_s29 + $0x2e8] sm:$0xff] %v1527_v29 }
  0x3f   : > { %1530 = vst [vmem:[%s7814_s29 + $0x2f0] sm:$0xff] %v1529_v30  ;;  %1532 = vst [vmem:[%s7814_s29 + $0x2f8] sm:$0xff] %v1531_v31  ;;  %v1533_v32 = vld [vmem:[%s7806_s28 + $0x600] sm:$0xff]  ;;  %v1535_v33 = vld [vmem:[%s7806_s28 + $0x610] sm:$0xff] }
  0x40   : > { %v1537_v34 = vld [vmem:[%s7806_s28 + $0x620] sm:$0xff]  ;;  %1534 = vst [vmem:[%s7814_s29 + $0x300] sm:$0xff] %v1533_v32  ;;  %1536 = vst [vmem:[%s7814_s29 + $0x308] sm:$0xff] %v1535_v33  ;;  %v1539_v35 = vld [vmem:[%s7806_s28 + $0x630] sm:$0xff] }
  0x41   : > { %1538 = vst [vmem:[%s7814_s29 + $0x310] sm:$0xff] %v1537_v34  ;;  %v1541_v36 = vld [vmem:[%s7806_s28 + $0x640] sm:$0xff]  ;;  %v1543_v37 = vld [vmem:[%s7806_s28 + $0x650] sm:$0xff]  ;;  %1540 = vst [vmem:[%s7814_s29 + $0x318] sm:$0xff] %v1539_v35 }
  0x42   : > { %1542 = vst [vmem:[%s7814_s29 + $0x320] sm:$0xff] %v1541_v36  ;;  %1544 = vst [vmem:[%s7814_s29 + $0x328] sm:$0xff] %v1543_v37  ;;  %v1545_v38 = vld [vmem:[%s7806_s28 + $0x660] sm:$0xff]  ;;  %v1547_v39 = vld [vmem:[%s7806_s28 + $0x670] sm:$0xff] }
  0x43   : > { %v1549_v40 = vld [vmem:[%s7806_s28 + $0x680] sm:$0xff]  ;;  %1546 = vst [vmem:[%s7814_s29 + $0x330] sm:$0xff] %v1545_v38  ;;  %1548 = vst [vmem:[%s7814_s29 + $0x338] sm:$0xff] %v1547_v39  ;;  %v1551_v41 = vld [vmem:[%s7806_s28 + $0x690] sm:$0xff] }
  0x44   : > { %1550 = vst [vmem:[%s7814_s29 + $0x340] sm:$0xff] %v1549_v40  ;;  %v1553_v42 = vld [vmem:[%s7806_s28 + $0x6a0] sm:$0xff]  ;;  %v1555_v43 = vld [vmem:[%s7806_s28 + $0x6b0] sm:$0xff]  ;;  %1552 = vst [vmem:[%s7814_s29 + $0x348] sm:$0xff] %v1551_v41 }
  0x45   : > { %1554 = vst [vmem:[%s7814_s29 + $0x350] sm:$0xff] %v1553_v42  ;;  %1556 = vst [vmem:[%s7814_s29 + $0x358] sm:$0xff] %v1555_v43  ;;  %v1557_v44 = vld [vmem:[%s7806_s28 + $0x6c0] sm:$0xff]  ;;  %v1559_v45 = vld [vmem:[%s7806_s28 + $0x6d0] sm:$0xff] }
  0x46   : > { %v1561_v46 = vld [vmem:[%s7806_s28 + $0x6e0] sm:$0xff]  ;;  %1558 = vst [vmem:[%s7814_s29 + $0x360] sm:$0xff] %v1557_v44  ;;  %1560 = vst [vmem:[%s7814_s29 + $0x368] sm:$0xff] %v1559_v45  ;;  %v1563_v47 = vld [vmem:[%s7806_s28 + $0x6f0] sm:$0xff] }
  0x47   : > { %1562 = vst [vmem:[%s7814_s29 + $0x370] sm:$0xff] %v1561_v46  ;;  %v1565_v48 = vld [vmem:[%s7806_s28 + $0x700] sm:$0xff]  ;;  %v1567_v49 = vld [vmem:[%s7806_s28 + $0x710] sm:$0xff]  ;;  %1564 = vst [vmem:[%s7814_s29 + $0x378] sm:$0xff] %v1563_v47 }
  0x48   : > { %1566 = vst [vmem:[%s7814_s29 + $0x380] sm:$0xff] %v1565_v48  ;;  %1568 = vst [vmem:[%s7814_s29 + $0x388] sm:$0xff] %v1567_v49  ;;  %v1569_v50 = vld [vmem:[%s7806_s28 + $0x720] sm:$0xff]  ;;  %v1571_v51 = vld [vmem:[%s7806_s28 + $0x730] sm:$0xff] }
  0x49   : > { %v1573_v52 = vld [vmem:[%s7806_s28 + $0x740] sm:$0xff]  ;;  %1570 = vst [vmem:[%s7814_s29 + $0x390] sm:$0xff] %v1569_v50  ;;  %1572 = vst [vmem:[%s7814_s29 + $0x398] sm:$0xff] %v1571_v51  ;;  %v1575_v53 = vld [vmem:[%s7806_s28 + $0x750] sm:$0xff] }
  0x4a   : > { %1574 = vst [vmem:[%s7814_s29 + $0x3a0] sm:$0xff] %v1573_v52  ;;  %v1577_v54 = vld [vmem:[%s7806_s28 + $0x760] sm:$0xff]  ;;  %v1579_v55 = vld [vmem:[%s7806_s28 + $0x770] sm:$0xff]  ;;  %1576 = vst [vmem:[%s7814_s29 + $0x3a8] sm:$0xff] %v1575_v53 }
  0x4b   : > { %1578 = vst [vmem:[%s7814_s29 + $0x3b0] sm:$0xff] %v1577_v54  ;;  %1580 = vst [vmem:[%s7814_s29 + $0x3b8] sm:$0xff] %v1579_v55  ;;  %v1581_v56 = vld [vmem:[%s7806_s28 + $0x780] sm:$0xff]  ;;  %v1583_v57 = vld [vmem:[%s7806_s28 + $0x790] sm:$0xff] }
  0x4c   : > { %v1585_v58 = vld [vmem:[%s7806_s28 + $0x7a0] sm:$0xff]  ;;  %1582 = vst [vmem:[%s7814_s29 + $0x3c0] sm:$0xff] %v1581_v56  ;;  %1584 = vst [vmem:[%s7814_s29 + $0x3c8] sm:$0xff] %v1583_v57  ;;  %v1587_v59 = vld [vmem:[%s7806_s28 + $0x7b0] sm:$0xff] }
  0x4d   : > { %1586 = vst [vmem:[%s7814_s29 + $0x3d0] sm:$0xff] %v1585_v58  ;;  %v1589_v60 = vld [vmem:[%s7806_s28 + $0x7c0] sm:$0xff]  ;;  %v1591_v61 = vld [vmem:[%s7806_s28 + $0x7d0] sm:$0xff]  ;;  %1588 = vst [vmem:[%s7814_s29 + $0x3d8] sm:$0xff] %v1587_v59 }
  0x4e   : > { %1590 = vst [vmem:[%s7814_s29 + $0x3e0] sm:$0xff] %v1589_v60  ;;  %1592 = vst [vmem:[%s7814_s29 + $0x3e8] sm:$0xff] %v1591_v61  ;;  %v1593_v62 = vld [vmem:[%s7806_s28 + $0x7e0] sm:$0xff]  ;;  %v1595_v63 = vld [vmem:[%s7806_s28 + $0x7f0] sm:$0xff] }
  0x4f   : > { %v1597_v0 = vld [vmem:[%s7806_s28 + $0x800] sm:$0xff]  ;;  %1594 = vst [vmem:[%s7814_s29 + $0x3f0] sm:$0xff] %v1593_v62  ;;  %1596 = vst [vmem:[%s7814_s29 + $0x3f8] sm:$0xff] %v1595_v63  ;;  %v1599_v1 = vld [vmem:[%s7806_s28 + $0x810] sm:$0xff] }
  0x50   : > { %1598 = vst [vmem:[%s7814_s29 + $0x400] sm:$0xff] %v1597_v0  ;;  %v1601_v2 = vld [vmem:[%s7806_s28 + $0x820] sm:$0xff]  ;;  %v1603_v3 = vld [vmem:[%s7806_s28 + $0x830] sm:$0xff]  ;;  %1600 = vst [vmem:[%s7814_s29 + $0x408] sm:$0xff] %v1599_v1 }
  0x51   : > { %1602 = vst [vmem:[%s7814_s29 + $0x410] sm:$0xff] %v1601_v2  ;;  %1604 = vst [vmem:[%s7814_s29 + $0x418] sm:$0xff] %v1603_v3  ;;  %v1605_v4 = vld [vmem:[%s7806_s28 + $0x840] sm:$0xff]  ;;  %v1607_v5 = vld [vmem:[%s7806_s28 + $0x850] sm:$0xff] }
  0x52   : > { %v1609_v6 = vld [vmem:[%s7806_s28 + $0x860] sm:$0xff]  ;;  %1606 = vst [vmem:[%s7814_s29 + $0x420] sm:$0xff] %v1605_v4  ;;  %1608 = vst [vmem:[%s7814_s29 + $0x428] sm:$0xff] %v1607_v5  ;;  %v1611_v7 = vld [vmem:[%s7806_s28 + $0x870] sm:$0xff] }
  0x53   : > { %1610 = vst [vmem:[%s7814_s29 + $0x430] sm:$0xff] %v1609_v6  ;;  %v1613_v8 = vld [vmem:[%s7806_s28 + $0x880] sm:$0xff]  ;;  %v1615_v9 = vld [vmem:[%s7806_s28 + $0x890] sm:$0xff]  ;;  %1612 = vst [vmem:[%s7814_s29 + $0x438] sm:$0xff] %v1611_v7 }
  0x54   : > { %1614 = vst [vmem:[%s7814_s29 + $0x440] sm:$0xff] %v1613_v8  ;;  %1616 = vst [vmem:[%s7814_s29 + $0x448] sm:$0xff] %v1615_v9  ;;  %v1617_v10 = vld [vmem:[%s7806_s28 + $0x8a0] sm:$0xff]  ;;  %v1619_v11 = vld [vmem:[%s7806_s28 + $0x8b0] sm:$0xff] }
  0x55   : > { %v1621_v12 = vld [vmem:[%s7806_s28 + $0x8c0] sm:$0xff]  ;;  %1618 = vst [vmem:[%s7814_s29 + $0x450] sm:$0xff] %v1617_v10  ;;  %1620 = vst [vmem:[%s7814_s29 + $0x458] sm:$0xff] %v1619_v11  ;;  %v1623_v13 = vld [vmem:[%s7806_s28 + $0x8d0] sm:$0xff] }
  0x56   : > { %1622 = vst [vmem:[%s7814_s29 + $0x460] sm:$0xff] %v1621_v12  ;;  %v1625_v14 = vld [vmem:[%s7806_s28 + $0x8e0] sm:$0xff]  ;;  %v1627_v15 = vld [vmem:[%s7806_s28 + $0x8f0] sm:$0xff]  ;;  %1624 = vst [vmem:[%s7814_s29 + $0x468] sm:$0xff] %v1623_v13 }
  0x57   : > { %1626 = vst [vmem:[%s7814_s29 + $0x470] sm:$0xff] %v1625_v14  ;;  %1628 = vst [vmem:[%s7814_s29 + $0x478] sm:$0xff] %v1627_v15  ;;  %v1629_v16 = vld [vmem:[%s7806_s28 + $0x900] sm:$0xff]  ;;  %v1631_v17 = vld [vmem:[%s7806_s28 + $0x910] sm:$0xff] }
  0x58   : > { %v1633_v18 = vld [vmem:[%s7806_s28 + $0x920] sm:$0xff]  ;;  %1630 = vst [vmem:[%s7814_s29 + $0x480] sm:$0xff] %v1629_v16  ;;  %1632 = vst [vmem:[%s7814_s29 + $0x488] sm:$0xff] %v1631_v17  ;;  %v1635_v19 = vld [vmem:[%s7806_s28 + $0x930] sm:$0xff] }
  0x59   : > { %1634 = vst [vmem:[%s7814_s29 + $0x490] sm:$0xff] %v1633_v18  ;;  %v1637_v20 = vld [vmem:[%s7806_s28 + $0x940] sm:$0xff]  ;;  %v1639_v21 = vld [vmem:[%s7806_s28 + $0x950] sm:$0xff]  ;;  %1636 = vst [vmem:[%s7814_s29 + $0x498] sm:$0xff] %v1635_v19 }
  0x5a   : > { %1638 = vst [vmem:[%s7814_s29 + $0x4a0] sm:$0xff] %v1637_v20  ;;  %1640 = vst [vmem:[%s7814_s29 + $0x4a8] sm:$0xff] %v1639_v21  ;;  %v1641_v22 = vld [vmem:[%s7806_s28 + $0x960] sm:$0xff]  ;;  %v1643_v23 = vld [vmem:[%s7806_s28 + $0x970] sm:$0xff] }
  0x5b   : > { %v1645_v24 = vld [vmem:[%s7806_s28 + $0x980] sm:$0xff]  ;;  %1642 = vst [vmem:[%s7814_s29 + $0x4b0] sm:$0xff] %v1641_v22  ;;  %1644 = vst [vmem:[%s7814_s29 + $0x4b8] sm:$0xff] %v1643_v23  ;;  %v1647_v25 = vld [vmem:[%s7806_s28 + $0x990] sm:$0xff] }
  0x5c   : > { %1646 = vst [vmem:[%s7814_s29 + $0x4c0] sm:$0xff] %v1645_v24  ;;  %v1649_v26 = vld [vmem:[%s7806_s28 + $0x9a0] sm:$0xff]  ;;  %v1651_v27 = vld [vmem:[%s7806_s28 + $0x9b0] sm:$0xff]  ;;  %1648 = vst [vmem:[%s7814_s29 + $0x4c8] sm:$0xff] %v1647_v25 }
  0x5d   : > { %1650 = vst [vmem:[%s7814_s29 + $0x4d0] sm:$0xff] %v1649_v26  ;;  %1652 = vst [vmem:[%s7814_s29 + $0x4d8] sm:$0xff] %v1651_v27  ;;  %v1653_v28 = vld [vmem:[%s7806_s28 + $0x9c0] sm:$0xff]  ;;  %v1655_v29 = vld [vmem:[%s7806_s28 + $0x9d0] sm:$0xff] }
  0x5e   : > { %v1657_v30 = vld [vmem:[%s7806_s28 + $0x9e0] sm:$0xff]  ;;  %1654 = vst [vmem:[%s7814_s29 + $0x4e0] sm:$0xff] %v1653_v28  ;;  %1656 = vst [vmem:[%s7814_s29 + $0x4e8] sm:$0xff] %v1655_v29  ;;  %v1659_v31 = vld [vmem:[%s7806_s28 + $0x9f0] sm:$0xff] }
  0x5f   : > { %1658 = vst [vmem:[%s7814_s29 + $0x4f0] sm:$0xff] %v1657_v30  ;;  %v1661_v32 = vld [vmem:[%s7806_s28 + $0xa00] sm:$0xff]  ;;  %v1663_v33 = vld [vmem:[%s7806_s28 + $0xa10] sm:$0xff]  ;;  %1660 = vst [vmem:[%s7814_s29 + $0x4f8] sm:$0xff] %v1659_v31 }
  0x60   : > { %1662 = vst [vmem:[%s7814_s29 + $0x500] sm:$0xff] %v1661_v32  ;;  %1664 = vst [vmem:[%s7814_s29 + $0x508] sm:$0xff] %v1663_v33  ;;  %v1665_v34 = vld [vmem:[%s7806_s28 + $0xa20] sm:$0xff]  ;;  %v1667_v35 = vld [vmem:[%s7806_s28 + $0xa30] sm:$0xff] }
  0x61   : > { %v1669_v36 = vld [vmem:[%s7806_s28 + $0xa40] sm:$0xff]  ;;  %1666 = vst [vmem:[%s7814_s29 + $0x510] sm:$0xff] %v1665_v34  ;;  %1668 = vst [vmem:[%s7814_s29 + $0x518] sm:$0xff] %v1667_v35  ;;  %v1671_v37 = vld [vmem:[%s7806_s28 + $0xa50] sm:$0xff] }
  0x62   : > { %1670 = vst [vmem:[%s7814_s29 + $0x520] sm:$0xff] %v1669_v36  ;;  %v1673_v38 = vld [vmem:[%s7806_s28 + $0xa60] sm:$0xff]  ;;  %v1675_v39 = vld [vmem:[%s7806_s28 + $0xa70] sm:$0xff]  ;;  %1672 = vst [vmem:[%s7814_s29 + $0x528] sm:$0xff] %v1671_v37 }
  0x63   : > { %1674 = vst [vmem:[%s7814_s29 + $0x530] sm:$0xff] %v1673_v38  ;;  %1676 = vst [vmem:[%s7814_s29 + $0x538] sm:$0xff] %v1675_v39  ;;  %v1677_v40 = vld [vmem:[%s7806_s28 + $0xa80] sm:$0xff]  ;;  %v1679_v41 = vld [vmem:[%s7806_s28 + $0xa90] sm:$0xff] }
  0x64   : > { %v1681_v42 = vld [vmem:[%s7806_s28 + $0xaa0] sm:$0xff]  ;;  %1678 = vst [vmem:[%s7814_s29 + $0x540] sm:$0xff] %v1677_v40  ;;  %1680 = vst [vmem:[%s7814_s29 + $0x548] sm:$0xff] %v1679_v41  ;;  %v1683_v43 = vld [vmem:[%s7806_s28 + $0xab0] sm:$0xff] }
  0x65   : > { %1682 = vst [vmem:[%s7814_s29 + $0x550] sm:$0xff] %v1681_v42  ;;  %v1685_v44 = vld [vmem:[%s7806_s28 + $0xac0] sm:$0xff]  ;;  %v1687_v45 = vld [vmem:[%s7806_s28 + $0xad0] sm:$0xff]  ;;  %1684 = vst [vmem:[%s7814_s29 + $0x558] sm:$0xff] %v1683_v43 }
  0x66   : > { %1686 = vst [vmem:[%s7814_s29 + $0x560] sm:$0xff] %v1685_v44  ;;  %1688 = vst [vmem:[%s7814_s29 + $0x568] sm:$0xff] %v1687_v45  ;;  %v1689_v46 = vld [vmem:[%s7806_s28 + $0xae0] sm:$0xff]  ;;  %v1691_v47 = vld [vmem:[%s7806_s28 + $0xaf0] sm:$0xff] }
  0x67   : > { %v1693_v48 = vld [vmem:[%s7806_s28 + $0xb00] sm:$0xff]  ;;  %1690 = vst [vmem:[%s7814_s29 + $0x570] sm:$0xff] %v1689_v46  ;;  %1692 = vst [vmem:[%s7814_s29 + $0x578] sm:$0xff] %v1691_v47  ;;  %v1695_v49 = vld [vmem:[%s7806_s28 + $0xb10] sm:$0xff] }
  0x68   : > { %1694 = vst [vmem:[%s7814_s29 + $0x580] sm:$0xff] %v1693_v48  ;;  %v1697_v50 = vld [vmem:[%s7806_s28 + $0xb20] sm:$0xff]  ;;  %v1699_v51 = vld [vmem:[%s7806_s28 + $0xb30] sm:$0xff]  ;;  %1696 = vst [vmem:[%s7814_s29 + $0x588] sm:$0xff] %v1695_v49 }
  0x69   : > { %1698 = vst [vmem:[%s7814_s29 + $0x590] sm:$0xff] %v1697_v50  ;;  %1700 = vst [vmem:[%s7814_s29 + $0x598] sm:$0xff] %v1699_v51  ;;  %v1701_v52 = vld [vmem:[%s7806_s28 + $0xb40] sm:$0xff]  ;;  %v1703_v53 = vld [vmem:[%s7806_s28 + $0xb50] sm:$0xff] }
  0x6a   : > { %v1705_v54 = vld [vmem:[%s7806_s28 + $0xb60] sm:$0xff]  ;;  %1702 = vst [vmem:[%s7814_s29 + $0x5a0] sm:$0xff] %v1701_v52  ;;  %1704 = vst [vmem:[%s7814_s29 + $0x5a8] sm:$0xff] %v1703_v53  ;;  %v1707_v55 = vld [vmem:[%s7806_s28 + $0xb70] sm:$0xff] }
  0x6b   : > { %1706 = vst [vmem:[%s7814_s29 + $0x5b0] sm:$0xff] %v1705_v54  ;;  %v1709_v56 = vld [vmem:[%s7806_s28 + $0xb80] sm:$0xff]  ;;  %v1711_v57 = vld [vmem:[%s7806_s28 + $0xb90] sm:$0xff]  ;;  %1708 = vst [vmem:[%s7814_s29 + $0x5b8] sm:$0xff] %v1707_v55 }
  0x6c   : > { %1710 = vst [vmem:[%s7814_s29 + $0x5c0] sm:$0xff] %v1709_v56  ;;  %1712 = vst [vmem:[%s7814_s29 + $0x5c8] sm:$0xff] %v1711_v57  ;;  %v1713_v58 = vld [vmem:[%s7806_s28 + $0xba0] sm:$0xff]  ;;  %v1715_v59 = vld [vmem:[%s7806_s28 + $0xbb0] sm:$0xff] }
  0x6d   : > { %v1717_v60 = vld [vmem:[%s7806_s28 + $0xbc0] sm:$0xff]  ;;  %1714 = vst [vmem:[%s7814_s29 + $0x5d0] sm:$0xff] %v1713_v58  ;;  %1716 = vst [vmem:[%s7814_s29 + $0x5d8] sm:$0xff] %v1715_v59  ;;  %v1719_v61 = vld [vmem:[%s7806_s28 + $0xbd0] sm:$0xff] }
  0x6e   : > { %1718 = vst [vmem:[%s7814_s29 + $0x5e0] sm:$0xff] %v1717_v60  ;;  %v1721_v62 = vld [vmem:[%s7806_s28 + $0xbe0] sm:$0xff]  ;;  %v1723_v63 = vld [vmem:[%s7806_s28 + $0xbf0] sm:$0xff]  ;;  %1720 = vst [vmem:[%s7814_s29 + $0x5e8] sm:$0xff] %v1719_v61 }
  0x6f   : > { %1722 = vst [vmem:[%s7814_s29 + $0x5f0] sm:$0xff] %v1721_v62  ;;  %1724 = vst [vmem:[%s7814_s29 + $0x5f8] sm:$0xff] %v1723_v63  ;;  %v1725_v0 = vld [vmem:[%s7806_s28 + $0xc00] sm:$0xff]  ;;  %v1727_v1 = vld [vmem:[%s7806_s28 + $0xc10] sm:$0xff] }
  0x70   : > { %v1729_v2 = vld [vmem:[%s7806_s28 + $0xc20] sm:$0xff]  ;;  %1726 = vst [vmem:[%s7814_s29 + $0x600] sm:$0xff] %v1725_v0  ;;  %1728 = vst [vmem:[%s7814_s29 + $0x608] sm:$0xff] %v1727_v1  ;;  %v1731_v3 = vld [vmem:[%s7806_s28 + $0xc30] sm:$0xff] }
  0x71   : > { %1730 = vst [vmem:[%s7814_s29 + $0x610] sm:$0xff] %v1729_v2  ;;  %v1733_v4 = vld [vmem:[%s7806_s28 + $0xc40] sm:$0xff]  ;;  %v1735_v5 = vld [vmem:[%s7806_s28 + $0xc50] sm:$0xff]  ;;  %1732 = vst [vmem:[%s7814_s29 + $0x618] sm:$0xff] %v1731_v3 }
  0x72   : > { %1734 = vst [vmem:[%s7814_s29 + $0x620] sm:$0xff] %v1733_v4  ;;  %1736 = vst [vmem:[%s7814_s29 + $0x628] sm:$0xff] %v1735_v5  ;;  %v1737_v6 = vld [vmem:[%s7806_s28 + $0xc60] sm:$0xff]  ;;  %v1739_v7 = vld [vmem:[%s7806_s28 + $0xc70] sm:$0xff] }
  0x73   : > { %v1741_v8 = vld [vmem:[%s7806_s28 + $0xc80] sm:$0xff]  ;;  %1738 = vst [vmem:[%s7814_s29 + $0x630] sm:$0xff] %v1737_v6  ;;  %1740 = vst [vmem:[%s7814_s29 + $0x638] sm:$0xff] %v1739_v7  ;;  %v1743_v9 = vld [vmem:[%s7806_s28 + $0xc90] sm:$0xff] }
  0x74   : > { %1742 = vst [vmem:[%s7814_s29 + $0x640] sm:$0xff] %v1741_v8  ;;  %v1745_v10 = vld [vmem:[%s7806_s28 + $0xca0] sm:$0xff]  ;;  %v1747_v11 = vld [vmem:[%s7806_s28 + $0xcb0] sm:$0xff]  ;;  %1744 = vst [vmem:[%s7814_s29 + $0x648] sm:$0xff] %v1743_v9 }
  0x75   : > { %1746 = vst [vmem:[%s7814_s29 + $0x650] sm:$0xff] %v1745_v10  ;;  %1748 = vst [vmem:[%s7814_s29 + $0x658] sm:$0xff] %v1747_v11  ;;  %v1749_v12 = vld [vmem:[%s7806_s28 + $0xcc0] sm:$0xff]  ;;  %v1751_v13 = vld [vmem:[%s7806_s28 + $0xcd0] sm:$0xff] }
  0x76   : > { %v1753_v14 = vld [vmem:[%s7806_s28 + $0xce0] sm:$0xff]  ;;  %1750 = vst [vmem:[%s7814_s29 + $0x660] sm:$0xff] %v1749_v12  ;;  %1752 = vst [vmem:[%s7814_s29 + $0x668] sm:$0xff] %v1751_v13  ;;  %v1755_v15 = vld [vmem:[%s7806_s28 + $0xcf0] sm:$0xff] }
  0x77   : > { %1754 = vst [vmem:[%s7814_s29 + $0x670] sm:$0xff] %v1753_v14  ;;  %v1757_v16 = vld [vmem:[%s7806_s28 + $0xd00] sm:$0xff]  ;;  %v1759_v17 = vld [vmem:[%s7806_s28 + $0xd10] sm:$0xff]  ;;  %1756 = vst [vmem:[%s7814_s29 + $0x678] sm:$0xff] %v1755_v15 }
  0x78   : > { %1758 = vst [vmem:[%s7814_s29 + $0x680] sm:$0xff] %v1757_v16  ;;  %1760 = vst [vmem:[%s7814_s29 + $0x688] sm:$0xff] %v1759_v17  ;;  %v1761_v18 = vld [vmem:[%s7806_s28 + $0xd20] sm:$0xff]  ;;  %v1763_v19 = vld [vmem:[%s7806_s28 + $0xd30] sm:$0xff] }
  0x79   : > { %v1765_v20 = vld [vmem:[%s7806_s28 + $0xd40] sm:$0xff]  ;;  %1762 = vst [vmem:[%s7814_s29 + $0x690] sm:$0xff] %v1761_v18  ;;  %1764 = vst [vmem:[%s7814_s29 + $0x698] sm:$0xff] %v1763_v19  ;;  %v1767_v21 = vld [vmem:[%s7806_s28 + $0xd50] sm:$0xff] }
  0x7a   : > { %1766 = vst [vmem:[%s7814_s29 + $0x6a0] sm:$0xff] %v1765_v20  ;;  %v1769_v22 = vld [vmem:[%s7806_s28 + $0xd60] sm:$0xff]  ;;  %v1771_v23 = vld [vmem:[%s7806_s28 + $0xd70] sm:$0xff]  ;;  %1768 = vst [vmem:[%s7814_s29 + $0x6a8] sm:$0xff] %v1767_v21 }
  0x7b   : > { %1770 = vst [vmem:[%s7814_s29 + $0x6b0] sm:$0xff] %v1769_v22  ;;  %1772 = vst [vmem:[%s7814_s29 + $0x6b8] sm:$0xff] %v1771_v23  ;;  %v1773_v24 = vld [vmem:[%s7806_s28 + $0xd80] sm:$0xff]  ;;  %v1775_v25 = vld [vmem:[%s7806_s28 + $0xd90] sm:$0xff] }
  0x7c   : > { %v1777_v26 = vld [vmem:[%s7806_s28 + $0xda0] sm:$0xff]  ;;  %1774 = vst [vmem:[%s7814_s29 + $0x6c0] sm:$0xff] %v1773_v24  ;;  %1776 = vst [vmem:[%s7814_s29 + $0x6c8] sm:$0xff] %v1775_v25  ;;  %v1779_v27 = vld [vmem:[%s7806_s28 + $0xdb0] sm:$0xff] }
  0x7d   : > { %1778 = vst [vmem:[%s7814_s29 + $0x6d0] sm:$0xff] %v1777_v26  ;;  %v1781_v28 = vld [vmem:[%s7806_s28 + $0xdc0] sm:$0xff]  ;;  %v1783_v29 = vld [vmem:[%s7806_s28 + $0xdd0] sm:$0xff]  ;;  %1780 = vst [vmem:[%s7814_s29 + $0x6d8] sm:$0xff] %v1779_v27 }
  0x7e   : > { %1782 = vst [vmem:[%s7814_s29 + $0x6e0] sm:$0xff] %v1781_v28  ;;  %1784 = vst [vmem:[%s7814_s29 + $0x6e8] sm:$0xff] %v1783_v29  ;;  %v1785_v30 = vld [vmem:[%s7806_s28 + $0xde0] sm:$0xff]  ;;  %v1787_v31 = vld [vmem:[%s7806_s28 + $0xdf0] sm:$0xff] }
  0x7f   : > { %v1789_v32 = vld [vmem:[%s7806_s28 + $0xe00] sm:$0xff]  ;;  %1786 = vst [vmem:[%s7814_s29 + $0x6f0] sm:$0xff] %v1785_v30  ;;  %1788 = vst [vmem:[%s7814_s29 + $0x6f8] sm:$0xff] %v1787_v31  ;;  %v1791_v33 = vld [vmem:[%s7806_s28 + $0xe10] sm:$0xff] }
  0x80   : > { %1790 = vst [vmem:[%s7814_s29 + $0x700] sm:$0xff] %v1789_v32  ;;  %v1793_v34 = vld [vmem:[%s7806_s28 + $0xe20] sm:$0xff]  ;;  %v1795_v35 = vld [vmem:[%s7806_s28 + $0xe30] sm:$0xff]  ;;  %1792 = vst [vmem:[%s7814_s29 + $0x708] sm:$0xff] %v1791_v33 }
  0x81   : > { %1794 = vst [vmem:[%s7814_s29 + $0x710] sm:$0xff] %v1793_v34  ;;  %1796 = vst [vmem:[%s7814_s29 + $0x718] sm:$0xff] %v1795_v35  ;;  %v1797_v36 = vld [vmem:[%s7806_s28 + $0xe40] sm:$0xff]  ;;  %v1799_v37 = vld [vmem:[%s7806_s28 + $0xe50] sm:$0xff] }
  0x82   : > { %v1801_v38 = vld [vmem:[%s7806_s28 + $0xe60] sm:$0xff]  ;;  %1798 = vst [vmem:[%s7814_s29 + $0x720] sm:$0xff] %v1797_v36  ;;  %1800 = vst [vmem:[%s7814_s29 + $0x728] sm:$0xff] %v1799_v37  ;;  %v1803_v39 = vld [vmem:[%s7806_s28 + $0xe70] sm:$0xff] }
  0x83   : > { %1802 = vst [vmem:[%s7814_s29 + $0x730] sm:$0xff] %v1801_v38  ;;  %v1805_v40 = vld [vmem:[%s7806_s28 + $0xe80] sm:$0xff]  ;;  %v1807_v41 = vld [vmem:[%s7806_s28 + $0xe90] sm:$0xff]  ;;  %1804 = vst [vmem:[%s7814_s29 + $0x738] sm:$0xff] %v1803_v39 }
  0x84   : > { %1806 = vst [vmem:[%s7814_s29 + $0x740] sm:$0xff] %v1805_v40  ;;  %1808 = vst [vmem:[%s7814_s29 + $0x748] sm:$0xff] %v1807_v41  ;;  %v1809_v42 = vld [vmem:[%s7806_s28 + $0xea0] sm:$0xff]  ;;  %v1811_v43 = vld [vmem:[%s7806_s28 + $0xeb0] sm:$0xff] }
  0x85   : > { %v1813_v44 = vld [vmem:[%s7806_s28 + $0xec0] sm:$0xff]  ;;  %1810 = vst [vmem:[%s7814_s29 + $0x750] sm:$0xff] %v1809_v42  ;;  %1812 = vst [vmem:[%s7814_s29 + $0x758] sm:$0xff] %v1811_v43  ;;  %v1815_v45 = vld [vmem:[%s7806_s28 + $0xed0] sm:$0xff] }
  0x86   : > { %1814 = vst [vmem:[%s7814_s29 + $0x760] sm:$0xff] %v1813_v44  ;;  %v1817_v46 = vld [vmem:[%s7806_s28 + $0xee0] sm:$0xff]  ;;  %v1819_v47 = vld [vmem:[%s7806_s28 + $0xef0] sm:$0xff]  ;;  %1816 = vst [vmem:[%s7814_s29 + $0x768] sm:$0xff] %v1815_v45 }
  0x87   : > { %1818 = vst [vmem:[%s7814_s29 + $0x770] sm:$0xff] %v1817_v46  ;;  %1820 = vst [vmem:[%s7814_s29 + $0x778] sm:$0xff] %v1819_v47  ;;  %v1821_v48 = vld [vmem:[%s7806_s28 + $0xf00] sm:$0xff]  ;;  %v1823_v49 = vld [vmem:[%s7806_s28 + $0xf10] sm:$0xff] }
  0x88   : > { %v1825_v50 = vld [vmem:[%s7806_s28 + $0xf20] sm:$0xff]  ;;  %1822 = vst [vmem:[%s7814_s29 + $0x780] sm:$0xff] %v1821_v48  ;;  %1824 = vst [vmem:[%s7814_s29 + $0x788] sm:$0xff] %v1823_v49  ;;  %v1827_v51 = vld [vmem:[%s7806_s28 + $0xf30] sm:$0xff] }
  0x89   : > { %1826 = vst [vmem:[%s7814_s29 + $0x790] sm:$0xff] %v1825_v50  ;;  %v1829_v52 = vld [vmem:[%s7806_s28 + $0xf40] sm:$0xff]  ;;  %v1831_v53 = vld [vmem:[%s7806_s28 + $0xf50] sm:$0xff]  ;;  %1828 = vst [vmem:[%s7814_s29 + $0x798] sm:$0xff] %v1827_v51 }
  0x8a   : > { %1830 = vst [vmem:[%s7814_s29 + $0x7a0] sm:$0xff] %v1829_v52  ;;  %1832 = vst [vmem:[%s7814_s29 + $0x7a8] sm:$0xff] %v1831_v53  ;;  %v1833_v54 = vld [vmem:[%s7806_s28 + $0xf60] sm:$0xff]  ;;  %v1835_v55 = vld [vmem:[%s7806_s28 + $0xf70] sm:$0xff] }
  0x8b   : > { %v1837_v56 = vld [vmem:[%s7806_s28 + $0xf80] sm:$0xff]  ;;  %1834 = vst [vmem:[%s7814_s29 + $0x7b0] sm:$0xff] %v1833_v54  ;;  %1836 = vst [vmem:[%s7814_s29 + $0x7b8] sm:$0xff] %v1835_v55  ;;  %v1839_v57 = vld [vmem:[%s7806_s28 + $0xf90] sm:$0xff] }
  0x8c   : > { %1838 = vst [vmem:[%s7814_s29 + $0x7c0] sm:$0xff] %v1837_v56  ;;  %v1841_v58 = vld [vmem:[%s7806_s28 + $0xfa0] sm:$0xff]  ;;  %v1843_v59 = vld [vmem:[%s7806_s28 + $0xfb0] sm:$0xff]  ;;  %1840 = vst [vmem:[%s7814_s29 + $0x7c8] sm:$0xff] %v1839_v57 }
  0x8d   : > { %1842 = vst [vmem:[%s7814_s29 + $0x7d0] sm:$0xff] %v1841_v58  ;;  %1844 = vst [vmem:[%s7814_s29 + $0x7d8] sm:$0xff] %v1843_v59  ;;  %v1845_v60 = vld [vmem:[%s7806_s28 + $0xfc0] sm:$0xff]  ;;  %v1847_v61 = vld [vmem:[%s7806_s28 + $0xfd0] sm:$0xff] }
  0x8e   : > { %v1849_v62 = vld [vmem:[%s7806_s28 + $0xfe0] sm:$0xff]  ;;  %1846 = vst [vmem:[%s7814_s29 + $0x7e0] sm:$0xff] %v1845_v60  ;;  %1848 = vst [vmem:[%s7814_s29 + $0x7e8] sm:$0xff] %v1847_v61  ;;  %v1851_v63 = vld [vmem:[%s7806_s28 + $0xff0] sm:$0xff] }
  0x8f   : > { %1850 = vst [vmem:[%s7814_s29 + $0x7f0] sm:$0xff] %v1849_v62  ;;  %v1853_v0 = vld [vmem:[%s7806_s28 + $0x1000] sm:$0xff]  ;;  %v1855_v1 = vld [vmem:[%s7806_s28 + $0x1010] sm:$0xff]  ;;  %1852 = vst [vmem:[%s7814_s29 + $0x7f8] sm:$0xff] %v1851_v63 }
  0x90   : > { %1854 = vst [vmem:[%s7814_s29 + $0x800] sm:$0xff] %v1853_v0  ;;  %1856 = vst [vmem:[%s7814_s29 + $0x808] sm:$0xff] %v1855_v1  ;;  %v1857_v2 = vld [vmem:[%s7806_s28 + $0x1020] sm:$0xff]  ;;  %v1859_v3 = vld [vmem:[%s7806_s28 + $0x1030] sm:$0xff] }
  0x91   : > { %v1861_v4 = vld [vmem:[%s7806_s28 + $0x1040] sm:$0xff]  ;;  %1858 = vst [vmem:[%s7814_s29 + $0x810] sm:$0xff] %v1857_v2  ;;  %1860 = vst [vmem:[%s7814_s29 + $0x818] sm:$0xff] %v1859_v3  ;;  %v1863_v5 = vld [vmem:[%s7806_s28 + $0x1050] sm:$0xff] }
  0x92   : > { %1862 = vst [vmem:[%s7814_s29 + $0x820] sm:$0xff] %v1861_v4  ;;  %v1865_v6 = vld [vmem:[%s7806_s28 + $0x1060] sm:$0xff]  ;;  %v1867_v7 = vld [vmem:[%s7806_s28 + $0x1070] sm:$0xff]  ;;  %1864 = vst [vmem:[%s7814_s29 + $0x828] sm:$0xff] %v1863_v5 }
  0x93   : > { %1866 = vst [vmem:[%s7814_s29 + $0x830] sm:$0xff] %v1865_v6  ;;  %1868 = vst [vmem:[%s7814_s29 + $0x838] sm:$0xff] %v1867_v7  ;;  %v1869_v8 = vld [vmem:[%s7806_s28 + $0x1080] sm:$0xff]  ;;  %v1871_v9 = vld [vmem:[%s7806_s28 + $0x1090] sm:$0xff] }
  0x94   : > { %v1873_v10 = vld [vmem:[%s7806_s28 + $0x10a0] sm:$0xff]  ;;  %1870 = vst [vmem:[%s7814_s29 + $0x840] sm:$0xff] %v1869_v8  ;;  %1872 = vst [vmem:[%s7814_s29 + $0x848] sm:$0xff] %v1871_v9  ;;  %v1875_v11 = vld [vmem:[%s7806_s28 + $0x10b0] sm:$0xff] }
  0x95   : > { %1874 = vst [vmem:[%s7814_s29 + $0x850] sm:$0xff] %v1873_v10  ;;  %v1877_v12 = vld [vmem:[%s7806_s28 + $0x10c0] sm:$0xff]  ;;  %v1879_v13 = vld [vmem:[%s7806_s28 + $0x10d0] sm:$0xff]  ;;  %1876 = vst [vmem:[%s7814_s29 + $0x858] sm:$0xff] %v1875_v11 }
  0x96   : > { %1878 = vst [vmem:[%s7814_s29 + $0x860] sm:$0xff] %v1877_v12  ;;  %1880 = vst [vmem:[%s7814_s29 + $0x868] sm:$0xff] %v1879_v13  ;;  %v1881_v14 = vld [vmem:[%s7806_s28 + $0x10e0] sm:$0xff]  ;;  %v1883_v15 = vld [vmem:[%s7806_s28 + $0x10f0] sm:$0xff] }
  0x97   : > { %v1885_v16 = vld [vmem:[%s7806_s28 + $0x1100] sm:$0xff]  ;;  %1882 = vst [vmem:[%s7814_s29 + $0x870] sm:$0xff] %v1881_v14  ;;  %1884 = vst [vmem:[%s7814_s29 + $0x878] sm:$0xff] %v1883_v15  ;;  %v1887_v17 = vld [vmem:[%s7806_s28 + $0x1110] sm:$0xff] }
  0x98   : > { %1886 = vst [vmem:[%s7814_s29 + $0x880] sm:$0xff] %v1885_v16  ;;  %v1889_v18 = vld [vmem:[%s7806_s28 + $0x1120] sm:$0xff]  ;;  %v1891_v19 = vld [vmem:[%s7806_s28 + $0x1130] sm:$0xff]  ;;  %1888 = vst [vmem:[%s7814_s29 + $0x888] sm:$0xff] %v1887_v17 }
  0x99   : > { %1890 = vst [vmem:[%s7814_s29 + $0x890] sm:$0xff] %v1889_v18  ;;  %1892 = vst [vmem:[%s7814_s29 + $0x898] sm:$0xff] %v1891_v19  ;;  %v1893_v20 = vld [vmem:[%s7806_s28 + $0x1140] sm:$0xff]  ;;  %v1895_v21 = vld [vmem:[%s7806_s28 + $0x1150] sm:$0xff] }
  0x9a   : > { %v1897_v22 = vld [vmem:[%s7806_s28 + $0x1160] sm:$0xff]  ;;  %1894 = vst [vmem:[%s7814_s29 + $0x8a0] sm:$0xff] %v1893_v20  ;;  %1896 = vst [vmem:[%s7814_s29 + $0x8a8] sm:$0xff] %v1895_v21  ;;  %v1899_v23 = vld [vmem:[%s7806_s28 + $0x1170] sm:$0xff] }
  0x9b   : > { %1898 = vst [vmem:[%s7814_s29 + $0x8b0] sm:$0xff] %v1897_v22  ;;  %v1901_v24 = vld [vmem:[%s7806_s28 + $0x1180] sm:$0xff]  ;;  %v1903_v25 = vld [vmem:[%s7806_s28 + $0x1190] sm:$0xff]  ;;  %1900 = vst [vmem:[%s7814_s29 + $0x8b8] sm:$0xff] %v1899_v23 }
  0x9c   : > { %1902 = vst [vmem:[%s7814_s29 + $0x8c0] sm:$0xff] %v1901_v24  ;;  %1904 = vst [vmem:[%s7814_s29 + $0x8c8] sm:$0xff] %v1903_v25  ;;  %v1905_v26 = vld [vmem:[%s7806_s28 + $0x11a0] sm:$0xff]  ;;  %v1907_v27 = vld [vmem:[%s7806_s28 + $0x11b0] sm:$0xff] }
  0x9d   : > { %v1909_v28 = vld [vmem:[%s7806_s28 + $0x11c0] sm:$0xff]  ;;  %1906 = vst [vmem:[%s7814_s29 + $0x8d0] sm:$0xff] %v1905_v26  ;;  %1908 = vst [vmem:[%s7814_s29 + $0x8d8] sm:$0xff] %v1907_v27  ;;  %v1911_v29 = vld [vmem:[%s7806_s28 + $0x11d0] sm:$0xff] }
  0x9e   : > { %1910 = vst [vmem:[%s7814_s29 + $0x8e0] sm:$0xff] %v1909_v28  ;;  %v1913_v30 = vld [vmem:[%s7806_s28 + $0x11e0] sm:$0xff]  ;;  %v1915_v31 = vld [vmem:[%s7806_s28 + $0x11f0] sm:$0xff]  ;;  %1912 = vst [vmem:[%s7814_s29 + $0x8e8] sm:$0xff] %v1911_v29 }
  0x9f   : > { %1914 = vst [vmem:[%s7814_s29 + $0x8f0] sm:$0xff] %v1913_v30  ;;  %1916 = vst [vmem:[%s7814_s29 + $0x8f8] sm:$0xff] %v1915_v31  ;;  %v1917_v32 = vld [vmem:[%s7806_s28 + $0x1200] sm:$0xff]  ;;  %v1919_v33 = vld [vmem:[%s7806_s28 + $0x1210] sm:$0xff] }
  0xa0   : > { %v1921_v34 = vld [vmem:[%s7806_s28 + $0x1220] sm:$0xff]  ;;  %1918 = vst [vmem:[%s7814_s29 + $0x900] sm:$0xff] %v1917_v32  ;;  %1920 = vst [vmem:[%s7814_s29 + $0x908] sm:$0xff] %v1919_v33  ;;  %v1923_v35 = vld [vmem:[%s7806_s28 + $0x1230] sm:$0xff] }
  0xa1   : > { %1922 = vst [vmem:[%s7814_s29 + $0x910] sm:$0xff] %v1921_v34  ;;  %v1925_v36 = vld [vmem:[%s7806_s28 + $0x1240] sm:$0xff]  ;;  %v1927_v37 = vld [vmem:[%s7806_s28 + $0x1250] sm:$0xff]  ;;  %1924 = vst [vmem:[%s7814_s29 + $0x918] sm:$0xff] %v1923_v35 }
  0xa2   : > { %1926 = vst [vmem:[%s7814_s29 + $0x920] sm:$0xff] %v1925_v36  ;;  %1928 = vst [vmem:[%s7814_s29 + $0x928] sm:$0xff] %v1927_v37  ;;  %v1929_v38 = vld [vmem:[%s7806_s28 + $0x1260] sm:$0xff]  ;;  %v1931_v39 = vld [vmem:[%s7806_s28 + $0x1270] sm:$0xff] }
  0xa3   : > { %v1933_v40 = vld [vmem:[%s7806_s28 + $0x1280] sm:$0xff]  ;;  %1930 = vst [vmem:[%s7814_s29 + $0x930] sm:$0xff] %v1929_v38  ;;  %1932 = vst [vmem:[%s7814_s29 + $0x938] sm:$0xff] %v1931_v39  ;;  %v1935_v41 = vld [vmem:[%s7806_s28 + $0x1290] sm:$0xff] }
  0xa4   : > { %1934 = vst [vmem:[%s7814_s29 + $0x940] sm:$0xff] %v1933_v40  ;;  %v1937_v42 = vld [vmem:[%s7806_s28 + $0x12a0] sm:$0xff]  ;;  %v1939_v43 = vld [vmem:[%s7806_s28 + $0x12b0] sm:$0xff]  ;;  %1936 = vst [vmem:[%s7814_s29 + $0x948] sm:$0xff] %v1935_v41 }
  0xa5   : > { %1938 = vst [vmem:[%s7814_s29 + $0x950] sm:$0xff] %v1937_v42  ;;  %1940 = vst [vmem:[%s7814_s29 + $0x958] sm:$0xff] %v1939_v43  ;;  %v1941_v44 = vld [vmem:[%s7806_s28 + $0x12c0] sm:$0xff]  ;;  %v1943_v45 = vld [vmem:[%s7806_s28 + $0x12d0] sm:$0xff] }
  0xa6   : > { %v1945_v46 = vld [vmem:[%s7806_s28 + $0x12e0] sm:$0xff]  ;;  %1942 = vst [vmem:[%s7814_s29 + $0x960] sm:$0xff] %v1941_v44  ;;  %1944 = vst [vmem:[%s7814_s29 + $0x968] sm:$0xff] %v1943_v45  ;;  %v1947_v47 = vld [vmem:[%s7806_s28 + $0x12f0] sm:$0xff] }
  0xa7   : > { %1946 = vst [vmem:[%s7814_s29 + $0x970] sm:$0xff] %v1945_v46  ;;  %v1949_v48 = vld [vmem:[%s7806_s28 + $0x1300] sm:$0xff]  ;;  %v1951_v49 = vld [vmem:[%s7806_s28 + $0x1310] sm:$0xff]  ;;  %1948 = vst [vmem:[%s7814_s29 + $0x978] sm:$0xff] %v1947_v47 }
  0xa8   : > { %1950 = vst [vmem:[%s7814_s29 + $0x980] sm:$0xff] %v1949_v48  ;;  %1952 = vst [vmem:[%s7814_s29 + $0x988] sm:$0xff] %v1951_v49  ;;  %v1953_v50 = vld [vmem:[%s7806_s28 + $0x1320] sm:$0xff]  ;;  %v1955_v51 = vld [vmem:[%s7806_s28 + $0x1330] sm:$0xff] }
  0xa9   : > { %v1957_v52 = vld [vmem:[%s7806_s28 + $0x1340] sm:$0xff]  ;;  %1954 = vst [vmem:[%s7814_s29 + $0x990] sm:$0xff] %v1953_v50  ;;  %1956 = vst [vmem:[%s7814_s29 + $0x998] sm:$0xff] %v1955_v51  ;;  %v1959_v53 = vld [vmem:[%s7806_s28 + $0x1350] sm:$0xff] }
  0xaa   : > { %1958 = vst [vmem:[%s7814_s29 + $0x9a0] sm:$0xff] %v1957_v52  ;;  %v1961_v54 = vld [vmem:[%s7806_s28 + $0x1360] sm:$0xff]  ;;  %v1963_v55 = vld [vmem:[%s7806_s28 + $0x1370] sm:$0xff]  ;;  %1960 = vst [vmem:[%s7814_s29 + $0x9a8] sm:$0xff] %v1959_v53 }
  0xab   : > { %1962 = vst [vmem:[%s7814_s29 + $0x9b0] sm:$0xff] %v1961_v54  ;;  %1964 = vst [vmem:[%s7814_s29 + $0x9b8] sm:$0xff] %v1963_v55  ;;  %v1965_v56 = vld [vmem:[%s7806_s28 + $0x1380] sm:$0xff]  ;;  %v1967_v57 = vld [vmem:[%s7806_s28 + $0x1390] sm:$0xff] }
  0xac   : > { %v1969_v58 = vld [vmem:[%s7806_s28 + $0x13a0] sm:$0xff]  ;;  %1966 = vst [vmem:[%s7814_s29 + $0x9c0] sm:$0xff] %v1965_v56  ;;  %1968 = vst [vmem:[%s7814_s29 + $0x9c8] sm:$0xff] %v1967_v57  ;;  %v1971_v59 = vld [vmem:[%s7806_s28 + $0x13b0] sm:$0xff] }
  0xad   : > { %1970 = vst [vmem:[%s7814_s29 + $0x9d0] sm:$0xff] %v1969_v58  ;;  %v1973_v60 = vld [vmem:[%s7806_s28 + $0x13c0] sm:$0xff]  ;;  %v1975_v61 = vld [vmem:[%s7806_s28 + $0x13d0] sm:$0xff]  ;;  %1972 = vst [vmem:[%s7814_s29 + $0x9d8] sm:$0xff] %v1971_v59 }
  0xae   : > { %1974 = vst [vmem:[%s7814_s29 + $0x9e0] sm:$0xff] %v1973_v60  ;;  %1976 = vst [vmem:[%s7814_s29 + $0x9e8] sm:$0xff] %v1975_v61  ;;  %v1977_v62 = vld [vmem:[%s7806_s28 + $0x13e0] sm:$0xff]  ;;  %v1979_v63 = vld [vmem:[%s7806_s28 + $0x13f0] sm:$0xff] }
  0xaf   : > { %v1981_v0 = vld [vmem:[%s7806_s28 + $0x1400] sm:$0xff]  ;;  %1978 = vst [vmem:[%s7814_s29 + $0x9f0] sm:$0xff] %v1977_v62  ;;  %1980 = vst [vmem:[%s7814_s29 + $0x9f8] sm:$0xff] %v1979_v63  ;;  %v1983_v1 = vld [vmem:[%s7806_s28 + $0x1410] sm:$0xff] }
  0xb0   : > { %1982 = vst [vmem:[%s7814_s29 + $0xa00] sm:$0xff] %v1981_v0  ;;  %v1985_v2 = vld [vmem:[%s7806_s28 + $0x1420] sm:$0xff]  ;;  %v1987_v3 = vld [vmem:[%s7806_s28 + $0x1430] sm:$0xff]  ;;  %1984 = vst [vmem:[%s7814_s29 + $0xa08] sm:$0xff] %v1983_v1 }
  0xb1   : > { %1986 = vst [vmem:[%s7814_s29 + $0xa10] sm:$0xff] %v1985_v2  ;;  %1988 = vst [vmem:[%s7814_s29 + $0xa18] sm:$0xff] %v1987_v3  ;;  %v1989_v4 = vld [vmem:[%s7806_s28 + $0x1440] sm:$0xff]  ;;  %v1991_v5 = vld [vmem:[%s7806_s28 + $0x1450] sm:$0xff] }
  0xb2   : > { %v1993_v6 = vld [vmem:[%s7806_s28 + $0x1460] sm:$0xff]  ;;  %1990 = vst [vmem:[%s7814_s29 + $0xa20] sm:$0xff] %v1989_v4  ;;  %1992 = vst [vmem:[%s7814_s29 + $0xa28] sm:$0xff] %v1991_v5  ;;  %v1995_v7 = vld [vmem:[%s7806_s28 + $0x1470] sm:$0xff] }
  0xb3   : > { %1994 = vst [vmem:[%s7814_s29 + $0xa30] sm:$0xff] %v1993_v6  ;;  %v1997_v8 = vld [vmem:[%s7806_s28 + $0x1480] sm:$0xff]  ;;  %v1999_v9 = vld [vmem:[%s7806_s28 + $0x1490] sm:$0xff]  ;;  %1996 = vst [vmem:[%s7814_s29 + $0xa38] sm:$0xff] %v1995_v7 }
  0xb4   : > { %1998 = vst [vmem:[%s7814_s29 + $0xa40] sm:$0xff] %v1997_v8  ;;  %2000 = vst [vmem:[%s7814_s29 + $0xa48] sm:$0xff] %v1999_v9  ;;  %v2001_v10 = vld [vmem:[%s7806_s28 + $0x14a0] sm:$0xff]  ;;  %v2003_v11 = vld [vmem:[%s7806_s28 + $0x14b0] sm:$0xff] }
  0xb5   : > { %v2005_v12 = vld [vmem:[%s7806_s28 + $0x14c0] sm:$0xff]  ;;  %2002 = vst [vmem:[%s7814_s29 + $0xa50] sm:$0xff] %v2001_v10  ;;  %2004 = vst [vmem:[%s7814_s29 + $0xa58] sm:$0xff] %v2003_v11  ;;  %v2007_v13 = vld [vmem:[%s7806_s28 + $0x14d0] sm:$0xff] }
  0xb6   : > { %2006 = vst [vmem:[%s7814_s29 + $0xa60] sm:$0xff] %v2005_v12  ;;  %v2009_v14 = vld [vmem:[%s7806_s28 + $0x14e0] sm:$0xff]  ;;  %v2011_v15 = vld [vmem:[%s7806_s28 + $0x14f0] sm:$0xff]  ;;  %2008 = vst [vmem:[%s7814_s29 + $0xa68] sm:$0xff] %v2007_v13 }
  0xb7   : > { %2010 = vst [vmem:[%s7814_s29 + $0xa70] sm:$0xff] %v2009_v14  ;;  %2012 = vst [vmem:[%s7814_s29 + $0xa78] sm:$0xff] %v2011_v15  ;;  %v2013_v16 = vld [vmem:[%s7806_s28 + $0x1500] sm:$0xff]  ;;  %v2015_v17 = vld [vmem:[%s7806_s28 + $0x1510] sm:$0xff] }
  0xb8   : > { %v2017_v18 = vld [vmem:[%s7806_s28 + $0x1520] sm:$0xff]  ;;  %2014 = vst [vmem:[%s7814_s29 + $0xa80] sm:$0xff] %v2013_v16  ;;  %2016 = vst [vmem:[%s7814_s29 + $0xa88] sm:$0xff] %v2015_v17  ;;  %v2019_v19 = vld [vmem:[%s7806_s28 + $0x1530] sm:$0xff] }
  0xb9   : > { %2018 = vst [vmem:[%s7814_s29 + $0xa90] sm:$0xff] %v2017_v18  ;;  %v2021_v20 = vld [vmem:[%s7806_s28 + $0x1540] sm:$0xff]  ;;  %v2023_v21 = vld [vmem:[%s7806_s28 + $0x1550] sm:$0xff]  ;;  %2020 = vst [vmem:[%s7814_s29 + $0xa98] sm:$0xff] %v2019_v19 }
  0xba   : > { %2022 = vst [vmem:[%s7814_s29 + $0xaa0] sm:$0xff] %v2021_v20  ;;  %2024 = vst [vmem:[%s7814_s29 + $0xaa8] sm:$0xff] %v2023_v21  ;;  %v2025_v22 = vld [vmem:[%s7806_s28 + $0x1560] sm:$0xff]  ;;  %v2027_v23 = vld [vmem:[%s7806_s28 + $0x1570] sm:$0xff] }
  0xbb   : > { %v2029_v24 = vld [vmem:[%s7806_s28 + $0x1580] sm:$0xff]  ;;  %2026 = vst [vmem:[%s7814_s29 + $0xab0] sm:$0xff] %v2025_v22  ;;  %2028 = vst [vmem:[%s7814_s29 + $0xab8] sm:$0xff] %v2027_v23  ;;  %v2031_v25 = vld [vmem:[%s7806_s28 + $0x1590] sm:$0xff] }
  0xbc   : > { %2030 = vst [vmem:[%s7814_s29 + $0xac0] sm:$0xff] %v2029_v24  ;;  %v2033_v26 = vld [vmem:[%s7806_s28 + $0x15a0] sm:$0xff]  ;;  %v2035_v27 = vld [vmem:[%s7806_s28 + $0x15b0] sm:$0xff]  ;;  %2032 = vst [vmem:[%s7814_s29 + $0xac8] sm:$0xff] %v2031_v25 }
  0xbd   : > { %2034 = vst [vmem:[%s7814_s29 + $0xad0] sm:$0xff] %v2033_v26  ;;  %2036 = vst [vmem:[%s7814_s29 + $0xad8] sm:$0xff] %v2035_v27  ;;  %v2037_v28 = vld [vmem:[%s7806_s28 + $0x15c0] sm:$0xff]  ;;  %v2039_v29 = vld [vmem:[%s7806_s28 + $0x15d0] sm:$0xff] }
  0xbe   : > { %v2041_v30 = vld [vmem:[%s7806_s28 + $0x15e0] sm:$0xff]  ;;  %2038 = vst [vmem:[%s7814_s29 + $0xae0] sm:$0xff] %v2037_v28  ;;  %2040 = vst [vmem:[%s7814_s29 + $0xae8] sm:$0xff] %v2039_v29  ;;  %v2043_v31 = vld [vmem:[%s7806_s28 + $0x15f0] sm:$0xff] }
  0xbf   : > { %2042 = vst [vmem:[%s7814_s29 + $0xaf0] sm:$0xff] %v2041_v30  ;;  %v2045_v32 = vld [vmem:[%s7806_s28 + $0x1600] sm:$0xff]  ;;  %v2047_v33 = vld [vmem:[%s7806_s28 + $0x1610] sm:$0xff]  ;;  %2044 = vst [vmem:[%s7814_s29 + $0xaf8] sm:$0xff] %v2043_v31 }
  0xc0   : > { %2046 = vst [vmem:[%s7814_s29 + $0xb00] sm:$0xff] %v2045_v32  ;;  %2048 = vst [vmem:[%s7814_s29 + $0xb08] sm:$0xff] %v2047_v33  ;;  %v2049_v34 = vld [vmem:[%s7806_s28 + $0x1620] sm:$0xff]  ;;  %v2051_v35 = vld [vmem:[%s7806_s28 + $0x1630] sm:$0xff] }
  0xc1   : > { %v2053_v36 = vld [vmem:[%s7806_s28 + $0x1640] sm:$0xff]  ;;  %2050 = vst [vmem:[%s7814_s29 + $0xb10] sm:$0xff] %v2049_v34  ;;  %2052 = vst [vmem:[%s7814_s29 + $0xb18] sm:$0xff] %v2051_v35  ;;  %v2055_v37 = vld [vmem:[%s7806_s28 + $0x1650] sm:$0xff] }
  0xc2   : > { %2054 = vst [vmem:[%s7814_s29 + $0xb20] sm:$0xff] %v2053_v36  ;;  %v2057_v38 = vld [vmem:[%s7806_s28 + $0x1660] sm:$0xff]  ;;  %v2059_v39 = vld [vmem:[%s7806_s28 + $0x1670] sm:$0xff]  ;;  %2056 = vst [vmem:[%s7814_s29 + $0xb28] sm:$0xff] %v2055_v37 }
  0xc3   : > { %2058 = vst [vmem:[%s7814_s29 + $0xb30] sm:$0xff] %v2057_v38  ;;  %2060 = vst [vmem:[%s7814_s29 + $0xb38] sm:$0xff] %v2059_v39  ;;  %v2061_v40 = vld [vmem:[%s7806_s28 + $0x1680] sm:$0xff]  ;;  %v2063_v41 = vld [vmem:[%s7806_s28 + $0x1690] sm:$0xff] }
  0xc4   : > { %v2065_v42 = vld [vmem:[%s7806_s28 + $0x16a0] sm:$0xff]  ;;  %2062 = vst [vmem:[%s7814_s29 + $0xb40] sm:$0xff] %v2061_v40  ;;  %2064 = vst [vmem:[%s7814_s29 + $0xb48] sm:$0xff] %v2063_v41  ;;  %v2067_v43 = vld [vmem:[%s7806_s28 + $0x16b0] sm:$0xff] }
  0xc5   : > { %2066 = vst [vmem:[%s7814_s29 + $0xb50] sm:$0xff] %v2065_v42  ;;  %v2069_v44 = vld [vmem:[%s7806_s28 + $0x16c0] sm:$0xff]  ;;  %v2071_v45 = vld [vmem:[%s7806_s28 + $0x16d0] sm:$0xff]  ;;  %2068 = vst [vmem:[%s7814_s29 + $0xb58] sm:$0xff] %v2067_v43 }
  0xc6   : > { %2070 = vst [vmem:[%s7814_s29 + $0xb60] sm:$0xff] %v2069_v44  ;;  %2072 = vst [vmem:[%s7814_s29 + $0xb68] sm:$0xff] %v2071_v45  ;;  %v2073_v46 = vld [vmem:[%s7806_s28 + $0x16e0] sm:$0xff]  ;;  %v2075_v47 = vld [vmem:[%s7806_s28 + $0x16f0] sm:$0xff] }
  0xc7   : > { %v2077_v48 = vld [vmem:[%s7806_s28 + $0x1700] sm:$0xff]  ;;  %2074 = vst [vmem:[%s7814_s29 + $0xb70] sm:$0xff] %v2073_v46  ;;  %2076 = vst [vmem:[%s7814_s29 + $0xb78] sm:$0xff] %v2075_v47  ;;  %v2079_v49 = vld [vmem:[%s7806_s28 + $0x1710] sm:$0xff] }
  0xc8   : > { %2078 = vst [vmem:[%s7814_s29 + $0xb80] sm:$0xff] %v2077_v48  ;;  %v2081_v50 = vld [vmem:[%s7806_s28 + $0x1720] sm:$0xff]  ;;  %v2083_v51 = vld [vmem:[%s7806_s28 + $0x1730] sm:$0xff]  ;;  %2080 = vst [vmem:[%s7814_s29 + $0xb88] sm:$0xff] %v2079_v49 }
  0xc9   : > { %2082 = vst [vmem:[%s7814_s29 + $0xb90] sm:$0xff] %v2081_v50  ;;  %2084 = vst [vmem:[%s7814_s29 + $0xb98] sm:$0xff] %v2083_v51  ;;  %v2085_v52 = vld [vmem:[%s7806_s28 + $0x1740] sm:$0xff]  ;;  %v2087_v53 = vld [vmem:[%s7806_s28 + $0x1750] sm:$0xff] }
  0xca   : > { %v2089_v54 = vld [vmem:[%s7806_s28 + $0x1760] sm:$0xff]  ;;  %2086 = vst [vmem:[%s7814_s29 + $0xba0] sm:$0xff] %v2085_v52  ;;  %2088 = vst [vmem:[%s7814_s29 + $0xba8] sm:$0xff] %v2087_v53  ;;  %v2091_v55 = vld [vmem:[%s7806_s28 + $0x1770] sm:$0xff] }
  0xcb   : > { %2090 = vst [vmem:[%s7814_s29 + $0xbb0] sm:$0xff] %v2089_v54  ;;  %v2093_v56 = vld [vmem:[%s7806_s28 + $0x1780] sm:$0xff]  ;;  %v2095_v57 = vld [vmem:[%s7806_s28 + $0x1790] sm:$0xff]  ;;  %2092 = vst [vmem:[%s7814_s29 + $0xbb8] sm:$0xff] %v2091_v55 }
  0xcc   : > { %2094 = vst [vmem:[%s7814_s29 + $0xbc0] sm:$0xff] %v2093_v56  ;;  %2096 = vst [vmem:[%s7814_s29 + $0xbc8] sm:$0xff] %v2095_v57  ;;  %v2097_v58 = vld [vmem:[%s7806_s28 + $0x17a0] sm:$0xff]  ;;  %v2099_v59 = vld [vmem:[%s7806_s28 + $0x17b0] sm:$0xff] }
  0xcd   : > { %v2101_v60 = vld [vmem:[%s7806_s28 + $0x17c0] sm:$0xff]  ;;  %2098 = vst [vmem:[%s7814_s29 + $0xbd0] sm:$0xff] %v2097_v58  ;;  %2100 = vst [vmem:[%s7814_s29 + $0xbd8] sm:$0xff] %v2099_v59  ;;  %v2103_v61 = vld [vmem:[%s7806_s28 + $0x17d0] sm:$0xff] }
  0xce   : > { %2102 = vst [vmem:[%s7814_s29 + $0xbe0] sm:$0xff] %v2101_v60  ;;  %v2105_v62 = vld [vmem:[%s7806_s28 + $0x17e0] sm:$0xff]  ;;  %v2107_v63 = vld [vmem:[%s7806_s28 + $0x17f0] sm:$0xff]  ;;  %2104 = vst [vmem:[%s7814_s29 + $0xbe8] sm:$0xff] %v2103_v61 }
  0xcf   : > { %2106 = vst [vmem:[%s7814_s29 + $0xbf0] sm:$0xff] %v2105_v62  ;;  %2108 = vst [vmem:[%s7814_s29 + $0xbf8] sm:$0xff] %v2107_v63  ;;  %v2109_v0 = vld [vmem:[%s7806_s28 + $0x1800] sm:$0xff]  ;;  %v2111_v1 = vld [vmem:[%s7806_s28 + $0x1810] sm:$0xff] }
  0xd0   : > { %v2113_v2 = vld [vmem:[%s7806_s28 + $0x1820] sm:$0xff]  ;;  %2110 = vst [vmem:[%s7814_s29 + $0xc00] sm:$0xff] %v2109_v0  ;;  %2112 = vst [vmem:[%s7814_s29 + $0xc08] sm:$0xff] %v2111_v1  ;;  %v2115_v3 = vld [vmem:[%s7806_s28 + $0x1830] sm:$0xff] }
  0xd1   : > { %2114 = vst [vmem:[%s7814_s29 + $0xc10] sm:$0xff] %v2113_v2  ;;  %v2117_v4 = vld [vmem:[%s7806_s28 + $0x1840] sm:$0xff]  ;;  %v2119_v5 = vld [vmem:[%s7806_s28 + $0x1850] sm:$0xff]  ;;  %2116 = vst [vmem:[%s7814_s29 + $0xc18] sm:$0xff] %v2115_v3 }
  0xd2   : > { %2118 = vst [vmem:[%s7814_s29 + $0xc20] sm:$0xff] %v2117_v4  ;;  %2120 = vst [vmem:[%s7814_s29 + $0xc28] sm:$0xff] %v2119_v5  ;;  %v2121_v6 = vld [vmem:[%s7806_s28 + $0x1860] sm:$0xff]  ;;  %v2123_v7 = vld [vmem:[%s7806_s28 + $0x1870] sm:$0xff] }
  0xd3   : > { %v2125_v8 = vld [vmem:[%s7806_s28 + $0x1880] sm:$0xff]  ;;  %2122 = vst [vmem:[%s7814_s29 + $0xc30] sm:$0xff] %v2121_v6  ;;  %2124 = vst [vmem:[%s7814_s29 + $0xc38] sm:$0xff] %v2123_v7  ;;  %v2127_v9 = vld [vmem:[%s7806_s28 + $0x1890] sm:$0xff] }
  0xd4   : > { %2126 = vst [vmem:[%s7814_s29 + $0xc40] sm:$0xff] %v2125_v8  ;;  %v2129_v10 = vld [vmem:[%s7806_s28 + $0x18a0] sm:$0xff]  ;;  %v2131_v11 = vld [vmem:[%s7806_s28 + $0x18b0] sm:$0xff]  ;;  %2128 = vst [vmem:[%s7814_s29 + $0xc48] sm:$0xff] %v2127_v9 }
  0xd5   : > { %2130 = vst [vmem:[%s7814_s29 + $0xc50] sm:$0xff] %v2129_v10  ;;  %2132 = vst [vmem:[%s7814_s29 + $0xc58] sm:$0xff] %v2131_v11  ;;  %v2133_v12 = vld [vmem:[%s7806_s28 + $0x18c0] sm:$0xff]  ;;  %v2135_v13 = vld [vmem:[%s7806_s28 + $0x18d0] sm:$0xff] }
  0xd6   : > { %v2137_v14 = vld [vmem:[%s7806_s28 + $0x18e0] sm:$0xff]  ;;  %2134 = vst [vmem:[%s7814_s29 + $0xc60] sm:$0xff] %v2133_v12  ;;  %2136 = vst [vmem:[%s7814_s29 + $0xc68] sm:$0xff] %v2135_v13  ;;  %v2139_v15 = vld [vmem:[%s7806_s28 + $0x18f0] sm:$0xff] }
  0xd7   : > { %2138 = vst [vmem:[%s7814_s29 + $0xc70] sm:$0xff] %v2137_v14  ;;  %v2141_v16 = vld [vmem:[%s7806_s28 + $0x1900] sm:$0xff]  ;;  %v2143_v17 = vld [vmem:[%s7806_s28 + $0x1910] sm:$0xff]  ;;  %2140 = vst [vmem:[%s7814_s29 + $0xc78] sm:$0xff] %v2139_v15 }
  0xd8   : > { %2142 = vst [vmem:[%s7814_s29 + $0xc80] sm:$0xff] %v2141_v16  ;;  %2144 = vst [vmem:[%s7814_s29 + $0xc88] sm:$0xff] %v2143_v17  ;;  %v2145_v18 = vld [vmem:[%s7806_s28 + $0x1920] sm:$0xff]  ;;  %v2147_v19 = vld [vmem:[%s7806_s28 + $0x1930] sm:$0xff] }
  0xd9   : > { %v2149_v20 = vld [vmem:[%s7806_s28 + $0x1940] sm:$0xff]  ;;  %2146 = vst [vmem:[%s7814_s29 + $0xc90] sm:$0xff] %v2145_v18  ;;  %2148 = vst [vmem:[%s7814_s29 + $0xc98] sm:$0xff] %v2147_v19  ;;  %v2151_v21 = vld [vmem:[%s7806_s28 + $0x1950] sm:$0xff] }
  0xda   : > { %2150 = vst [vmem:[%s7814_s29 + $0xca0] sm:$0xff] %v2149_v20  ;;  %v2153_v22 = vld [vmem:[%s7806_s28 + $0x1960] sm:$0xff]  ;;  %v2155_v23 = vld [vmem:[%s7806_s28 + $0x1970] sm:$0xff]  ;;  %2152 = vst [vmem:[%s7814_s29 + $0xca8] sm:$0xff] %v2151_v21 }
  0xdb   : > { %2154 = vst [vmem:[%s7814_s29 + $0xcb0] sm:$0xff] %v2153_v22  ;;  %2156 = vst [vmem:[%s7814_s29 + $0xcb8] sm:$0xff] %v2155_v23  ;;  %v2157_v24 = vld [vmem:[%s7806_s28 + $0x1980] sm:$0xff]  ;;  %v2159_v25 = vld [vmem:[%s7806_s28 + $0x1990] sm:$0xff] }
  0xdc   : > { %v2161_v26 = vld [vmem:[%s7806_s28 + $0x19a0] sm:$0xff]  ;;  %2158 = vst [vmem:[%s7814_s29 + $0xcc0] sm:$0xff] %v2157_v24  ;;  %2160 = vst [vmem:[%s7814_s29 + $0xcc8] sm:$0xff] %v2159_v25  ;;  %v2163_v27 = vld [vmem:[%s7806_s28 + $0x19b0] sm:$0xff] }
  0xdd   : > { %2162 = vst [vmem:[%s7814_s29 + $0xcd0] sm:$0xff] %v2161_v26  ;;  %v2165_v28 = vld [vmem:[%s7806_s28 + $0x19c0] sm:$0xff]  ;;  %v2167_v29 = vld [vmem:[%s7806_s28 + $0x19d0] sm:$0xff]  ;;  %2164 = vst [vmem:[%s7814_s29 + $0xcd8] sm:$0xff] %v2163_v27 }
  0xde   : > { %2166 = vst [vmem:[%s7814_s29 + $0xce0] sm:$0xff] %v2165_v28  ;;  %2168 = vst [vmem:[%s7814_s29 + $0xce8] sm:$0xff] %v2167_v29  ;;  %v2169_v30 = vld [vmem:[%s7806_s28 + $0x19e0] sm:$0xff]  ;;  %v2171_v31 = vld [vmem:[%s7806_s28 + $0x19f0] sm:$0xff] }
  0xdf   : > { %v2173_v32 = vld [vmem:[%s7806_s28 + $0x1a00] sm:$0xff]  ;;  %2170 = vst [vmem:[%s7814_s29 + $0xcf0] sm:$0xff] %v2169_v30  ;;  %2172 = vst [vmem:[%s7814_s29 + $0xcf8] sm:$0xff] %v2171_v31  ;;  %v2175_v33 = vld [vmem:[%s7806_s28 + $0x1a10] sm:$0xff] }
  0xe0   : > { %2174 = vst [vmem:[%s7814_s29 + $0xd00] sm:$0xff] %v2173_v32  ;;  %v2177_v34 = vld [vmem:[%s7806_s28 + $0x1a20] sm:$0xff]  ;;  %v2179_v35 = vld [vmem:[%s7806_s28 + $0x1a30] sm:$0xff]  ;;  %2176 = vst [vmem:[%s7814_s29 + $0xd08] sm:$0xff] %v2175_v33 }
  0xe1   : > { %2178 = vst [vmem:[%s7814_s29 + $0xd10] sm:$0xff] %v2177_v34  ;;  %2180 = vst [vmem:[%s7814_s29 + $0xd18] sm:$0xff] %v2179_v35  ;;  %v2181_v36 = vld [vmem:[%s7806_s28 + $0x1a40] sm:$0xff]  ;;  %v2183_v37 = vld [vmem:[%s7806_s28 + $0x1a50] sm:$0xff] }
  0xe2   : > { %v2185_v38 = vld [vmem:[%s7806_s28 + $0x1a60] sm:$0xff]  ;;  %2182 = vst [vmem:[%s7814_s29 + $0xd20] sm:$0xff] %v2181_v36  ;;  %2184 = vst [vmem:[%s7814_s29 + $0xd28] sm:$0xff] %v2183_v37  ;;  %v2187_v39 = vld [vmem:[%s7806_s28 + $0x1a70] sm:$0xff] }
  0xe3   : > { %2186 = vst [vmem:[%s7814_s29 + $0xd30] sm:$0xff] %v2185_v38  ;;  %v2189_v40 = vld [vmem:[%s7806_s28 + $0x1a80] sm:$0xff]  ;;  %v2191_v41 = vld [vmem:[%s7806_s28 + $0x1a90] sm:$0xff]  ;;  %2188 = vst [vmem:[%s7814_s29 + $0xd38] sm:$0xff] %v2187_v39 }
  0xe4   : > { %2190 = vst [vmem:[%s7814_s29 + $0xd40] sm:$0xff] %v2189_v40  ;;  %2192 = vst [vmem:[%s7814_s29 + $0xd48] sm:$0xff] %v2191_v41  ;;  %v2193_v42 = vld [vmem:[%s7806_s28 + $0x1aa0] sm:$0xff]  ;;  %v2195_v43 = vld [vmem:[%s7806_s28 + $0x1ab0] sm:$0xff] }
  0xe5   : > { %v2197_v44 = vld [vmem:[%s7806_s28 + $0x1ac0] sm:$0xff]  ;;  %2194 = vst [vmem:[%s7814_s29 + $0xd50] sm:$0xff] %v2193_v42  ;;  %2196 = vst [vmem:[%s7814_s29 + $0xd58] sm:$0xff] %v2195_v43  ;;  %v2199_v45 = vld [vmem:[%s7806_s28 + $0x1ad0] sm:$0xff] }
  0xe6   : > { %2198 = vst [vmem:[%s7814_s29 + $0xd60] sm:$0xff] %v2197_v44  ;;  %v2201_v46 = vld [vmem:[%s7806_s28 + $0x1ae0] sm:$0xff]  ;;  %v2203_v47 = vld [vmem:[%s7806_s28 + $0x1af0] sm:$0xff]  ;;  %2200 = vst [vmem:[%s7814_s29 + $0xd68] sm:$0xff] %v2199_v45 }
  0xe7   : > { %2202 = vst [vmem:[%s7814_s29 + $0xd70] sm:$0xff] %v2201_v46  ;;  %2204 = vst [vmem:[%s7814_s29 + $0xd78] sm:$0xff] %v2203_v47  ;;  %v2205_v48 = vld [vmem:[%s7806_s28 + $0x1b00] sm:$0xff]  ;;  %v2207_v49 = vld [vmem:[%s7806_s28 + $0x1b10] sm:$0xff] }
  0xe8   : > { %v2209_v50 = vld [vmem:[%s7806_s28 + $0x1b20] sm:$0xff]  ;;  %2206 = vst [vmem:[%s7814_s29 + $0xd80] sm:$0xff] %v2205_v48  ;;  %2208 = vst [vmem:[%s7814_s29 + $0xd88] sm:$0xff] %v2207_v49  ;;  %v2211_v51 = vld [vmem:[%s7806_s28 + $0x1b30] sm:$0xff] }
  0xe9   : > { %2210 = vst [vmem:[%s7814_s29 + $0xd90] sm:$0xff] %v2209_v50  ;;  %v2213_v52 = vld [vmem:[%s7806_s28 + $0x1b40] sm:$0xff]  ;;  %v2215_v53 = vld [vmem:[%s7806_s28 + $0x1b50] sm:$0xff]  ;;  %2212 = vst [vmem:[%s7814_s29 + $0xd98] sm:$0xff] %v2211_v51 }
  0xea   : > { %2214 = vst [vmem:[%s7814_s29 + $0xda0] sm:$0xff] %v2213_v52  ;;  %2216 = vst [vmem:[%s7814_s29 + $0xda8] sm:$0xff] %v2215_v53  ;;  %v2217_v54 = vld [vmem:[%s7806_s28 + $0x1b60] sm:$0xff]  ;;  %v2219_v55 = vld [vmem:[%s7806_s28 + $0x1b70] sm:$0xff] }
  0xeb   : > { %v2221_v56 = vld [vmem:[%s7806_s28 + $0x1b80] sm:$0xff]  ;;  %2218 = vst [vmem:[%s7814_s29 + $0xdb0] sm:$0xff] %v2217_v54  ;;  %2220 = vst [vmem:[%s7814_s29 + $0xdb8] sm:$0xff] %v2219_v55  ;;  %v2223_v57 = vld [vmem:[%s7806_s28 + $0x1b90] sm:$0xff] }
  0xec   : > { %2222 = vst [vmem:[%s7814_s29 + $0xdc0] sm:$0xff] %v2221_v56  ;;  %v2225_v58 = vld [vmem:[%s7806_s28 + $0x1ba0] sm:$0xff]  ;;  %v2227_v59 = vld [vmem:[%s7806_s28 + $0x1bb0] sm:$0xff]  ;;  %2224 = vst [vmem:[%s7814_s29 + $0xdc8] sm:$0xff] %v2223_v57 }
  0xed   : > { %2226 = vst [vmem:[%s7814_s29 + $0xdd0] sm:$0xff] %v2225_v58  ;;  %2228 = vst [vmem:[%s7814_s29 + $0xdd8] sm:$0xff] %v2227_v59  ;;  %v2229_v60 = vld [vmem:[%s7806_s28 + $0x1bc0] sm:$0xff]  ;;  %v2231_v61 = vld [vmem:[%s7806_s28 + $0x1bd0] sm:$0xff] }
  0xee   : > { %v2233_v62 = vld [vmem:[%s7806_s28 + $0x1be0] sm:$0xff]  ;;  %2230 = vst [vmem:[%s7814_s29 + $0xde0] sm:$0xff] %v2229_v60  ;;  %2232 = vst [vmem:[%s7814_s29 + $0xde8] sm:$0xff] %v2231_v61  ;;  %v2235_v63 = vld [vmem:[%s7806_s28 + $0x1bf0] sm:$0xff] }
  0xef   : > { %2234 = vst [vmem:[%s7814_s29 + $0xdf0] sm:$0xff] %v2233_v62  ;;  %v2237_v0 = vld [vmem:[%s7806_s28 + $0x1c00] sm:$0xff]  ;;  %v2239_v1 = vld [vmem:[%s7806_s28 + $0x1c10] sm:$0xff]  ;;  %2236 = vst [vmem:[%s7814_s29 + $0xdf8] sm:$0xff] %v2235_v63 }
  0xf0   : > { %2238 = vst [vmem:[%s7814_s29 + $0xe00] sm:$0xff] %v2237_v0  ;;  %2240 = vst [vmem:[%s7814_s29 + $0xe08] sm:$0xff] %v2239_v1  ;;  %v2241_v2 = vld [vmem:[%s7806_s28 + $0x1c20] sm:$0xff]  ;;  %v2243_v3 = vld [vmem:[%s7806_s28 + $0x1c30] sm:$0xff] }
  0xf1   : > { %v2245_v4 = vld [vmem:[%s7806_s28 + $0x1c40] sm:$0xff]  ;;  %2242 = vst [vmem:[%s7814_s29 + $0xe10] sm:$0xff] %v2241_v2  ;;  %2244 = vst [vmem:[%s7814_s29 + $0xe18] sm:$0xff] %v2243_v3  ;;  %v2247_v5 = vld [vmem:[%s7806_s28 + $0x1c50] sm:$0xff] }
  0xf2   : > { %2246 = vst [vmem:[%s7814_s29 + $0xe20] sm:$0xff] %v2245_v4  ;;  %v2249_v6 = vld [vmem:[%s7806_s28 + $0x1c60] sm:$0xff]  ;;  %v2251_v7 = vld [vmem:[%s7806_s28 + $0x1c70] sm:$0xff]  ;;  %2248 = vst [vmem:[%s7814_s29 + $0xe28] sm:$0xff] %v2247_v5 }
  0xf3   : > { %2250 = vst [vmem:[%s7814_s29 + $0xe30] sm:$0xff] %v2249_v6  ;;  %2252 = vst [vmem:[%s7814_s29 + $0xe38] sm:$0xff] %v2251_v7  ;;  %v2253_v8 = vld [vmem:[%s7806_s28 + $0x1c80] sm:$0xff]  ;;  %v2255_v9 = vld [vmem:[%s7806_s28 + $0x1c90] sm:$0xff] }
  0xf4   : > { %v2257_v10 = vld [vmem:[%s7806_s28 + $0x1ca0] sm:$0xff]  ;;  %2254 = vst [vmem:[%s7814_s29 + $0xe40] sm:$0xff] %v2253_v8  ;;  %2256 = vst [vmem:[%s7814_s29 + $0xe48] sm:$0xff] %v2255_v9  ;;  %v2259_v11 = vld [vmem:[%s7806_s28 + $0x1cb0] sm:$0xff] }
  0xf5   : > { %2258 = vst [vmem:[%s7814_s29 + $0xe50] sm:$0xff] %v2257_v10  ;;  %v2261_v12 = vld [vmem:[%s7806_s28 + $0x1cc0] sm:$0xff]  ;;  %v2263_v13 = vld [vmem:[%s7806_s28 + $0x1cd0] sm:$0xff]  ;;  %2260 = vst [vmem:[%s7814_s29 + $0xe58] sm:$0xff] %v2259_v11 }
  0xf6   : > { %2262 = vst [vmem:[%s7814_s29 + $0xe60] sm:$0xff] %v2261_v12  ;;  %2264 = vst [vmem:[%s7814_s29 + $0xe68] sm:$0xff] %v2263_v13  ;;  %v2265_v14 = vld [vmem:[%s7806_s28 + $0x1ce0] sm:$0xff]  ;;  %v2267_v15 = vld [vmem:[%s7806_s28 + $0x1cf0] sm:$0xff] }
  0xf7   : > { %v2269_v16 = vld [vmem:[%s7806_s28 + $0x1d00] sm:$0xff]  ;;  %2266 = vst [vmem:[%s7814_s29 + $0xe70] sm:$0xff] %v2265_v14  ;;  %2268 = vst [vmem:[%s7814_s29 + $0xe78] sm:$0xff] %v2267_v15  ;;  %v2271_v17 = vld [vmem:[%s7806_s28 + $0x1d10] sm:$0xff] }
  0xf8   : > { %2270 = vst [vmem:[%s7814_s29 + $0xe80] sm:$0xff] %v2269_v16  ;;  %v2273_v18 = vld [vmem:[%s7806_s28 + $0x1d20] sm:$0xff]  ;;  %v2275_v19 = vld [vmem:[%s7806_s28 + $0x1d30] sm:$0xff]  ;;  %2272 = vst [vmem:[%s7814_s29 + $0xe88] sm:$0xff] %v2271_v17 }
  0xf9   : > { %2274 = vst [vmem:[%s7814_s29 + $0xe90] sm:$0xff] %v2273_v18  ;;  %2276 = vst [vmem:[%s7814_s29 + $0xe98] sm:$0xff] %v2275_v19  ;;  %v2277_v20 = vld [vmem:[%s7806_s28 + $0x1d40] sm:$0xff]  ;;  %v2279_v21 = vld [vmem:[%s7806_s28 + $0x1d50] sm:$0xff] }
  0xfa   : > { %v2281_v22 = vld [vmem:[%s7806_s28 + $0x1d60] sm:$0xff]  ;;  %2278 = vst [vmem:[%s7814_s29 + $0xea0] sm:$0xff] %v2277_v20  ;;  %2280 = vst [vmem:[%s7814_s29 + $0xea8] sm:$0xff] %v2279_v21  ;;  %v2283_v23 = vld [vmem:[%s7806_s28 + $0x1d70] sm:$0xff] }
  0xfb   : > { %2282 = vst [vmem:[%s7814_s29 + $0xeb0] sm:$0xff] %v2281_v22  ;;  %v2285_v24 = vld [vmem:[%s7806_s28 + $0x1d80] sm:$0xff]  ;;  %v2287_v25 = vld [vmem:[%s7806_s28 + $0x1d90] sm:$0xff]  ;;  %2284 = vst [vmem:[%s7814_s29 + $0xeb8] sm:$0xff] %v2283_v23 }
  0xfc   : > { %2286 = vst [vmem:[%s7814_s29 + $0xec0] sm:$0xff] %v2285_v24  ;;  %2288 = vst [vmem:[%s7814_s29 + $0xec8] sm:$0xff] %v2287_v25  ;;  %v2289_v26 = vld [vmem:[%s7806_s28 + $0x1da0] sm:$0xff]  ;;  %v2291_v27 = vld [vmem:[%s7806_s28 + $0x1db0] sm:$0xff] }
  0xfd   : > { %v2293_v28 = vld [vmem:[%s7806_s28 + $0x1dc0] sm:$0xff]  ;;  %2290 = vst [vmem:[%s7814_s29 + $0xed0] sm:$0xff] %v2289_v26  ;;  %2292 = vst [vmem:[%s7814_s29 + $0xed8] sm:$0xff] %v2291_v27  ;;  %v2295_v29 = vld [vmem:[%s7806_s28 + $0x1dd0] sm:$0xff] }
  0xfe   : > { %2294 = vst [vmem:[%s7814_s29 + $0xee0] sm:$0xff] %v2293_v28  ;;  %v2297_v30 = vld [vmem:[%s7806_s28 + $0x1de0] sm:$0xff]  ;;  %v2299_v31 = vld [vmem:[%s7806_s28 + $0x1df0] sm:$0xff]  ;;  %2296 = vst [vmem:[%s7814_s29 + $0xee8] sm:$0xff] %v2295_v29 }
  0xff   : > { %2298 = vst [vmem:[%s7814_s29 + $0xef0] sm:$0xff] %v2297_v30  ;;  %2300 = vst [vmem:[%s7814_s29 + $0xef8] sm:$0xff] %v2299_v31  ;;  %v2301_v32 = vld [vmem:[%s7806_s28 + $0x1e00] sm:$0xff]  ;;  %v2303_v33 = vld [vmem:[%s7806_s28 + $0x1e10] sm:$0xff] }
 0x100   : > { %v2305_v34 = vld [vmem:[%s7806_s28 + $0x1e20] sm:$0xff]  ;;  %2302 = vst [vmem:[%s7814_s29 + $0xf00] sm:$0xff] %v2301_v32  ;;  %2304 = vst [vmem:[%s7814_s29 + $0xf08] sm:$0xff] %v2303_v33  ;;  %v2307_v35 = vld [vmem:[%s7806_s28 + $0x1e30] sm:$0xff] }
 0x101   : > { %2306 = vst [vmem:[%s7814_s29 + $0xf10] sm:$0xff] %v2305_v34  ;;  %v2309_v36 = vld [vmem:[%s7806_s28 + $0x1e40] sm:$0xff]  ;;  %v2311_v37 = vld [vmem:[%s7806_s28 + $0x1e50] sm:$0xff]  ;;  %2308 = vst [vmem:[%s7814_s29 + $0xf18] sm:$0xff] %v2307_v35 }
 0x102   : > { %2310 = vst [vmem:[%s7814_s29 + $0xf20] sm:$0xff] %v2309_v36  ;;  %2312 = vst [vmem:[%s7814_s29 + $0xf28] sm:$0xff] %v2311_v37  ;;  %v2313_v38 = vld [vmem:[%s7806_s28 + $0x1e60] sm:$0xff]  ;;  %v2315_v39 = vld [vmem:[%s7806_s28 + $0x1e70] sm:$0xff] }
 0x103   : > { %v2317_v40 = vld [vmem:[%s7806_s28 + $0x1e80] sm:$0xff]  ;;  %2314 = vst [vmem:[%s7814_s29 + $0xf30] sm:$0xff] %v2313_v38  ;;  %2316 = vst [vmem:[%s7814_s29 + $0xf38] sm:$0xff] %v2315_v39  ;;  %v2319_v41 = vld [vmem:[%s7806_s28 + $0x1e90] sm:$0xff] }
 0x104   : > { %2318 = vst [vmem:[%s7814_s29 + $0xf40] sm:$0xff] %v2317_v40  ;;  %v2321_v42 = vld [vmem:[%s7806_s28 + $0x1ea0] sm:$0xff]  ;;  %v2323_v43 = vld [vmem:[%s7806_s28 + $0x1eb0] sm:$0xff]  ;;  %2320 = vst [vmem:[%s7814_s29 + $0xf48] sm:$0xff] %v2319_v41 }
 0x105   : > { %2322 = vst [vmem:[%s7814_s29 + $0xf50] sm:$0xff] %v2321_v42  ;;  %2324 = vst [vmem:[%s7814_s29 + $0xf58] sm:$0xff] %v2323_v43  ;;  %v2325_v44 = vld [vmem:[%s7806_s28 + $0x1ec0] sm:$0xff]  ;;  %v2327_v45 = vld [vmem:[%s7806_s28 + $0x1ed0] sm:$0xff] }
 0x106   : > { %v2329_v46 = vld [vmem:[%s7806_s28 + $0x1ee0] sm:$0xff]  ;;  %2326 = vst [vmem:[%s7814_s29 + $0xf60] sm:$0xff] %v2325_v44  ;;  %2328 = vst [vmem:[%s7814_s29 + $0xf68] sm:$0xff] %v2327_v45  ;;  %v2331_v47 = vld [vmem:[%s7806_s28 + $0x1ef0] sm:$0xff] }
 0x107   : > { %2330 = vst [vmem:[%s7814_s29 + $0xf70] sm:$0xff] %v2329_v46  ;;  %v2333_v48 = vld [vmem:[%s7806_s28 + $0x1f00] sm:$0xff]  ;;  %v2335_v49 = vld [vmem:[%s7806_s28 + $0x1f10] sm:$0xff]  ;;  %2332 = vst [vmem:[%s7814_s29 + $0xf78] sm:$0xff] %v2331_v47 }
 0x108   : > { %2334 = vst [vmem:[%s7814_s29 + $0xf80] sm:$0xff] %v2333_v48  ;;  %2336 = vst [vmem:[%s7814_s29 + $0xf88] sm:$0xff] %v2335_v49  ;;  %v2337_v50 = vld [vmem:[%s7806_s28 + $0x1f20] sm:$0xff]  ;;  %v2339_v51 = vld [vmem:[%s7806_s28 + $0x1f30] sm:$0xff] }
 0x109   : > { %v2341_v52 = vld [vmem:[%s7806_s28 + $0x1f40] sm:$0xff]  ;;  %2338 = vst [vmem:[%s7814_s29 + $0xf90] sm:$0xff] %v2337_v50  ;;  %2340 = vst [vmem:[%s7814_s29 + $0xf98] sm:$0xff] %v2339_v51  ;;  %v2343_v53 = vld [vmem:[%s7806_s28 + $0x1f50] sm:$0xff] }
 0x10a   : > { %2342 = vst [vmem:[%s7814_s29 + $0xfa0] sm:$0xff] %v2341_v52  ;;  %v2345_v54 = vld [vmem:[%s7806_s28 + $0x1f60] sm:$0xff]  ;;  %v2347_v55 = vld [vmem:[%s7806_s28 + $0x1f70] sm:$0xff]  ;;  %2344 = vst [vmem:[%s7814_s29 + $0xfa8] sm:$0xff] %v2343_v53 }
 0x10b   : > { %2346 = vst [vmem:[%s7814_s29 + $0xfb0] sm:$0xff] %v2345_v54  ;;  %2348 = vst [vmem:[%s7814_s29 + $0xfb8] sm:$0xff] %v2347_v55  ;;  %v2349_v56 = vld [vmem:[%s7806_s28 + $0x1f80] sm:$0xff]  ;;  %v2351_v57 = vld [vmem:[%s7806_s28 + $0x1f90] sm:$0xff] }
 0x10c   : > { %v2353_v58 = vld [vmem:[%s7806_s28 + $0x1fa0] sm:$0xff]  ;;  %2350 = vst [vmem:[%s7814_s29 + $0xfc0] sm:$0xff] %v2349_v56  ;;  %2352 = vst [vmem:[%s7814_s29 + $0xfc8] sm:$0xff] %v2351_v57  ;;  %v2355_v59 = vld [vmem:[%s7806_s28 + $0x1fb0] sm:$0xff] }
 0x10d   : > { %2354 = vst [vmem:[%s7814_s29 + $0xfd0] sm:$0xff] %v2353_v58  ;;  %v2357_v60 = vld [vmem:[%s7806_s28 + $0x1fc0] sm:$0xff]  ;;  %v2359_v61 = vld [vmem:[%s7806_s28 + $0x1fd0] sm:$0xff]  ;;  %2356 = vst [vmem:[%s7814_s29 + $0xfd8] sm:$0xff] %v2355_v59 }
 0x10e   : > { %2358 = vst [vmem:[%s7814_s29 + $0xfe0] sm:$0xff] %v2357_v60  ;;  %2360 = vst [vmem:[%s7814_s29 + $0xfe8] sm:$0xff] %v2359_v61  ;;  %v2361_v62 = vld [vmem:[%s7806_s28 + $0x1fe0] sm:$0xff]  ;;  %v2363_v63 = vld [vmem:[%s7806_s28 + $0x1ff0] sm:$0xff] }
 0x10f   : > { %v2365_v0 = vld [vmem:[%s7806_s28 + $0x2000] sm:$0xff]  ;;  %2362 = vst [vmem:[%s7814_s29 + $0xff0] sm:$0xff] %v2361_v62  ;;  %2364 = vst [vmem:[%s7814_s29 + $0xff8] sm:$0xff] %v2363_v63  ;;  %v2367_v1 = vld [vmem:[%s7806_s28 + $0x2010] sm:$0xff] }
 0x110   : > { %2366 = vst [vmem:[%s7814_s29 + $0x1000] sm:$0xff] %v2365_v0  ;;  %v2369_v2 = vld [vmem:[%s7806_s28 + $0x2020] sm:$0xff]  ;;  %v2371_v3 = vld [vmem:[%s7806_s28 + $0x2030] sm:$0xff]  ;;  %2368 = vst [vmem:[%s7814_s29 + $0x1008] sm:$0xff] %v2367_v1 }
 0x111   : > { %2370 = vst [vmem:[%s7814_s29 + $0x1010] sm:$0xff] %v2369_v2  ;;  %2372 = vst [vmem:[%s7814_s29 + $0x1018] sm:$0xff] %v2371_v3  ;;  %v2373_v4 = vld [vmem:[%s7806_s28 + $0x2040] sm:$0xff]  ;;  %v2375_v5 = vld [vmem:[%s7806_s28 + $0x2050] sm:$0xff] }
 0x112   : > { %v2377_v6 = vld [vmem:[%s7806_s28 + $0x2060] sm:$0xff]  ;;  %2374 = vst [vmem:[%s7814_s29 + $0x1020] sm:$0xff] %v2373_v4  ;;  %2376 = vst [vmem:[%s7814_s29 + $0x1028] sm:$0xff] %v2375_v5  ;;  %v2379_v7 = vld [vmem:[%s7806_s28 + $0x2070] sm:$0xff] }
 0x113   : > { %2378 = vst [vmem:[%s7814_s29 + $0x1030] sm:$0xff] %v2377_v6  ;;  %v2381_v8 = vld [vmem:[%s7806_s28 + $0x2080] sm:$0xff]  ;;  %v2383_v9 = vld [vmem:[%s7806_s28 + $0x2090] sm:$0xff]  ;;  %2380 = vst [vmem:[%s7814_s29 + $0x1038] sm:$0xff] %v2379_v7 }
 0x114   : > { %2382 = vst [vmem:[%s7814_s29 + $0x1040] sm:$0xff] %v2381_v8  ;;  %2384 = vst [vmem:[%s7814_s29 + $0x1048] sm:$0xff] %v2383_v9  ;;  %v2385_v10 = vld [vmem:[%s7806_s28 + $0x20a0] sm:$0xff]  ;;  %v2387_v11 = vld [vmem:[%s7806_s28 + $0x20b0] sm:$0xff] }
 0x115   : > { %v2389_v12 = vld [vmem:[%s7806_s28 + $0x20c0] sm:$0xff]  ;;  %2386 = vst [vmem:[%s7814_s29 + $0x1050] sm:$0xff] %v2385_v10  ;;  %2388 = vst [vmem:[%s7814_s29 + $0x1058] sm:$0xff] %v2387_v11  ;;  %v2391_v13 = vld [vmem:[%s7806_s28 + $0x20d0] sm:$0xff] }
 0x116   : > { %2390 = vst [vmem:[%s7814_s29 + $0x1060] sm:$0xff] %v2389_v12  ;;  %v2393_v14 = vld [vmem:[%s7806_s28 + $0x20e0] sm:$0xff]  ;;  %v2395_v15 = vld [vmem:[%s7806_s28 + $0x20f0] sm:$0xff]  ;;  %2392 = vst [vmem:[%s7814_s29 + $0x1068] sm:$0xff] %v2391_v13 }
 0x117   : > { %2394 = vst [vmem:[%s7814_s29 + $0x1070] sm:$0xff] %v2393_v14  ;;  %2396 = vst [vmem:[%s7814_s29 + $0x1078] sm:$0xff] %v2395_v15  ;;  %v2397_v16 = vld [vmem:[%s7806_s28 + $0x2100] sm:$0xff]  ;;  %v2399_v17 = vld [vmem:[%s7806_s28 + $0x2110] sm:$0xff] }
 0x118   : > { %v2401_v18 = vld [vmem:[%s7806_s28 + $0x2120] sm:$0xff]  ;;  %2398 = vst [vmem:[%s7814_s29 + $0x1080] sm:$0xff] %v2397_v16  ;;  %2400 = vst [vmem:[%s7814_s29 + $0x1088] sm:$0xff] %v2399_v17  ;;  %v2403_v19 = vld [vmem:[%s7806_s28 + $0x2130] sm:$0xff] }
 0x119   : > { %2402 = vst [vmem:[%s7814_s29 + $0x1090] sm:$0xff] %v2401_v18  ;;  %v2405_v20 = vld [vmem:[%s7806_s28 + $0x2140] sm:$0xff]  ;;  %v2407_v21 = vld [vmem:[%s7806_s28 + $0x2150] sm:$0xff]  ;;  %2404 = vst [vmem:[%s7814_s29 + $0x1098] sm:$0xff] %v2403_v19 }
 0x11a   : > { %2406 = vst [vmem:[%s7814_s29 + $0x10a0] sm:$0xff] %v2405_v20  ;;  %2408 = vst [vmem:[%s7814_s29 + $0x10a8] sm:$0xff] %v2407_v21  ;;  %v2409_v22 = vld [vmem:[%s7806_s28 + $0x2160] sm:$0xff]  ;;  %v2411_v23 = vld [vmem:[%s7806_s28 + $0x2170] sm:$0xff] }
 0x11b   : > { %v2413_v24 = vld [vmem:[%s7806_s28 + $0x2180] sm:$0xff]  ;;  %2410 = vst [vmem:[%s7814_s29 + $0x10b0] sm:$0xff] %v2409_v22  ;;  %2412 = vst [vmem:[%s7814_s29 + $0x10b8] sm:$0xff] %v2411_v23  ;;  %v2415_v25 = vld [vmem:[%s7806_s28 + $0x2190] sm:$0xff] }
 0x11c   : > { %2414 = vst [vmem:[%s7814_s29 + $0x10c0] sm:$0xff] %v2413_v24  ;;  %v2417_v26 = vld [vmem:[%s7806_s28 + $0x21a0] sm:$0xff]  ;;  %v2419_v27 = vld [vmem:[%s7806_s28 + $0x21b0] sm:$0xff]  ;;  %2416 = vst [vmem:[%s7814_s29 + $0x10c8] sm:$0xff] %v2415_v25 }
 0x11d   : > { %2418 = vst [vmem:[%s7814_s29 + $0x10d0] sm:$0xff] %v2417_v26  ;;  %2420 = vst [vmem:[%s7814_s29 + $0x10d8] sm:$0xff] %v2419_v27  ;;  %v2421_v28 = vld [vmem:[%s7806_s28 + $0x21c0] sm:$0xff]  ;;  %v2423_v29 = vld [vmem:[%s7806_s28 + $0x21d0] sm:$0xff] }
 0x11e   : > { %v2425_v30 = vld [vmem:[%s7806_s28 + $0x21e0] sm:$0xff]  ;;  %2422 = vst [vmem:[%s7814_s29 + $0x10e0] sm:$0xff] %v2421_v28  ;;  %2424 = vst [vmem:[%s7814_s29 + $0x10e8] sm:$0xff] %v2423_v29  ;;  %v2427_v31 = vld [vmem:[%s7806_s28 + $0x21f0] sm:$0xff] }
 0x11f   : > { %2426 = vst [vmem:[%s7814_s29 + $0x10f0] sm:$0xff] %v2425_v30  ;;  %v2429_v32 = vld [vmem:[%s7806_s28 + $0x2200] sm:$0xff]  ;;  %v2431_v33 = vld [vmem:[%s7806_s28 + $0x2210] sm:$0xff]  ;;  %2428 = vst [vmem:[%s7814_s29 + $0x10f8] sm:$0xff] %v2427_v31 }
 0x120   : > { %2430 = vst [vmem:[%s7814_s29 + $0x1100] sm:$0xff] %v2429_v32  ;;  %2432 = vst [vmem:[%s7814_s29 + $0x1108] sm:$0xff] %v2431_v33  ;;  %v2433_v34 = vld [vmem:[%s7806_s28 + $0x2220] sm:$0xff]  ;;  %v2435_v35 = vld [vmem:[%s7806_s28 + $0x2230] sm:$0xff] }
 0x121   : > { %v2437_v36 = vld [vmem:[%s7806_s28 + $0x2240] sm:$0xff]  ;;  %2434 = vst [vmem:[%s7814_s29 + $0x1110] sm:$0xff] %v2433_v34  ;;  %2436 = vst [vmem:[%s7814_s29 + $0x1118] sm:$0xff] %v2435_v35  ;;  %v2439_v37 = vld [vmem:[%s7806_s28 + $0x2250] sm:$0xff] }
 0x122   : > { %2438 = vst [vmem:[%s7814_s29 + $0x1120] sm:$0xff] %v2437_v36  ;;  %v2441_v38 = vld [vmem:[%s7806_s28 + $0x2260] sm:$0xff]  ;;  %v2443_v39 = vld [vmem:[%s7806_s28 + $0x2270] sm:$0xff]  ;;  %2440 = vst [vmem:[%s7814_s29 + $0x1128] sm:$0xff] %v2439_v37 }
 0x123   : > { %2442 = vst [vmem:[%s7814_s29 + $0x1130] sm:$0xff] %v2441_v38  ;;  %2444 = vst [vmem:[%s7814_s29 + $0x1138] sm:$0xff] %v2443_v39  ;;  %v2445_v40 = vld [vmem:[%s7806_s28 + $0x2280] sm:$0xff]  ;;  %v2447_v41 = vld [vmem:[%s7806_s28 + $0x2290] sm:$0xff] }
 0x124   : > { %v2449_v42 = vld [vmem:[%s7806_s28 + $0x22a0] sm:$0xff]  ;;  %2446 = vst [vmem:[%s7814_s29 + $0x1140] sm:$0xff] %v2445_v40  ;;  %2448 = vst [vmem:[%s7814_s29 + $0x1148] sm:$0xff] %v2447_v41  ;;  %v2451_v43 = vld [vmem:[%s7806_s28 + $0x22b0] sm:$0xff] }
 0x125   : > { %2450 = vst [vmem:[%s7814_s29 + $0x1150] sm:$0xff] %v2449_v42  ;;  %v2453_v44 = vld [vmem:[%s7806_s28 + $0x22c0] sm:$0xff]  ;;  %v2455_v45 = vld [vmem:[%s7806_s28 + $0x22d0] sm:$0xff]  ;;  %2452 = vst [vmem:[%s7814_s29 + $0x1158] sm:$0xff] %v2451_v43 }
 0x126   : > { %2454 = vst [vmem:[%s7814_s29 + $0x1160] sm:$0xff] %v2453_v44  ;;  %2456 = vst [vmem:[%s7814_s29 + $0x1168] sm:$0xff] %v2455_v45  ;;  %v2457_v46 = vld [vmem:[%s7806_s28 + $0x22e0] sm:$0xff]  ;;  %v2459_v47 = vld [vmem:[%s7806_s28 + $0x22f0] sm:$0xff] }
 0x127   : > { %v2461_v48 = vld [vmem:[%s7806_s28 + $0x2300] sm:$0xff]  ;;  %2458 = vst [vmem:[%s7814_s29 + $0x1170] sm:$0xff] %v2457_v46  ;;  %2460 = vst [vmem:[%s7814_s29 + $0x1178] sm:$0xff] %v2459_v47  ;;  %v2463_v49 = vld [vmem:[%s7806_s28 + $0x2310] sm:$0xff] }
 0x128   : > { %2462 = vst [vmem:[%s7814_s29 + $0x1180] sm:$0xff] %v2461_v48  ;;  %v2465_v50 = vld [vmem:[%s7806_s28 + $0x2320] sm:$0xff]  ;;  %v2467_v51 = vld [vmem:[%s7806_s28 + $0x2330] sm:$0xff]  ;;  %2464 = vst [vmem:[%s7814_s29 + $0x1188] sm:$0xff] %v2463_v49 }
 0x129   : > { %2466 = vst [vmem:[%s7814_s29 + $0x1190] sm:$0xff] %v2465_v50  ;;  %2468 = vst [vmem:[%s7814_s29 + $0x1198] sm:$0xff] %v2467_v51  ;;  %v2469_v52 = vld [vmem:[%s7806_s28 + $0x2340] sm:$0xff]  ;;  %v2471_v53 = vld [vmem:[%s7806_s28 + $0x2350] sm:$0xff] }
 0x12a   : > { %v2473_v54 = vld [vmem:[%s7806_s28 + $0x2360] sm:$0xff]  ;;  %2470 = vst [vmem:[%s7814_s29 + $0x11a0] sm:$0xff] %v2469_v52  ;;  %2472 = vst [vmem:[%s7814_s29 + $0x11a8] sm:$0xff] %v2471_v53  ;;  %v2475_v55 = vld [vmem:[%s7806_s28 + $0x2370] sm:$0xff] }
 0x12b   : > { %2474 = vst [vmem:[%s7814_s29 + $0x11b0] sm:$0xff] %v2473_v54  ;;  %v2477_v56 = vld [vmem:[%s7806_s28 + $0x2380] sm:$0xff]  ;;  %v2479_v57 = vld [vmem:[%s7806_s28 + $0x2390] sm:$0xff]  ;;  %2476 = vst [vmem:[%s7814_s29 + $0x11b8] sm:$0xff] %v2475_v55 }
 0x12c   : > { %2478 = vst [vmem:[%s7814_s29 + $0x11c0] sm:$0xff] %v2477_v56  ;;  %2480 = vst [vmem:[%s7814_s29 + $0x11c8] sm:$0xff] %v2479_v57  ;;  %v2481_v58 = vld [vmem:[%s7806_s28 + $0x23a0] sm:$0xff]  ;;  %v2483_v59 = vld [vmem:[%s7806_s28 + $0x23b0] sm:$0xff] }
 0x12d   : > { %v2485_v60 = vld [vmem:[%s7806_s28 + $0x23c0] sm:$0xff]  ;;  %2482 = vst [vmem:[%s7814_s29 + $0x11d0] sm:$0xff] %v2481_v58  ;;  %2484 = vst [vmem:[%s7814_s29 + $0x11d8] sm:$0xff] %v2483_v59  ;;  %v2487_v61 = vld [vmem:[%s7806_s28 + $0x23d0] sm:$0xff] }
 0x12e   : > { %2486 = vst [vmem:[%s7814_s29 + $0x11e0] sm:$0xff] %v2485_v60  ;;  %v2489_v62 = vld [vmem:[%s7806_s28 + $0x23e0] sm:$0xff]  ;;  %v2491_v63 = vld [vmem:[%s7806_s28 + $0x23f0] sm:$0xff]  ;;  %2488 = vst [vmem:[%s7814_s29 + $0x11e8] sm:$0xff] %v2487_v61 }
 0x12f   : > { %2490 = vst [vmem:[%s7814_s29 + $0x11f0] sm:$0xff] %v2489_v62  ;;  %2492 = vst [vmem:[%s7814_s29 + $0x11f8] sm:$0xff] %v2491_v63 }
 0x130 PF: > { %p6964_p5 = scmp.ge.s32.totalorder %s7740_s17, 1  ;;  %p4847_p6 = scmp.lt.s32.totalorder %s7740_s17, 3 }
 0x132   : > { %p4848_p7 = pnand %p6964_p5, %p4847_p6 }
 0x133   : > { %s4854_s30 = sand.u32 (!%p4848_p7), 1, %s7732_s15   ;;  %p6967_p9 = scmp.ne.s32.totalorder (!%p4848_p7), %s7786_s18, 0 }
 0x134   : > { %4851 = sbr.rel (%p4848_p7) target bundleno = 1053 (0x41d), region = 84 }
 0x135   : > { %s7656_s9 = smul.u32 (!%p4848_p7), 4608, %s4854_s30 }
 0x137   : > { %s8971_s10 = scalar_lea.vmem (!%p4848_p7), [#allocation2], %s7656_s9 }
 0x139   : > { %v4886_v0 = vld [vmem:[%s9699_s0 + $0x8] sm:$0xff]  ;;  %v4888_v1 = vld [vmem:[%s9699_s0 + $0x18] sm:$0xff]  ;;  %v4951_v6 = vld [vmem:[%s8971_s10 + $0xf0] sm:$0xff]  ;;  %vm7743_vm0 = vmmov 0   ;;  %vm6761_vm1 = vcmask 1043456   ;;  %vm6797_vm2 = vcmask 1041409  }
 0x13a   : > { %5561 = vmatprep.mubr.f32.mxu0 %v4886_v0  ;;  %5631 = vmatprep.mubr.f32.mxu1 %v4888_v1  ;;  %v4952_v2 = vld [vmem:[%s8971_s10 + $0xf8] sm:$0xff]  ;;  %v4983_v7 = vld [vmem:[%s8971_s10 + $0x1f0] sm:$0xff]  ;;  %v4950_v10 = vld [vmem:[%s8971_s10 + $0xe8] sm:$0xff] }
 0x13b   : > { %v4984_v3 = vld [vmem:[%s8971_s10 + $0x1f8] sm:$0xff]  ;;  %6973 = vmatprep.subr.mxu0 %v4952_v2  ;;  %v4935_v8 = vld [vmem:[%s8971_s10 + $0x70] sm:$0xff]  ;;  %v4982_v11 = vld [vmem:[%s8971_s10 + $0x1e8] sm:$0xff] }
 0x13c   : > { %v4936_v4 = vld [vmem:[%s8971_s10 + $0x78] sm:$0xff]  ;;  %7008 = vmatprep.subr.mxu1 %v4984_v3  ;;  %v4967_v9 = vld [vmem:[%s8971_s10 + $0x170] sm:$0xff]  ;;  %v4934_v12 = vld [vmem:[%s8971_s10 + $0x68] sm:$0xff] }
 0x13d   : > { %v4968_v5 = vld [vmem:[%s8971_s10 + $0x178] sm:$0xff]  ;;  %6974 = vmatpush3.msra.mxu0 %v4936_v4  ;;  %v4966_v13 = vld [vmem:[%s8971_s10 + $0x168] sm:$0xff]  ;;  %v4949_v14 = vld [vmem:[%s8971_s10 + $0xe0] sm:$0xff] }
 0x13e   : > { %7009 = vmatpush3.msra.mxu1 %v4968_v5  ;;  %6975 = vmatprep.subr.mxu0 %v4951_v6  ;;  %v4981_v15 = vld [vmem:[%s8971_s10 + $0x1e0] sm:$0xff]  ;;  %v4948_v18 = vld [vmem:[%s8971_s10 + $0xd8] sm:$0xff]  ;;  %v4947_v22 = vld [vmem:[%s8971_s10 + $0xd0] sm:$0xff] }
 0x13f   : > { %7010 = vmatprep.subr.mxu1 %v4983_v7  ;;  %6976 = vmatpush3.msra.mxu0 %v4935_v8  ;;  %v4933_v16 = vld [vmem:[%s8971_s10 + $0x60] sm:$0xff]  ;;  %v4980_v19 = vld [vmem:[%s8971_s10 + $0x1d8] sm:$0xff]  ;;  %v4979_v23 = vld [vmem:[%s8971_s10 + $0x1d0] sm:$0xff] }
 0x140   : > { %7011 = vmatpush3.msra.mxu1 %v4967_v9  ;;  %6977 = vmatprep.subr.mxu0 %v4950_v10  ;;  %v4965_v17 = vld [vmem:[%s8971_s10 + $0x160] sm:$0xff]  ;;  %v4932_v20 = vld [vmem:[%s8971_s10 + $0x58] sm:$0xff]  ;;  %v4931_v24 = vld [vmem:[%s8971_s10 + $0x50] sm:$0xff] }
 0x141   : > { %7012 = vmatprep.subr.mxu1 %v4982_v11  ;;  %6978 = vmatpush3.msra.mxu0 %v4934_v12  ;;  %v4964_v21 = vld [vmem:[%s8971_s10 + $0x158] sm:$0xff]  ;;  %v4963_v25 = vld [vmem:[%s8971_s10 + $0x150] sm:$0xff]  ;;  %v4946_v26 = vld [vmem:[%s8971_s10 + $0xc8] sm:$0xff] }
 0x142   : > { %7013 = vmatpush3.msra.mxu1 %v4966_v13  ;;  %6979 = vmatprep.subr.mxu0 %v4949_v14  ;;  %v4978_v27 = vld [vmem:[%s8971_s10 + $0x1c8] sm:$0xff]  ;;  %v4945_v30 = vld [vmem:[%s8971_s10 + $0xc0] sm:$0xff]  ;;  %v4944_v34 = vld [vmem:[%s8971_s10 + $0xb8] sm:$0xff] }
 0x143   : > { %7014 = vmatprep.subr.mxu1 %v4981_v15  ;;  %6980 = vmatpush3.msra.mxu0 %v4933_v16  ;;  %v4930_v28 = vld [vmem:[%s8971_s10 + $0x48] sm:$0xff]  ;;  %v4977_v31 = vld [vmem:[%s8971_s10 + $0x1c0] sm:$0xff]  ;;  %v4976_v35 = vld [vmem:[%s8971_s10 + $0x1b8] sm:$0xff] }
 0x144   : > { %7015 = vmatpush3.msra.mxu1 %v4965_v17  ;;  %6981 = vmatprep.subr.mxu0 %v4948_v18  ;;  %v4962_v29 = vld [vmem:[%s8971_s10 + $0x148] sm:$0xff]  ;;  %v4929_v32 = vld [vmem:[%s8971_s10 + $0x40] sm:$0xff]  ;;  %v4928_v36 = vld [vmem:[%s8971_s10 + $0x38] sm:$0xff] }
 0x145   : > { %7016 = vmatprep.subr.mxu1 %v4980_v19  ;;  %6982 = vmatpush3.msra.mxu0 %v4932_v20  ;;  %v4961_v33 = vld [vmem:[%s8971_s10 + $0x140] sm:$0xff]  ;;  %v4960_v37 = vld [vmem:[%s8971_s10 + $0x138] sm:$0xff]  ;;  %v4943_v38 = vld [vmem:[%s8971_s10 + $0xb0] sm:$0xff] }
 0x146   : > { %7017 = vmatpush3.msra.mxu1 %v4964_v21  ;;  %6983 = vmatprep.subr.mxu0 %v4947_v22  ;;  %v4975_v39 = vld [vmem:[%s8971_s10 + $0x1b0] sm:$0xff]  ;;  %v4942_v42 = vld [vmem:[%s8971_s10 + $0xa8] sm:$0xff]  ;;  %v4941_v46 = vld [vmem:[%s8971_s10 + $0xa0] sm:$0xff] }
 0x147   : > { %7018 = vmatprep.subr.mxu1 %v4979_v23  ;;  %6984 = vmatpush3.msra.mxu0 %v4931_v24  ;;  %v4927_v40 = vld [vmem:[%s8971_s10 + $0x30] sm:$0xff]  ;;  %v4974_v43 = vld [vmem:[%s8971_s10 + $0x1a8] sm:$0xff]  ;;  %v4973_v47 = vld [vmem:[%s8971_s10 + $0x1a0] sm:$0xff] }
 0x148   : > { %7019 = vmatpush3.msra.mxu1 %v4963_v25  ;;  %6985 = vmatprep.subr.mxu0 %v4946_v26  ;;  %v4959_v41 = vld [vmem:[%s8971_s10 + $0x130] sm:$0xff]  ;;  %v4926_v44 = vld [vmem:[%s8971_s10 + $0x28] sm:$0xff]  ;;  %v4925_v48 = vld [vmem:[%s8971_s10 + $0x20] sm:$0xff] }
 0x149   : > { %7020 = vmatprep.subr.mxu1 %v4978_v27  ;;  %6986 = vmatpush3.msra.mxu0 %v4930_v28  ;;  %v4958_v45 = vld [vmem:[%s8971_s10 + $0x128] sm:$0xff]  ;;  %v4957_v49 = vld [vmem:[%s8971_s10 + $0x120] sm:$0xff]  ;;  %v4940_v50 = vld [vmem:[%s8971_s10 + $0x98] sm:$0xff] }
 0x14a   : > { %7021 = vmatpush3.msra.mxu1 %v4962_v29  ;;  %6987 = vmatprep.subr.mxu0 %v4945_v30  ;;  %v4972_v51 = vld [vmem:[%s8971_s10 + $0x198] sm:$0xff]  ;;  %v4939_v54 = vld [vmem:[%s8971_s10 + $0x90] sm:$0xff]  ;;  %v4938_v58 = vld [vmem:[%s8971_s10 + $0x88] sm:$0xff] }
 0x14b   : > { %7022 = vmatprep.subr.mxu1 %v4977_v31  ;;  %6988 = vmatpush3.msra.mxu0 %v4929_v32  ;;  %v4924_v52 = vld [vmem:[%s8971_s10 + $0x18] sm:$0xff]  ;;  %v4971_v55 = vld [vmem:[%s8971_s10 + $0x190] sm:$0xff]  ;;  %v4970_v59 = vld [vmem:[%s8971_s10 + $0x188] sm:$0xff] }
 0x14c   : > { %7023 = vmatpush3.msra.mxu1 %v4961_v33  ;;  %6989 = vmatprep.subr.mxu0 %v4944_v34  ;;  %v4956_v53 = vld [vmem:[%s8971_s10 + $0x118] sm:$0xff]  ;;  %v4923_v56 = vld [vmem:[%s8971_s10 + $0x10] sm:$0xff]  ;;  %v4922_v60 = vld [vmem:[%s8971_s10 + $0x8] sm:$0xff] }
 0x14d   : > { %7024 = vmatprep.subr.mxu1 %v4976_v35  ;;  %6990 = vmatpush3.msra.mxu0 %v4928_v36  ;;  %v4955_v57 = vld [vmem:[%s8971_s10 + $0x110] sm:$0xff]  ;;  %v4954_v61 = vld [vmem:[%s8971_s10 + $0x108] sm:$0xff]  ;;  %v4937_v62 = vld [vmem:[%s8971_s10 + $0x80] sm:$0xff] }
 0x14e   : > { %7025 = vmatpush3.msra.mxu1 %v4960_v37  ;;  %6991 = vmatprep.subr.mxu0 %v4943_v38  ;;  %v4969_v63 = vld [vmem:[%s8971_s10 + $0x180] sm:$0xff]  ;;  %v4887_v3 = vld [vmem:[%s9699_s0 + $0x10] sm:$0xff]  ;;  %v5016_v4 = vld [vmem:[%s8971_s10 + $0x2f8] sm:$0xff] }
 0x14f   : > { %7026 = vmatprep.subr.mxu1 %v4975_v39  ;;  %6992 = vmatpush3.msra.mxu0 %v4927_v40  ;;  %v4921_v0 = vld [vmem:[%s8971_s10] sm:$0xff]  ;;  %v5048_v5 = vld [vmem:[%s8971_s10 + $0x3f8] sm:$0xff]  ;;  %v5015_v8 = vld [vmem:[%s8971_s10 + $0x2f0] sm:$0xff] }
 0x150   : > { %7027 = vmatpush3.msra.mxu1 %v4959_v41  ;;  %6993 = vmatprep.subr.mxu0 %v4942_v42  ;;  %v4953_v1 = vld [vmem:[%s8971_s10 + $0x100] sm:$0xff]  ;;  %v5000_v6 = vld [vmem:[%s8971_s10 + $0x278] sm:$0xff]  ;;  %v5047_v9 = vld [vmem:[%s8971_s10 + $0x3f0] sm:$0xff] }
 0x151   : > { %7028 = vmatprep.subr.mxu1 %v4974_v43  ;;  %6994 = vmatpush3.msra.mxu0 %v4926_v44  ;;  %v4885_v2 = vld [vmem:[%s9699_s0] sm:$0xff]  ;;  %v5032_v7 = vld [vmem:[%s8971_s10 + $0x378] sm:$0xff]  ;;  %v4999_v10 = vld [vmem:[%s8971_s10 + $0x270] sm:$0xff] }
 0x152   : > { %7029 = vmatpush3.msra.mxu1 %v4958_v45  ;;  %6995 = vmatprep.subr.mxu0 %v4941_v46  ;;  %v5031_v11 = vld [vmem:[%s8971_s10 + $0x370] sm:$0xff]  ;;  %v5014_v12 = vld [vmem:[%s8971_s10 + $0x2e8] sm:$0xff]  ;;  %v5013_v16 = vld [vmem:[%s8971_s10 + $0x2e0] sm:$0xff] }
 0x153   : > { %7030 = vmatprep.subr.mxu1 %v4973_v47  ;;  %6996 = vmatpush3.msra.mxu0 %v4925_v48  ;;  %v5046_v13 = vld [vmem:[%s8971_s10 + $0x3e8] sm:$0xff]  ;;  %v5045_v17 = vld [vmem:[%s8971_s10 + $0x3e0] sm:$0xff]  ;;  %v5012_v20 = vld [vmem:[%s8971_s10 + $0x2d8] sm:$0xff] }
 0x154   : > { %7031 = vmatpush3.msra.mxu1 %v4957_v49  ;;  %6997 = vmatprep.subr.mxu0 %v4940_v50  ;;  %v4998_v14 = vld [vmem:[%s8971_s10 + $0x268] sm:$0xff]  ;;  %v4997_v18 = vld [vmem:[%s8971_s10 + $0x260] sm:$0xff]  ;;  %v5044_v21 = vld [vmem:[%s8971_s10 + $0x3d8] sm:$0xff] }
 0x155   : > { %7032 = vmatprep.subr.mxu1 %v4972_v51  ;;  %6998 = vmatpush3.msra.mxu0 %v4924_v52  ;;  %v5030_v15 = vld [vmem:[%s8971_s10 + $0x368] sm:$0xff]  ;;  %v5029_v19 = vld [vmem:[%s8971_s10 + $0x360] sm:$0xff]  ;;  %v4996_v22 = vld [vmem:[%s8971_s10 + $0x258] sm:$0xff] }
 0x156   : > { %7033 = vmatpush3.msra.mxu1 %v4956_v53  ;;  %6999 = vmatprep.subr.mxu0 %v4939_v54  ;;  %v5028_v23 = vld [vmem:[%s8971_s10 + $0x358] sm:$0xff]  ;;  %v5011_v24 = vld [vmem:[%s8971_s10 + $0x2d0] sm:$0xff]  ;;  %v5010_v28 = vld [vmem:[%s8971_s10 + $0x2c8] sm:$0xff] }
 0x157   : > { %7034 = vmatprep.subr.mxu1 %v4971_v55  ;;  %7000 = vmatpush3.msra.mxu0 %v4923_v56  ;;  %v5043_v25 = vld [vmem:[%s8971_s10 + $0x3d0] sm:$0xff]  ;;  %v5042_v29 = vld [vmem:[%s8971_s10 + $0x3c8] sm:$0xff]  ;;  %v5009_v32 = vld [vmem:[%s8971_s10 + $0x2c0] sm:$0xff] }
 0x158   : > { %7035 = vmatpush3.msra.mxu1 %v4955_v57  ;;  %7001 = vmatprep.subr.mxu0 %v4938_v58  ;;  %v4995_v26 = vld [vmem:[%s8971_s10 + $0x250] sm:$0xff]  ;;  %v4994_v30 = vld [vmem:[%s8971_s10 + $0x248] sm:$0xff]  ;;  %v5041_v33 = vld [vmem:[%s8971_s10 + $0x3c0] sm:$0xff] }
 0x159   : > { %7036 = vmatprep.subr.mxu1 %v4970_v59  ;;  %7002 = vmatpush3.msra.mxu0 %v4922_v60  ;;  %v5027_v27 = vld [vmem:[%s8971_s10 + $0x350] sm:$0xff]  ;;  %v5026_v31 = vld [vmem:[%s8971_s10 + $0x348] sm:$0xff]  ;;  %v4993_v34 = vld [vmem:[%s8971_s10 + $0x240] sm:$0xff] }
 0x15a   : > { %7037 = vmatpush3.msra.mxu1 %v4954_v61  ;;  %7003 = vmatprep.subr.mxu0 %v4937_v62  ;;  %v5025_v35 = vld [vmem:[%s8971_s10 + $0x340] sm:$0xff]  ;;  %v5008_v36 = vld [vmem:[%s8971_s10 + $0x2b8] sm:$0xff]  ;;  %v5007_v40 = vld [vmem:[%s8971_s10 + $0x2b0] sm:$0xff] }
 0x15b   : > { %7038 = vmatprep.subr.mxu1 %v4969_v63  ;;  %7004 = vmatpush3.msra.mxu0 %v4921_v0  ;;  %v5040_v37 = vld [vmem:[%s8971_s10 + $0x3b8] sm:$0xff]  ;;  %v5039_v41 = vld [vmem:[%s8971_s10 + $0x3b0] sm:$0xff]  ;;  %v5006_v44 = vld [vmem:[%s8971_s10 + $0x2a8] sm:$0xff] }
 0x15c   : > { %7039 = vmatpush3.msra.mxu1 %v4953_v1  ;;  %5562 = vmatmul.mubr.f32.vlgmr.msra.gmra.mxu0 %v4885_v2  ;;  %v4992_v38 = vld [vmem:[%s8971_s10 + $0x238] sm:$0xff]  ;;  %v4991_v42 = vld [vmem:[%s8971_s10 + $0x230] sm:$0xff]  ;;  %v5038_v45 = vld [vmem:[%s8971_s10 + $0x3a8] sm:$0xff] }
 0x15d   : > { %5632 = vmatmul.mubr.f32.vlgmr.msra.gmra.mxu1 %v4887_v3  ;;  %7043 = vmatprep.subr.mxu0 %v5016_v4  ;;  %v5024_v39 = vld [vmem:[%s8971_s10 + $0x338] sm:$0xff]  ;;  %v5023_v43 = vld [vmem:[%s8971_s10 + $0x330] sm:$0xff]  ;;  %v4990_v46 = vld [vmem:[%s8971_s10 + $0x228] sm:$0xff] }
 0x15e   : > { %7078 = vmatprep.subr.mxu1 %v5048_v5  ;;  %7044 = vmatpush3.msra.mxu0 %v5000_v6  ;;  %v5022_v47 = vld [vmem:[%s8971_s10 + $0x328] sm:$0xff]  ;;  %v5005_v48 = vld [vmem:[%s8971_s10 + $0x2a0] sm:$0xff]  ;;  %v5004_v52 = vld [vmem:[%s8971_s10 + $0x298] sm:$0xff] }
 0x15f   : > { %7079 = vmatpush3.msra.mxu1 %v5032_v7  ;;  %7045 = vmatprep.subr.mxu0 %v5015_v8  ;;  %v5037_v49 = vld [vmem:[%s8971_s10 + $0x3a0] sm:$0xff]  ;;  %v5036_v53 = vld [vmem:[%s8971_s10 + $0x398] sm:$0xff]  ;;  %v5003_v56 = vld [vmem:[%s8971_s10 + $0x290] sm:$0xff] }
 0x160   : > { %7080 = vmatprep.subr.mxu1 %v5047_v9  ;;  %7046 = vmatpush3.msra.mxu0 %v4999_v10  ;;  %v4989_v50 = vld [vmem:[%s8971_s10 + $0x220] sm:$0xff]  ;;  %v4988_v54 = vld [vmem:[%s8971_s10 + $0x218] sm:$0xff]  ;;  %v5035_v57 = vld [vmem:[%s8971_s10 + $0x390] sm:$0xff] }
 0x161   : > { %7081 = vmatpush3.msra.mxu1 %v5031_v11  ;;  %7047 = vmatprep.subr.mxu0 %v5014_v12  ;;  %v5021_v51 = vld [vmem:[%s8971_s10 + $0x320] sm:$0xff]  ;;  %v5020_v55 = vld [vmem:[%s8971_s10 + $0x318] sm:$0xff]  ;;  %v4987_v58 = vld [vmem:[%s8971_s10 + $0x210] sm:$0xff] }
 0x162   : > { %7082 = vmatprep.subr.mxu1 %v5046_v13  ;;  %7048 = vmatpush3.msra.mxu0 %v4998_v14  ;;  %v5019_v59 = vld [vmem:[%s8971_s10 + $0x310] sm:$0xff]  ;;  %v5002_v60 = vld [vmem:[%s8971_s10 + $0x288] sm:$0xff]  ;;  %v5001_v0 = vld [vmem:[%s8971_s10 + $0x280] sm:$0xff] }
 0x163   : > { %7083 = vmatpush3.msra.mxu1 %v5030_v15  ;;  %7049 = vmatprep.subr.mxu0 %v5013_v16  ;;  %v5034_v61 = vld [vmem:[%s8971_s10 + $0x388] sm:$0xff]  ;;  %v5033_v1 = vld [vmem:[%s8971_s10 + $0x380] sm:$0xff]  ;;  %v4892_v6 = vld [vmem:[%s9699_s0 + $0x38] sm:$0xff] }
 0x164   : > { %7084 = vmatprep.subr.mxu1 %v5045_v17  ;;  %7050 = vmatpush3.msra.mxu0 %v4997_v18  ;;  %v4986_v62 = vld [vmem:[%s8971_s10 + $0x208] sm:$0xff]  ;;  %v4985_v2 = vld [vmem:[%s8971_s10 + $0x200] sm:$0xff]  ;;  %v5080_v7 = vld [vmem:[%s8971_s10 + $0x4f8] sm:$0xff] }
 0x165   : > { %7085 = vmatpush3.msra.mxu1 %v5029_v19  ;;  %7051 = vmatprep.subr.mxu0 %v5012_v20  ;;  %v5018_v63 = vld [vmem:[%s8971_s10 + $0x308] sm:$0xff]  ;;  %v5017_v4 = vld [vmem:[%s8971_s10 + $0x300] sm:$0xff]  ;;  %v5112_v8 = vld [vmem:[%s8971_s10 + $0x5f8] sm:$0xff] }
 0x166   : > { %7086 = vmatprep.subr.mxu1 %v5044_v21  ;;  %7052 = vmatpush3.msra.mxu0 %v4996_v22  ;;  %v4890_v3 = vld [vmem:[%s9699_s0 + $0x28] sm:$0xff]  ;;  %v4889_v5 = vld [vmem:[%s9699_s0 + $0x20] sm:$0xff]  ;;  %v4891_v9 = vld [vmem:[%s9699_s0 + $0x30] sm:$0xff] }
 0x167   : > { %7087 = vmatpush3.msra.mxu1 %v5028_v23  ;;  %7053 = vmatprep.subr.mxu0 %v5011_v24  ;;  %v5064_v10 = vld [vmem:[%s8971_s10 + $0x478] sm:$0xff]  ;;  %v5079_v12 = vld [vmem:[%s8971_s10 + $0x4f0] sm:$0xff]  ;;  %v5078_v16 = vld [vmem:[%s8971_s10 + $0x4e8] sm:$0xff] }
 0x168   : > { %7088 = vmatprep.subr.mxu1 %v5043_v25  ;;  %7054 = vmatpush3.msra.mxu0 %v4995_v26  ;;  %v5096_v11 = vld [vmem:[%s8971_s10 + $0x578] sm:$0xff]  ;;  %v5111_v13 = vld [vmem:[%s8971_s10 + $0x5f0] sm:$0xff]  ;;  %v5110_v17 = vld [vmem:[%s8971_s10 + $0x5e8] sm:$0xff] }
 0x169   : > { %7089 = vmatpush3.msra.mxu1 %v5027_v27  ;;  %7055 = vmatprep.subr.mxu0 %v5010_v28  ;;  %v5063_v14 = vld [vmem:[%s8971_s10 + $0x470] sm:$0xff]  ;;  %v5062_v18 = vld [vmem:[%s8971_s10 + $0x468] sm:$0xff]  ;;  %v5077_v20 = vld [vmem:[%s8971_s10 + $0x4e0] sm:$0xff] }
 0x16a   : > { %7090 = vmatprep.subr.mxu1 %v5042_v29  ;;  %7056 = vmatpush3.msra.mxu0 %v4994_v30  ;;  %v5095_v15 = vld [vmem:[%s8971_s10 + $0x570] sm:$0xff]  ;;  %v5094_v19 = vld [vmem:[%s8971_s10 + $0x568] sm:$0xff]  ;;  %v5109_v21 = vld [vmem:[%s8971_s10 + $0x5e0] sm:$0xff] }
 0x16b   : > { %7091 = vmatpush3.msra.mxu1 %v5026_v31  ;;  %7057 = vmatprep.subr.mxu0 %v5009_v32  ;;  %v5061_v22 = vld [vmem:[%s8971_s10 + $0x460] sm:$0xff]  ;;  %v5076_v24 = vld [vmem:[%s8971_s10 + $0x4d8] sm:$0xff]  ;;  %v5075_v28 = vld [vmem:[%s8971_s10 + $0x4d0] sm:$0xff] }
 0x16c   : > { %7092 = vmatprep.subr.mxu1 %v5041_v33  ;;  %7058 = vmatpush3.msra.mxu0 %v4993_v34  ;;  %v5093_v23 = vld [vmem:[%s8971_s10 + $0x560] sm:$0xff]  ;;  %v5108_v25 = vld [vmem:[%s8971_s10 + $0x5d8] sm:$0xff]  ;;  %v5107_v29 = vld [vmem:[%s8971_s10 + $0x5d0] sm:$0xff] }
 0x16d   : > { %7093 = vmatpush3.msra.mxu1 %v5025_v35  ;;  %7059 = vmatprep.subr.mxu0 %v5008_v36  ;;  %v5060_v26 = vld [vmem:[%s8971_s10 + $0x458] sm:$0xff]  ;;  %v5059_v30 = vld [vmem:[%s8971_s10 + $0x450] sm:$0xff]  ;;  %v5074_v32 = vld [vmem:[%s8971_s10 + $0x4c8] sm:$0xff] }
 0x16e   : > { %7094 = vmatprep.subr.mxu1 %v5040_v37  ;;  %7060 = vmatpush3.msra.mxu0 %v4992_v38  ;;  %v5092_v27 = vld [vmem:[%s8971_s10 + $0x558] sm:$0xff]  ;;  %v5091_v31 = vld [vmem:[%s8971_s10 + $0x550] sm:$0xff]  ;;  %v5106_v33 = vld [vmem:[%s8971_s10 + $0x5c8] sm:$0xff] }
 0x16f   : > { %7095 = vmatpush3.msra.mxu1 %v5024_v39  ;;  %7061 = vmatprep.subr.mxu0 %v5007_v40  ;;  %v5058_v34 = vld [vmem:[%s8971_s10 + $0x448] sm:$0xff]  ;;  %v5073_v36 = vld [vmem:[%s8971_s10 + $0x4c0] sm:$0xff]  ;;  %v5072_v40 = vld [vmem:[%s8971_s10 + $0x4b8] sm:$0xff] }
 0x170   : > { %7096 = vmatprep.subr.mxu1 %v5039_v41  ;;  %7062 = vmatpush3.msra.mxu0 %v4991_v42  ;;  %v5090_v35 = vld [vmem:[%s8971_s10 + $0x548] sm:$0xff]  ;;  %v5105_v37 = vld [vmem:[%s8971_s10 + $0x5c0] sm:$0xff]  ;;  %v5104_v41 = vld [vmem:[%s8971_s10 + $0x5b8] sm:$0xff] }
 0x171   : > { %7097 = vmatpush3.msra.mxu1 %v5023_v43  ;;  %7063 = vmatprep.subr.mxu0 %v5006_v44  ;;  %v5057_v38 = vld [vmem:[%s8971_s10 + $0x440] sm:$0xff]  ;;  %v5056_v42 = vld [vmem:[%s8971_s10 + $0x438] sm:$0xff]  ;;  %v5071_v44 = vld [vmem:[%s8971_s10 + $0x4b0] sm:$0xff] }
 0x172   : > { %7098 = vmatprep.subr.mxu1 %v5038_v45  ;;  %7064 = vmatpush3.msra.mxu0 %v4990_v46  ;;  %v5089_v39 = vld [vmem:[%s8971_s10 + $0x540] sm:$0xff]  ;;  %v5088_v43 = vld [vmem:[%s8971_s10 + $0x538] sm:$0xff]  ;;  %v5103_v45 = vld [vmem:[%s8971_s10 + $0x5b0] sm:$0xff] }
 0x173   : > { %7099 = vmatpush3.msra.mxu1 %v5022_v47  ;;  %7065 = vmatprep.subr.mxu0 %v5005_v48  ;;  %v5055_v46 = vld [vmem:[%s8971_s10 + $0x430] sm:$0xff]  ;;  %v5070_v48 = vld [vmem:[%s8971_s10 + $0x4a8] sm:$0xff] }
 0x174   : > { %7100 = vmatprep.subr.mxu1 %v5037_v49  ;;  %7066 = vmatpush3.msra.mxu0 %v4989_v50  ;;  %v5087_v47 = vld [vmem:[%s8971_s10 + $0x530] sm:$0xff]  ;;  %v5102_v49 = vld [vmem:[%s8971_s10 + $0x5a8] sm:$0xff] }
 0x175   : > { %7101 = vmatpush3.msra.mxu1 %v5021_v51  ;;  %7067 = vmatprep.subr.mxu0 %v5004_v52  ;;  %v5054_v50 = vld [vmem:[%s8971_s10 + $0x428] sm:$0xff]  ;;  %v5069_v52 = vld [vmem:[%s8971_s10 + $0x4a0] sm:$0xff] }
 0x176   : > { %7102 = vmatprep.subr.mxu1 %v5036_v53  ;;  %7068 = vmatpush3.msra.mxu0 %v4988_v54  ;;  %v5086_v51 = vld [vmem:[%s8971_s10 + $0x528] sm:$0xff]  ;;  %v5101_v53 = vld [vmem:[%s8971_s10 + $0x5a0] sm:$0xff] }
 0x177   : > { %7103 = vmatpush3.msra.mxu1 %v5020_v55  ;;  %7069 = vmatprep.subr.mxu0 %v5003_v56  ;;  %v5053_v54 = vld [vmem:[%s8971_s10 + $0x420] sm:$0xff]  ;;  %v5068_v56 = vld [vmem:[%s8971_s10 + $0x498] sm:$0xff] }
 0x178   : > { %7104 = vmatprep.subr.mxu1 %v5035_v57  ;;  %7070 = vmatpush3.msra.mxu0 %v4987_v58  ;;  %v5085_v55 = vld [vmem:[%s8971_s10 + $0x520] sm:$0xff]  ;;  %v5100_v57 = vld [vmem:[%s8971_s10 + $0x598] sm:$0xff] }
 0x179   : > { %7105 = vmatpush3.msra.mxu1 %v5019_v59  ;;  %7071 = vmatprep.subr.mxu0 %v5002_v60  ;;  %v5052_v58 = vld [vmem:[%s8971_s10 + $0x418] sm:$0xff]  ;;  %v5067_v60 = vld [vmem:[%s8971_s10 + $0x490] sm:$0xff] }
 0x17a   : > { %7106 = vmatprep.subr.mxu1 %v5034_v61  ;;  %7072 = vmatpush3.msra.mxu0 %v4986_v62  ;;  %v5084_v59 = vld [vmem:[%s8971_s10 + $0x518] sm:$0xff]  ;;  %v5099_v61 = vld [vmem:[%s8971_s10 + $0x590] sm:$0xff] }
 0x17b   : > { %7107 = vmatpush3.msra.mxu1 %v5018_v63  ;;  %7073 = vmatprep.subr.mxu0 %v5001_v0  ;;  %v5051_v62 = vld [vmem:[%s8971_s10 + $0x410] sm:$0xff]  ;;  %v5066_v0 = vld [vmem:[%s8971_s10 + $0x488] sm:$0xff] }
 0x17c   : > { %7108 = vmatprep.subr.mxu1 %v5033_v1  ;;  %7074 = vmatpush3.msra.mxu0 %v4985_v2  ;;  %v5083_v63 = vld [vmem:[%s8971_s10 + $0x510] sm:$0xff]  ;;  %v5098_v1 = vld [vmem:[%s8971_s10 + $0x588] sm:$0xff] }
 0x17d   : > { %5701 = vmatprep.mubr.f32.mxu0 %v4890_v3  ;;  %7109 = vmatpush3.msra.mxu1 %v5017_v4  ;;  %v5050_v2 = vld [vmem:[%s8971_s10 + $0x408] sm:$0xff]  ;;  %v5065_v4 = vld [vmem:[%s8971_s10 + $0x480] sm:$0xff] }
 0x17e   : > { %5702 = vmatmul.mubr.f32.vlgmr.msra.gmra.mxu0 %v4889_v5  ;;  %5771 = vmatprep.mubr.f32.mxu1 %v4892_v6  ;;  %v5082_v3 = vld [vmem:[%s8971_s10 + $0x508] sm:$0xff]  ;;  %v5097_v5 = vld [vmem:[%s8971_s10 + $0x580] sm:$0xff] }
 0x17f   : > { %7113 = vmatprep.subr.mxu0 %v5080_v7  ;;  %7148 = vmatprep.subr.mxu1 %v5112_v8  ;;  %v5049_v6 = vld [vmem:[%s8971_s10 + $0x400] sm:$0xff]  ;;  %v4894_v7 = vld [vmem:[%s9699_s0 + $0x48] sm:$0xff] }
 0x180   : > { %5772 = vmatmul.mubr.f32.vlgmr.msra.gmra.mxu1 %v4891_v9  ;;  %7114 = vmatpush3.msra.mxu0 %v5064_v10  ;;  %v5081_v8 = vld [vmem:[%s8971_s10 + $0x500] sm:$0xff]  ;;  %v4896_v10 = vld [vmem:[%s9699_s0 + $0x58] sm:$0xff] }
 0x181   : > { %7149 = vmatpush3.msra.mxu1 %v5096_v11  ;;  %7115 = vmatprep.subr.mxu0 %v5079_v12  ;;  %v4893_v9 = vld [vmem:[%s9699_s0 + $0x40] sm:$0xff]  ;;  %v5144_v11 = vld [vmem:[%s8971_s10 + $0x6f8] sm:$0xff] }
 0x182   : > { %7150 = vmatprep.subr.mxu1 %v5111_v13  ;;  %7116 = vmatpush3.msra.mxu0 %v5063_v14  ;;  %v5176_v12 = vld [vmem:[%s8971_s10 + $0x7f8] sm:$0xff]  ;;  %v4895_v13 = vld [vmem:[%s9699_s0 + $0x50] sm:$0xff] }
 0x183   : > { %7151 = vmatpush3.msra.mxu1 %v5095_v15  ;;  %7117 = vmatprep.subr.mxu0 %v5078_v16  ;;  %v5128_v14 = vld [vmem:[%s8971_s10 + $0x678] sm:$0xff]  ;;  %v5143_v16 = vld [vmem:[%s8971_s10 + $0x6f0] sm:$0xff] }
 0x184   : > { %7152 = vmatprep.subr.mxu1 %v5110_v17  ;;  %7118 = vmatpush3.msra.mxu0 %v5062_v18  ;;  %v5160_v15 = vld [vmem:[%s8971_s10 + $0x778] sm:$0xff]  ;;  %v5175_v17 = vld [vmem:[%s8971_s10 + $0x7f0] sm:$0xff] }
 0x185   : > { %7153 = vmatpush3.msra.mxu1 %v5094_v19  ;;  %7119 = vmatprep.subr.mxu0 %v5077_v20  ;;  %v5127_v18 = vld [vmem:[%s8971_s10 + $0x670] sm:$0xff]  ;;  %v5142_v20 = vld [vmem:[%s8971_s10 + $0x6e8] sm:$0xff] }
 0x186   : > { %7154 = vmatprep.subr.mxu1 %v5109_v21  ;;  %7120 = vmatpush3.msra.mxu0 %v5061_v22  ;;  %v5159_v19 = vld [vmem:[%s8971_s10 + $0x770] sm:$0xff]  ;;  %v5174_v21 = vld [vmem:[%s8971_s10 + $0x7e8] sm:$0xff] }
 0x187   : > { %7155 = vmatpush3.msra.mxu1 %v5093_v23  ;;  %7121 = vmatprep.subr.mxu0 %v5076_v24  ;;  %v5126_v22 = vld [vmem:[%s8971_s10 + $0x668] sm:$0xff]  ;;  %v5141_v24 = vld [vmem:[%s8971_s10 + $0x6e0] sm:$0xff] }
 0x188   : > { %7156 = vmatprep.subr.mxu1 %v5108_v25  ;;  %7122 = vmatpush3.msra.mxu0 %v5060_v26  ;;  %v5158_v23 = vld [vmem:[%s8971_s10 + $0x768] sm:$0xff]  ;;  %v5173_v25 = vld [vmem:[%s8971_s10 + $0x7e0] sm:$0xff] }
 0x189   : > { %7157 = vmatpush3.msra.mxu1 %v5092_v27  ;;  %7123 = vmatprep.subr.mxu0 %v5075_v28  ;;  %v5125_v26 = vld [vmem:[%s8971_s10 + $0x660] sm:$0xff]  ;;  %v5140_v28 = vld [vmem:[%s8971_s10 + $0x6d8] sm:$0xff] }
 0x18a   : > { %7158 = vmatprep.subr.mxu1 %v5107_v29  ;;  %7124 = vmatpush3.msra.mxu0 %v5059_v30  ;;  %v5157_v27 = vld [vmem:[%s8971_s10 + $0x760] sm:$0xff]  ;;  %v5172_v29 = vld [vmem:[%s8971_s10 + $0x7d8] sm:$0xff] }
 0x18b   : > { %7159 = vmatpush3.msra.mxu1 %v5091_v31  ;;  %7125 = vmatprep.subr.mxu0 %v5074_v32  ;;  %v5124_v30 = vld [vmem:[%s8971_s10 + $0x658] sm:$0xff]  ;;  %v5139_v32 = vld [vmem:[%s8971_s10 + $0x6d0] sm:$0xff] }
 0x18c   : > { %7160 = vmatprep.subr.mxu1 %v5106_v33  ;;  %7126 = vmatpush3.msra.mxu0 %v5058_v34  ;;  %v5156_v31 = vld [vmem:[%s8971_s10 + $0x758] sm:$0xff]  ;;  %v5171_v33 = vld [vmem:[%s8971_s10 + $0x7d0] sm:$0xff] }
 0x18d   : > { %7161 = vmatpush3.msra.mxu1 %v5090_v35  ;;  %7127 = vmatprep.subr.mxu0 %v5073_v36  ;;  %v5123_v34 = vld [vmem:[%s8971_s10 + $0x650] sm:$0xff]  ;;  %v5138_v36 = vld [vmem:[%s8971_s10 + $0x6c8] sm:$0xff] }
 0x18e   : > { %7162 = vmatprep.subr.mxu1 %v5105_v37  ;;  %7128 = vmatpush3.msra.mxu0 %v5057_v38  ;;  %v5155_v35 = vld [vmem:[%s8971_s10 + $0x750] sm:$0xff]  ;;  %v5170_v37 = vld [vmem:[%s8971_s10 + $0x7c8] sm:$0xff] }
 0x18f   : > { %7163 = vmatpush3.msra.mxu1 %v5089_v39  ;;  %7129 = vmatprep.subr.mxu0 %v5072_v40  ;;  %v5122_v38 = vld [vmem:[%s8971_s10 + $0x648] sm:$0xff]  ;;  %v5137_v40 = vld [vmem:[%s8971_s10 + $0x6c0] sm:$0xff] }
 0x190   : > { %7164 = vmatprep.subr.mxu1 %v5104_v41  ;;  %7130 = vmatpush3.msra.mxu0 %v5056_v42  ;;  %v5154_v39 = vld [vmem:[%s8971_s10 + $0x748] sm:$0xff]  ;;  %v5169_v41 = vld [vmem:[%s8971_s10 + $0x7c0] sm:$0xff] }
 0x191   : > { %7165 = vmatpush3.msra.mxu1 %v5088_v43  ;;  %7131 = vmatprep.subr.mxu0 %v5071_v44  ;;  %v5121_v42 = vld [vmem:[%s8971_s10 + $0x640] sm:$0xff]  ;;  %v5136_v44 = vld [vmem:[%s8971_s10 + $0x6b8] sm:$0xff] }
 0x192   : > { %7166 = vmatprep.subr.mxu1 %v5103_v45  ;;  %7132 = vmatpush3.msra.mxu0 %v5055_v46  ;;  %v5153_v43 = vld [vmem:[%s8971_s10 + $0x740] sm:$0xff]  ;;  %v5168_v45 = vld [vmem:[%s8971_s10 + $0x7b8] sm:$0xff] }
 0x193   : > { %7167 = vmatpush3.msra.mxu1 %v5087_v47  ;;  %7133 = vmatprep.subr.mxu0 %v5070_v48  ;;  %v5120_v46 = vld [vmem:[%s8971_s10 + $0x638] sm:$0xff]  ;;  %v5135_v48 = vld [vmem:[%s8971_s10 + $0x6b0] sm:$0xff] }
 0x194   : > { %7168 = vmatprep.subr.mxu1 %v5102_v49  ;;  %7134 = vmatpush3.msra.mxu0 %v5054_v50  ;;  %v5152_v47 = vld [vmem:[%s8971_s10 + $0x738] sm:$0xff]  ;;  %v5167_v49 = vld [vmem:[%s8971_s10 + $0x7b0] sm:$0xff] }
 0x195   : > { %7169 = vmatpush3.msra.mxu1 %v5086_v51  ;;  %7135 = vmatprep.subr.mxu0 %v5069_v52  ;;  %v5119_v50 = vld [vmem:[%s8971_s10 + $0x630] sm:$0xff]  ;;  %v5134_v52 = vld [vmem:[%s8971_s10 + $0x6a8] sm:$0xff] }
 0x196   : > { %7170 = vmatprep.subr.mxu1 %v5101_v53  ;;  %7136 = vmatpush3.msra.mxu0 %v5053_v54  ;;  %v5151_v51 = vld [vmem:[%s8971_s10 + $0x730] sm:$0xff]  ;;  %v5166_v53 = vld [vmem:[%s8971_s10 + $0x7a8] sm:$0xff] }
 0x197   : > { %7171 = vmatpush3.msra.mxu1 %v5085_v55  ;;  %7137 = vmatprep.subr.mxu0 %v5068_v56  ;;  %v5118_v54 = vld [vmem:[%s8971_s10 + $0x628] sm:$0xff]  ;;  %v5133_v56 = vld [vmem:[%s8971_s10 + $0x6a0] sm:$0xff] }
 0x198   : > { %7172 = vmatprep.subr.mxu1 %v5100_v57  ;;  %7138 = vmatpush3.msra.mxu0 %v5052_v58  ;;  %v5150_v55 = vld [vmem:[%s8971_s10 + $0x728] sm:$0xff]  ;;  %v5165_v57 = vld [vmem:[%s8971_s10 + $0x7a0] sm:$0xff] }
 0x199   : > { %7173 = vmatpush3.msra.mxu1 %v5084_v59  ;;  %7139 = vmatprep.subr.mxu0 %v5067_v60  ;;  %v5117_v58 = vld [vmem:[%s8971_s10 + $0x620] sm:$0xff]  ;;  %v5132_v60 = vld [vmem:[%s8971_s10 + $0x698] sm:$0xff] }
 0x19a   : > { %7174 = vmatprep.subr.mxu1 %v5099_v61  ;;  %7140 = vmatpush3.msra.mxu0 %v5051_v62  ;;  %v5149_v59 = vld [vmem:[%s8971_s10 + $0x720] sm:$0xff]  ;;  %v5164_v61 = vld [vmem:[%s8971_s10 + $0x798] sm:$0xff] }
 0x19b   : > { %7175 = vmatpush3.msra.mxu1 %v5083_v63  ;;  %7141 = vmatprep.subr.mxu0 %v5066_v0  ;;  %v5116_v62 = vld [vmem:[%s8971_s10 + $0x618] sm:$0xff]  ;;  %v5131_v0 = vld [vmem:[%s8971_s10 + $0x690] sm:$0xff] }
 0x19c   : > { %7176 = vmatprep.subr.mxu1 %v5098_v1  ;;  %7142 = vmatpush3.msra.mxu0 %v5050_v2  ;;  %v5148_v63 = vld [vmem:[%s8971_s10 + $0x718] sm:$0xff]  ;;  %v5163_v1 = vld [vmem:[%s8971_s10 + $0x790] sm:$0xff] }
 0x19d   : > { %7177 = vmatpush3.msra.mxu1 %v5082_v3  ;;  %7143 = vmatprep.subr.mxu0 %v5065_v4  ;;  %v5115_v2 = vld [vmem:[%s8971_s10 + $0x610] sm:$0xff]  ;;  %v5130_v4 = vld [vmem:[%s8971_s10 + $0x688] sm:$0xff] }
 0x19e   : > { %7178 = vmatprep.subr.mxu1 %v5097_v5  ;;  %7144 = vmatpush3.msra.mxu0 %v5049_v6  ;;  %v5147_v3 = vld [vmem:[%s8971_s10 + $0x710] sm:$0xff]  ;;  %v5162_v5 = vld [vmem:[%s8971_s10 + $0x788] sm:$0xff] }
 0x19f   : > { %5841 = vmatprep.mubr.f32.mxu0 %v4894_v7  ;;  %7179 = vmatpush3.msra.mxu1 %v5081_v8  ;;  %v5114_v6 = vld [vmem:[%s8971_s10 + $0x608] sm:$0xff]  ;;  %v5129_v8 = vld [vmem:[%s8971_s10 + $0x680] sm:$0xff] }
 0x1a0   : > { %5842 = vmatmul.mubr.f32.vlgmr.msra.gmra.mxu0 %v4893_v9  ;;  %5911 = vmatprep.mubr.f32.mxu1 %v4896_v10  ;;  %v5146_v7 = vld [vmem:[%s8971_s10 + $0x708] sm:$0xff]  ;;  %v5161_v9 = vld [vmem:[%s8971_s10 + $0x780] sm:$0xff] }
 0x1a1   : > { %7183 = vmatprep.subr.mxu0 %v5144_v11  ;;  %7218 = vmatprep.subr.mxu1 %v5176_v12  ;;  %v5113_v10 = vld [vmem:[%s8971_s10 + $0x600] sm:$0xff]  ;;  %v4898_v11 = vld [vmem:[%s9699_s0 + $0x68] sm:$0xff] }
 0x1a2   : > { %5912 = vmatmul.mubr.f32.vlgmr.msra.gmra.mxu1 %v4895_v13  ;;  %7184 = vmatpush3.msra.mxu0 %v5128_v14  ;;  %v5145_v12 = vld [vmem:[%s8971_s10 + $0x700] sm:$0xff]  ;;  %v4900_v14 = vld [vmem:[%s9699_s0 + $0x78] sm:$0xff] }
 0x1a3   : > { %7219 = vmatpush3.msra.mxu1 %v5160_v15  ;;  %7185 = vmatprep.subr.mxu0 %v5143_v16  ;;  %v4897_v13 = vld [vmem:[%s9699_s0 + $0x60] sm:$0xff]  ;;  %v5208_v15 = vld [vmem:[%s8971_s10 + $0x8f8] sm:$0xff] }
 0x1a4   : > { %7220 = vmatprep.subr.mxu1 %v5175_v17  ;;  %7186 = vmatpush3.msra.mxu0 %v5127_v18  ;;  %v5240_v16 = vld [vmem:[%s8971_s10 + $0x9f8] sm:$0xff]  ;;  %v4899_v17 = vld [vmem:[%s9699_s0 + $0x70] sm:$0xff] }
 0x1a5   : > { %7221 = vmatpush3.msra.mxu1 %v5159_v19  ;;  %7187 = vmatprep.subr.mxu0 %v5142_v20  ;;  %v5192_v18 = vld [vmem:[%s8971_s10 + $0x878] sm:$0xff]  ;;  %v5207_v20 = vld [vmem:[%s8971_s10 + $0x8f0] sm:$0xff] }
 0x1a6   : > { %7222 = vmatprep.subr.mxu1 %v5174_v21  ;;  %7188 = vmatpush3.msra.mxu0 %v5126_v22  ;;  %v5224_v19 = vld [vmem:[%s8971_s10 + $0x978] sm:$0xff]  ;;  %v5239_v21 = vld [vmem:[%s8971_s10 + $0x9f0] sm:$0xff] }
 0x1a7   : > { %7223 = vmatpush3.msra.mxu1 %v5158_v23  ;;  %7189 = vmatprep.subr.mxu0 %v5141_v24  ;;  %v5191_v22 = vld [vmem:[%s8971_s10 + $0x870] sm:$0xff]  ;;  %v5206_v24 = vld [vmem:[%s8971_s10 + $0x8e8] sm:$0xff] }
 0x1a8   : > { %7224 = vmatprep.subr.mxu1 %v5173_v25  ;;  %7190 = vmatpush3.msra.mxu0 %v5125_v26  ;;  %v5223_v23 = vld [vmem:[%s8971_s10 + $0x970] sm:$0xff]  ;;  %v5238_v25 = vld [vmem:[%s8971_s10 + $0x9e8] sm:$0xff] }
 0x1a9   : > { %7225 = vmatpush3.msra.mxu1 %v5157_v27  ;;  %7191 = vmatprep.subr.mxu0 %v5140_v28  ;;  %v5190_v26 = vld [vmem:[%s8971_s10 + $0x868] sm:$0xff]  ;;  %v5205_v28 = vld [vmem:[%s8971_s10 + $0x8e0] sm:$0xff] }
 0x1aa   : > { %7226 = vmatprep.subr.mxu1 %v5172_v29  ;;  %7192 = vmatpush3.msra.mxu0 %v5124_v30  ;;  %v5222_v27 = vld [vmem:[%s8971_s10 + $0x968] sm:$0xff]  ;;  %v5237_v29 = vld [vmem:[%s8971_s10 + $0x9e0] sm:$0xff] }
 0x1ab   : > { %7227 = vmatpush3.msra.mxu1 %v5156_v31  ;;  %7193 = vmatprep.subr.mxu0 %v5139_v32  ;;  %v5189_v30 = vld [vmem:[%s8971_s10 + $0x860] sm:$0xff]  ;;  %v5204_v32 = vld [vmem:[%s8971_s10 + $0x8d8] sm:$0xff] }
 0x1ac   : > { %7228 = vmatprep.subr.mxu1 %v5171_v33  ;;  %7194 = vmatpush3.msra.mxu0 %v5123_v34  ;;  %v5221_v31 = vld [vmem:[%s8971_s10 + $0x960] sm:$0xff]  ;;  %v5236_v33 = vld [vmem:[%s8971_s10 + $0x9d8] sm:$0xff] }
 0x1ad   : > { %7229 = vmatpush3.msra.mxu1 %v5155_v35  ;;  %7195 = vmatprep.subr.mxu0 %v5138_v36  ;;  %v5188_v34 = vld [vmem:[%s8971_s10 + $0x858] sm:$0xff]  ;;  %v5203_v36 = vld [vmem:[%s8971_s10 + $0x8d0] sm:$0xff] }
 0x1ae   : > { %7230 = vmatprep.subr.mxu1 %v5170_v37  ;;  %7196 = vmatpush3.msra.mxu0 %v5122_v38  ;;  %v5220_v35 = vld [vmem:[%s8971_s10 + $0x958] sm:$0xff]  ;;  %v5235_v37 = vld [vmem:[%s8971_s10 + $0x9d0] sm:$0xff] }
 0x1af   : > { %7231 = vmatpush3.msra.mxu1 %v5154_v39  ;;  %7197 = vmatprep.subr.mxu0 %v5137_v40  ;;  %v5187_v38 = vld [vmem:[%s8971_s10 + $0x850] sm:$0xff]  ;;  %v5202_v40 = vld [vmem:[%s8971_s10 + $0x8c8] sm:$0xff] }
 0x1b0   : > { %7232 = vmatprep.subr.mxu1 %v5169_v41  ;;  %7198 = vmatpush3.msra.mxu0 %v5121_v42  ;;  %v5219_v39 = vld [vmem:[%s8971_s10 + $0x950] sm:$0xff]  ;;  %v5234_v41 = vld [vmem:[%s8971_s10 + $0x9c8] sm:$0xff] }
 0x1b1   : > { %7233 = vmatpush3.msra.mxu1 %v5153_v43  ;;  %7199 = vmatprep.subr.mxu0 %v5136_v44  ;;  %v5186_v42 = vld [vmem:[%s8971_s10 + $0x848] sm:$0xff]  ;;  %v5201_v44 = vld [vmem:[%s8971_s10 + $0x8c0] sm:$0xff] }
 0x1b2   : > { %7234 = vmatprep.subr.mxu1 %v5168_v45  ;;  %7200 = vmatpush3.msra.mxu0 %v5120_v46  ;;  %v5218_v43 = vld [vmem:[%s8971_s10 + $0x948] sm:$0xff]  ;;  %v5233_v45 = vld [vmem:[%s8971_s10 + $0x9c0] sm:$0xff] }
 0x1b3   : > { %7235 = vmatpush3.msra.mxu1 %v5152_v47  ;;  %7201 = vmatprep.subr.mxu0 %v5135_v48  ;;  %v5185_v46 = vld [vmem:[%s8971_s10 + $0x840] sm:$0xff]  ;;  %v5200_v48 = vld [vmem:[%s8971_s10 + $0x8b8] sm:$0xff] }
 0x1b4   : > { %7236 = vmatprep.subr.mxu1 %v5167_v49  ;;  %7202 = vmatpush3.msra.mxu0 %v5119_v50  ;;  %v5217_v47 = vld [vmem:[%s8971_s10 + $0x940] sm:$0xff]  ;;  %v5232_v49 = vld [vmem:[%s8971_s10 + $0x9b8] sm:$0xff] }
 0x1b5   : > { %7237 = vmatpush3.msra.mxu1 %v5151_v51  ;;  %7203 = vmatprep.subr.mxu0 %v5134_v52  ;;  %v5184_v50 = vld [vmem:[%s8971_s10 + $0x838] sm:$0xff]  ;;  %v5199_v52 = vld [vmem:[%s8971_s10 + $0x8b0] sm:$0xff] }
 0x1b6   : > { %7238 = vmatprep.subr.mxu1 %v5166_v53  ;;  %7204 = vmatpush3.msra.mxu0 %v5118_v54  ;;  %v5216_v51 = vld [vmem:[%s8971_s10 + $0x938] sm:$0xff]  ;;  %v5231_v53 = vld [vmem:[%s8971_s10 + $0x9b0] sm:$0xff] }
 0x1b7   : > { %7239 = vmatpush3.msra.mxu1 %v5150_v55  ;;  %7205 = vmatprep.subr.mxu0 %v5133_v56  ;;  %v5183_v54 = vld [vmem:[%s8971_s10 + $0x830] sm:$0xff]  ;;  %v5198_v56 = vld [vmem:[%s8971_s10 + $0x8a8] sm:$0xff] }
 0x1b8   : > { %7240 = vmatprep.subr.mxu1 %v5165_v57  ;;  %7206 = vmatpush3.msra.mxu0 %v5117_v58  ;;  %v5215_v55 = vld [vmem:[%s8971_s10 + $0x930] sm:$0xff]  ;;  %v5230_v57 = vld [vmem:[%s8971_s10 + $0x9a8] sm:$0xff] }
 0x1b9   : > { %7241 = vmatpush3.msra.mxu1 %v5149_v59  ;;  %7207 = vmatprep.subr.mxu0 %v5132_v60  ;;  %v5182_v58 = vld [vmem:[%s8971_s10 + $0x828] sm:$0xff]  ;;  %v5197_v60 = vld [vmem:[%s8971_s10 + $0x8a0] sm:$0xff] }
 0x1ba   : > { %7242 = vmatprep.subr.mxu1 %v5164_v61  ;;  %7208 = vmatpush3.msra.mxu0 %v5116_v62  ;;  %v5214_v59 = vld [vmem:[%s8971_s10 + $0x928] sm:$0xff]  ;;  %v5229_v61 = vld [vmem:[%s8971_s10 + $0x9a0] sm:$0xff] }
 0x1bb   : > { %7243 = vmatpush3.msra.mxu1 %v5148_v63  ;;  %7209 = vmatprep.subr.mxu0 %v5131_v0  ;;  %v5181_v62 = vld [vmem:[%s8971_s10 + $0x820] sm:$0xff]  ;;  %v5196_v0 = vld [vmem:[%s8971_s10 + $0x898] sm:$0xff] }
 0x1bc   : > { %7244 = vmatprep.subr.mxu1 %v5163_v1  ;;  %7210 = vmatpush3.msra.mxu0 %v5115_v2  ;;  %v5213_v63 = vld [vmem:[%s8971_s10 + $0x920] sm:$0xff]  ;;  %v5228_v1 = vld [vmem:[%s8971_s10 + $0x998] sm:$0xff] }
 0x1bd   : > { %7245 = vmatpush3.msra.mxu1 %v5147_v3  ;;  %7211 = vmatprep.subr.mxu0 %v5130_v4  ;;  %v5180_v2 = vld [vmem:[%s8971_s10 + $0x818] sm:$0xff]  ;;  %v5195_v4 = vld [vmem:[%s8971_s10 + $0x890] sm:$0xff] }
 0x1be   : > { %7246 = vmatprep.subr.mxu1 %v5162_v5  ;;  %7212 = vmatpush3.msra.mxu0 %v5114_v6  ;;  %v5212_v3 = vld [vmem:[%s8971_s10 + $0x918] sm:$0xff]  ;;  %v5227_v5 = vld [vmem:[%s8971_s10 + $0x990] sm:$0xff] }
 0x1bf   : > { %7247 = vmatpush3.msra.mxu1 %v5146_v7  ;;  %7213 = vmatprep.subr.mxu0 %v5129_v8  ;;  %v5179_v6 = vld [vmem:[%s8971_s10 + $0x810] sm:$0xff]  ;;  %v5194_v8 = vld [vmem:[%s8971_s10 + $0x888] sm:$0xff] }
 0x1c0   : > { %7248 = vmatprep.subr.mxu1 %v5161_v9  ;;  %7214 = vmatpush3.msra.mxu0 %v5113_v10  ;;  %v5211_v7 = vld [vmem:[%s8971_s10 + $0x910] sm:$0xff]  ;;  %v5226_v9 = vld [vmem:[%s8971_s10 + $0x988] sm:$0xff] }
 0x1c1   : > { %5981 = vmatprep.mubr.f32.mxu0 %v4898_v11  ;;  %7249 = vmatpush3.msra.mxu1 %v5145_v12  ;;  %v5178_v10 = vld [vmem:[%s8971_s10 + $0x808] sm:$0xff]  ;;  %v5193_v12 = vld [vmem:[%s8971_s10 + $0x880] sm:$0xff] }
 0x1c2   : > { %5982 = vmatmul.mubr.f32.vlgmr.msra.gmra.mxu0 %v4897_v13  ;;  %6051 = vmatprep.mubr.f32.mxu1 %v4900_v14  ;;  %v5210_v11 = vld [vmem:[%s8971_s10 + $0x908] sm:$0xff]  ;;  %v5225_v13 = vld [vmem:[%s8971_s10 + $0x980] sm:$0xff] }
 0x1c3   : > { %7253 = vmatprep.subr.mxu0 %v5208_v15  ;;  %7288 = vmatprep.subr.mxu1 %v5240_v16  ;;  %v5177_v14 = vld [vmem:[%s8971_s10 + $0x800] sm:$0xff]  ;;  %v4902_v15 = vld [vmem:[%s9699_s0 + $0x88] sm:$0xff] }
 0x1c4   : > { %6052 = vmatmul.mubr.f32.vlgmr.msra.gmra.mxu1 %v4899_v17  ;;  %7254 = vmatpush3.msra.mxu0 %v5192_v18  ;;  %v5209_v16 = vld [vmem:[%s8971_s10 + $0x900] sm:$0xff]  ;;  %v4904_v18 = vld [vmem:[%s9699_s0 + $0x98] sm:$0xff] }
 0x1c5   : > { %7289 = vmatpush3.msra.mxu1 %v5224_v19  ;;  %7255 = vmatprep.subr.mxu0 %v5207_v20  ;;  %v4901_v17 = vld [vmem:[%s9699_s0 + $0x80] sm:$0xff]  ;;  %v5272_v19 = vld [vmem:[%s8971_s10 + $0xaf8] sm:$0xff] }
 0x1c6   : > { %7290 = vmatprep.subr.mxu1 %v5239_v21  ;;  %7256 = vmatpush3.msra.mxu0 %v5191_v22  ;;  %v5304_v20 = vld [vmem:[%s8971_s10 + $0xbf8] sm:$0xff]  ;;  %v4903_v21 = vld [vmem:[%s9699_s0 + $0x90] sm:$0xff] }
 0x1c7   : > { %7291 = vmatpush3.msra.mxu1 %v5223_v23  ;;  %7257 = vmatprep.subr.mxu0 %v5206_v24  ;;  %v5256_v22 = vld [vmem:[%s8971_s10 + $0xa78] sm:$0xff]  ;;  %v5271_v24 = vld [vmem:[%s8971_s10 + $0xaf0] sm:$0xff] }
 0x1c8   : > { %7292 = vmatprep.subr.mxu1 %v5238_v25  ;;  %7258 = vmatpush3.msra.mxu0 %v5190_v26  ;;  %v5288_v23 = vld [vmem:[%s8971_s10 + $0xb78] sm:$0xff]  ;;  %v5303_v25 = vld [vmem:[%s8971_s10 + $0xbf0] sm:$0xff] }
 0x1c9   : > { %7293 = vmatpush3.msra.mxu1 %v5222_v27  ;;  %7259 = vmatprep.subr.mxu0 %v5205_v28  ;;  %v5255_v26 = vld [vmem:[%s8971_s10 + $0xa70] sm:$0xff]  ;;  %v5270_v28 = vld [vmem:[%s8971_s10 + $0xae8] sm:$0xff] }
 0x1ca   : > { %7294 = vmatprep.subr.mxu1 %v5237_v29  ;;  %7260 = vmatpush3.msra.mxu0 %v5189_v30  ;;  %v5287_v27 = vld [vmem:[%s8971_s10 + $0xb70] sm:$0xff]  ;;  %v5302_v29 = vld [vmem:[%s8971_s10 + $0xbe8] sm:$0xff] }
 0x1cb   : > { %7295 = vmatpush3.msra.mxu1 %v5221_v31  ;;  %7261 = vmatprep.subr.mxu0 %v5204_v32  ;;  %v5254_v30 = vld [vmem:[%s8971_s10 + $0xa68] sm:$0xff]  ;;  %v5269_v32 = vld [vmem:[%s8971_s10 + $0xae0] sm:$0xff] }
 0x1cc   : > { %7296 = vmatprep.subr.mxu1 %v5236_v33  ;;  %7262 = vmatpush3.msra.mxu0 %v5188_v34  ;;  %v5286_v31 = vld [vmem:[%s8971_s10 + $0xb68] sm:$0xff]  ;;  %v5301_v33 = vld [vmem:[%s8971_s10 + $0xbe0] sm:$0xff] }
 0x1cd   : > { %7297 = vmatpush3.msra.mxu1 %v5220_v35  ;;  %7263 = vmatprep.subr.mxu0 %v5203_v36  ;;  %v5253_v34 = vld [vmem:[%s8971_s10 + $0xa60] sm:$0xff]  ;;  %v5268_v36 = vld [vmem:[%s8971_s10 + $0xad8] sm:$0xff] }
 0x1ce   : > { %7298 = vmatprep.subr.mxu1 %v5235_v37  ;;  %7264 = vmatpush3.msra.mxu0 %v5187_v38  ;;  %v5285_v35 = vld [vmem:[%s8971_s10 + $0xb60] sm:$0xff]  ;;  %v5300_v37 = vld [vmem:[%s8971_s10 + $0xbd8] sm:$0xff] }
 0x1cf   : > { %7299 = vmatpush3.msra.mxu1 %v5219_v39  ;;  %7265 = vmatprep.subr.mxu0 %v5202_v40  ;;  %v5252_v38 = vld [vmem:[%s8971_s10 + $0xa58] sm:$0xff]  ;;  %v5267_v40 = vld [vmem:[%s8971_s10 + $0xad0] sm:$0xff] }
 0x1d0   : > { %7300 = vmatprep.subr.mxu1 %v5234_v41  ;;  %7266 = vmatpush3.msra.mxu0 %v5186_v42  ;;  %v5284_v39 = vld [vmem:[%s8971_s10 + $0xb58] sm:$0xff]  ;;  %v5299_v41 = vld [vmem:[%s8971_s10 + $0xbd0] sm:$0xff] }
 0x1d1   : > { %7301 = vmatpush3.msra.mxu1 %v5218_v43  ;;  %7267 = vmatprep.subr.mxu0 %v5201_v44  ;;  %v5251_v42 = vld [vmem:[%s8971_s10 + $0xa50] sm:$0xff]  ;;  %v5266_v44 = vld [vmem:[%s8971_s10 + $0xac8] sm:$0xff] }
 0x1d2   : > { %7302 = vmatprep.subr.mxu1 %v5233_v45  ;;  %7268 = vmatpush3.msra.mxu0 %v5185_v46  ;;  %v5283_v43 = vld [vmem:[%s8971_s10 + $0xb50] sm:$0xff]  ;;  %v5298_v45 = vld [vmem:[%s8971_s10 + $0xbc8] sm:$0xff] }
 0x1d3   : > { %7303 = vmatpush3.msra.mxu1 %v5217_v47  ;;  %7269 = vmatprep.subr.mxu0 %v5200_v48  ;;  %v5250_v46 = vld [vmem:[%s8971_s10 + $0xa48] sm:$0xff]  ;;  %v5265_v48 = vld [vmem:[%s8971_s10 + $0xac0] sm:$0xff] }
 0x1d4   : > { %7304 = vmatprep.subr.mxu1 %v5232_v49  ;;  %7270 = vmatpush3.msra.mxu0 %v5184_v50  ;;  %v5282_v47 = vld [vmem:[%s8971_s10 + $0xb48] sm:$0xff]  ;;  %v5297_v49 = vld [vmem:[%s8971_s10 + $0xbc0] sm:$0xff] }
 0x1d5   : > { %7305 = vmatpush3.msra.mxu1 %v5216_v51  ;;  %7271 = vmatprep.subr.mxu0 %v5199_v52  ;;  %v5249_v50 = vld [vmem:[%s8971_s10 + $0xa40] sm:$0xff]  ;;  %v5264_v52 = vld [vmem:[%s8971_s10 + $0xab8] sm:$0xff] }
 0x1d6   : > { %7306 = vmatprep.subr.mxu1 %v5231_v53  ;;  %7272 = vmatpush3.msra.mxu0 %v5183_v54  ;;  %v5281_v51 = vld [vmem:[%s8971_s10 + $0xb40] sm:$0xff]  ;;  %v5296_v53 = vld [vmem:[%s8971_s10 + $0xbb8] sm:$0xff] }
 0x1d7   : > { %7307 = vmatpush3.msra.mxu1 %v5215_v55  ;;  %7273 = vmatprep.subr.mxu0 %v5198_v56  ;;  %v5248_v54 = vld [vmem:[%s8971_s10 + $0xa38] sm:$0xff]  ;;  %v5263_v56 = vld [vmem:[%s8971_s10 + $0xab0] sm:$0xff] }
 0x1d8   : > { %7308 = vmatprep.subr.mxu1 %v5230_v57  ;;  %7274 = vmatpush3.msra.mxu0 %v5182_v58  ;;  %v5280_v55 = vld [vmem:[%s8971_s10 + $0xb38] sm:$0xff]  ;;  %v5295_v57 = vld [vmem:[%s8971_s10 + $0xbb0] sm:$0xff] }
 0x1d9   : > { %7309 = vmatpush3.msra.mxu1 %v5214_v59  ;;  %7275 = vmatprep.subr.mxu0 %v5197_v60  ;;  %v5247_v58 = vld [vmem:[%s8971_s10 + $0xa30] sm:$0xff]  ;;  %v5262_v60 = vld [vmem:[%s8971_s10 + $0xaa8] sm:$0xff] }
 0x1da   : > { %7310 = vmatprep.subr.mxu1 %v5229_v61  ;;  %7276 = vmatpush3.msra.mxu0 %v5181_v62  ;;  %v5279_v59 = vld [vmem:[%s8971_s10 + $0xb30] sm:$0xff]  ;;  %v5294_v61 = vld [vmem:[%s8971_s10 + $0xba8] sm:$0xff] }
 0x1db   : > { %7311 = vmatpush3.msra.mxu1 %v5213_v63  ;;  %7277 = vmatprep.subr.mxu0 %v5196_v0  ;;  %v5246_v62 = vld [vmem:[%s8971_s10 + $0xa28] sm:$0xff]  ;;  %v5261_v0 = vld [vmem:[%s8971_s10 + $0xaa0] sm:$0xff] }
 0x1dc   : > { %7312 = vmatprep.subr.mxu1 %v5228_v1  ;;  %7278 = vmatpush3.msra.mxu0 %v5180_v2  ;;  %v5278_v63 = vld [vmem:[%s8971_s10 + $0xb28] sm:$0xff]  ;;  %v5293_v1 = vld [vmem:[%s8971_s10 + $0xba0] sm:$0xff] }
 0x1dd   : > { %7313 = vmatpush3.msra.mxu1 %v5212_v3  ;;  %7279 = vmatprep.subr.mxu0 %v5195_v4  ;;  %v5245_v2 = vld [vmem:[%s8971_s10 + $0xa20] sm:$0xff]  ;;  %v5260_v4 = vld [vmem:[%s8971_s10 + $0xa98] sm:$0xff] }
 0x1de   : > { %7314 = vmatprep.subr.mxu1 %v5227_v5  ;;  %7280 = vmatpush3.msra.mxu0 %v5179_v6  ;;  %v5277_v3 = vld [vmem:[%s8971_s10 + $0xb20] sm:$0xff]  ;;  %v5292_v5 = vld [vmem:[%s8971_s10 + $0xb98] sm:$0xff] }
 0x1df   : > { %7315 = vmatpush3.msra.mxu1 %v5211_v7  ;;  %7281 = vmatprep.subr.mxu0 %v5194_v8  ;;  %v5244_v6 = vld [vmem:[%s8971_s10 + $0xa18] sm:$0xff]  ;;  %v5259_v8 = vld [vmem:[%s8971_s10 + $0xa90] sm:$0xff] }
 0x1e0   : > { %7316 = vmatprep.subr.mxu1 %v5226_v9  ;;  %7282 = vmatpush3.msra.mxu0 %v5178_v10  ;;  %v5276_v7 = vld [vmem:[%s8971_s10 + $0xb18] sm:$0xff]  ;;  %v5291_v9 = vld [vmem:[%s8971_s10 + $0xb90] sm:$0xff] }
 0x1e1   : > { %7317 = vmatpush3.msra.mxu1 %v5210_v11  ;;  %7283 = vmatprep.subr.mxu0 %v5193_v12  ;;  %v5243_v10 = vld [vmem:[%s8971_s10 + $0xa10] sm:$0xff]  ;;  %v5258_v12 = vld [vmem:[%s8971_s10 + $0xa88] sm:$0xff] }
 0x1e2   : > { %7318 = vmatprep.subr.mxu1 %v5225_v13  ;;  %7284 = vmatpush3.msra.mxu0 %v5177_v14  ;;  %v5275_v11 = vld [vmem:[%s8971_s10 + $0xb10] sm:$0xff]  ;;  %v5290_v13 = vld [vmem:[%s8971_s10 + $0xb88] sm:$0xff] }
 0x1e3   : > { %6121 = vmatprep.mubr.f32.mxu0 %v4902_v15  ;;  %7319 = vmatpush3.msra.mxu1 %v5209_v16  ;;  %v5242_v14 = vld [vmem:[%s8971_s10 + $0xa08] sm:$0xff]  ;;  %v5257_v16 = vld [vmem:[%s8971_s10 + $0xa80] sm:$0xff] }
 0x1e4   : > { %6122 = vmatmul.mubr.f32.vlgmr.msra.gmra.mxu0 %v4901_v17  ;;  %6191 = vmatprep.mubr.f32.mxu1 %v4904_v18  ;;  %v5274_v15 = vld [vmem:[%s8971_s10 + $0xb08] sm:$0xff]  ;;  %v5289_v17 = vld [vmem:[%s8971_s10 + $0xb80] sm:$0xff] }
 0x1e5   : > { %7323 = vmatprep.subr.mxu0 %v5272_v19  ;;  %7358 = vmatprep.subr.mxu1 %v5304_v20  ;;  %v5241_v18 = vld [vmem:[%s8971_s10 + $0xa00] sm:$0xff]  ;;  %v4906_v19 = vld [vmem:[%s9699_s0 + $0xa8] sm:$0xff] }
 0x1e6   : > { %6192 = vmatmul.mubr.f32.vlgmr.msra.gmra.mxu1 %v4903_v21  ;;  %7324 = vmatpush3.msra.mxu0 %v5256_v22  ;;  %v5273_v20 = vld [vmem:[%s8971_s10 + $0xb00] sm:$0xff]  ;;  %v4908_v22 = vld [vmem:[%s9699_s0 + $0xb8] sm:$0xff] }
 0x1e7   : > { %7359 = vmatpush3.msra.mxu1 %v5288_v23  ;;  %7325 = vmatprep.subr.mxu0 %v5271_v24  ;;  %v4905_v21 = vld [vmem:[%s9699_s0 + $0xa0] sm:$0xff]  ;;  %v5336_v23 = vld [vmem:[%s8971_s10 + $0xcf8] sm:$0xff] }
 0x1e8   : > { %7360 = vmatprep.subr.mxu1 %v5303_v25  ;;  %7326 = vmatpush3.msra.mxu0 %v5255_v26  ;;  %v5368_v24 = vld [vmem:[%s8971_s10 + $0xdf8] sm:$0xff]  ;;  %v4907_v25 = vld [vmem:[%s9699_s0 + $0xb0] sm:$0xff] }
 0x1e9   : > { %7361 = vmatpush3.msra.mxu1 %v5287_v27  ;;  %7327 = vmatprep.subr.mxu0 %v5270_v28  ;;  %v5320_v26 = vld [vmem:[%s8971_s10 + $0xc78] sm:$0xff]  ;;  %v5335_v28 = vld [vmem:[%s8971_s10 + $0xcf0] sm:$0xff] }
 0x1ea   : > { %7362 = vmatprep.subr.mxu1 %v5302_v29  ;;  %7328 = vmatpush3.msra.mxu0 %v5254_v30  ;;  %v5352_v27 = vld [vmem:[%s8971_s10 + $0xd78] sm:$0xff]  ;;  %v5367_v29 = vld [vmem:[%s8971_s10 + $0xdf0] sm:$0xff] }
 0x1eb   : > { %7363 = vmatpush3.msra.mxu1 %v5286_v31  ;;  %7329 = vmatprep.subr.mxu0 %v5269_v32  ;;  %v5319_v30 = vld [vmem:[%s8971_s10 + $0xc70] sm:$0xff]  ;;  %v5334_v32 = vld [vmem:[%s8971_s10 + $0xce8] sm:$0xff] }
 0x1ec   : > { %7364 = vmatprep.subr.mxu1 %v5301_v33  ;;  %7330 = vmatpush3.msra.mxu0 %v5253_v34  ;;  %v5351_v31 = vld [vmem:[%s8971_s10 + $0xd70] sm:$0xff]  ;;  %v5366_v33 = vld [vmem:[%s8971_s10 + $0xde8] sm:$0xff] }
 0x1ed   : > { %7365 = vmatpush3.msra.mxu1 %v5285_v35  ;;  %7331 = vmatprep.subr.mxu0 %v5268_v36  ;;  %v5318_v34 = vld [vmem:[%s8971_s10 + $0xc68] sm:$0xff]  ;;  %v5333_v36 = vld [vmem:[%s8971_s10 + $0xce0] sm:$0xff] }
 0x1ee   : > { %7366 = vmatprep.subr.mxu1 %v5300_v37  ;;  %7332 = vmatpush3.msra.mxu0 %v5252_v38  ;;  %v5350_v35 = vld [vmem:[%s8971_s10 + $0xd68] sm:$0xff]  ;;  %v5365_v37 = vld [vmem:[%s8971_s10 + $0xde0] sm:$0xff] }
 0x1ef   : > { %7367 = vmatpush3.msra.mxu1 %v5284_v39  ;;  %7333 = vmatprep.subr.mxu0 %v5267_v40  ;;  %v5317_v38 = vld [vmem:[%s8971_s10 + $0xc60] sm:$0xff]  ;;  %v5332_v40 = vld [vmem:[%s8971_s10 + $0xcd8] sm:$0xff] }
 0x1f0   : > { %7368 = vmatprep.subr.mxu1 %v5299_v41  ;;  %7334 = vmatpush3.msra.mxu0 %v5251_v42  ;;  %v5349_v39 = vld [vmem:[%s8971_s10 + $0xd60] sm:$0xff]  ;;  %v5364_v41 = vld [vmem:[%s8971_s10 + $0xdd8] sm:$0xff] }
 0x1f1   : > { %7369 = vmatpush3.msra.mxu1 %v5283_v43  ;;  %7335 = vmatprep.subr.mxu0 %v5266_v44  ;;  %v5316_v42 = vld [vmem:[%s8971_s10 + $0xc58] sm:$0xff]  ;;  %v5331_v44 = vld [vmem:[%s8971_s10 + $0xcd0] sm:$0xff] }
 0x1f2   : > { %7370 = vmatprep.subr.mxu1 %v5298_v45  ;;  %7336 = vmatpush3.msra.mxu0 %v5250_v46  ;;  %v5348_v43 = vld [vmem:[%s8971_s10 + $0xd58] sm:$0xff]  ;;  %v5363_v45 = vld [vmem:[%s8971_s10 + $0xdd0] sm:$0xff] }
 0x1f3   : > { %7371 = vmatpush3.msra.mxu1 %v5282_v47  ;;  %7337 = vmatprep.subr.mxu0 %v5265_v48  ;;  %v5315_v46 = vld [vmem:[%s8971_s10 + $0xc50] sm:$0xff]  ;;  %v5330_v48 = vld [vmem:[%s8971_s10 + $0xcc8] sm:$0xff] }
 0x1f4   : > { %7372 = vmatprep.subr.mxu1 %v5297_v49  ;;  %7338 = vmatpush3.msra.mxu0 %v5249_v50  ;;  %v5347_v47 = vld [vmem:[%s8971_s10 + $0xd50] sm:$0xff]  ;;  %v5362_v49 = vld [vmem:[%s8971_s10 + $0xdc8] sm:$0xff] }
 0x1f5   : > { %7373 = vmatpush3.msra.mxu1 %v5281_v51  ;;  %7339 = vmatprep.subr.mxu0 %v5264_v52  ;;  %v5314_v50 = vld [vmem:[%s8971_s10 + $0xc48] sm:$0xff]  ;;  %v5329_v52 = vld [vmem:[%s8971_s10 + $0xcc0] sm:$0xff] }
 0x1f6   : > { %7374 = vmatprep.subr.mxu1 %v5296_v53  ;;  %7340 = vmatpush3.msra.mxu0 %v5248_v54  ;;  %v5346_v51 = vld [vmem:[%s8971_s10 + $0xd48] sm:$0xff]  ;;  %v5361_v53 = vld [vmem:[%s8971_s10 + $0xdc0] sm:$0xff] }
 0x1f7   : > { %7375 = vmatpush3.msra.mxu1 %v5280_v55  ;;  %7341 = vmatprep.subr.mxu0 %v5263_v56  ;;  %v5313_v54 = vld [vmem:[%s8971_s10 + $0xc40] sm:$0xff]  ;;  %v5328_v56 = vld [vmem:[%s8971_s10 + $0xcb8] sm:$0xff] }
 0x1f8   : > { %7376 = vmatprep.subr.mxu1 %v5295_v57  ;;  %7342 = vmatpush3.msra.mxu0 %v5247_v58  ;;  %v5345_v55 = vld [vmem:[%s8971_s10 + $0xd40] sm:$0xff]  ;;  %v5360_v57 = vld [vmem:[%s8971_s10 + $0xdb8] sm:$0xff] }
 0x1f9   : > { %7377 = vmatpush3.msra.mxu1 %v5279_v59  ;;  %7343 = vmatprep.subr.mxu0 %v5262_v60  ;;  %v5312_v58 = vld [vmem:[%s8971_s10 + $0xc38] sm:$0xff]  ;;  %v5327_v60 = vld [vmem:[%s8971_s10 + $0xcb0] sm:$0xff] }
 0x1fa   : > { %7378 = vmatprep.subr.mxu1 %v5294_v61  ;;  %7344 = vmatpush3.msra.mxu0 %v5246_v62  ;;  %v5344_v59 = vld [vmem:[%s8971_s10 + $0xd38] sm:$0xff]  ;;  %v5359_v61 = vld [vmem:[%s8971_s10 + $0xdb0] sm:$0xff] }
 0x1fb   : > { %7379 = vmatpush3.msra.mxu1 %v5278_v63  ;;  %7345 = vmatprep.subr.mxu0 %v5261_v0  ;;  %v5311_v62 = vld [vmem:[%s8971_s10 + $0xc30] sm:$0xff]  ;;  %v5326_v0 = vld [vmem:[%s8971_s10 + $0xca8] sm:$0xff] }
 0x1fc   : > { %7380 = vmatprep.subr.mxu1 %v5293_v1  ;;  %7346 = vmatpush3.msra.mxu0 %v5245_v2  ;;  %v5343_v63 = vld [vmem:[%s8971_s10 + $0xd30] sm:$0xff]  ;;  %v5358_v1 = vld [vmem:[%s8971_s10 + $0xda8] sm:$0xff] }
 0x1fd   : > { %7381 = vmatpush3.msra.mxu1 %v5277_v3  ;;  %7347 = vmatprep.subr.mxu0 %v5260_v4  ;;  %v5310_v2 = vld [vmem:[%s8971_s10 + $0xc28] sm:$0xff]  ;;  %v5325_v4 = vld [vmem:[%s8971_s10 + $0xca0] sm:$0xff] }
 0x1fe   : > { %7382 = vmatprep.subr.mxu1 %v5292_v5  ;;  %7348 = vmatpush3.msra.mxu0 %v5244_v6  ;;  %v5342_v3 = vld [vmem:[%s8971_s10 + $0xd28] sm:$0xff]  ;;  %v5357_v5 = vld [vmem:[%s8971_s10 + $0xda0] sm:$0xff] }
 0x1ff   : > { %7383 = vmatpush3.msra.mxu1 %v5276_v7  ;;  %7349 = vmatprep.subr.mxu0 %v5259_v8  ;;  %v5309_v6 = vld [vmem:[%s8971_s10 + $0xc20] sm:$0xff]  ;;  %v5324_v8 = vld [vmem:[%s8971_s10 + $0xc98] sm:$0xff] }
 0x200   : > { %7384 = vmatprep.subr.mxu1 %v5291_v9  ;;  %7350 = vmatpush3.msra.mxu0 %v5243_v10  ;;  %v5341_v7 = vld [vmem:[%s8971_s10 + $0xd20] sm:$0xff]  ;;  %v5356_v9 = vld [vmem:[%s8971_s10 + $0xd98] sm:$0xff] }
 0x201   : > { %7385 = vmatpush3.msra.mxu1 %v5275_v11  ;;  %7351 = vmatprep.subr.mxu0 %v5258_v12  ;;  %v5308_v10 = vld [vmem:[%s8971_s10 + $0xc18] sm:$0xff]  ;;  %v5323_v12 = vld [vmem:[%s8971_s10 + $0xc90] sm:$0xff] }
 0x202   : > { %7386 = vmatprep.subr.mxu1 %v5290_v13  ;;  %7352 = vmatpush3.msra.mxu0 %v5242_v14  ;;  %v5340_v11 = vld [vmem:[%s8971_s10 + $0xd18] sm:$0xff]  ;;  %v5355_v13 = vld [vmem:[%s8971_s10 + $0xd90] sm:$0xff] }
 0x203   : > { %7387 = vmatpush3.msra.mxu1 %v5274_v15  ;;  %7353 = vmatprep.subr.mxu0 %v5257_v16  ;;  %v5307_v14 = vld [vmem:[%s8971_s10 + $0xc10] sm:$0xff]  ;;  %v5322_v16 = vld [vmem:[%s8971_s10 + $0xc88] sm:$0xff] }
 0x204   : > { %7388 = vmatprep.subr.mxu1 %v5289_v17  ;;  %7354 = vmatpush3.msra.mxu0 %v5241_v18  ;;  %v5339_v15 = vld [vmem:[%s8971_s10 + $0xd10] sm:$0xff]  ;;  %v5354_v17 = vld [vmem:[%s8971_s10 + $0xd88] sm:$0xff] }
 0x205   : > { %6261 = vmatprep.mubr.f32.mxu0 %v4906_v19  ;;  %7389 = vmatpush3.msra.mxu1 %v5273_v20  ;;  %v5306_v18 = vld [vmem:[%s8971_s10 + $0xc08] sm:$0xff]  ;;  %v5321_v20 = vld [vmem:[%s8971_s10 + $0xc80] sm:$0xff] }
 0x206   : > { %6262 = vmatmul.mubr.f32.vlgmr.msra.gmra.mxu0 %v4905_v21  ;;  %6331 = vmatprep.mubr.f32.mxu1 %v4908_v22  ;;  %v5338_v19 = vld [vmem:[%s8971_s10 + $0xd08] sm:$0xff]  ;;  %v5353_v21 = vld [vmem:[%s8971_s10 + $0xd80] sm:$0xff] }
 0x207   : > { %7393 = vmatprep.subr.mxu0 %v5336_v23  ;;  %7428 = vmatprep.subr.mxu1 %v5368_v24  ;;  %v5305_v22 = vld [vmem:[%s8971_s10 + $0xc00] sm:$0xff]  ;;  %v4910_v23 = vld [vmem:[%s9699_s0 + $0xc8] sm:$0xff] }
 0x208   : > { %6332 = vmatmul.mubr.f32.vlgmr.msra.gmra.mxu1 %v4907_v25  ;;  %7394 = vmatpush3.msra.mxu0 %v5320_v26  ;;  %v5337_v24 = vld [vmem:[%s8971_s10 + $0xd00] sm:$0xff]  ;;  %v4912_v26 = vld [vmem:[%s9699_s0 + $0xd8] sm:$0xff] }
 0x209   : > { %7429 = vmatpush3.msra.mxu1 %v5352_v27  ;;  %7395 = vmatprep.subr.mxu0 %v5335_v28  ;;  %v4909_v25 = vld [vmem:[%s9699_s0 + $0xc0] sm:$0xff]  ;;  %v5400_v27 = vld [vmem:[%s8971_s10 + $0xef8] sm:$0xff] }
 0x20a   : > { %7430 = vmatprep.subr.mxu1 %v5367_v29  ;;  %7396 = vmatpush3.msra.mxu0 %v5319_v30  ;;  %v5432_v28 = vld [vmem:[%s8971_s10 + $0xff8] sm:$0xff]  ;;  %v4911_v29 = vld [vmem:[%s9699_s0 + $0xd0] sm:$0xff] }
 0x20b   : > { %7431 = vmatpush3.msra.mxu1 %v5351_v31  ;;  %7397 = vmatprep.subr.mxu0 %v5334_v32  ;;  %v5384_v30 = vld [vmem:[%s8971_s10 + $0xe78] sm:$0xff]  ;;  %v5399_v32 = vld [vmem:[%s8971_s10 + $0xef0] sm:$0xff] }
 0x20c   : > { %7432 = vmatprep.subr.mxu1 %v5366_v33  ;;  %7398 = vmatpush3.msra.mxu0 %v5318_v34  ;;  %v5416_v31 = vld [vmem:[%s8971_s10 + $0xf78] sm:$0xff]  ;;  %v5431_v33 = vld [vmem:[%s8971_s10 + $0xff0] sm:$0xff] }
 0x20d   : > { %7433 = vmatpush3.msra.mxu1 %v5350_v35  ;;  %7399 = vmatprep.subr.mxu0 %v5333_v36  ;;  %v5383_v34 = vld [vmem:[%s8971_s10 + $0xe70] sm:$0xff]  ;;  %v5398_v36 = vld [vmem:[%s8971_s10 + $0xee8] sm:$0xff] }
 0x20e   : > { %7434 = vmatprep.subr.mxu1 %v5365_v37  ;;  %7400 = vmatpush3.msra.mxu0 %v5317_v38  ;;  %v5415_v35 = vld [vmem:[%s8971_s10 + $0xf70] sm:$0xff]  ;;  %v5430_v37 = vld [vmem:[%s8971_s10 + $0xfe8] sm:$0xff] }
 0x20f   : > { %7435 = vmatpush3.msra.mxu1 %v5349_v39  ;;  %7401 = vmatprep.subr.mxu0 %v5332_v40  ;;  %v5382_v38 = vld [vmem:[%s8971_s10 + $0xe68] sm:$0xff]  ;;  %v5397_v40 = vld [vmem:[%s8971_s10 + $0xee0] sm:$0xff] }
 0x210   : > { %7436 = vmatprep.subr.mxu1 %v5364_v41  ;;  %7402 = vmatpush3.msra.mxu0 %v5316_v42  ;;  %v5414_v39 = vld [vmem:[%s8971_s10 + $0xf68] sm:$0xff]  ;;  %v5429_v41 = vld [vmem:[%s8971_s10 + $0xfe0] sm:$0xff] }
 0x211   : > { %7437 = vmatpush3.msra.mxu1 %v5348_v43  ;;  %7403 = vmatprep.subr.mxu0 %v5331_v44  ;;  %v5381_v42 = vld [vmem:[%s8971_s10 + $0xe60] sm:$0xff]  ;;  %v5396_v44 = vld [vmem:[%s8971_s10 + $0xed8] sm:$0xff] }
 0x212   : > { %7438 = vmatprep.subr.mxu1 %v5363_v45  ;;  %7404 = vmatpush3.msra.mxu0 %v5315_v46  ;;  %v5413_v43 = vld [vmem:[%s8971_s10 + $0xf60] sm:$0xff]  ;;  %v5428_v45 = vld [vmem:[%s8971_s10 + $0xfd8] sm:$0xff] }
 0x213   : > { %7439 = vmatpush3.msra.mxu1 %v5347_v47  ;;  %7405 = vmatprep.subr.mxu0 %v5330_v48  ;;  %v5380_v46 = vld [vmem:[%s8971_s10 + $0xe58] sm:$0xff]  ;;  %v5395_v48 = vld [vmem:[%s8971_s10 + $0xed0] sm:$0xff] }
 0x214   : > { %7440 = vmatprep.subr.mxu1 %v5362_v49  ;;  %7406 = vmatpush3.msra.mxu0 %v5314_v50  ;;  %v5412_v47 = vld [vmem:[%s8971_s10 + $0xf58] sm:$0xff]  ;;  %v5427_v49 = vld [vmem:[%s8971_s10 + $0xfd0] sm:$0xff] }
 0x215   : > { %7441 = vmatpush3.msra.mxu1 %v5346_v51  ;;  %7407 = vmatprep.subr.mxu0 %v5329_v52  ;;  %v5379_v50 = vld [vmem:[%s8971_s10 + $0xe50] sm:$0xff]  ;;  %v5394_v52 = vld [vmem:[%s8971_s10 + $0xec8] sm:$0xff] }
 0x216   : > { %7442 = vmatprep.subr.mxu1 %v5361_v53  ;;  %7408 = vmatpush3.msra.mxu0 %v5313_v54  ;;  %v5411_v51 = vld [vmem:[%s8971_s10 + $0xf50] sm:$0xff]  ;;  %v5426_v53 = vld [vmem:[%s8971_s10 + $0xfc8] sm:$0xff] }
 0x217   : > { %7443 = vmatpush3.msra.mxu1 %v5345_v55  ;;  %7409 = vmatprep.subr.mxu0 %v5328_v56  ;;  %v5378_v54 = vld [vmem:[%s8971_s10 + $0xe48] sm:$0xff]  ;;  %v5393_v56 = vld [vmem:[%s8971_s10 + $0xec0] sm:$0xff] }
 0x218   : > { %7444 = vmatprep.subr.mxu1 %v5360_v57  ;;  %7410 = vmatpush3.msra.mxu0 %v5312_v58  ;;  %v5410_v55 = vld [vmem:[%s8971_s10 + $0xf48] sm:$0xff]  ;;  %v5425_v57 = vld [vmem:[%s8971_s10 + $0xfc0] sm:$0xff] }
 0x219   : > { %7445 = vmatpush3.msra.mxu1 %v5344_v59  ;;  %7411 = vmatprep.subr.mxu0 %v5327_v60  ;;  %v5377_v58 = vld [vmem:[%s8971_s10 + $0xe40] sm:$0xff]  ;;  %v5392_v60 = vld [vmem:[%s8971_s10 + $0xeb8] sm:$0xff] }
 0x21a   : > { %7446 = vmatprep.subr.mxu1 %v5359_v61  ;;  %7412 = vmatpush3.msra.mxu0 %v5311_v62  ;;  %v5409_v59 = vld [vmem:[%s8971_s10 + $0xf40] sm:$0xff]  ;;  %v5424_v61 = vld [vmem:[%s8971_s10 + $0xfb8] sm:$0xff] }
 0x21b   : > { %7447 = vmatpush3.msra.mxu1 %v5343_v63  ;;  %7413 = vmatprep.subr.mxu0 %v5326_v0  ;;  %v5376_v62 = vld [vmem:[%s8971_s10 + $0xe38] sm:$0xff]  ;;  %v5391_v0 = vld [vmem:[%s8971_s10 + $0xeb0] sm:$0xff] }
 0x21c   : > { %7448 = vmatprep.subr.mxu1 %v5358_v1  ;;  %7414 = vmatpush3.msra.mxu0 %v5310_v2  ;;  %v5408_v63 = vld [vmem:[%s8971_s10 + $0xf38] sm:$0xff]  ;;  %v5423_v1 = vld [vmem:[%s8971_s10 + $0xfb0] sm:$0xff] }
 0x21d   : > { %7449 = vmatpush3.msra.mxu1 %v5342_v3  ;;  %7415 = vmatprep.subr.mxu0 %v5325_v4  ;;  %v5375_v2 = vld [vmem:[%s8971_s10 + $0xe30] sm:$0xff]  ;;  %v5390_v4 = vld [vmem:[%s8971_s10 + $0xea8] sm:$0xff] }
 0x21e   : > { %7450 = vmatprep.subr.mxu1 %v5357_v5  ;;  %7416 = vmatpush3.msra.mxu0 %v5309_v6  ;;  %v5407_v3 = vld [vmem:[%s8971_s10 + $0xf30] sm:$0xff]  ;;  %v5422_v5 = vld [vmem:[%s8971_s10 + $0xfa8] sm:$0xff] }
 0x21f   : > { %7451 = vmatpush3.msra.mxu1 %v5341_v7  ;;  %7417 = vmatprep.subr.mxu0 %v5324_v8  ;;  %v5374_v6 = vld [vmem:[%s8971_s10 + $0xe28] sm:$0xff]  ;;  %v5389_v8 = vld [vmem:[%s8971_s10 + $0xea0] sm:$0xff] }
 0x220   : > { %7452 = vmatprep.subr.mxu1 %v5356_v9  ;;  %7418 = vmatpush3.msra.mxu0 %v5308_v10  ;;  %v5406_v7 = vld [vmem:[%s8971_s10 + $0xf28] sm:$0xff]  ;;  %v5421_v9 = vld [vmem:[%s8971_s10 + $0xfa0] sm:$0xff] }
 0x221   : > { %7453 = vmatpush3.msra.mxu1 %v5340_v11  ;;  %7419 = vmatprep.subr.mxu0 %v5323_v12  ;;  %v5373_v10 = vld [vmem:[%s8971_s10 + $0xe20] sm:$0xff]  ;;  %v5388_v12 = vld [vmem:[%s8971_s10 + $0xe98] sm:$0xff] }
 0x222   : > { %7454 = vmatprep.subr.mxu1 %v5355_v13  ;;  %7420 = vmatpush3.msra.mxu0 %v5307_v14  ;;  %v5405_v11 = vld [vmem:[%s8971_s10 + $0xf20] sm:$0xff]  ;;  %v5420_v13 = vld [vmem:[%s8971_s10 + $0xf98] sm:$0xff] }
 0x223   : > { %7455 = vmatpush3.msra.mxu1 %v5339_v15  ;;  %7421 = vmatprep.subr.mxu0 %v5322_v16  ;;  %v5372_v14 = vld [vmem:[%s8971_s10 + $0xe18] sm:$0xff]  ;;  %v5387_v16 = vld [vmem:[%s8971_s10 + $0xe90] sm:$0xff] }
 0x224   : > { %7456 = vmatprep.subr.mxu1 %v5354_v17  ;;  %7422 = vmatpush3.msra.mxu0 %v5306_v18  ;;  %v5404_v15 = vld [vmem:[%s8971_s10 + $0xf18] sm:$0xff]  ;;  %v5419_v17 = vld [vmem:[%s8971_s10 + $0xf90] sm:$0xff] }
 0x225   : > { %7457 = vmatpush3.msra.mxu1 %v5338_v19  ;;  %7423 = vmatprep.subr.mxu0 %v5321_v20  ;;  %v5371_v18 = vld [vmem:[%s8971_s10 + $0xe10] sm:$0xff]  ;;  %v5386_v20 = vld [vmem:[%s8971_s10 + $0xe88] sm:$0xff] }
 0x226   : > { %7458 = vmatprep.subr.mxu1 %v5353_v21  ;;  %7424 = vmatpush3.msra.mxu0 %v5305_v22  ;;  %v5403_v19 = vld [vmem:[%s8971_s10 + $0xf10] sm:$0xff]  ;;  %v5418_v21 = vld [vmem:[%s8971_s10 + $0xf88] sm:$0xff] }
 0x227   : > { %6401 = vmatprep.mubr.f32.mxu0 %v4910_v23  ;;  %7459 = vmatpush3.msra.mxu1 %v5337_v24  ;;  %v5370_v22 = vld [vmem:[%s8971_s10 + $0xe08] sm:$0xff]  ;;  %v5385_v24 = vld [vmem:[%s8971_s10 + $0xe80] sm:$0xff] }
 0x228   : > { %6402 = vmatmul.mubr.f32.vlgmr.msra.gmra.mxu0 %v4909_v25  ;;  %6471 = vmatprep.mubr.f32.mxu1 %v4912_v26  ;;  %v5402_v23 = vld [vmem:[%s8971_s10 + $0xf08] sm:$0xff]  ;;  %v5417_v25 = vld [vmem:[%s8971_s10 + $0xf80] sm:$0xff] }
 0x229   : > { %7463 = vmatprep.subr.mxu0 %v5400_v27  ;;  %7498 = vmatprep.subr.mxu1 %v5432_v28  ;;  %v5369_v26 = vld [vmem:[%s8971_s10 + $0xe00] sm:$0xff]  ;;  %v4914_v27 = vld [vmem:[%s9699_s0 + $0xe8] sm:$0xff] }
 0x22a   : > { %6472 = vmatmul.mubr.f32.vlgmr.msra.gmra.mxu1 %v4911_v29  ;;  %7464 = vmatpush3.msra.mxu0 %v5384_v30  ;;  %v5401_v28 = vld [vmem:[%s8971_s10 + $0xf00] sm:$0xff]  ;;  %v4916_v30 = vld [vmem:[%s9699_s0 + $0xf8] sm:$0xff] }
 0x22b   : > { %7499 = vmatpush3.msra.mxu1 %v5416_v31  ;;  %7465 = vmatprep.subr.mxu0 %v5399_v32  ;;  %v4913_v29 = vld [vmem:[%s9699_s0 + $0xe0] sm:$0xff]  ;;  %v5464_v31 = vld [vmem:[%s8971_s10 + $0x10f8] sm:$0xff] }
 0x22c   : > { %7500 = vmatprep.subr.mxu1 %v5431_v33  ;;  %7466 = vmatpush3.msra.mxu0 %v5383_v34  ;;  %v5496_v32 = vld [vmem:[%s8971_s10 + $0x11f8] sm:$0xff]  ;;  %v4915_v33 = vld [vmem:[%s9699_s0 + $0xf0] sm:$0xff] }
 0x22d   : > { %7501 = vmatpush3.msra.mxu1 %v5415_v35  ;;  %7467 = vmatprep.subr.mxu0 %v5398_v36  ;;  %v5448_v34 = vld [vmem:[%s8971_s10 + $0x1078] sm:$0xff]  ;;  %v5463_v36 = vld [vmem:[%s8971_s10 + $0x10f0] sm:$0xff] }
 0x22e   : > { %7502 = vmatprep.subr.mxu1 %v5430_v37  ;;  %7468 = vmatpush3.msra.mxu0 %v5382_v38  ;;  %v5480_v35 = vld [vmem:[%s8971_s10 + $0x1178] sm:$0xff]  ;;  %v5495_v37 = vld [vmem:[%s8971_s10 + $0x11f0] sm:$0xff] }
 0x22f   : > { %7503 = vmatpush3.msra.mxu1 %v5414_v39  ;;  %7469 = vmatprep.subr.mxu0 %v5397_v40  ;;  %v5447_v38 = vld [vmem:[%s8971_s10 + $0x1070] sm:$0xff]  ;;  %v5462_v40 = vld [vmem:[%s8971_s10 + $0x10e8] sm:$0xff] }
 0x230   : > { %7504 = vmatprep.subr.mxu1 %v5429_v41  ;;  %7470 = vmatpush3.msra.mxu0 %v5381_v42  ;;  %v5479_v39 = vld [vmem:[%s8971_s10 + $0x1170] sm:$0xff]  ;;  %v5494_v41 = vld [vmem:[%s8971_s10 + $0x11e8] sm:$0xff] }
 0x231   : > { %7505 = vmatpush3.msra.mxu1 %v5413_v43  ;;  %7471 = vmatprep.subr.mxu0 %v5396_v44  ;;  %v5446_v42 = vld [vmem:[%s8971_s10 + $0x1068] sm:$0xff]  ;;  %v5461_v44 = vld [vmem:[%s8971_s10 + $0x10e0] sm:$0xff] }
 0x232   : > { %7506 = vmatprep.subr.mxu1 %v5428_v45  ;;  %7472 = vmatpush3.msra.mxu0 %v5380_v46  ;;  %v5478_v43 = vld [vmem:[%s8971_s10 + $0x1168] sm:$0xff]  ;;  %v5493_v45 = vld [vmem:[%s8971_s10 + $0x11e0] sm:$0xff] }
 0x233   : > { %7507 = vmatpush3.msra.mxu1 %v5412_v47  ;;  %7473 = vmatprep.subr.mxu0 %v5395_v48  ;;  %v5445_v46 = vld [vmem:[%s8971_s10 + $0x1060] sm:$0xff]  ;;  %v5460_v48 = vld [vmem:[%s8971_s10 + $0x10d8] sm:$0xff] }
 0x234   : > { %7508 = vmatprep.subr.mxu1 %v5427_v49  ;;  %7474 = vmatpush3.msra.mxu0 %v5379_v50  ;;  %v5477_v47 = vld [vmem:[%s8971_s10 + $0x1160] sm:$0xff]  ;;  %v5492_v49 = vld [vmem:[%s8971_s10 + $0x11d8] sm:$0xff] }
 0x235   : > { %7509 = vmatpush3.msra.mxu1 %v5411_v51  ;;  %7475 = vmatprep.subr.mxu0 %v5394_v52  ;;  %v5444_v50 = vld [vmem:[%s8971_s10 + $0x1058] sm:$0xff]  ;;  %v5459_v52 = vld [vmem:[%s8971_s10 + $0x10d0] sm:$0xff] }
 0x236   : > { %7510 = vmatprep.subr.mxu1 %v5426_v53  ;;  %7476 = vmatpush3.msra.mxu0 %v5378_v54  ;;  %v5476_v51 = vld [vmem:[%s8971_s10 + $0x1158] sm:$0xff]  ;;  %v5491_v53 = vld [vmem:[%s8971_s10 + $0x11d0] sm:$0xff] }
 0x237   : > { %7511 = vmatpush3.msra.mxu1 %v5410_v55  ;;  %7477 = vmatprep.subr.mxu0 %v5393_v56  ;;  %v5443_v54 = vld [vmem:[%s8971_s10 + $0x1050] sm:$0xff]  ;;  %v5458_v56 = vld [vmem:[%s8971_s10 + $0x10c8] sm:$0xff] }
 0x238   : > { %7512 = vmatprep.subr.mxu1 %v5425_v57  ;;  %7478 = vmatpush3.msra.mxu0 %v5377_v58  ;;  %v5475_v55 = vld [vmem:[%s8971_s10 + $0x1150] sm:$0xff]  ;;  %v5490_v57 = vld [vmem:[%s8971_s10 + $0x11c8] sm:$0xff] }
 0x239   : > { %7513 = vmatpush3.msra.mxu1 %v5409_v59  ;;  %7479 = vmatprep.subr.mxu0 %v5392_v60  ;;  %v5442_v58 = vld [vmem:[%s8971_s10 + $0x1048] sm:$0xff]  ;;  %v5457_v60 = vld [vmem:[%s8971_s10 + $0x10c0] sm:$0xff] }
 0x23a   : > { %7514 = vmatprep.subr.mxu1 %v5424_v61  ;;  %7480 = vmatpush3.msra.mxu0 %v5376_v62  ;;  %v5474_v59 = vld [vmem:[%s8971_s10 + $0x1148] sm:$0xff]  ;;  %v5489_v61 = vld [vmem:[%s8971_s10 + $0x11c0] sm:$0xff] }
 0x23b   : > { %7515 = vmatpush3.msra.mxu1 %v5408_v63  ;;  %7481 = vmatprep.subr.mxu0 %v5391_v0  ;;  %v5441_v62 = vld [vmem:[%s8971_s10 + $0x1040] sm:$0xff]  ;;  %v5456_v0 = vld [vmem:[%s8971_s10 + $0x10b8] sm:$0xff] }
 0x23c   : > { %7516 = vmatprep.subr.mxu1 %v5423_v1  ;;  %7482 = vmatpush3.msra.mxu0 %v5375_v2  ;;  %v5473_v63 = vld [vmem:[%s8971_s10 + $0x1140] sm:$0xff]  ;;  %v5488_v1 = vld [vmem:[%s8971_s10 + $0x11b8] sm:$0xff] }
 0x23d   : > { %7517 = vmatpush3.msra.mxu1 %v5407_v3  ;;  %7483 = vmatprep.subr.mxu0 %v5390_v4  ;;  %v5440_v2 = vld [vmem:[%s8971_s10 + $0x1038] sm:$0xff]  ;;  %v5455_v4 = vld [vmem:[%s8971_s10 + $0x10b0] sm:$0xff] }
 0x23e   : > { %7518 = vmatprep.subr.mxu1 %v5422_v5  ;;  %7484 = vmatpush3.msra.mxu0 %v5374_v6  ;;  %v5472_v3 = vld [vmem:[%s8971_s10 + $0x1138] sm:$0xff]  ;;  %v5487_v5 = vld [vmem:[%s8971_s10 + $0x11b0] sm:$0xff] }
 0x23f   : > { %7519 = vmatpush3.msra.mxu1 %v5406_v7  ;;  %7485 = vmatprep.subr.mxu0 %v5389_v8  ;;  %v5439_v6 = vld [vmem:[%s8971_s10 + $0x1030] sm:$0xff]  ;;  %v5454_v8 = vld [vmem:[%s8971_s10 + $0x10a8] sm:$0xff] }
 0x240   : > { %7520 = vmatprep.subr.mxu1 %v5421_v9  ;;  %7486 = vmatpush3.msra.mxu0 %v5373_v10  ;;  %v5471_v7 = vld [vmem:[%s8971_s10 + $0x1130] sm:$0xff]  ;;  %v5486_v9 = vld [vmem:[%s8971_s10 + $0x11a8] sm:$0xff] }
 0x241   : > { %7521 = vmatpush3.msra.mxu1 %v5405_v11  ;;  %7487 = vmatprep.subr.mxu0 %v5388_v12  ;;  %v5438_v10 = vld [vmem:[%s8971_s10 + $0x1028] sm:$0xff]  ;;  %v5453_v12 = vld [vmem:[%s8971_s10 + $0x10a0] sm:$0xff] }
 0x242   : > { %7522 = vmatprep.subr.mxu1 %v5420_v13  ;;  %7488 = vmatpush3.msra.mxu0 %v5372_v14  ;;  %v5470_v11 = vld [vmem:[%s8971_s10 + $0x1128] sm:$0xff]  ;;  %v5485_v13 = vld [vmem:[%s8971_s10 + $0x11a0] sm:$0xff] }
 0x243   : > { %7523 = vmatpush3.msra.mxu1 %v5404_v15  ;;  %7489 = vmatprep.subr.mxu0 %v5387_v16  ;;  %v5437_v14 = vld [vmem:[%s8971_s10 + $0x1020] sm:$0xff]  ;;  %v5452_v16 = vld [vmem:[%s8971_s10 + $0x1098] sm:$0xff] }
 0x244   : > { %7524 = vmatprep.subr.mxu1 %v5419_v17  ;;  %7490 = vmatpush3.msra.mxu0 %v5371_v18  ;;  %v5469_v15 = vld [vmem:[%s8971_s10 + $0x1120] sm:$0xff]  ;;  %v5484_v17 = vld [vmem:[%s8971_s10 + $0x1198] sm:$0xff] }
 0x245   : > { %7525 = vmatpush3.msra.mxu1 %v5403_v19  ;;  %7491 = vmatprep.subr.mxu0 %v5386_v20  ;;  %v5436_v18 = vld [vmem:[%s8971_s10 + $0x1018] sm:$0xff]  ;;  %v5451_v20 = vld [vmem:[%s8971_s10 + $0x1090] sm:$0xff] }
 0x246   : > { %7526 = vmatprep.subr.mxu1 %v5418_v21  ;;  %7492 = vmatpush3.msra.mxu0 %v5370_v22  ;;  %v5468_v19 = vld [vmem:[%s8971_s10 + $0x1118] sm:$0xff]  ;;  %v5483_v21 = vld [vmem:[%s8971_s10 + $0x1190] sm:$0xff] }
 0x247   : > { %7527 = vmatpush3.msra.mxu1 %v5402_v23  ;;  %7493 = vmatprep.subr.mxu0 %v5385_v24  ;;  %v5435_v22 = vld [vmem:[%s8971_s10 + $0x1010] sm:$0xff]  ;;  %v5450_v24 = vld [vmem:[%s8971_s10 + $0x1088] sm:$0xff] }
 0x248   : > { %7528 = vmatprep.subr.mxu1 %v5417_v25  ;;  %7494 = vmatpush3.msra.mxu0 %v5369_v26  ;;  %v5467_v23 = vld [vmem:[%s8971_s10 + $0x1110] sm:$0xff]  ;;  %v5482_v25 = vld [vmem:[%s8971_s10 + $0x1188] sm:$0xff] }
 0x249   : > { %6541 = vmatprep.mubr.f32.mxu0 %v4914_v27  ;;  %7529 = vmatpush3.msra.mxu1 %v5401_v28  ;;  %v5434_v26 = vld [vmem:[%s8971_s10 + $0x1008] sm:$0xff]  ;;  %v5449_v28 = vld [vmem:[%s8971_s10 + $0x1080] sm:$0xff] }
 0x24a   : > { %6542 = vmatmul.mubr.f32.vlgmr.msra.gmra.mxu0 %v4913_v29  ;;  %6611 = vmatprep.mubr.f32.mxu1 %v4916_v30  ;;  %v5466_v27 = vld [vmem:[%s8971_s10 + $0x1108] sm:$0xff]  ;;  %v5481_v29 = vld [vmem:[%s8971_s10 + $0x1180] sm:$0xff] }
 0x24b   : > { %7533 = vmatprep.subr.mxu0 %v5464_v31  ;;  %7568 = vmatprep.subr.mxu1 %v5496_v32  ;;  %v5433_v30 = vld [vmem:[%s8971_s10 + $0x1000] sm:$0xff]  ;;  %v4918_v31 = vld [vmem:[%s9699_s0 + $0x108] sm:$0xff] }
 0x24c   : > { %6612 = vmatmul.mubr.f32.vlgmr.msra.gmra.mxu1 %v4915_v33  ;;  %7534 = vmatpush3.msra.mxu0 %v5448_v34  ;;  %v5465_v32 = vld [vmem:[%s8971_s10 + $0x1100] sm:$0xff]  ;;  %v4920_v33 = vld [vmem:[%s9699_s0 + $0x118] sm:$0xff]  ;;  %s6965_s10 = sshll.u32 %s7786_s18, 4 }
 0x24d   : > { %7569 = vmatpush3.msra.mxu1 %v5480_v35  ;;  %7535 = vmatprep.subr.mxu0 %v5463_v36  ;;  %v4917_v34 = vld [vmem:[%s9699_s0 + $0x100] sm:$0xff]  ;;  %v4919_v35 = vld [vmem:[%s9699_s0 + $0x110] sm:$0xff]  ;;  %v7742_v36 = vmov 0.0   ;;  %p4880_p8 = scmp.lt.s32.totalorder %s6965_s10, 31 }
 0x24e   : > { %7570 = vmatprep.subr.mxu1 %v5495_v37  ;;  %7536 = vmatpush3.msra.mxu0 %v5447_v38 }
 0x24f   : > { %7571 = vmatpush3.msra.mxu1 %v5479_v39  ;;  %7537 = vmatprep.subr.mxu0 %v5462_v40  ;;  %s9708_s10 = smov (!%p4880_p8, %s6965_s10), 31 }
 0x250   : > { %7572 = vmatprep.subr.mxu1 %v5494_v41  ;;  %7538 = vmatpush3.msra.mxu0 %v5446_v42  ;;  %s6966_s17 = sshll.u32 %s9708_s10, 3 }
 0x251   : > { %7573 = vmatpush3.msra.mxu1 %v5478_v43  ;;  %7539 = vmatprep.subr.mxu0 %v5461_v44  ;;  %s9655_s23 = scalar_lea.vmem %s9701_s2, %s6966_s17 }
 0x252   : > { %7574 = vmatprep.subr.mxu1 %v5493_v45  ;;  %7540 = vmatpush3.msra.mxu0 %v5445_v46  ;;  %v6794_v37 = vld [vmem:[%s9655_s23 + $0x78] sm:$0xff]  ;;  %v6793_v38 = vld [vmem:[%s9655_s23 + $0x70] sm:$0xff]  ;;  %v6792_v39 = vld [vmem:[%s9655_s23 + $0x68] sm:$0xff] }
 0x253   : > { %7575 = vmatpush3.msra.mxu1 %v5477_v47  ;;  %7541 = vmatprep.subr.mxu0 %v5460_v48  ;;  %v6791_v40 = vld [vmem:[%s9655_s23 + $0x60] sm:$0xff]  ;;  %v6790_v41 = vld [vmem:[%s9655_s23 + $0x58] sm:$0xff]  ;;  %v6789_v42 = vld [vmem:[%s9655_s23 + $0x50] sm:$0xff] }
 0x254   : > { %7576 = vmatprep.subr.mxu1 %v5492_v49  ;;  %7542 = vmatpush3.msra.mxu0 %v5444_v50  ;;  %v6788_v43 = vld [vmem:[%s9655_s23 + $0x48] sm:$0xff]  ;;  %v6787_v44 = vld [vmem:[%s9655_s23 + $0x40] sm:$0xff]  ;;  %v6786_v45 = vld [vmem:[%s9655_s23 + $0x38] sm:$0xff] }
 0x255   : > { %7577 = vmatpush3.msra.mxu1 %v5476_v51  ;;  %7543 = vmatprep.subr.mxu0 %v5459_v52  ;;  %v6785_v46 = vld [vmem:[%s9655_s23 + $0x30] sm:$0xff]  ;;  %v6784_v47 = vld [vmem:[%s9655_s23 + $0x28] sm:$0xff]  ;;  %v6783_v48 = vld [vmem:[%s9655_s23 + $0x20] sm:$0xff] }
 0x256   : > { %7578 = vmatprep.subr.mxu1 %v5491_v53  ;;  %7544 = vmatpush3.msra.mxu0 %v5443_v54  ;;  %v6782_v49 = vld [vmem:[%s9655_s23 + $0x18] sm:$0xff]  ;;  %v6781_v50 = vld [vmem:[%s9655_s23 + $0x10] sm:$0xff]  ;;  %v6780_v51 = vld [vmem:[%s9655_s23 + $0x8] sm:$0xff]  ;;  %v7005_v53 = vpop.f32.mrf.mxu0  ;;  %v7040_v54 = vpop.f32.mrf.mxu1 }
 0x257   : > { %7579 = vmatpush3.msra.mxu1 %v5475_v55  ;;  %7545 = vmatprep.subr.mxu0 %v5458_v56  ;;  %v6779_v52 = vld [vmem:[%s9655_s23] sm:$0xff] }
 0x258   : > { %7580 = vmatprep.subr.mxu1 %v5490_v57  ;;  %7546 = vmatpush3.msra.mxu0 %v5442_v58  ;;  %v7006_v55 = vpop.f32.mrf.mxu0  ;;  %v7041_v57 = vpop.f32.mrf.mxu1 }
 0x259   : > { %7581 = vmatpush3.msra.mxu1 %v5474_v59  ;;  %7547 = vmatprep.subr.mxu0 %v5457_v60  ;;  %v7007_v60 = vadd.f32 %v7006_v55, %v7005_v53 }
 0x25a   : > { %7582 = vmatprep.subr.mxu1 %v5489_v61  ;;  %7548 = vmatpush3.msra.mxu0 %v5441_v62  ;;  %v7075_v56 = vpop.f32.mrf.mxu0  ;;  %v7110_v58 = vpop.f32.mrf.mxu1  ;;  %v7042_v61 = vadd.f32 %v7041_v57, %v7040_v54 }
 0x25b   : > { %7583 = vmatpush3.msra.mxu1 %v5473_v63  ;;  %7549 = vmatprep.subr.mxu0 %v5456_v0 }
 0x25c   : > { %7584 = vmatprep.subr.mxu1 %v5488_v1  ;;  %7550 = vmatpush3.msra.mxu0 %v5440_v2  ;;  %v7076_v59 = vpop.f32.mrf.mxu0  ;;  %v7111_v0 = vpop.f32.mrf.mxu1  ;;  %v5634_v1 = vadd.f32 %v7042_v61, %v7007_v60 }
 0x25d   : > { %7585 = vmatpush3.msra.mxu1 %v5472_v3  ;;  %7551 = vmatprep.subr.mxu0 %v5455_v4  ;;  %v7077_v63 = vadd.f32 %v7076_v59, %v7075_v56 }
 0x25e   : > { %7586 = vmatprep.subr.mxu1 %v5487_v5  ;;  %7552 = vmatpush3.msra.mxu0 %v5439_v6  ;;  %v7112_v5 = vadd.f32 %v7111_v0, %v7110_v58 }
 0x25f   : > { %7587 = vmatpush3.msra.mxu1 %v5471_v7  ;;  %7553 = vmatprep.subr.mxu0 %v5454_v8  ;;  %v5704_v4 = vadd.f32 %v7077_v63, %v5634_v1 }
 0x260   : > { %7588 = vmatprep.subr.mxu1 %v5486_v9  ;;  %7554 = vmatpush3.msra.mxu0 %v5438_v10  ;;  %v7145_v62 = vpop.f32.mrf.mxu0 }
 0x261   : > { %7589 = vmatpush3.msra.mxu1 %v5470_v11  ;;  %7555 = vmatprep.subr.mxu0 %v5453_v12  ;;  %v5774_v9 = vadd.f32 %v7112_v5, %v5704_v4 }
 0x262   : > { %7590 = vmatprep.subr.mxu1 %v5485_v13  ;;  %7556 = vmatpush3.msra.mxu0 %v5437_v14  ;;  %v7180_v2 = vpop.f32.mrf.mxu1  ;;  %v7146_v3 = vpop.f32.mrf.mxu0 }
 0x263   : > { %7591 = vmatpush3.msra.mxu1 %v5469_v15  ;;  %7557 = vmatprep.subr.mxu0 %v5452_v16  ;;  %v7147_v7 = vadd.f32 %v7146_v3, %v7145_v62 }
 0x264   : > { %7592 = vmatprep.subr.mxu1 %v5484_v17  ;;  %7558 = vmatpush3.msra.mxu0 %v5436_v18  ;;  %v7181_v8 = vpop.f32.mrf.mxu1 }
 0x265   : > { %7593 = vmatpush3.msra.mxu1 %v5468_v19  ;;  %7559 = vmatprep.subr.mxu0 %v5451_v20  ;;  %v5844_v12 = vadd.f32 %v7147_v7, %v5774_v9  ;;  %v7182_v13 = vadd.f32 %v7181_v8, %v7180_v2 }
 0x266   : > { %7594 = vmatprep.subr.mxu1 %v5483_v21  ;;  %7560 = vmatpush3.msra.mxu0 %v5435_v22 }
 0x267   : > { %7595 = vmatpush3.msra.mxu1 %v5467_v23  ;;  %7561 = vmatprep.subr.mxu0 %v5450_v24  ;;  %v5914_v17 = vadd.f32 %v7182_v13, %v5844_v12 }
 0x268   : > { %7596 = vmatprep.subr.mxu1 %v5482_v25  ;;  %7562 = vmatpush3.msra.mxu0 %v5434_v26 }
 0x269   : > { %7597 = vmatpush3.msra.mxu1 %v5466_v27  ;;  %7563 = vmatprep.subr.mxu0 %v5449_v28 }
 0x26a   : > { %7598 = vmatprep.subr.mxu1 %v5481_v29  ;;  %7564 = vmatpush3.msra.mxu0 %v5433_v30 }
 0x26b   : > { %6681 = vmatprep.mubr.f32.mxu0 %v4918_v31  ;;  %7599 = vmatpush3.msra.mxu1 %v5465_v32 }
 0x26c   : > { %6751 = vmatprep.mubr.f32.mxu1 %v4920_v33  ;;  %6682 = vmatmul.mubr.f32.vlgmr.msra.gmra.mxu0 %v4917_v34 }
 0x26d   : > { %6752 = vmatmul.mubr.f32.vlgmr.msra.gmra.mxu1 %v4919_v35  ;;  %7620 = vmatprep.subr.mxu0 %v7742_v36 }
 0x26e   : > { %7621 = vmatpush3.msra.mxu0 %v6794_v37  ;;  %7652 = vmatprep.mubr.msk.f32.mxu0 %vm7743_vm0, %v7742_v36 }
 0x26f   : > { %7622 = vmatprep.subr.mxu0 %v7742_v36 }
 0x270   : > { %7623 = vmatpush3.msra.mxu0 %v6793_v38 }
 0x271   : > { %7624 = vmatprep.subr.mxu0 %v7742_v36 }
 0x272   : > { %7625 = vmatpush3.msra.mxu0 %v6792_v39 }
 0x273   : > { %7626 = vmatprep.subr.mxu0 %v7742_v36 }
 0x274   : > { %7627 = vmatpush3.msra.mxu0 %v6791_v40 }
 0x275   : > { %7628 = vmatprep.subr.mxu0 %v7742_v36 }
 0x276   : > { %7629 = vmatpush3.msra.mxu0 %v6790_v41 }
 0x277   : > { %7630 = vmatprep.subr.mxu0 %v7742_v36 }
 0x278   : > { %7631 = vmatpush3.msra.mxu0 %v6789_v42 }
 0x279   : > { %7632 = vmatprep.subr.mxu0 %v7742_v36 }
 0x27a   : > { %7633 = vmatpush3.msra.mxu0 %v6788_v43 }
 0x27b   : > { %7634 = vmatprep.subr.mxu0 %v7742_v36 }
 0x27c   : > { %7635 = vmatpush3.msra.mxu0 %v6787_v44 }
 0x27d   : > { %7636 = vmatprep.subr.mxu0 %v7742_v36 }
 0x27e   : > { %7637 = vmatpush3.msra.mxu0 %v6786_v45 }
 0x27f   : > { %7638 = vmatprep.subr.mxu0 %v7742_v36 }
 0x280   : > { %7639 = vmatpush3.msra.mxu0 %v6785_v46 }
 0x281   : > { %7640 = vmatprep.subr.mxu0 %v7742_v36 }
 0x282   : > { %7641 = vmatpush3.msra.mxu0 %v6784_v47  ;;  %v7215_v6 = vpop.f32.mrf.mxu0 }
 0x283   : > { %7642 = vmatprep.subr.mxu0 %v7742_v36 }
 0x284   : > { %7643 = vmatpush3.msra.mxu0 %v6783_v48  ;;  %v7250_v10 = vpop.f32.mrf.mxu1  ;;  %v7216_v11 = vpop.f32.mrf.mxu0 }
 0x285   : > { %7644 = vmatprep.subr.mxu0 %v7742_v36  ;;  %v7217_v15 = vadd.f32 %v7216_v11, %v7215_v6 }
 0x286   : > { %7645 = vmatpush3.msra.mxu0 %v6782_v49  ;;  %v7251_v16 = vpop.f32.mrf.mxu1 }
 0x287   : > { %7646 = vmatprep.subr.mxu0 %v7742_v36  ;;  %v5984_v20 = vadd.f32 %v7217_v15, %v5914_v17  ;;  %v7252_v21 = vadd.f32 %v7251_v16, %v7250_v10 }
 0x288   : > { %7647 = vmatpush3.msra.mxu0 %v6781_v50 }
 0x289   : > { %7648 = vmatprep.subr.mxu0 %v7742_v36  ;;  %v6054_v25 = vadd.f32 %v7252_v21, %v5984_v20 }
 0x28a   : > { %7649 = vmatpush3.msra.mxu0 %v6780_v51 }
 0x28b   : > { %7650 = vmatprep.subr.mxu0 %v7742_v36 }
 0x28c   : > { %7651 = vmatpush3.msra.mxu0 %v6779_v52 }
 0x2a4   : > { %v7285_v14 = vpop.f32.mrf.mxu0 }
 0x2a6   : > { %v7320_v18 = vpop.f32.mrf.mxu1  ;;  %v7286_v19 = vpop.f32.mrf.mxu0 }
 0x2a7   : > { %v7287_v23 = vadd.f32 %v7286_v19, %v7285_v14 }
 0x2a8   : > { %v7321_v24 = vpop.f32.mrf.mxu1 }
 0x2a9   : > { %v6124_v28 = vadd.f32 %v7287_v23, %v6054_v25  ;;  %v7322_v29 = vadd.f32 %v7321_v24, %v7320_v18 }
 0x2ab   : > { %v6194_v33 = vadd.f32 %v7322_v29, %v6124_v28 }
 0x2c6   : > { %v7355_v22 = vpop.f32.mrf.mxu0 }
 0x2c8   : > { %v7390_v26 = vpop.f32.mrf.mxu1  ;;  %v7356_v27 = vpop.f32.mrf.mxu0 }
 0x2c9   : > { %v7357_v31 = vadd.f32 %v7356_v27, %v7355_v22 }
 0x2ca   : > { %v7391_v32 = vpop.f32.mrf.mxu1 }
 0x2cb   : > { %v6264_v36 = vadd.f32 %v7357_v31, %v6194_v33  ;;  %v7392_v37 = vadd.f32 %v7391_v32, %v7390_v26 }
 0x2cd   : > { %v6334_v41 = vadd.f32 %v7392_v37, %v6264_v36 }
 0x2e8   : > { %v7425_v30 = vpop.f32.mrf.mxu0 }
 0x2ea   : > { %v7460_v34 = vpop.f32.mrf.mxu1  ;;  %v7426_v35 = vpop.f32.mrf.mxu0 }
 0x2eb   : > { %v7427_v39 = vadd.f32 %v7426_v35, %v7425_v30 }
 0x2ec   : > { %v7461_v40 = vpop.f32.mrf.mxu1 }
 0x2ed   : > { %v6404_v44 = vadd.f32 %v7427_v39, %v6334_v41  ;;  %v7462_v45 = vadd.f32 %v7461_v40, %v7460_v34 }
 0x2ef   : > { %v6474_v48 = vadd.f32 %v7462_v45, %v6404_v44 }
 0x30a   : > { %v7495_v38 = vpop.f32.mrf.mxu0 }
 0x30c   : > { %v7530_v42 = vpop.f32.mrf.mxu1  ;;  %v7496_v43 = vpop.f32.mrf.mxu0 }
 0x30d   : > { %v7497_v46 = vadd.f32 %v7496_v43, %v7495_v38 }
 0x30e   : > { %v7531_v47 = vpop.f32.mrf.mxu1 }
 0x30f   : > { %v6544_v49 = vadd.f32 %v7497_v46, %v6474_v48  ;;  %v7532_v50 = vadd.f32 %v7531_v47, %v7530_v42 }
 0x311   : > { %v6614_v55 = vadd.f32 %v7532_v50, %v6544_v49 }
 0x32c   : > { %v7565_v51 = vpop.f32.mrf.mxu0 }
 0x32d   : > { %v7600_v52 = vpop.f32.mrf.mxu1 }
 0x32e   : > { %v7566_v53 = vpop.f32.mrf.mxu0 }
 0x32f   : > { %v7601_v54 = vpop.f32.mrf.mxu1  ;;  %v7567_v56 = vadd.f32 %v7566_v53, %v7565_v51 }
 0x330   : > { %v7602_v58 = vadd.f32 %v7601_v54, %v7600_v52 }
 0x331   : > { %v6684_v57 = vadd.f32 %v7567_v56, %v6614_v55 }
 0x333   : > { %v6754_v59 = vadd.f32 %v7602_v58, %v6684_v57 }
 0x335   : > { %v6757_v60 = vmax.f32 %v6754_v59, 0.0 }
 0x337   : > { %v6759_v61 = vcombine.high %v6757_v60, %v6757_v60  ;;  %v6762_v62 = vsel %vm6761_vm1, %v6757_v60, 0.0 }
 0x338   : > { %v6763_v63 = vrot.slane %v6762_v62, 4 }
 0x339   : > { %v6769_v0 = vsel %vm6761_vm1, %v6759_v61, 0.0 }
 0x33a   : > { %v6764_v1 = vadd.f32 %v6763_v63, %v6762_v62  ;;  %v6770_v2 = vrot.slane %v6769_v0, 4 }
 0x33c   : > { %v6765_v3 = vrot.slane %v6764_v1, 2  ;;  %v6771_v4 = vadd.f32 %v6770_v2, %v6769_v0 }
 0x33e   : > { %v6766_v5 = vadd.f32 %v6765_v3, %v6764_v1  ;;  %v6772_v6 = vrot.slane %v6771_v4, 2 }
 0x340   : > { %v6767_v7 = vrot.slane %v6766_v5, 1  ;;  %v6773_v8 = vadd.f32 %v6772_v6, %v6771_v4 }
 0x342   : > { %v6768_v9 = vadd.f32 %v6767_v7, %v6766_v5  ;;  %v6774_v10 = vrot.slane %v6773_v8, 1 }
 0x344   : > { %v6775_v11 = vadd.f32 %v6774_v10, %v6773_v8  ;;  %v6777_v12 = vmul.f32 0.25, %v6768_v9 }
 0x346   : > { %v6778_v13 = vmul.f32 0.25, %v6775_v11 }
 0x348   : > { %v6798_v14 = vsel %vm6797_vm2, %v6778_v13, %v6777_v12 }
 0x349   : > { %7653 = vmatmul.mubr.f32.vlgmr.msra.gmra.mxu0 %v6798_v14 }
 0x407   : > { %6873 = sbr.rel (%p6967_p9) target bundleno = 1038 (0x40e), region = 92 }
 0x409   : > { %v6866_v15 = vpop.f32.mrf.mxu0 }
 0x40b   : > { %v7654_v16 = vpop.f32.mrf.mxu0 }
 0x40c   : > { %v6968_v17 = vld [vmem:[%s9702_s3] ss:$0 sm:$0xff]  ;;  %vm6881_vm3 = vcmask 91136  }
 0x40d   : > { %6882 = vst.msk [vmem:[#allocation3] sm:$0x3] %vm6881_vm3, %v6968_v17 }
 0x40e PF: > { %vm6885_vm4 = vcmask 91136   ;;  %p7661_p10 = scmp.eq.s32.totalorder %s7786_s18, 1  ;;  %s7744_s26 = smov [#allocation3]  }
 0x40f   : > { %s6894_s27 = sshll.u32 %s7744_s26, 4  ;;  %s6895_s27 = int_to_ptr.vmem [resolvable:$true] %s6894_s27 }
 0x410   : > { %s7690_s28 = scalar_lea.vmem %s6895_s27, 32  ;;  %p7697_p0 = scmp.lt.s32.totalorder %s6895_s27, %s6895_s27 }
 0x411   : > { %p7691_p11 = scmp.ne.s32.totalorder %s6895_s27, %s7690_s28  ;;  %p7698_p1 = scmp.lt.s32.totalorder %s7690_s28, %s7690_s28 }
 0x413   : > { %p7692_p12 = pnand %p7691_p11, %p7661_p10  ;;  %p7699_p2 = por %p7698_p1, %p7697_p0 }
 0x414   : > { %v6883_v18 = vld [vmem:[#allocation3] sm:$0x3] }
 0x415   : > { %v6884_v19 = vadd.f32 %v6883_v18, %v6866_v15  ;;  %p7693_p13 = pneg %p7692_p12 }
 0x417   : > { %6886 = vst.msk [vmem:[#allocation3] sm:$0x3] %vm6885_vm4, %v6884_v19  ;;  %p7700_p3 = pnand %p7699_p2, %p7693_p13 }
 0x419   : > { %7703 = shalt.err (!%p7700_p3)
}
 0x41a   : > { %7658 = dma.vmem_to_hbm [thread:$0]  (%p7661_p10), %s6895_s27, 32, %s9703_s4, [#allocation4]  }
 0x41b   : > { %7727 = dma.done.wait (%p7661_p10), [#allocation4], 32  }
 0x41c   : > { %7729 = vsyncadd (%p7661_p10), [#allocation4], 4294967264 }
 0x41d PF: > { %p12_p4 = scmp.ge.s32.totalorder %s7789_s19, 4   ;;  %s9704_s15 = smov %s7736_s16 }
 0x41e   : > { %s9705_s16 = smov %s7798_s22  ;;  %s9706_s17 = smov %s7789_s19 }
 0x41f   :  { %14 = sbr.rel (!%p12_p4) target bundleno = 2 (0x2), region = 133 }
 0x424   :  { %6907 = vsyncpa [#allocation4], 1 }
 0x425   :  { %6909 = vsyncpa [#allocation4 + $0x1], 1 }

// kernel: net_gcr_forward.2
= control target key start
LH: loop header
LB: loop body
LE: loop exit
PB: predicated region body
PF: predicated region fallthrough
CT: control target
= control target key end

     0   :  { %7 = vsyncpa [#allocation3], 0  ;;  %s4796_s0 = inlined_call_operand.vmem [shape: f32[32,4608], index: 0, kind: input, shape index: {}]   ;;  %s4797_s1 = inlined_call_operand.hbm [shape: f32[4608,512], index: 1, kind: input, shape index: {}]   ;;  %s4798_s2 = inlined_call_operand.vmem [shape: f32[32,512], index: 2, kind: output, shape index: {}]  }
   0x1   :  { %9 = vsyncpa [#allocation3 + $0x1], 0  ;;  %s3460_s9 = smov 0   ;;  %s3462_s10 = smov 0  }
   0x2   :  { %s3464_s11 = smov 0   ;;  %s3466_s12 = smov 0  }
   0x3 LB: > { %s3479_s13 = sadd.s32 4294967295, %s3439_s12   ;;  %s3482_s14 = sadd.s32 1, %s3439_s12   ;;  %s3439_s12 = sphi %s3466_s12, %s4840_s12   ;;  %s3435_s11 = sphi %s3464_s11, %s4839_s11   ;;  %s3431_s10 = sphi %s3462_s10, %s4838_s10   ;;  %s3427_s9 = sphi %s3460_s9, %s4837_s9  }
   0x4   : > { %s40_s15 = ssub.s32 %s3439_s12, %s3482_s14  ;;  %s43_s16 = sadd.s32 1, %s3435_s11 }
   0x5   : > { %p41_p0 = scmp.eq.s32.totalorder %s40_s15, 0  ;;  %p50_p1 = scmp.ne.s32.totalorder %s3435_s11, %s3431_s10 }
   0x6   : > { %p51_p2 = scmp.eq.s32.totalorder %s3439_s12, 0  ;;  %p56_p3 = scmp.ne.s32.totalorder %s3431_s10, %s3427_s9 }
   0x7   : > { %s3492_s17 = scalar_select %p41_p0, %s3435_s11, %s43_s16  }
   0x8   : > { %p52_p4 = por %p51_p2, %p50_p1  ;;  %p57_p5 = scmp.eq.s32.totalorder %s3479_s13, 0 }
   0x9   : > { %p80_p6 = scmp.eq.s32.totalorder %s3479_s13, 3  ;;  %p3341_p8 = scmp.lt.s32.totalorder %s3439_s12, 4 }
   0xa   : > { %p3496_p7 = por %p57_p5, %p56_p3  ;;  %s109_s20 = sand.u32 1, %s3435_s11  }
   0xb   : > { %p3501_p9 = por %p80_p6, %p50_p1  ;;  %s3333_s21 = smul.u32 4608, %s109_s20 }
   0xc   : > { %s4800_s18 = scalar_select %p3496_p7, 1, 0 }
   0xd   : > { %s4801_s19 = scalar_select %p3501_p9, 1, 0 }
   0xe   : > { %s2534_s22 = sshll.u32 %s3439_s12, 7  ;;  %p3507_p10 = pnand %p3341_p8, %p52_p4 }
   0xf   : > { %s3514_s26 = scalar_lea.hbm %s4797_s1, %s2534_s22  ;;  %s113_s27 = scalar_lea.vmem [#allocation2], %s3333_s21 }
  0x10   : > { %s119_s28 = sshll.u32 %s113_s27, 4  ;;  %s3518_s29 = scalar_lea.sflag [#allocation3], %s109_s20  ;;  %s3516_s28 = int_to_ptr.vmem [resolvable:$true] %s119_s28 }
  0x11   : > { %s3377_s30 = scalar_lea.hbm %s3514_s26, 73728  ;;  %p3379_p12 = pneg %p3507_p10 }
  0x12   : > { %p3378_p11 = scmp.ne.s32.totalorder %s3514_s26, %s3377_s30  ;;  %s3382_s5 = scalar_lea.hbm %s4797_s1, 294912 }
  0x13   : > { %p3383_p1 = scmp.lt.s32.totalorder %s3514_s26, %s4797_s1  ;;  %p3384_p2 = scmp.lt.s32.totalorder %s3382_s5, %s3377_s30 }
  0x14   : > { %p3380_p13 = pnand %p3379_p12, %p3378_p11 }
  0x15   : > { %p3385_p3 = por %p3384_p2, %p3383_p1 }
  0x16   : > { %p3381_p0 = pneg %p3380_p13 }
  0x18   : > { %p3386_p4 = pnand %p3385_p3, %p3381_p0 }
  0x1a   : > { %3389 = shalt.err (!%p3386_p4)
}
  0x1b   : > { %s3390_s8 = scalar_lea.vmem %s3516_s28, 73728  ;;  %s3441_s9 = smov [#allocation2]  }
  0x1c   : > { %p3391_p5 = scmp.ne.s32.totalorder %s3516_s28, %s3390_s8  ;;  %s3395_s15 = sshll.u32 %s3441_s9, 4  ;;  %s3396_s15 = int_to_ptr.vmem [resolvable:$false] %s3395_s15 }
  0x1d   : > { %s3397_s16 = scalar_lea.vmem %s3396_s15, 147456  ;;  %p3398_p11 = scmp.lt.s32.totalorder %s3516_s28, %s3396_s15 }
  0x1e   : > { %p3393_p6 = pnand %p3391_p5, %p3379_p12  ;;  %p3399_p13 = scmp.lt.s32.totalorder %s3397_s16, %s3390_s8 }
  0x20   : > { %p3394_p8 = pneg %p3393_p6  ;;  %p3400_p9 = por %p3399_p13, %p3398_p11 }
  0x22   : > { %p3401_p7 = pnand %p3400_p9, %p3394_p8 }
  0x24   : > { %3404 = shalt.err (!%p3401_p7)
}
  0x25   : > { %s3442_s20 = smov 512   ;;  %s3443_s21 = smov 128  }
  0x26   : > { %s3444_s22 = smov 8   ;;  %p2535_p12 = scmp.ge.s32.totalorder %s3439_s12, 1 }
  0x27   : > { %3340 = dma.hbm_to_vmem [thread:$0]  (!%p3507_p10), %s3514_s26, 73728, %s3516_s28, %s3518_s29, %s3442_s20, %s3443_s21, %s3444_s22  }
  0x28   : > { %p127_p0 = scmp.lt.s32.totalorder %s3439_s12, 5 }
  0x2a   : > { %p128_p1 = pnand %p2535_p12, %p127_p0 }
  0x2c   : > { %131 = sbr.rel (%p128_p1) target bundleno = 633 (0x279), region = 28 }
  0x31   : > { %s3542_s24 = sand.u32 1, %s3431_s10   ;;  %p4803_p7 = scmp.ne.s32.totalorder %s4800_s18, 0 }
  0x32   : > { %s3334_s25 = smul.u32 4608, %s3542_s24  ;;  %s134_s27 = scalar_lea.sflag [#allocation3], %s3542_s24 }
  0x34   : > { %s3546_s30 = scalar_lea.vmem [#allocation2], %s3334_s25 }
  0x35   : > { %3422 = dma.done.wait (%p4803_p7), %s134_s27, 73728  }
  0x36   : > { %3424 = vsyncadd (%p4803_p7), %s134_s27, 4294893568  ;;  %v332_v0 = vld [vmem:[%s3546_s30 + $0xf8] sm:$0xff]  ;;  %v331_v4 = vld [vmem:[%s3546_s30 + $0xf0] sm:$0xff]  ;;  %s2536_s3 = sshll.u32 %s3542_s24, 5  ;;  %p4836_p9 = scmp.ne.s32.totalorder %s4801_s19, 0 }
  0x37   : > { %v364_v1 = vld [vmem:[%s3546_s30 + $0x1f8] sm:$0xff]  ;;  %2541 = vmatprep.subr.mxu0 %v332_v0  ;;  %v363_v5 = vld [vmem:[%s3546_s30 + $0x1f0] sm:$0xff]  ;;  %v330_v8 = vld [vmem:[%s3546_s30 + $0xe8] sm:$0xff]  ;;  %s156_s24 = scalar_lea.vmem [#allocation4], %s2536_s3  ;;  %s2538_s4 = sshll.u32 (%p4836_p9), %s3479_s13, 3 }
  0x38   : > { %v316_v2 = vld [vmem:[%s3546_s30 + $0x78] sm:$0xff]  ;;  %2585 = vmatprep.subr.mxu1 %v364_v1  ;;  %v315_v6 = vld [vmem:[%s3546_s30 + $0x70] sm:$0xff]  ;;  %v362_v9 = vld [vmem:[%s3546_s30 + $0x1e8] sm:$0xff]  ;;  %s2423_s7 = scalar_lea.vmem (%p4836_p9), %s4798_s2, %s2538_s4 }
  0x39   : > { %v348_v3 = vld [vmem:[%s3546_s30 + $0x178] sm:$0xff]  ;;  %2542 = vmatpush3.msra.mxu0 %v316_v2  ;;  %v347_v7 = vld [vmem:[%s3546_s30 + $0x170] sm:$0xff]  ;;  %v314_v10 = vld [vmem:[%s3546_s30 + $0x68] sm:$0xff] }
  0x3a   : > { %2586 = vmatpush3.msra.mxu1 %v348_v3  ;;  %2543 = vmatprep.subr.mxu0 %v331_v4  ;;  %v346_v11 = vld [vmem:[%s3546_s30 + $0x168] sm:$0xff]  ;;  %v329_v12 = vld [vmem:[%s3546_s30 + $0xe0] sm:$0xff]  ;;  %v328_v16 = vld [vmem:[%s3546_s30 + $0xd8] sm:$0xff] }
  0x3b   : > { %2587 = vmatprep.subr.mxu1 %v363_v5  ;;  %2544 = vmatpush3.msra.mxu0 %v315_v6  ;;  %v361_v13 = vld [vmem:[%s3546_s30 + $0x1e0] sm:$0xff]  ;;  %v360_v17 = vld [vmem:[%s3546_s30 + $0x1d8] sm:$0xff]  ;;  %v327_v20 = vld [vmem:[%s3546_s30 + $0xd0] sm:$0xff] }
  0x3c   : > { %2588 = vmatpush3.msra.mxu1 %v347_v7  ;;  %2545 = vmatprep.subr.mxu0 %v330_v8  ;;  %v313_v14 = vld [vmem:[%s3546_s30 + $0x60] sm:$0xff]  ;;  %v312_v18 = vld [vmem:[%s3546_s30 + $0x58] sm:$0xff]  ;;  %v359_v21 = vld [vmem:[%s3546_s30 + $0x1d0] sm:$0xff] }
  0x3d   : > { %2589 = vmatprep.subr.mxu1 %v362_v9  ;;  %v345_v15 = vld [vmem:[%s3546_s30 + $0x160] sm:$0xff]  ;;  %2546 = vmatpush3.msra.mxu0 %v314_v10  ;;  %v344_v19 = vld [vmem:[%s3546_s30 + $0x158] sm:$0xff]  ;;  %v311_v22 = vld [vmem:[%s3546_s30 + $0x50] sm:$0xff] }
  0x3e   : > { %2590 = vmatpush3.msra.mxu1 %v346_v11  ;;  %2547 = vmatprep.subr.mxu0 %v329_v12  ;;  %v343_v23 = vld [vmem:[%s3546_s30 + $0x150] sm:$0xff]  ;;  %v326_v24 = vld [vmem:[%s3546_s30 + $0xc8] sm:$0xff]  ;;  %v325_v28 = vld [vmem:[%s3546_s30 + $0xc0] sm:$0xff] }
  0x3f   : > { %2591 = vmatprep.subr.mxu1 %v361_v13  ;;  %2548 = vmatpush3.msra.mxu0 %v313_v14  ;;  %v358_v25 = vld [vmem:[%s3546_s30 + $0x1c8] sm:$0xff]  ;;  %v357_v29 = vld [vmem:[%s3546_s30 + $0x1c0] sm:$0xff]  ;;  %v324_v32 = vld [vmem:[%s3546_s30 + $0xb8] sm:$0xff] }
  0x40   : > { %2592 = vmatpush3.msra.mxu1 %v345_v15  ;;  %2549 = vmatprep.subr.mxu0 %v328_v16  ;;  %v310_v26 = vld [vmem:[%s3546_s30 + $0x48] sm:$0xff]  ;;  %v309_v30 = vld [vmem:[%s3546_s30 + $0x40] sm:$0xff]  ;;  %v356_v33 = vld [vmem:[%s3546_s30 + $0x1b8] sm:$0xff] }
  0x41   : > { %2593 = vmatprep.subr.mxu1 %v360_v17  ;;  %2550 = vmatpush3.msra.mxu0 %v312_v18  ;;  %v342_v27 = vld [vmem:[%s3546_s30 + $0x148] sm:$0xff]  ;;  %v341_v31 = vld [vmem:[%s3546_s30 + $0x140] sm:$0xff]  ;;  %v308_v34 = vld [vmem:[%s3546_s30 + $0x38] sm:$0xff] }
  0x42   : > { %2594 = vmatpush3.msra.mxu1 %v344_v19  ;;  %2551 = vmatprep.subr.mxu0 %v327_v20  ;;  %v340_v35 = vld [vmem:[%s3546_s30 + $0x138] sm:$0xff]  ;;  %v323_v36 = vld [vmem:[%s3546_s30 + $0xb0] sm:$0xff]  ;;  %v322_v40 = vld [vmem:[%s3546_s30 + $0xa8] sm:$0xff] }
  0x43   : > { %2595 = vmatprep.subr.mxu1 %v359_v21  ;;  %2552 = vmatpush3.msra.mxu0 %v311_v22  ;;  %v355_v37 = vld [vmem:[%s3546_s30 + $0x1b0] sm:$0xff]  ;;  %v354_v41 = vld [vmem:[%s3546_s30 + $0x1a8] sm:$0xff]  ;;  %v321_v44 = vld [vmem:[%s3546_s30 + $0xa0] sm:$0xff] }
  0x44   : > { %2596 = vmatpush3.msra.mxu1 %v343_v23  ;;  %2553 = vmatprep.subr.mxu0 %v326_v24  ;;  %v307_v38 = vld [vmem:[%s3546_s30 + $0x30] sm:$0xff]  ;;  %v306_v42 = vld [vmem:[%s3546_s30 + $0x28] sm:$0xff]  ;;  %v353_v45 = vld [vmem:[%s3546_s30 + $0x1a0] sm:$0xff] }
  0x45   : > { %2597 = vmatprep.subr.mxu1 %v358_v25  ;;  %2554 = vmatpush3.msra.mxu0 %v310_v26  ;;  %v339_v39 = vld [vmem:[%s3546_s30 + $0x130] sm:$0xff]  ;;  %v338_v43 = vld [vmem:[%s3546_s30 + $0x128] sm:$0xff]  ;;  %v305_v46 = vld [vmem:[%s3546_s30 + $0x20] sm:$0xff] }
  0x46   : > { %2598 = vmatpush3.msra.mxu1 %v342_v27  ;;  %2555 = vmatprep.subr.mxu0 %v325_v28  ;;  %v337_v47 = vld [vmem:[%s3546_s30 + $0x120] sm:$0xff]  ;;  %v320_v48 = vld [vmem:[%s3546_s30 + $0x98] sm:$0xff]  ;;  %v319_v52 = vld [vmem:[%s3546_s30 + $0x90] sm:$0xff] }
  0x47   : > { %2599 = vmatprep.subr.mxu1 %v357_v29  ;;  %2556 = vmatpush3.msra.mxu0 %v309_v30  ;;  %v352_v49 = vld [vmem:[%s3546_s30 + $0x198] sm:$0xff]  ;;  %v351_v53 = vld [vmem:[%s3546_s30 + $0x190] sm:$0xff]  ;;  %v318_v56 = vld [vmem:[%s3546_s30 + $0x88] sm:$0xff] }
  0x48   : > { %2600 = vmatpush3.msra.mxu1 %v341_v31  ;;  %2557 = vmatprep.subr.mxu0 %v324_v32  ;;  %v304_v50 = vld [vmem:[%s3546_s30 + $0x18] sm:$0xff]  ;;  %v303_v54 = vld [vmem:[%s3546_s30 + $0x10] sm:$0xff]  ;;  %v350_v57 = vld [vmem:[%s3546_s30 + $0x188] sm:$0xff] }
  0x49   : > { %2601 = vmatprep.subr.mxu1 %v356_v33  ;;  %2558 = vmatpush3.msra.mxu0 %v308_v34  ;;  %v336_v51 = vld [vmem:[%s3546_s30 + $0x118] sm:$0xff]  ;;  %v335_v55 = vld [vmem:[%s3546_s30 + $0x110] sm:$0xff]  ;;  %v302_v58 = vld [vmem:[%s3546_s30 + $0x8] sm:$0xff] }
  0x4a   : > { %2602 = vmatpush3.msra.mxu1 %v340_v35  ;;  %2559 = vmatprep.subr.mxu0 %v323_v36  ;;  %v334_v59 = vld [vmem:[%s3546_s30 + $0x108] sm:$0xff]  ;;  %v317_v60 = vld [vmem:[%s3546_s30 + $0x80] sm:$0xff]  ;;  %v160_v1 = vld [vmem:[%s4796_s0 + $0x18] sm:$0xff] }
  0x4b   : > { %2603 = vmatprep.subr.mxu1 %v355_v37  ;;  %2560 = vmatpush3.msra.mxu0 %v307_v38  ;;  %v349_v61 = vld [vmem:[%s3546_s30 + $0x180] sm:$0xff]  ;;  %v158_v63 = vld [vmem:[%s4796_s0 + $0x8] sm:$0xff]  ;;  %v159_v3 = vld [vmem:[%s4796_s0 + $0x10] sm:$0xff] }
  0x4c   : > { %2604 = vmatpush3.msra.mxu1 %v339_v39  ;;  %2561 = vmatprep.subr.mxu0 %v322_v40  ;;  %v301_v62 = vld [vmem:[%s3546_s30] sm:$0xff]  ;;  %v396_v4 = vld [vmem:[%s3546_s30 + $0x2f8] sm:$0xff]  ;;  %v395_v8 = vld [vmem:[%s3546_s30 + $0x2f0] sm:$0xff] }
  0x4d   : > { %2605 = vmatprep.subr.mxu1 %v354_v41  ;;  %2562 = vmatpush3.msra.mxu0 %v306_v42  ;;  %v333_v0 = vld [vmem:[%s3546_s30 + $0x100] sm:$0xff]  ;;  %v428_v5 = vld [vmem:[%s3546_s30 + $0x3f8] sm:$0xff]  ;;  %v427_v9 = vld [vmem:[%s3546_s30 + $0x3f0] sm:$0xff] }
  0x4e   : > { %2606 = vmatpush3.msra.mxu1 %v338_v43  ;;  %2563 = vmatprep.subr.mxu0 %v321_v44  ;;  %v157_v2 = vld [vmem:[%s4796_s0] sm:$0xff]  ;;  %v380_v6 = vld [vmem:[%s3546_s30 + $0x278] sm:$0xff]  ;;  %v379_v10 = vld [vmem:[%s3546_s30 + $0x270] sm:$0xff] }
  0x4f   : > { %2607 = vmatprep.subr.mxu1 %v353_v45  ;;  %2564 = vmatpush3.msra.mxu0 %v305_v46  ;;  %v412_v7 = vld [vmem:[%s3546_s30 + $0x378] sm:$0xff]  ;;  %v411_v11 = vld [vmem:[%s3546_s30 + $0x370] sm:$0xff]  ;;  %v394_v12 = vld [vmem:[%s3546_s30 + $0x2e8] sm:$0xff] }
  0x50   : > { %2608 = vmatpush3.msra.mxu1 %v337_v47  ;;  %2565 = vmatprep.subr.mxu0 %v320_v48  ;;  %v426_v13 = vld [vmem:[%s3546_s30 + $0x3e8] sm:$0xff]  ;;  %v393_v16 = vld [vmem:[%s3546_s30 + $0x2e0] sm:$0xff]  ;;  %v392_v20 = vld [vmem:[%s3546_s30 + $0x2d8] sm:$0xff] }
  0x51   : > { %2609 = vmatprep.subr.mxu1 %v352_v49  ;;  %2566 = vmatpush3.msra.mxu0 %v304_v50  ;;  %v378_v14 = vld [vmem:[%s3546_s30 + $0x268] sm:$0xff]  ;;  %v425_v17 = vld [vmem:[%s3546_s30 + $0x3e0] sm:$0xff]  ;;  %v424_v21 = vld [vmem:[%s3546_s30 + $0x3d8] sm:$0xff] }
  0x52   : > { %2610 = vmatpush3.msra.mxu1 %v336_v51  ;;  %2567 = vmatprep.subr.mxu0 %v319_v52  ;;  %v410_v15 = vld [vmem:[%s3546_s30 + $0x368] sm:$0xff]  ;;  %v377_v18 = vld [vmem:[%s3546_s30 + $0x260] sm:$0xff]  ;;  %v376_v22 = vld [vmem:[%s3546_s30 + $0x258] sm:$0xff] }
  0x53   : > { %2611 = vmatprep.subr.mxu1 %v351_v53  ;;  %2568 = vmatpush3.msra.mxu0 %v303_v54  ;;  %v409_v19 = vld [vmem:[%s3546_s30 + $0x360] sm:$0xff]  ;;  %v408_v23 = vld [vmem:[%s3546_s30 + $0x358] sm:$0xff]  ;;  %v391_v24 = vld [vmem:[%s3546_s30 + $0x2d0] sm:$0xff] }
  0x54   : > { %2612 = vmatpush3.msra.mxu1 %v335_v55  ;;  %2569 = vmatprep.subr.mxu0 %v318_v56  ;;  %v423_v25 = vld [vmem:[%s3546_s30 + $0x3d0] sm:$0xff]  ;;  %v390_v28 = vld [vmem:[%s3546_s30 + $0x2c8] sm:$0xff]  ;;  %v389_v32 = vld [vmem:[%s3546_s30 + $0x2c0] sm:$0xff] }
  0x55   : > { %2613 = vmatprep.subr.mxu1 %v350_v57  ;;  %2570 = vmatpush3.msra.mxu0 %v302_v58  ;;  %v375_v26 = vld [vmem:[%s3546_s30 + $0x250] sm:$0xff]  ;;  %v422_v29 = vld [vmem:[%s3546_s30 + $0x3c8] sm:$0xff]  ;;  %v421_v33 = vld [vmem:[%s3546_s30 + $0x3c0] sm:$0xff] }
  0x56   : > { %2614 = vmatpush3.msra.mxu1 %v334_v59  ;;  %2571 = vmatprep.subr.mxu0 %v317_v60  ;;  %v407_v27 = vld [vmem:[%s3546_s30 + $0x350] sm:$0xff]  ;;  %v374_v30 = vld [vmem:[%s3546_s30 + $0x248] sm:$0xff]  ;;  %v373_v34 = vld [vmem:[%s3546_s30 + $0x240] sm:$0xff] }
  0x57   : > { %2615 = vmatprep.subr.mxu1 %v349_v61  ;;  %2572 = vmatpush3.msra.mxu0 %v301_v62  ;;  %v406_v31 = vld [vmem:[%s3546_s30 + $0x348] sm:$0xff]  ;;  %v405_v35 = vld [vmem:[%s3546_s30 + $0x340] sm:$0xff]  ;;  %v388_v36 = vld [vmem:[%s3546_s30 + $0x2b8] sm:$0xff] }
  0x58   : > { %941 = vmatprep.mubr.f32.mxu0 %v158_v63  ;;  %2616 = vmatpush3.msra.mxu1 %v333_v0  ;;  %v420_v37 = vld [vmem:[%s3546_s30 + $0x3b8] sm:$0xff]  ;;  %v194_v40 = vld [vmem:[%s4796_s0 + $0x128] sm:$0xff]  ;;  %v387_v42 = vld [vmem:[%s3546_s30 + $0x2b0] sm:$0xff] }
  0x59   : > { %1026 = vmatprep.mubr.f32.mxu1 %v160_v1  ;;  %942 = vmatmul.mubr.f32.vlgmr.msra.gmra.mxu0 %v157_v2  ;;  %v372_v38 = vld [vmem:[%s3546_s30 + $0x238] sm:$0xff]  ;;  %v419_v43 = vld [vmem:[%s3546_s30 + $0x3b0] sm:$0xff]  ;;  %v193_v44 = vld [vmem:[%s4796_s0 + $0x120] sm:$0xff] }
  0x5a   : > { %1027 = vmatmul.mubr.f32.vlgmr.msra.gmra.mxu1 %v159_v3  ;;  %2629 = vmatprep.subr.mxu0 %v396_v4  ;;  %v404_v39 = vld [vmem:[%s3546_s30 + $0x338] sm:$0xff]  ;;  %v195_v45 = vld [vmem:[%s4796_s0 + $0x130] sm:$0xff]  ;;  %v386_v48 = vld [vmem:[%s3546_s30 + $0x2a8] sm:$0xff] }
  0x5b   : > { %2673 = vmatprep.subr.mxu1 %v428_v5  ;;  %2630 = vmatpush3.msra.mxu0 %v380_v6  ;;  %v196_v41 = vld [vmem:[%s4796_s0 + $0x138] sm:$0xff]  ;;  %v371_v46 = vld [vmem:[%s3546_s30 + $0x230] sm:$0xff]  ;;  %v418_v49 = vld [vmem:[%s3546_s30 + $0x3a8] sm:$0xff] }
  0x5c   : > { %2674 = vmatpush3.msra.mxu1 %v412_v7  ;;  %2631 = vmatprep.subr.mxu0 %v395_v8  ;;  %v403_v47 = vld [vmem:[%s3546_s30 + $0x330] sm:$0xff]  ;;  %v370_v50 = vld [vmem:[%s3546_s30 + $0x228] sm:$0xff]  ;;  %v232_v53 = vld [vmem:[%s4796_s0 + $0x258] sm:$0xff] }
  0x5d   : > { %2675 = vmatprep.subr.mxu1 %v427_v9  ;;  %2632 = vmatpush3.msra.mxu0 %v379_v10  ;;  %v402_v51 = vld [vmem:[%s3546_s30 + $0x328] sm:$0xff]  ;;  %v385_v54 = vld [vmem:[%s3546_s30 + $0x2a0] sm:$0xff]  ;;  %v231_v57 = vld [vmem:[%s4796_s0 + $0x250] sm:$0xff] }
  0x5e   : > { %2676 = vmatpush3.msra.mxu1 %v411_v11  ;;  %2633 = vmatprep.subr.mxu0 %v394_v12  ;;  %v230_v52 = vld [vmem:[%s4796_s0 + $0x248] sm:$0xff]  ;;  %v417_v55 = vld [vmem:[%s3546_s30 + $0x3a0] sm:$0xff]  ;;  %v384_v60 = vld [vmem:[%s3546_s30 + $0x298] sm:$0xff] }
  0x5f   : > { %2677 = vmatprep.subr.mxu1 %v426_v13  ;;  %2634 = vmatpush3.msra.mxu0 %v378_v14  ;;  %v229_v56 = vld [vmem:[%s4796_s0 + $0x240] sm:$0xff]  ;;  %v416_v61 = vld [vmem:[%s3546_s30 + $0x398] sm:$0xff]  ;;  %v266_v0 = vld [vmem:[%s4796_s0 + $0x368] sm:$0xff] }
  0x60   : > { %2678 = vmatpush3.msra.mxu1 %v410_v15  ;;  %2635 = vmatprep.subr.mxu0 %v393_v16  ;;  %v369_v58 = vld [vmem:[%s3546_s30 + $0x220] sm:$0xff]  ;;  %v368_v62 = vld [vmem:[%s3546_s30 + $0x218] sm:$0xff]  ;;  %v383_v2 = vld [vmem:[%s3546_s30 + $0x290] sm:$0xff] }
  0x61   : > { %2679 = vmatprep.subr.mxu1 %v425_v17  ;;  %2636 = vmatpush3.msra.mxu0 %v377_v18  ;;  %v401_v59 = vld [vmem:[%s3546_s30 + $0x320] sm:$0xff]  ;;  %v400_v63 = vld [vmem:[%s3546_s30 + $0x318] sm:$0xff]  ;;  %v415_v3 = vld [vmem:[%s3546_s30 + $0x390] sm:$0xff] }
  0x62   : > { %2680 = vmatpush3.msra.mxu1 %v409_v19  ;;  %2637 = vmatprep.subr.mxu0 %v392_v20  ;;  %v268_v1 = vld [vmem:[%s4796_s0 + $0x378] sm:$0xff]  ;;  %v265_v4 = vld [vmem:[%s4796_s0 + $0x360] sm:$0xff]  ;;  %v267_v5 = vld [vmem:[%s4796_s0 + $0x370] sm:$0xff] }
  0x63   : > { %2681 = vmatprep.subr.mxu1 %v424_v21  ;;  %2638 = vmatpush3.msra.mxu0 %v376_v22  ;;  %v367_v6 = vld [vmem:[%s3546_s30 + $0x210] sm:$0xff]  ;;  %v382_v8 = vld [vmem:[%s3546_s30 + $0x288] sm:$0xff]  ;;  %v381_v12 = vld [vmem:[%s3546_s30 + $0x280] sm:$0xff] }
  0x64   : > { %2682 = vmatpush3.msra.mxu1 %v408_v23  ;;  %2639 = vmatprep.subr.mxu0 %v391_v24  ;;  %v399_v7 = vld [vmem:[%s3546_s30 + $0x310] sm:$0xff]  ;;  %v414_v9 = vld [vmem:[%s3546_s30 + $0x388] sm:$0xff]  ;;  %v413_v13 = vld [vmem:[%s3546_s30 + $0x380] sm:$0xff] }
  0x65   : > { %2683 = vmatprep.subr.mxu1 %v423_v25  ;;  %2640 = vmatpush3.msra.mxu0 %v375_v26  ;;  %v366_v10 = vld [vmem:[%s3546_s30 + $0x208] sm:$0xff]  ;;  %v365_v14 = vld [vmem:[%s3546_s30 + $0x200] sm:$0xff]  ;;  %v164_v18 = vld [vmem:[%s4796_s0 + $0x38] sm:$0xff] }
  0x66   : > { %2684 = vmatpush3.msra.mxu1 %v407_v27  ;;  %2641 = vmatprep.subr.mxu0 %v390_v28  ;;  %v398_v11 = vld [vmem:[%s3546_s30 + $0x308] sm:$0xff]  ;;  %v397_v16 = vld [vmem:[%s3546_s30 + $0x300] sm:$0xff]  ;;  %v460_v19 = vld [vmem:[%s3546_s30 + $0x4f8] sm:$0xff] }
  0x67   : > { %2685 = vmatprep.subr.mxu1 %v422_v29  ;;  %2642 = vmatpush3.msra.mxu0 %v374_v30  ;;  %v162_v15 = vld [vmem:[%s4796_s0 + $0x28] sm:$0xff]  ;;  %v161_v17 = vld [vmem:[%s4796_s0 + $0x20] sm:$0xff]  ;;  %v492_v20 = vld [vmem:[%s3546_s30 + $0x5f8] sm:$0xff] }
  0x68   : > { %2686 = vmatpush3.msra.mxu1 %v406_v31  ;;  %2643 = vmatprep.subr.mxu0 %v389_v32  ;;  %v163_v21 = vld [vmem:[%s4796_s0 + $0x30] sm:$0xff]  ;;  %v444_v22 = vld [vmem:[%s3546_s30 + $0x478] sm:$0xff]  ;;  %v198_v26 = vld [vmem:[%s4796_s0 + $0x148] sm:$0xff] }
  0x69   : > { %2687 = vmatprep.subr.mxu1 %v421_v33  ;;  %2644 = vmatpush3.msra.mxu0 %v373_v34  ;;  %v476_v23 = vld [vmem:[%s3546_s30 + $0x578] sm:$0xff]  ;;  %v459_v24 = vld [vmem:[%s3546_s30 + $0x4f0] sm:$0xff]  ;;  %v197_v29 = vld [vmem:[%s4796_s0 + $0x140] sm:$0xff] }
  0x6a   : > { %2688 = vmatpush3.msra.mxu1 %v405_v35  ;;  %2645 = vmatprep.subr.mxu0 %v388_v36  ;;  %v491_v25 = vld [vmem:[%s3546_s30 + $0x5f0] sm:$0xff]  ;;  %v458_v30 = vld [vmem:[%s3546_s30 + $0x4e8] sm:$0xff]  ;;  %v200_v32 = vld [vmem:[%s4796_s0 + $0x158] sm:$0xff] }
  0x6b   : > { %2689 = vmatprep.subr.mxu1 %v420_v37  ;;  %2646 = vmatpush3.msra.mxu0 %v372_v38  ;;  %v443_v27 = vld [vmem:[%s3546_s30 + $0x470] sm:$0xff]  ;;  %v490_v31 = vld [vmem:[%s3546_s30 + $0x5e8] sm:$0xff]  ;;  %v457_v35 = vld [vmem:[%s3546_s30 + $0x4e0] sm:$0xff] }
  0x6c   : > { %2690 = vmatpush3.msra.mxu1 %v404_v39  ;;  %946 = vmatprep.mubr.f32.mxu0 %v194_v40  ;;  %v475_v28 = vld [vmem:[%s3546_s30 + $0x570] sm:$0xff]  ;;  %v442_v33 = vld [vmem:[%s3546_s30 + $0x468] sm:$0xff]  ;;  %v489_v37 = vld [vmem:[%s3546_s30 + $0x5e0] sm:$0xff] }
  0x6d   : > { %1031 = vmatprep.mubr.f32.mxu1 %v196_v41  ;;  %2647 = vmatprep.subr.mxu0 %v387_v42  ;;  %v474_v34 = vld [vmem:[%s3546_s30 + $0x568] sm:$0xff]  ;;  %v199_v36 = vld [vmem:[%s4796_s0 + $0x150] sm:$0xff]  ;;  %v441_v39 = vld [vmem:[%s3546_s30 + $0x460] sm:$0xff] }
  0x6e   : > { %2691 = vmatprep.subr.mxu1 %v419_v43  ;;  %947 = vmatmul.mubr.f32.gmra.mxu0 %v193_v44  ;;  %v234_v38 = vld [vmem:[%s4796_s0 + $0x268] sm:$0xff]  ;;  %v473_v40 = vld [vmem:[%s3546_s30 + $0x560] sm:$0xff]  ;;  %v456_v42 = vld [vmem:[%s3546_s30 + $0x4d8] sm:$0xff] }
  0x6f   : > { %1032 = vmatmul.mubr.f32.gmra.mxu1 %v195_v45  ;;  %2648 = vmatpush3.msra.mxu0 %v371_v46  ;;  %v233_v41 = vld [vmem:[%s4796_s0 + $0x260] sm:$0xff]  ;;  %v488_v43 = vld [vmem:[%s3546_s30 + $0x5d8] sm:$0xff] }
  0x70   : > { %2692 = vmatpush3.msra.mxu1 %v403_v47  ;;  %2649 = vmatprep.subr.mxu0 %v386_v48  ;;  %v236_v44 = vld [vmem:[%s4796_s0 + $0x278] sm:$0xff]  ;;  %v455_v47 = vld [vmem:[%s3546_s30 + $0x4d0] sm:$0xff] }
  0x71   : > { %2693 = vmatprep.subr.mxu1 %v418_v49  ;;  %2650 = vmatpush3.msra.mxu0 %v370_v50  ;;  %v440_v45 = vld [vmem:[%s3546_s30 + $0x458] sm:$0xff]  ;;  %v235_v48 = vld [vmem:[%s4796_s0 + $0x270] sm:$0xff]  ;;  %v270_v50 = vld [vmem:[%s4796_s0 + $0x388] sm:$0xff] }
  0x72   : > { %2694 = vmatpush3.msra.mxu1 %v402_v51  ;;  %951 = vmatprep.mubr.f32.mxu0 %v230_v52  ;;  %v472_v46 = vld [vmem:[%s3546_s30 + $0x558] sm:$0xff]  ;;  %v487_v49 = vld [vmem:[%s3546_s30 + $0x5d0] sm:$0xff] }
  0x73   : > { %1036 = vmatprep.mubr.f32.mxu1 %v232_v53  ;;  %2651 = vmatprep.subr.mxu0 %v385_v54  ;;  %v439_v51 = vld [vmem:[%s3546_s30 + $0x450] sm:$0xff]  ;;  %v269_v53 = vld [vmem:[%s4796_s0 + $0x380] sm:$0xff]  ;;  %v454_v54 = vld [vmem:[%s3546_s30 + $0x4c8] sm:$0xff] }
  0x74   : > { %2695 = vmatprep.subr.mxu1 %v417_v55  ;;  %952 = vmatmul.mubr.f32.gmra.mxu0 %v229_v56  ;;  %v471_v52 = vld [vmem:[%s3546_s30 + $0x550] sm:$0xff]  ;;  %v486_v55 = vld [vmem:[%s3546_s30 + $0x5c8] sm:$0xff]  ;;  %v272_v56 = vld [vmem:[%s4796_s0 + $0x398] sm:$0xff] }
  0x75   : > { %1037 = vmatmul.mubr.f32.gmra.mxu1 %v231_v57  ;;  %2652 = vmatpush3.msra.mxu0 %v369_v58  ;;  %v438_v57 = vld [vmem:[%s3546_s30 + $0x448] sm:$0xff] }
  0x76   : > { %2696 = vmatpush3.msra.mxu1 %v401_v59  ;;  %2653 = vmatprep.subr.mxu0 %v384_v60  ;;  %v470_v58 = vld [vmem:[%s3546_s30 + $0x548] sm:$0xff]  ;;  %v453_v59 = vld [vmem:[%s3546_s30 + $0x4c0] sm:$0xff]  ;;  %v271_v60 = vld [vmem:[%s4796_s0 + $0x390] sm:$0xff] }
  0x77   : > { %2697 = vmatprep.subr.mxu1 %v416_v61  ;;  %2654 = vmatpush3.msra.mxu0 %v368_v62  ;;  %v485_v61 = vld [vmem:[%s3546_s30 + $0x5c0] sm:$0xff] }
  0x78   : > { %2698 = vmatpush3.msra.mxu1 %v400_v63  ;;  %956 = vmatprep.mubr.f32.mxu0 %v266_v0  ;;  %v437_v62 = vld [vmem:[%s3546_s30 + $0x440] sm:$0xff]  ;;  %v452_v0 = vld [vmem:[%s3546_s30 + $0x4b8] sm:$0xff] }
  0x79   : > { %1041 = vmatprep.mubr.f32.mxu1 %v268_v1  ;;  %2655 = vmatprep.subr.mxu0 %v383_v2  ;;  %v469_v63 = vld [vmem:[%s3546_s30 + $0x540] sm:$0xff]  ;;  %v484_v1 = vld [vmem:[%s3546_s30 + $0x5b8] sm:$0xff] }
  0x7a   : > { %2699 = vmatprep.subr.mxu1 %v415_v3  ;;  %957 = vmatmul.mubr.f32.gmra.mxu0 %v265_v4  ;;  %v436_v2 = vld [vmem:[%s3546_s30 + $0x438] sm:$0xff]  ;;  %v451_v4 = vld [vmem:[%s3546_s30 + $0x4b0] sm:$0xff] }
  0x7b   : > { %1042 = vmatmul.mubr.f32.gmra.mxu1 %v267_v5  ;;  %2656 = vmatpush3.msra.mxu0 %v367_v6  ;;  %v468_v3 = vld [vmem:[%s3546_s30 + $0x538] sm:$0xff]  ;;  %v483_v5 = vld [vmem:[%s3546_s30 + $0x5b0] sm:$0xff] }
  0x7c   : > { %2700 = vmatpush3.msra.mxu1 %v399_v7  ;;  %2657 = vmatprep.subr.mxu0 %v382_v8  ;;  %v435_v6 = vld [vmem:[%s3546_s30 + $0x430] sm:$0xff]  ;;  %v450_v8 = vld [vmem:[%s3546_s30 + $0x4a8] sm:$0xff] }
  0x7d   : > { %2701 = vmatprep.subr.mxu1 %v414_v9  ;;  %2658 = vmatpush3.msra.mxu0 %v366_v10  ;;  %v467_v7 = vld [vmem:[%s3546_s30 + $0x530] sm:$0xff]  ;;  %v482_v9 = vld [vmem:[%s3546_s30 + $0x5a8] sm:$0xff] }
  0x7e   : > { %2702 = vmatpush3.msra.mxu1 %v398_v11  ;;  %2659 = vmatprep.subr.mxu0 %v381_v12  ;;  %v434_v10 = vld [vmem:[%s3546_s30 + $0x428] sm:$0xff]  ;;  %v449_v12 = vld [vmem:[%s3546_s30 + $0x4a0] sm:$0xff] }
  0x7f   : > { %2703 = vmatprep.subr.mxu1 %v413_v13  ;;  %2660 = vmatpush3.msra.mxu0 %v365_v14  ;;  %v466_v11 = vld [vmem:[%s3546_s30 + $0x528] sm:$0xff]  ;;  %v481_v13 = vld [vmem:[%s3546_s30 + $0x5a0] sm:$0xff] }
  0x80   : > { %1111 = vmatprep.mubr.f32.mxu0 %v162_v15  ;;  %2704 = vmatpush3.msra.mxu1 %v397_v16  ;;  %v433_v14 = vld [vmem:[%s3546_s30 + $0x420] sm:$0xff]  ;;  %v448_v16 = vld [vmem:[%s3546_s30 + $0x498] sm:$0xff] }
  0x81   : > { %1112 = vmatmul.mubr.f32.vlgmr.msra.gmra.mxu0 %v161_v17  ;;  %1196 = vmatprep.mubr.f32.mxu1 %v164_v18  ;;  %v465_v15 = vld [vmem:[%s3546_s30 + $0x520] sm:$0xff]  ;;  %v480_v17 = vld [vmem:[%s3546_s30 + $0x598] sm:$0xff] }
  0x82   : > { %2717 = vmatprep.subr.mxu0 %v460_v19  ;;  %2761 = vmatprep.subr.mxu1 %v492_v20  ;;  %v432_v18 = vld [vmem:[%s3546_s30 + $0x418] sm:$0xff]  ;;  %v447_v20 = vld [vmem:[%s3546_s30 + $0x490] sm:$0xff] }
  0x83   : > { %1197 = vmatmul.mubr.f32.vlgmr.msra.gmra.mxu1 %v163_v21  ;;  %2718 = vmatpush3.msra.mxu0 %v444_v22  ;;  %v464_v19 = vld [vmem:[%s3546_s30 + $0x518] sm:$0xff]  ;;  %v479_v21 = vld [vmem:[%s3546_s30 + $0x590] sm:$0xff] }
  0x84   : > { %2762 = vmatpush3.msra.mxu1 %v476_v23  ;;  %2719 = vmatprep.subr.mxu0 %v459_v24  ;;  %v431_v22 = vld [vmem:[%s3546_s30 + $0x410] sm:$0xff]  ;;  %v446_v24 = vld [vmem:[%s3546_s30 + $0x488] sm:$0xff] }
  0x85   : > { %2763 = vmatprep.subr.mxu1 %v491_v25  ;;  %1116 = vmatprep.mubr.f32.mxu0 %v198_v26  ;;  %v463_v23 = vld [vmem:[%s3546_s30 + $0x510] sm:$0xff]  ;;  %v478_v25 = vld [vmem:[%s3546_s30 + $0x588] sm:$0xff] }
  0x86   : > { %2720 = vmatpush3.msra.mxu0 %v443_v27  ;;  %2764 = vmatpush3.msra.mxu1 %v475_v28  ;;  %v430_v26 = vld [vmem:[%s3546_s30 + $0x408] sm:$0xff]  ;;  %v445_v28 = vld [vmem:[%s3546_s30 + $0x480] sm:$0xff] }
  0x87   : > { %1117 = vmatmul.mubr.f32.gmra.mxu0 %v197_v29  ;;  %2721 = vmatprep.subr.mxu0 %v458_v30  ;;  %v462_v27 = vld [vmem:[%s3546_s30 + $0x508] sm:$0xff]  ;;  %v477_v29 = vld [vmem:[%s3546_s30 + $0x580] sm:$0xff] }
  0x88   : > { %2765 = vmatprep.subr.mxu1 %v490_v31  ;;  %1201 = vmatprep.mubr.f32.mxu1 %v200_v32  ;;  %v429_v30 = vld [vmem:[%s3546_s30 + $0x400] sm:$0xff]  ;;  %v166_v31 = vld [vmem:[%s4796_s0 + $0x48] sm:$0xff] }
  0x89   : > { %2722 = vmatpush3.msra.mxu0 %v442_v33  ;;  %2766 = vmatpush3.msra.mxu1 %v474_v34  ;;  %v461_v32 = vld [vmem:[%s3546_s30 + $0x500] sm:$0xff]  ;;  %v168_v34 = vld [vmem:[%s4796_s0 + $0x58] sm:$0xff] }
  0x8a   : > { %2723 = vmatprep.subr.mxu0 %v457_v35  ;;  %1202 = vmatmul.mubr.f32.gmra.mxu1 %v199_v36  ;;  %v165_v33 = vld [vmem:[%s4796_s0 + $0x40] sm:$0xff]  ;;  %v524_v35 = vld [vmem:[%s3546_s30 + $0x6f8] sm:$0xff] }
  0x8b   : > { %2767 = vmatprep.subr.mxu1 %v489_v37  ;;  %1121 = vmatprep.mubr.f32.mxu0 %v234_v38  ;;  %v556_v36 = vld [vmem:[%s3546_s30 + $0x7f8] sm:$0xff]  ;;  %v167_v37 = vld [vmem:[%s4796_s0 + $0x50] sm:$0xff] }
  0x8c   : > { %2724 = vmatpush3.msra.mxu0 %v441_v39  ;;  %2768 = vmatpush3.msra.mxu1 %v473_v40  ;;  %v508_v38 = vld [vmem:[%s3546_s30 + $0x678] sm:$0xff]  ;;  %v523_v40 = vld [vmem:[%s3546_s30 + $0x6f0] sm:$0xff] }
  0x8d   : > { %1122 = vmatmul.mubr.f32.gmra.mxu0 %v233_v41  ;;  %2725 = vmatprep.subr.mxu0 %v456_v42  ;;  %v540_v39 = vld [vmem:[%s3546_s30 + $0x778] sm:$0xff]  ;;  %v555_v41 = vld [vmem:[%s3546_s30 + $0x7f0] sm:$0xff]  ;;  %v202_v42 = vld [vmem:[%s4796_s0 + $0x168] sm:$0xff] }
  0x8e   : > { %2769 = vmatprep.subr.mxu1 %v488_v43  ;;  %1206 = vmatprep.mubr.f32.mxu1 %v236_v44  ;;  %v507_v43 = vld [vmem:[%s3546_s30 + $0x670] sm:$0xff] }
  0x8f   : > { %2726 = vmatpush3.msra.mxu0 %v440_v45  ;;  %2770 = vmatpush3.msra.mxu1 %v472_v46  ;;  %v539_v44 = vld [vmem:[%s3546_s30 + $0x770] sm:$0xff]  ;;  %v201_v45 = vld [vmem:[%s4796_s0 + $0x160] sm:$0xff]  ;;  %v522_v46 = vld [vmem:[%s3546_s30 + $0x6e8] sm:$0xff] }
  0x90   : > { %2727 = vmatprep.subr.mxu0 %v455_v47  ;;  %1207 = vmatmul.mubr.f32.gmra.mxu1 %v235_v48  ;;  %v554_v47 = vld [vmem:[%s3546_s30 + $0x7e8] sm:$0xff]  ;;  %v204_v48 = vld [vmem:[%s4796_s0 + $0x178] sm:$0xff] }
  0x91   : > { %2771 = vmatprep.subr.mxu1 %v487_v49  ;;  %1126 = vmatprep.mubr.f32.mxu0 %v270_v50  ;;  %v506_v49 = vld [vmem:[%s3546_s30 + $0x668] sm:$0xff] }
  0x92   : > { %2728 = vmatpush3.msra.mxu0 %v439_v51  ;;  %2772 = vmatpush3.msra.mxu1 %v471_v52  ;;  %v538_v50 = vld [vmem:[%s3546_s30 + $0x768] sm:$0xff]  ;;  %v521_v51 = vld [vmem:[%s3546_s30 + $0x6e0] sm:$0xff]  ;;  %v203_v52 = vld [vmem:[%s4796_s0 + $0x170] sm:$0xff] }
  0x93   : > { %1127 = vmatmul.mubr.f32.gmra.mxu0 %v269_v53  ;;  %2729 = vmatprep.subr.mxu0 %v454_v54  ;;  %v553_v53 = vld [vmem:[%s3546_s30 + $0x7e0] sm:$0xff]  ;;  %v238_v54 = vld [vmem:[%s4796_s0 + $0x288] sm:$0xff] }
  0x94   : > { %2773 = vmatprep.subr.mxu1 %v486_v55  ;;  %1211 = vmatprep.mubr.f32.mxu1 %v272_v56  ;;  %v505_v55 = vld [vmem:[%s3546_s30 + $0x660] sm:$0xff] }
  0x95   : > { %2730 = vmatpush3.msra.mxu0 %v438_v57  ;;  %2774 = vmatpush3.msra.mxu1 %v470_v58  ;;  %v537_v56 = vld [vmem:[%s3546_s30 + $0x760] sm:$0xff]  ;;  %v520_v58 = vld [vmem:[%s3546_s30 + $0x6d8] sm:$0xff] }
  0x96   : > { %2731 = vmatprep.subr.mxu0 %v453_v59  ;;  %1212 = vmatmul.mubr.f32.gmra.mxu1 %v271_v60  ;;  %v237_v57 = vld [vmem:[%s4796_s0 + $0x280] sm:$0xff]  ;;  %v552_v59 = vld [vmem:[%s3546_s30 + $0x7d8] sm:$0xff] }
  0x97   : > { %2775 = vmatprep.subr.mxu1 %v485_v61  ;;  %2732 = vmatpush3.msra.mxu0 %v437_v62  ;;  %v240_v60 = vld [vmem:[%s4796_s0 + $0x298] sm:$0xff] }
  0x98   : > { %2776 = vmatpush3.msra.mxu1 %v469_v63  ;;  %2733 = vmatprep.subr.mxu0 %v452_v0  ;;  %v504_v61 = vld [vmem:[%s3546_s30 + $0x658] sm:$0xff]  ;;  %v519_v63 = vld [vmem:[%s3546_s30 + $0x6d0] sm:$0xff] }
  0x99   : > { %2777 = vmatprep.subr.mxu1 %v484_v1  ;;  %2734 = vmatpush3.msra.mxu0 %v436_v2  ;;  %v536_v62 = vld [vmem:[%s3546_s30 + $0x758] sm:$0xff]  ;;  %v239_v0 = vld [vmem:[%s4796_s0 + $0x290] sm:$0xff]  ;;  %v274_v2 = vld [vmem:[%s4796_s0 + $0x3a8] sm:$0xff] }
  0x9a   : > { %2778 = vmatpush3.msra.mxu1 %v468_v3  ;;  %2735 = vmatprep.subr.mxu0 %v451_v4  ;;  %v551_v1 = vld [vmem:[%s3546_s30 + $0x7d0] sm:$0xff] }
  0x9b   : > { %2779 = vmatprep.subr.mxu1 %v483_v5  ;;  %2736 = vmatpush3.msra.mxu0 %v435_v6  ;;  %v503_v3 = vld [vmem:[%s3546_s30 + $0x650] sm:$0xff]  ;;  %v273_v5 = vld [vmem:[%s4796_s0 + $0x3a0] sm:$0xff]  ;;  %v518_v6 = vld [vmem:[%s3546_s30 + $0x6c8] sm:$0xff] }
  0x9c   : > { %2780 = vmatpush3.msra.mxu1 %v467_v7  ;;  %2737 = vmatprep.subr.mxu0 %v450_v8  ;;  %v535_v4 = vld [vmem:[%s3546_s30 + $0x750] sm:$0xff]  ;;  %v550_v7 = vld [vmem:[%s3546_s30 + $0x7c8] sm:$0xff]  ;;  %v276_v8 = vld [vmem:[%s4796_s0 + $0x3b8] sm:$0xff] }
  0x9d   : > { %2781 = vmatprep.subr.mxu1 %v482_v9  ;;  %2738 = vmatpush3.msra.mxu0 %v434_v10  ;;  %v502_v9 = vld [vmem:[%s3546_s30 + $0x648] sm:$0xff] }
  0x9e   : > { %2782 = vmatpush3.msra.mxu1 %v466_v11  ;;  %2739 = vmatprep.subr.mxu0 %v449_v12  ;;  %v534_v10 = vld [vmem:[%s3546_s30 + $0x748] sm:$0xff]  ;;  %v517_v11 = vld [vmem:[%s3546_s30 + $0x6c0] sm:$0xff]  ;;  %v275_v12 = vld [vmem:[%s4796_s0 + $0x3b0] sm:$0xff] }
  0x9f   : > { %2783 = vmatprep.subr.mxu1 %v481_v13  ;;  %2740 = vmatpush3.msra.mxu0 %v433_v14  ;;  %v549_v13 = vld [vmem:[%s3546_s30 + $0x7c0] sm:$0xff] }
  0xa0   : > { %2784 = vmatpush3.msra.mxu1 %v465_v15  ;;  %2741 = vmatprep.subr.mxu0 %v448_v16  ;;  %v501_v14 = vld [vmem:[%s3546_s30 + $0x640] sm:$0xff]  ;;  %v516_v16 = vld [vmem:[%s3546_s30 + $0x6b8] sm:$0xff] }
  0xa1   : > { %2785 = vmatprep.subr.mxu1 %v480_v17  ;;  %2742 = vmatpush3.msra.mxu0 %v432_v18  ;;  %v533_v15 = vld [vmem:[%s3546_s30 + $0x740] sm:$0xff]  ;;  %v548_v17 = vld [vmem:[%s3546_s30 + $0x7b8] sm:$0xff] }
  0xa2   : > { %2786 = vmatpush3.msra.mxu1 %v464_v19  ;;  %2743 = vmatprep.subr.mxu0 %v447_v20  ;;  %v500_v18 = vld [vmem:[%s3546_s30 + $0x638] sm:$0xff]  ;;  %v515_v20 = vld [vmem:[%s3546_s30 + $0x6b0] sm:$0xff] }
  0xa3   : > { %2787 = vmatprep.subr.mxu1 %v479_v21  ;;  %2744 = vmatpush3.msra.mxu0 %v431_v22  ;;  %v532_v19 = vld [vmem:[%s3546_s30 + $0x738] sm:$0xff]  ;;  %v547_v21 = vld [vmem:[%s3546_s30 + $0x7b0] sm:$0xff] }
  0xa4   : > { %2788 = vmatpush3.msra.mxu1 %v463_v23  ;;  %2745 = vmatprep.subr.mxu0 %v446_v24  ;;  %v499_v22 = vld [vmem:[%s3546_s30 + $0x630] sm:$0xff]  ;;  %v514_v24 = vld [vmem:[%s3546_s30 + $0x6a8] sm:$0xff] }
  0xa5   : > { %2789 = vmatprep.subr.mxu1 %v478_v25  ;;  %2746 = vmatpush3.msra.mxu0 %v430_v26  ;;  %v531_v23 = vld [vmem:[%s3546_s30 + $0x730] sm:$0xff]  ;;  %v546_v25 = vld [vmem:[%s3546_s30 + $0x7a8] sm:$0xff] }
  0xa6   : > { %2790 = vmatpush3.msra.mxu1 %v462_v27  ;;  %2747 = vmatprep.subr.mxu0 %v445_v28  ;;  %v498_v26 = vld [vmem:[%s3546_s30 + $0x628] sm:$0xff]  ;;  %v513_v28 = vld [vmem:[%s3546_s30 + $0x6a0] sm:$0xff] }
  0xa7   : > { %2791 = vmatprep.subr.mxu1 %v477_v29  ;;  %2748 = vmatpush3.msra.mxu0 %v429_v30  ;;  %v530_v27 = vld [vmem:[%s3546_s30 + $0x728] sm:$0xff]  ;;  %v545_v29 = vld [vmem:[%s3546_s30 + $0x7a0] sm:$0xff] }
  0xa8   : > { %1281 = vmatprep.mubr.f32.mxu0 %v166_v31  ;;  %2792 = vmatpush3.msra.mxu1 %v461_v32  ;;  %v497_v30 = vld [vmem:[%s3546_s30 + $0x620] sm:$0xff]  ;;  %v512_v32 = vld [vmem:[%s3546_s30 + $0x698] sm:$0xff] }
  0xa9   : > { %1282 = vmatmul.mubr.f32.vlgmr.msra.gmra.mxu0 %v165_v33  ;;  %1366 = vmatprep.mubr.f32.mxu1 %v168_v34  ;;  %v529_v31 = vld [vmem:[%s3546_s30 + $0x720] sm:$0xff]  ;;  %v544_v33 = vld [vmem:[%s3546_s30 + $0x798] sm:$0xff] }
  0xaa   : > { %2805 = vmatprep.subr.mxu0 %v524_v35  ;;  %2849 = vmatprep.subr.mxu1 %v556_v36  ;;  %v496_v34 = vld [vmem:[%s3546_s30 + $0x618] sm:$0xff]  ;;  %v511_v36 = vld [vmem:[%s3546_s30 + $0x690] sm:$0xff] }
  0xab   : > { %1367 = vmatmul.mubr.f32.vlgmr.msra.gmra.mxu1 %v167_v37  ;;  %2806 = vmatpush3.msra.mxu0 %v508_v38  ;;  %v528_v35 = vld [vmem:[%s3546_s30 + $0x718] sm:$0xff]  ;;  %v543_v37 = vld [vmem:[%s3546_s30 + $0x790] sm:$0xff] }
  0xac   : > { %2850 = vmatpush3.msra.mxu1 %v540_v39  ;;  %2807 = vmatprep.subr.mxu0 %v523_v40  ;;  %v495_v38 = vld [vmem:[%s3546_s30 + $0x610] sm:$0xff]  ;;  %v510_v40 = vld [vmem:[%s3546_s30 + $0x688] sm:$0xff] }
  0xad   : > { %2851 = vmatprep.subr.mxu1 %v555_v41  ;;  %1286 = vmatprep.mubr.f32.mxu0 %v202_v42  ;;  %v527_v39 = vld [vmem:[%s3546_s30 + $0x710] sm:$0xff]  ;;  %v542_v41 = vld [vmem:[%s3546_s30 + $0x788] sm:$0xff] }
  0xae   : > { %2808 = vmatpush3.msra.mxu0 %v507_v43  ;;  %2852 = vmatpush3.msra.mxu1 %v539_v44  ;;  %v494_v42 = vld [vmem:[%s3546_s30 + $0x608] sm:$0xff]  ;;  %v509_v44 = vld [vmem:[%s3546_s30 + $0x680] sm:$0xff] }
  0xaf   : > { %1287 = vmatmul.mubr.f32.gmra.mxu0 %v201_v45  ;;  %2809 = vmatprep.subr.mxu0 %v522_v46  ;;  %v526_v43 = vld [vmem:[%s3546_s30 + $0x708] sm:$0xff]  ;;  %v541_v45 = vld [vmem:[%s3546_s30 + $0x780] sm:$0xff] }
  0xb0   : > { %2853 = vmatprep.subr.mxu1 %v554_v47  ;;  %1371 = vmatprep.mubr.f32.mxu1 %v204_v48  ;;  %v493_v46 = vld [vmem:[%s3546_s30 + $0x600] sm:$0xff]  ;;  %v170_v47 = vld [vmem:[%s4796_s0 + $0x68] sm:$0xff] }
  0xb1   : > { %2810 = vmatpush3.msra.mxu0 %v506_v49  ;;  %2854 = vmatpush3.msra.mxu1 %v538_v50  ;;  %v525_v48 = vld [vmem:[%s3546_s30 + $0x700] sm:$0xff]  ;;  %v172_v50 = vld [vmem:[%s4796_s0 + $0x78] sm:$0xff] }
  0xb2   : > { %2811 = vmatprep.subr.mxu0 %v521_v51  ;;  %1372 = vmatmul.mubr.f32.gmra.mxu1 %v203_v52  ;;  %v169_v49 = vld [vmem:[%s4796_s0 + $0x60] sm:$0xff]  ;;  %v588_v51 = vld [vmem:[%s3546_s30 + $0x8f8] sm:$0xff] }
  0xb3   : > { %2855 = vmatprep.subr.mxu1 %v553_v53  ;;  %1291 = vmatprep.mubr.f32.mxu0 %v238_v54  ;;  %v620_v52 = vld [vmem:[%s3546_s30 + $0x9f8] sm:$0xff]  ;;  %v171_v53 = vld [vmem:[%s4796_s0 + $0x70] sm:$0xff] }
  0xb4   : > { %2812 = vmatpush3.msra.mxu0 %v505_v55  ;;  %2856 = vmatpush3.msra.mxu1 %v537_v56  ;;  %v572_v54 = vld [vmem:[%s3546_s30 + $0x878] sm:$0xff]  ;;  %v587_v56 = vld [vmem:[%s3546_s30 + $0x8f0] sm:$0xff] }
  0xb5   : > { %1292 = vmatmul.mubr.f32.gmra.mxu0 %v237_v57  ;;  %2813 = vmatprep.subr.mxu0 %v520_v58  ;;  %v604_v55 = vld [vmem:[%s3546_s30 + $0x978] sm:$0xff]  ;;  %v619_v57 = vld [vmem:[%s3546_s30 + $0x9f0] sm:$0xff]  ;;  %v206_v58 = vld [vmem:[%s4796_s0 + $0x188] sm:$0xff] }
  0xb6   : > { %2857 = vmatprep.subr.mxu1 %v552_v59  ;;  %1376 = vmatprep.mubr.f32.mxu1 %v240_v60  ;;  %v571_v59 = vld [vmem:[%s3546_s30 + $0x870] sm:$0xff] }
  0xb7   : > { %2814 = vmatpush3.msra.mxu0 %v504_v61  ;;  %2858 = vmatpush3.msra.mxu1 %v536_v62  ;;  %v603_v60 = vld [vmem:[%s3546_s30 + $0x970] sm:$0xff]  ;;  %v205_v61 = vld [vmem:[%s4796_s0 + $0x180] sm:$0xff]  ;;  %v586_v62 = vld [vmem:[%s3546_s30 + $0x8e8] sm:$0xff] }
  0xb8   : > { %2815 = vmatprep.subr.mxu0 %v519_v63  ;;  %1377 = vmatmul.mubr.f32.gmra.mxu1 %v239_v0  ;;  %v618_v63 = vld [vmem:[%s3546_s30 + $0x9e8] sm:$0xff]  ;;  %v208_v0 = vld [vmem:[%s4796_s0 + $0x198] sm:$0xff] }
  0xb9   : > { %2859 = vmatprep.subr.mxu1 %v551_v1  ;;  %1296 = vmatprep.mubr.f32.mxu0 %v274_v2  ;;  %v570_v1 = vld [vmem:[%s3546_s30 + $0x868] sm:$0xff] }
  0xba   : > { %2816 = vmatpush3.msra.mxu0 %v503_v3  ;;  %2860 = vmatpush3.msra.mxu1 %v535_v4  ;;  %v602_v2 = vld [vmem:[%s3546_s30 + $0x968] sm:$0xff]  ;;  %v585_v3 = vld [vmem:[%s3546_s30 + $0x8e0] sm:$0xff]  ;;  %v207_v4 = vld [vmem:[%s4796_s0 + $0x190] sm:$0xff] }
  0xbb   : > { %1297 = vmatmul.mubr.f32.gmra.mxu0 %v273_v5  ;;  %2817 = vmatprep.subr.mxu0 %v518_v6  ;;  %v617_v5 = vld [vmem:[%s3546_s30 + $0x9e0] sm:$0xff]  ;;  %v242_v6 = vld [vmem:[%s4796_s0 + $0x2a8] sm:$0xff] }
  0xbc   : > { %2861 = vmatprep.subr.mxu1 %v550_v7  ;;  %1381 = vmatprep.mubr.f32.mxu1 %v276_v8  ;;  %v569_v7 = vld [vmem:[%s3546_s30 + $0x860] sm:$0xff] }
  0xbd   : > { %2818 = vmatpush3.msra.mxu0 %v502_v9  ;;  %2862 = vmatpush3.msra.mxu1 %v534_v10  ;;  %v601_v8 = vld [vmem:[%s3546_s30 + $0x960] sm:$0xff]  ;;  %v584_v10 = vld [vmem:[%s3546_s30 + $0x8d8] sm:$0xff] }
  0xbe   : > { %2819 = vmatprep.subr.mxu0 %v517_v11  ;;  %1382 = vmatmul.mubr.f32.gmra.mxu1 %v275_v12  ;;  %v241_v9 = vld [vmem:[%s4796_s0 + $0x2a0] sm:$0xff]  ;;  %v616_v11 = vld [vmem:[%s3546_s30 + $0x9d8] sm:$0xff] }
  0xbf   : > { %2863 = vmatprep.subr.mxu1 %v549_v13  ;;  %2820 = vmatpush3.msra.mxu0 %v501_v14  ;;  %v244_v12 = vld [vmem:[%s4796_s0 + $0x2b8] sm:$0xff] }
  0xc0   : > { %2864 = vmatpush3.msra.mxu1 %v533_v15  ;;  %2821 = vmatprep.subr.mxu0 %v516_v16  ;;  %v568_v13 = vld [vmem:[%s3546_s30 + $0x858] sm:$0xff]  ;;  %v583_v15 = vld [vmem:[%s3546_s30 + $0x8d0] sm:$0xff] }
  0xc1   : > { %2865 = vmatprep.subr.mxu1 %v548_v17  ;;  %2822 = vmatpush3.msra.mxu0 %v500_v18  ;;  %v600_v14 = vld [vmem:[%s3546_s30 + $0x958] sm:$0xff]  ;;  %v243_v16 = vld [vmem:[%s4796_s0 + $0x2b0] sm:$0xff]  ;;  %v278_v18 = vld [vmem:[%s4796_s0 + $0x3c8] sm:$0xff] }
  0xc2   : > { %2866 = vmatpush3.msra.mxu1 %v532_v19  ;;  %2823 = vmatprep.subr.mxu0 %v515_v20  ;;  %v615_v17 = vld [vmem:[%s3546_s30 + $0x9d0] sm:$0xff] }
  0xc3   : > { %2867 = vmatprep.subr.mxu1 %v547_v21  ;;  %2824 = vmatpush3.msra.mxu0 %v499_v22  ;;  %v567_v19 = vld [vmem:[%s3546_s30 + $0x850] sm:$0xff]  ;;  %v277_v21 = vld [vmem:[%s4796_s0 + $0x3c0] sm:$0xff]  ;;  %v582_v22 = vld [vmem:[%s3546_s30 + $0x8c8] sm:$0xff] }
  0xc4   : > { %2868 = vmatpush3.msra.mxu1 %v531_v23  ;;  %2825 = vmatprep.subr.mxu0 %v514_v24  ;;  %v599_v20 = vld [vmem:[%s3546_s30 + $0x950] sm:$0xff]  ;;  %v614_v23 = vld [vmem:[%s3546_s30 + $0x9c8] sm:$0xff]  ;;  %v280_v24 = vld [vmem:[%s4796_s0 + $0x3d8] sm:$0xff] }
  0xc5   : > { %2869 = vmatprep.subr.mxu1 %v546_v25  ;;  %2826 = vmatpush3.msra.mxu0 %v498_v26  ;;  %v566_v25 = vld [vmem:[%s3546_s30 + $0x848] sm:$0xff] }
  0xc6   : > { %2870 = vmatpush3.msra.mxu1 %v530_v27  ;;  %2827 = vmatprep.subr.mxu0 %v513_v28  ;;  %v598_v26 = vld [vmem:[%s3546_s30 + $0x948] sm:$0xff]  ;;  %v581_v27 = vld [vmem:[%s3546_s30 + $0x8c0] sm:$0xff]  ;;  %v279_v28 = vld [vmem:[%s4796_s0 + $0x3d0] sm:$0xff] }
  0xc7   : > { %2871 = vmatprep.subr.mxu1 %v545_v29  ;;  %2828 = vmatpush3.msra.mxu0 %v497_v30  ;;  %v613_v29 = vld [vmem:[%s3546_s30 + $0x9c0] sm:$0xff] }
  0xc8   : > { %2872 = vmatpush3.msra.mxu1 %v529_v31  ;;  %2829 = vmatprep.subr.mxu0 %v512_v32  ;;  %v565_v30 = vld [vmem:[%s3546_s30 + $0x840] sm:$0xff]  ;;  %v580_v32 = vld [vmem:[%s3546_s30 + $0x8b8] sm:$0xff] }
  0xc9   : > { %2873 = vmatprep.subr.mxu1 %v544_v33  ;;  %2830 = vmatpush3.msra.mxu0 %v496_v34  ;;  %v597_v31 = vld [vmem:[%s3546_s30 + $0x940] sm:$0xff]  ;;  %v612_v33 = vld [vmem:[%s3546_s30 + $0x9b8] sm:$0xff] }
  0xca   : > { %2874 = vmatpush3.msra.mxu1 %v528_v35  ;;  %2831 = vmatprep.subr.mxu0 %v511_v36  ;;  %v564_v34 = vld [vmem:[%s3546_s30 + $0x838] sm:$0xff]  ;;  %v579_v36 = vld [vmem:[%s3546_s30 + $0x8b0] sm:$0xff] }
  0xcb   : > { %2875 = vmatprep.subr.mxu1 %v543_v37  ;;  %2832 = vmatpush3.msra.mxu0 %v495_v38  ;;  %v596_v35 = vld [vmem:[%s3546_s30 + $0x938] sm:$0xff]  ;;  %v611_v37 = vld [vmem:[%s3546_s30 + $0x9b0] sm:$0xff] }
  0xcc   : > { %2876 = vmatpush3.msra.mxu1 %v527_v39  ;;  %2833 = vmatprep.subr.mxu0 %v510_v40  ;;  %v563_v38 = vld [vmem:[%s3546_s30 + $0x830] sm:$0xff]  ;;  %v578_v40 = vld [vmem:[%s3546_s30 + $0x8a8] sm:$0xff] }
  0xcd   : > { %2877 = vmatprep.subr.mxu1 %v542_v41  ;;  %2834 = vmatpush3.msra.mxu0 %v494_v42  ;;  %v595_v39 = vld [vmem:[%s3546_s30 + $0x930] sm:$0xff]  ;;  %v610_v41 = vld [vmem:[%s3546_s30 + $0x9a8] sm:$0xff] }
  0xce   : > { %2878 = vmatpush3.msra.mxu1 %v526_v43  ;;  %2835 = vmatprep.subr.mxu0 %v509_v44  ;;  %v562_v42 = vld [vmem:[%s3546_s30 + $0x828] sm:$0xff]  ;;  %v577_v44 = vld [vmem:[%s3546_s30 + $0x8a0] sm:$0xff] }
  0xcf   : > { %2879 = vmatprep.subr.mxu1 %v541_v45  ;;  %2836 = vmatpush3.msra.mxu0 %v493_v46  ;;  %v594_v43 = vld [vmem:[%s3546_s30 + $0x928] sm:$0xff]  ;;  %v609_v45 = vld [vmem:[%s3546_s30 + $0x9a0] sm:$0xff] }
  0xd0   : > { %1451 = vmatprep.mubr.f32.mxu0 %v170_v47  ;;  %2880 = vmatpush3.msra.mxu1 %v525_v48  ;;  %v561_v46 = vld [vmem:[%s3546_s30 + $0x820] sm:$0xff]  ;;  %v576_v48 = vld [vmem:[%s3546_s30 + $0x898] sm:$0xff] }
  0xd1   : > { %1452 = vmatmul.mubr.f32.vlgmr.msra.gmra.mxu0 %v169_v49  ;;  %1536 = vmatprep.mubr.f32.mxu1 %v172_v50  ;;  %v593_v47 = vld [vmem:[%s3546_s30 + $0x920] sm:$0xff]  ;;  %v608_v49 = vld [vmem:[%s3546_s30 + $0x998] sm:$0xff] }
  0xd2   : > { %2893 = vmatprep.subr.mxu0 %v588_v51  ;;  %2937 = vmatprep.subr.mxu1 %v620_v52  ;;  %v560_v50 = vld [vmem:[%s3546_s30 + $0x818] sm:$0xff]  ;;  %v575_v52 = vld [vmem:[%s3546_s30 + $0x890] sm:$0xff] }
  0xd3   : > { %1537 = vmatmul.mubr.f32.vlgmr.msra.gmra.mxu1 %v171_v53  ;;  %2894 = vmatpush3.msra.mxu0 %v572_v54  ;;  %v592_v51 = vld [vmem:[%s3546_s30 + $0x918] sm:$0xff]  ;;  %v607_v53 = vld [vmem:[%s3546_s30 + $0x990] sm:$0xff] }
  0xd4   : > { %2938 = vmatpush3.msra.mxu1 %v604_v55  ;;  %2895 = vmatprep.subr.mxu0 %v587_v56  ;;  %v559_v54 = vld [vmem:[%s3546_s30 + $0x810] sm:$0xff]  ;;  %v574_v56 = vld [vmem:[%s3546_s30 + $0x888] sm:$0xff] }
  0xd5   : > { %2939 = vmatprep.subr.mxu1 %v619_v57  ;;  %1456 = vmatprep.mubr.f32.mxu0 %v206_v58  ;;  %v591_v55 = vld [vmem:[%s3546_s30 + $0x910] sm:$0xff]  ;;  %v606_v57 = vld [vmem:[%s3546_s30 + $0x988] sm:$0xff] }
  0xd6   : > { %2896 = vmatpush3.msra.mxu0 %v571_v59  ;;  %2940 = vmatpush3.msra.mxu1 %v603_v60  ;;  %v558_v58 = vld [vmem:[%s3546_s30 + $0x808] sm:$0xff]  ;;  %v573_v60 = vld [vmem:[%s3546_s30 + $0x880] sm:$0xff] }
  0xd7   : > { %1457 = vmatmul.mubr.f32.gmra.mxu0 %v205_v61  ;;  %2897 = vmatprep.subr.mxu0 %v586_v62  ;;  %v590_v59 = vld [vmem:[%s3546_s30 + $0x908] sm:$0xff]  ;;  %v605_v61 = vld [vmem:[%s3546_s30 + $0x980] sm:$0xff] }
  0xd8   : > { %2941 = vmatprep.subr.mxu1 %v618_v63  ;;  %1541 = vmatprep.mubr.f32.mxu1 %v208_v0  ;;  %v557_v62 = vld [vmem:[%s3546_s30 + $0x800] sm:$0xff]  ;;  %v174_v63 = vld [vmem:[%s4796_s0 + $0x88] sm:$0xff] }
  0xd9   : > { %2898 = vmatpush3.msra.mxu0 %v570_v1  ;;  %2942 = vmatpush3.msra.mxu1 %v602_v2  ;;  %v589_v0 = vld [vmem:[%s3546_s30 + $0x900] sm:$0xff]  ;;  %v176_v2 = vld [vmem:[%s4796_s0 + $0x98] sm:$0xff] }
  0xda   : > { %2899 = vmatprep.subr.mxu0 %v585_v3  ;;  %1542 = vmatmul.mubr.f32.gmra.mxu1 %v207_v4  ;;  %v173_v1 = vld [vmem:[%s4796_s0 + $0x80] sm:$0xff]  ;;  %v652_v3 = vld [vmem:[%s3546_s30 + $0xaf8] sm:$0xff] }
  0xdb   : > { %2943 = vmatprep.subr.mxu1 %v617_v5  ;;  %1461 = vmatprep.mubr.f32.mxu0 %v242_v6  ;;  %v684_v4 = vld [vmem:[%s3546_s30 + $0xbf8] sm:$0xff]  ;;  %v175_v5 = vld [vmem:[%s4796_s0 + $0x90] sm:$0xff] }
  0xdc   : > { %2900 = vmatpush3.msra.mxu0 %v569_v7  ;;  %2944 = vmatpush3.msra.mxu1 %v601_v8  ;;  %v636_v6 = vld [vmem:[%s3546_s30 + $0xa78] sm:$0xff]  ;;  %v651_v8 = vld [vmem:[%s3546_s30 + $0xaf0] sm:$0xff] }
  0xdd   : > { %1462 = vmatmul.mubr.f32.gmra.mxu0 %v241_v9  ;;  %2901 = vmatprep.subr.mxu0 %v584_v10  ;;  %v668_v7 = vld [vmem:[%s3546_s30 + $0xb78] sm:$0xff]  ;;  %v683_v9 = vld [vmem:[%s3546_s30 + $0xbf0] sm:$0xff]  ;;  %v210_v10 = vld [vmem:[%s4796_s0 + $0x1a8] sm:$0xff] }
  0xde   : > { %2945 = vmatprep.subr.mxu1 %v616_v11  ;;  %1546 = vmatprep.mubr.f32.mxu1 %v244_v12  ;;  %v635_v11 = vld [vmem:[%s3546_s30 + $0xa70] sm:$0xff] }
  0xdf   : > { %2902 = vmatpush3.msra.mxu0 %v568_v13  ;;  %2946 = vmatpush3.msra.mxu1 %v600_v14  ;;  %v667_v12 = vld [vmem:[%s3546_s30 + $0xb70] sm:$0xff]  ;;  %v209_v13 = vld [vmem:[%s4796_s0 + $0x1a0] sm:$0xff]  ;;  %v650_v14 = vld [vmem:[%s3546_s30 + $0xae8] sm:$0xff] }
  0xe0   : > { %2903 = vmatprep.subr.mxu0 %v583_v15  ;;  %1547 = vmatmul.mubr.f32.gmra.mxu1 %v243_v16  ;;  %v682_v15 = vld [vmem:[%s3546_s30 + $0xbe8] sm:$0xff]  ;;  %v212_v16 = vld [vmem:[%s4796_s0 + $0x1b8] sm:$0xff] }
  0xe1   : > { %2947 = vmatprep.subr.mxu1 %v615_v17  ;;  %1466 = vmatprep.mubr.f32.mxu0 %v278_v18  ;;  %v634_v17 = vld [vmem:[%s3546_s30 + $0xa68] sm:$0xff] }
  0xe2   : > { %2904 = vmatpush3.msra.mxu0 %v567_v19  ;;  %2948 = vmatpush3.msra.mxu1 %v599_v20  ;;  %v666_v18 = vld [vmem:[%s3546_s30 + $0xb68] sm:$0xff]  ;;  %v649_v19 = vld [vmem:[%s3546_s30 + $0xae0] sm:$0xff]  ;;  %v211_v20 = vld [vmem:[%s4796_s0 + $0x1b0] sm:$0xff] }
  0xe3   : > { %1467 = vmatmul.mubr.f32.gmra.mxu0 %v277_v21  ;;  %2905 = vmatprep.subr.mxu0 %v582_v22  ;;  %v681_v21 = vld [vmem:[%s3546_s30 + $0xbe0] sm:$0xff]  ;;  %v246_v22 = vld [vmem:[%s4796_s0 + $0x2c8] sm:$0xff] }
  0xe4   : > { %2949 = vmatprep.subr.mxu1 %v614_v23  ;;  %1551 = vmatprep.mubr.f32.mxu1 %v280_v24  ;;  %v633_v23 = vld [vmem:[%s3546_s30 + $0xa60] sm:$0xff] }
  0xe5   : > { %2906 = vmatpush3.msra.mxu0 %v566_v25  ;;  %2950 = vmatpush3.msra.mxu1 %v598_v26  ;;  %v665_v24 = vld [vmem:[%s3546_s30 + $0xb60] sm:$0xff]  ;;  %v648_v26 = vld [vmem:[%s3546_s30 + $0xad8] sm:$0xff] }
  0xe6   : > { %2907 = vmatprep.subr.mxu0 %v581_v27  ;;  %1552 = vmatmul.mubr.f32.gmra.mxu1 %v279_v28  ;;  %v245_v25 = vld [vmem:[%s4796_s0 + $0x2c0] sm:$0xff]  ;;  %v680_v27 = vld [vmem:[%s3546_s30 + $0xbd8] sm:$0xff] }
  0xe7   : > { %2951 = vmatprep.subr.mxu1 %v613_v29  ;;  %2908 = vmatpush3.msra.mxu0 %v565_v30  ;;  %v248_v28 = vld [vmem:[%s4796_s0 + $0x2d8] sm:$0xff] }
  0xe8   : > { %2952 = vmatpush3.msra.mxu1 %v597_v31  ;;  %2909 = vmatprep.subr.mxu0 %v580_v32  ;;  %v632_v29 = vld [vmem:[%s3546_s30 + $0xa58] sm:$0xff]  ;;  %v647_v31 = vld [vmem:[%s3546_s30 + $0xad0] sm:$0xff] }
  0xe9   : > { %2953 = vmatprep.subr.mxu1 %v612_v33  ;;  %2910 = vmatpush3.msra.mxu0 %v564_v34  ;;  %v664_v30 = vld [vmem:[%s3546_s30 + $0xb58] sm:$0xff]  ;;  %v247_v32 = vld [vmem:[%s4796_s0 + $0x2d0] sm:$0xff]  ;;  %v282_v34 = vld [vmem:[%s4796_s0 + $0x3e8] sm:$0xff] }
  0xea   : > { %2954 = vmatpush3.msra.mxu1 %v596_v35  ;;  %2911 = vmatprep.subr.mxu0 %v579_v36  ;;  %v679_v33 = vld [vmem:[%s3546_s30 + $0xbd0] sm:$0xff] }
  0xeb   : > { %2955 = vmatprep.subr.mxu1 %v611_v37  ;;  %2912 = vmatpush3.msra.mxu0 %v563_v38  ;;  %v631_v35 = vld [vmem:[%s3546_s30 + $0xa50] sm:$0xff]  ;;  %v281_v37 = vld [vmem:[%s4796_s0 + $0x3e0] sm:$0xff]  ;;  %v646_v38 = vld [vmem:[%s3546_s30 + $0xac8] sm:$0xff] }
  0xec   : > { %2956 = vmatpush3.msra.mxu1 %v595_v39  ;;  %2913 = vmatprep.subr.mxu0 %v578_v40  ;;  %v663_v36 = vld [vmem:[%s3546_s30 + $0xb50] sm:$0xff]  ;;  %v678_v39 = vld [vmem:[%s3546_s30 + $0xbc8] sm:$0xff]  ;;  %v284_v40 = vld [vmem:[%s4796_s0 + $0x3f8] sm:$0xff] }
  0xed   : > { %2957 = vmatprep.subr.mxu1 %v610_v41  ;;  %2914 = vmatpush3.msra.mxu0 %v562_v42  ;;  %v630_v41 = vld [vmem:[%s3546_s30 + $0xa48] sm:$0xff] }
  0xee   : > { %2958 = vmatpush3.msra.mxu1 %v594_v43  ;;  %2915 = vmatprep.subr.mxu0 %v577_v44  ;;  %v662_v42 = vld [vmem:[%s3546_s30 + $0xb48] sm:$0xff]  ;;  %v645_v43 = vld [vmem:[%s3546_s30 + $0xac0] sm:$0xff]  ;;  %v283_v44 = vld [vmem:[%s4796_s0 + $0x3f0] sm:$0xff] }
  0xef   : > { %2959 = vmatprep.subr.mxu1 %v609_v45  ;;  %2916 = vmatpush3.msra.mxu0 %v561_v46  ;;  %v677_v45 = vld [vmem:[%s3546_s30 + $0xbc0] sm:$0xff] }
  0xf0   : > { %2960 = vmatpush3.msra.mxu1 %v593_v47  ;;  %2917 = vmatprep.subr.mxu0 %v576_v48  ;;  %v629_v46 = vld [vmem:[%s3546_s30 + $0xa40] sm:$0xff]  ;;  %v644_v48 = vld [vmem:[%s3546_s30 + $0xab8] sm:$0xff] }
  0xf1   : > { %2961 = vmatprep.subr.mxu1 %v608_v49  ;;  %2918 = vmatpush3.msra.mxu0 %v560_v50  ;;  %v661_v47 = vld [vmem:[%s3546_s30 + $0xb40] sm:$0xff]  ;;  %v676_v49 = vld [vmem:[%s3546_s30 + $0xbb8] sm:$0xff] }
  0xf2   : > { %2962 = vmatpush3.msra.mxu1 %v592_v51  ;;  %2919 = vmatprep.subr.mxu0 %v575_v52  ;;  %v628_v50 = vld [vmem:[%s3546_s30 + $0xa38] sm:$0xff]  ;;  %v643_v52 = vld [vmem:[%s3546_s30 + $0xab0] sm:$0xff] }
  0xf3   : > { %2963 = vmatprep.subr.mxu1 %v607_v53  ;;  %2920 = vmatpush3.msra.mxu0 %v559_v54  ;;  %v660_v51 = vld [vmem:[%s3546_s30 + $0xb38] sm:$0xff]  ;;  %v675_v53 = vld [vmem:[%s3546_s30 + $0xbb0] sm:$0xff] }
  0xf4   : > { %2964 = vmatpush3.msra.mxu1 %v591_v55  ;;  %2921 = vmatprep.subr.mxu0 %v574_v56  ;;  %v627_v54 = vld [vmem:[%s3546_s30 + $0xa30] sm:$0xff]  ;;  %v642_v56 = vld [vmem:[%s3546_s30 + $0xaa8] sm:$0xff] }
  0xf5   : > { %2965 = vmatprep.subr.mxu1 %v606_v57  ;;  %2922 = vmatpush3.msra.mxu0 %v558_v58  ;;  %v659_v55 = vld [vmem:[%s3546_s30 + $0xb30] sm:$0xff]  ;;  %v674_v57 = vld [vmem:[%s3546_s30 + $0xba8] sm:$0xff] }
  0xf6   : > { %2966 = vmatpush3.msra.mxu1 %v590_v59  ;;  %2923 = vmatprep.subr.mxu0 %v573_v60  ;;  %v626_v58 = vld [vmem:[%s3546_s30 + $0xa28] sm:$0xff]  ;;  %v641_v60 = vld [vmem:[%s3546_s30 + $0xaa0] sm:$0xff] }
  0xf7   : > { %2967 = vmatprep.subr.mxu1 %v605_v61  ;;  %2924 = vmatpush3.msra.mxu0 %v557_v62  ;;  %v658_v59 = vld [vmem:[%s3546_s30 + $0xb28] sm:$0xff]  ;;  %v673_v61 = vld [vmem:[%s3546_s30 + $0xba0] sm:$0xff] }
  0xf8   : > { %1621 = vmatprep.mubr.f32.mxu0 %v174_v63  ;;  %2968 = vmatpush3.msra.mxu1 %v589_v0  ;;  %v625_v62 = vld [vmem:[%s3546_s30 + $0xa20] sm:$0xff]  ;;  %v640_v0 = vld [vmem:[%s3546_s30 + $0xa98] sm:$0xff] }
  0xf9   : > { %1622 = vmatmul.mubr.f32.vlgmr.msra.gmra.mxu0 %v173_v1  ;;  %1706 = vmatprep.mubr.f32.mxu1 %v176_v2  ;;  %v657_v63 = vld [vmem:[%s3546_s30 + $0xb20] sm:$0xff]  ;;  %v672_v1 = vld [vmem:[%s3546_s30 + $0xb98] sm:$0xff] }
  0xfa   : > { %2981 = vmatprep.subr.mxu0 %v652_v3  ;;  %3025 = vmatprep.subr.mxu1 %v684_v4  ;;  %v624_v2 = vld [vmem:[%s3546_s30 + $0xa18] sm:$0xff]  ;;  %v639_v4 = vld [vmem:[%s3546_s30 + $0xa90] sm:$0xff] }
  0xfb   : > { %1707 = vmatmul.mubr.f32.vlgmr.msra.gmra.mxu1 %v175_v5  ;;  %2982 = vmatpush3.msra.mxu0 %v636_v6  ;;  %v656_v3 = vld [vmem:[%s3546_s30 + $0xb18] sm:$0xff]  ;;  %v671_v5 = vld [vmem:[%s3546_s30 + $0xb90] sm:$0xff] }
  0xfc   : > { %3026 = vmatpush3.msra.mxu1 %v668_v7  ;;  %2983 = vmatprep.subr.mxu0 %v651_v8  ;;  %v623_v6 = vld [vmem:[%s3546_s30 + $0xa10] sm:$0xff]  ;;  %v638_v8 = vld [vmem:[%s3546_s30 + $0xa88] sm:$0xff] }
  0xfd   : > { %3027 = vmatprep.subr.mxu1 %v683_v9  ;;  %1626 = vmatprep.mubr.f32.mxu0 %v210_v10  ;;  %v655_v7 = vld [vmem:[%s3546_s30 + $0xb10] sm:$0xff]  ;;  %v670_v9 = vld [vmem:[%s3546_s30 + $0xb88] sm:$0xff] }
  0xfe   : > { %2984 = vmatpush3.msra.mxu0 %v635_v11  ;;  %3028 = vmatpush3.msra.mxu1 %v667_v12  ;;  %v622_v12 = vld [vmem:[%s3546_s30 + $0xa08] sm:$0xff] }
  0xff   : > { %1627 = vmatmul.mubr.f32.gmra.mxu0 %v209_v13  ;;  %2985 = vmatprep.subr.mxu0 %v650_v14  ;;  %v654_v13 = vld [vmem:[%s3546_s30 + $0xb08] sm:$0xff]  ;;  %v637_v14 = vld [vmem:[%s3546_s30 + $0xa80] sm:$0xff] }
 0x100   : > { %3029 = vmatprep.subr.mxu1 %v682_v15  ;;  %1711 = vmatprep.mubr.f32.mxu1 %v212_v16  ;;  %v669_v15 = vld [vmem:[%s3546_s30 + $0xb80] sm:$0xff] }
 0x101   : > { %2986 = vmatpush3.msra.mxu0 %v634_v17  ;;  %3030 = vmatpush3.msra.mxu1 %v666_v18  ;;  %v621_v18 = vld [vmem:[%s3546_s30 + $0xa00] sm:$0xff] }
 0x102   : > { %2987 = vmatprep.subr.mxu0 %v649_v19  ;;  %1712 = vmatmul.mubr.f32.gmra.mxu1 %v211_v20  ;;  %v178_v19 = vld [vmem:[%s4796_s0 + $0xa8] sm:$0xff] }
 0x103   : > { %3031 = vmatprep.subr.mxu1 %v681_v21  ;;  %1631 = vmatprep.mubr.f32.mxu0 %v246_v22  ;;  %v653_v22 = vld [vmem:[%s3546_s30 + $0xb00] sm:$0xff] }
 0x104   : > { %2988 = vmatpush3.msra.mxu0 %v633_v23  ;;  %3032 = vmatpush3.msra.mxu1 %v665_v24  ;;  %v177_v23 = vld [vmem:[%s4796_s0 + $0xa0] sm:$0xff]  ;;  %v180_v24 = vld [vmem:[%s4796_s0 + $0xb8] sm:$0xff] }
 0x105   : > { %1632 = vmatmul.mubr.f32.gmra.mxu0 %v245_v25  ;;  %2989 = vmatprep.subr.mxu0 %v648_v26  ;;  %v716_v25 = vld [vmem:[%s3546_s30 + $0xcf8] sm:$0xff] }
 0x106   : > { %3033 = vmatprep.subr.mxu1 %v680_v27  ;;  %1716 = vmatprep.mubr.f32.mxu1 %v248_v28  ;;  %v748_v27 = vld [vmem:[%s3546_s30 + $0xdf8] sm:$0xff]  ;;  %v179_v28 = vld [vmem:[%s4796_s0 + $0xb0] sm:$0xff] }
 0x107   : > { %2990 = vmatpush3.msra.mxu0 %v632_v29  ;;  %3034 = vmatpush3.msra.mxu1 %v664_v30  ;;  %v700_v29 = vld [vmem:[%s3546_s30 + $0xc78] sm:$0xff] }
 0x108   : > { %2991 = vmatprep.subr.mxu0 %v647_v31  ;;  %1717 = vmatmul.mubr.f32.gmra.mxu1 %v247_v32  ;;  %v732_v30 = vld [vmem:[%s3546_s30 + $0xd78] sm:$0xff]  ;;  %v715_v31 = vld [vmem:[%s3546_s30 + $0xcf0] sm:$0xff] }
 0x109   : > { %3035 = vmatprep.subr.mxu1 %v679_v33  ;;  %1636 = vmatprep.mubr.f32.mxu0 %v282_v34  ;;  %v747_v32 = vld [vmem:[%s3546_s30 + $0xdf0] sm:$0xff]  ;;  %v214_v33 = vld [vmem:[%s4796_s0 + $0x1c8] sm:$0xff] }
 0x10a   : > { %2992 = vmatpush3.msra.mxu0 %v631_v35  ;;  %3036 = vmatpush3.msra.mxu1 %v663_v36  ;;  %v699_v34 = vld [vmem:[%s3546_s30 + $0xc70] sm:$0xff]  ;;  %v213_v36 = vld [vmem:[%s4796_s0 + $0x1c0] sm:$0xff] }
 0x10b   : > { %1637 = vmatmul.mubr.f32.gmra.mxu0 %v281_v37  ;;  %2993 = vmatprep.subr.mxu0 %v646_v38  ;;  %v731_v35 = vld [vmem:[%s3546_s30 + $0xd70] sm:$0xff]  ;;  %v714_v37 = vld [vmem:[%s3546_s30 + $0xce8] sm:$0xff] }
 0x10c   : > { %3037 = vmatprep.subr.mxu1 %v678_v39  ;;  %1721 = vmatprep.mubr.f32.mxu1 %v284_v40  ;;  %v746_v38 = vld [vmem:[%s3546_s30 + $0xde8] sm:$0xff]  ;;  %v216_v39 = vld [vmem:[%s4796_s0 + $0x1d8] sm:$0xff] }
 0x10d   : > { %2994 = vmatpush3.msra.mxu0 %v630_v41  ;;  %3038 = vmatpush3.msra.mxu1 %v662_v42  ;;  %v698_v40 = vld [vmem:[%s3546_s30 + $0xc68] sm:$0xff]  ;;  %v713_v42 = vld [vmem:[%s3546_s30 + $0xce0] sm:$0xff] }
 0x10e   : > { %2995 = vmatprep.subr.mxu0 %v645_v43  ;;  %1722 = vmatmul.mubr.f32.gmra.mxu1 %v283_v44  ;;  %v730_v41 = vld [vmem:[%s3546_s30 + $0xd68] sm:$0xff]  ;;  %v215_v43 = vld [vmem:[%s4796_s0 + $0x1d0] sm:$0xff]  ;;  %v745_v44 = vld [vmem:[%s3546_s30 + $0xde0] sm:$0xff] }
 0x10f   : > { %3039 = vmatprep.subr.mxu1 %v677_v45  ;;  %2996 = vmatpush3.msra.mxu0 %v629_v46  ;;  %v250_v45 = vld [vmem:[%s4796_s0 + $0x2e8] sm:$0xff]  ;;  %v697_v46 = vld [vmem:[%s3546_s30 + $0xc60] sm:$0xff] }
 0x110   : > { %3040 = vmatpush3.msra.mxu1 %v661_v47  ;;  %2997 = vmatprep.subr.mxu0 %v644_v48  ;;  %v729_v47 = vld [vmem:[%s3546_s30 + $0xd60] sm:$0xff] }
 0x111   : > { %3041 = vmatprep.subr.mxu1 %v676_v49  ;;  %2998 = vmatpush3.msra.mxu0 %v628_v50  ;;  %v249_v48 = vld [vmem:[%s4796_s0 + $0x2e0] sm:$0xff]  ;;  %v712_v49 = vld [vmem:[%s3546_s30 + $0xcd8] sm:$0xff] }
 0x112   : > { %3042 = vmatpush3.msra.mxu1 %v660_v51  ;;  %2999 = vmatprep.subr.mxu0 %v643_v52  ;;  %v744_v50 = vld [vmem:[%s3546_s30 + $0xdd8] sm:$0xff] }
 0x113   : > { %3043 = vmatprep.subr.mxu1 %v675_v53  ;;  %3000 = vmatpush3.msra.mxu0 %v627_v54  ;;  %v252_v51 = vld [vmem:[%s4796_s0 + $0x2f8] sm:$0xff]  ;;  %v711_v54 = vld [vmem:[%s3546_s30 + $0xcd0] sm:$0xff] }
 0x114   : > { %3044 = vmatpush3.msra.mxu1 %v659_v55  ;;  %3001 = vmatprep.subr.mxu0 %v642_v56  ;;  %v696_v52 = vld [vmem:[%s3546_s30 + $0xc58] sm:$0xff]  ;;  %v251_v55 = vld [vmem:[%s4796_s0 + $0x2f0] sm:$0xff] }
 0x115   : > { %3045 = vmatprep.subr.mxu1 %v674_v57  ;;  %3002 = vmatpush3.msra.mxu0 %v626_v58  ;;  %v728_v53 = vld [vmem:[%s3546_s30 + $0xd58] sm:$0xff]  ;;  %v743_v56 = vld [vmem:[%s3546_s30 + $0xdd0] sm:$0xff]  ;;  %v286_v57 = vld [vmem:[%s4796_s0 + $0x408] sm:$0xff] }
 0x116   : > { %3046 = vmatpush3.msra.mxu1 %v658_v59  ;;  %3003 = vmatprep.subr.mxu0 %v641_v60  ;;  %v695_v58 = vld [vmem:[%s3546_s30 + $0xc50] sm:$0xff] }
 0x117   : > { %3047 = vmatprep.subr.mxu1 %v673_v61  ;;  %3004 = vmatpush3.msra.mxu0 %v625_v62  ;;  %v727_v61 = vld [vmem:[%s3546_s30 + $0xd50] sm:$0xff]  ;;  %v285_v62 = vld [vmem:[%s4796_s0 + $0x400] sm:$0xff] }
 0x118   : > { %3048 = vmatpush3.msra.mxu1 %v657_v63  ;;  %3005 = vmatprep.subr.mxu0 %v640_v0  ;;  %v710_v63 = vld [vmem:[%s3546_s30 + $0xcc8] sm:$0xff] }
 0x119   : > { %3049 = vmatprep.subr.mxu1 %v672_v1  ;;  %3006 = vmatpush3.msra.mxu0 %v624_v2  ;;  %v2573_v10 = vpop.f32.mrf.mxu0  ;;  %v742_v0 = vld [vmem:[%s3546_s30 + $0xdc8] sm:$0xff] }
 0x11a   : > { %3050 = vmatpush3.msra.mxu1 %v656_v3  ;;  %v2617_v11 = vpop.f32.mrf.mxu1  ;;  %3007 = vmatprep.subr.mxu0 %v639_v4  ;;  %v288_v3 = vld [vmem:[%s4796_s0 + $0x418] sm:$0xff]  ;;  %v694_v4 = vld [vmem:[%s3546_s30 + $0xc48] sm:$0xff] }
 0x11b   : > { %3051 = vmatprep.subr.mxu1 %v671_v5  ;;  %3008 = vmatpush3.msra.mxu0 %v623_v6  ;;  %v2574_v16 = vpop.f32.mrf.mxu0 }
 0x11c   : > { %3052 = vmatpush3.msra.mxu1 %v655_v7  ;;  %v2618_v17 = vpop.f32.mrf.mxu1  ;;  %3009 = vmatprep.subr.mxu0 %v638_v8  ;;  %v2575_v20 = vadd.f32 %v2574_v16, %v2573_v10  ;;  %v726_v7 = vld [vmem:[%s3546_s30 + $0xd48] sm:$0xff]  ;;  %v709_v8 = vld [vmem:[%s3546_s30 + $0xcc0] sm:$0xff]  ;;  %v708_v16 = vld [vmem:[%s3546_s30 + $0xcb8] sm:$0xff] }
 0x11d   : > { %3053 = vmatprep.subr.mxu1 %v670_v9  ;;  %v2619_v21 = vadd.f32 %v2618_v17, %v2617_v11  ;;  %3010 = vmatpush3.msra.mxu0 %v622_v12  ;;  %v287_v9 = vld [vmem:[%s4796_s0 + $0x410] sm:$0xff]  ;;  %v741_v10 = vld [vmem:[%s3546_s30 + $0xdc0] sm:$0xff]  ;;  %v740_v17 = vld [vmem:[%s3546_s30 + $0xdb8] sm:$0xff] }
 0x11e   : > { %3054 = vmatpush3.msra.mxu1 %v654_v13  ;;  %3011 = vmatprep.subr.mxu0 %v637_v14  ;;  %v693_v12 = vld [vmem:[%s3546_s30 + $0xc40] sm:$0xff] }
 0x11f   : > { %3055 = vmatprep.subr.mxu1 %v669_v15  ;;  %v4186_v26 = vadd.f32 %v2619_v21, %v2575_v20  ;;  %3012 = vmatpush3.msra.mxu0 %v621_v18  ;;  %v725_v13 = vld [vmem:[%s3546_s30 + $0xd40] sm:$0xff]  ;;  %v692_v18 = vld [vmem:[%s3546_s30 + $0xc38] sm:$0xff] }
 0x120   : > { %1791 = vmatprep.mubr.f32.mxu0 %v178_v19  ;;  %3056 = vmatpush3.msra.mxu1 %v653_v22  ;;  %v724_v19 = vld [vmem:[%s3546_s30 + $0xd38] sm:$0xff]  ;;  %v707_v22 = vld [vmem:[%s3546_s30 + $0xcb0] sm:$0xff] }
 0x121   : > { %1792 = vmatmul.mubr.f32.vlgmr.msra.gmra.mxu0 %v177_v23  ;;  %1876 = vmatprep.mubr.f32.mxu1 %v180_v24  ;;  %v739_v23 = vld [vmem:[%s3546_s30 + $0xdb0] sm:$0xff] }
 0x122   : > { %3069 = vmatprep.subr.mxu0 %v716_v25  ;;  %3113 = vmatprep.subr.mxu1 %v748_v27  ;;  %v691_v27 = vld [vmem:[%s3546_s30 + $0xc30] sm:$0xff] }
 0x123   : > { %1877 = vmatmul.mubr.f32.vlgmr.msra.gmra.mxu1 %v179_v28  ;;  %3070 = vmatpush3.msra.mxu0 %v700_v29  ;;  %v723_v28 = vld [vmem:[%s3546_s30 + $0xd30] sm:$0xff]  ;;  %v706_v29 = vld [vmem:[%s3546_s30 + $0xca8] sm:$0xff] }
 0x124   : > { %3114 = vmatpush3.msra.mxu1 %v732_v30  ;;  %3071 = vmatprep.subr.mxu0 %v715_v31  ;;  %v738_v30 = vld [vmem:[%s3546_s30 + $0xda8] sm:$0xff] }
 0x125   : > { %3115 = vmatprep.subr.mxu1 %v747_v32  ;;  %1796 = vmatprep.mubr.f32.mxu0 %v214_v33  ;;  %v690_v32 = vld [vmem:[%s3546_s30 + $0xc28] sm:$0xff] }
 0x126   : > { %3072 = vmatpush3.msra.mxu0 %v699_v34  ;;  %3116 = vmatpush3.msra.mxu1 %v731_v35  ;;  %v722_v33 = vld [vmem:[%s3546_s30 + $0xd28] sm:$0xff] }
 0x127   : > { %1797 = vmatmul.mubr.f32.gmra.mxu0 %v213_v36  ;;  %3073 = vmatprep.subr.mxu0 %v714_v37  ;;  %v705_v36 = vld [vmem:[%s3546_s30 + $0xca0] sm:$0xff] }
 0x128   : > { %3117 = vmatprep.subr.mxu1 %v746_v38  ;;  %1881 = vmatprep.mubr.f32.mxu1 %v216_v39  ;;  %v737_v37 = vld [vmem:[%s3546_s30 + $0xda0] sm:$0xff] }
 0x129   : > { %3074 = vmatpush3.msra.mxu0 %v698_v40  ;;  %3118 = vmatpush3.msra.mxu1 %v730_v41  ;;  %v689_v38 = vld [vmem:[%s3546_s30 + $0xc20] sm:$0xff] }
 0x12a   : > { %3075 = vmatprep.subr.mxu0 %v713_v42  ;;  %1882 = vmatmul.mubr.f32.gmra.mxu1 %v215_v43  ;;  %v721_v39 = vld [vmem:[%s3546_s30 + $0xd20] sm:$0xff]  ;;  %v704_v42 = vld [vmem:[%s3546_s30 + $0xc98] sm:$0xff] }
 0x12b   : > { %3119 = vmatprep.subr.mxu1 %v745_v44  ;;  %1801 = vmatprep.mubr.f32.mxu0 %v250_v45  ;;  %v736_v43 = vld [vmem:[%s3546_s30 + $0xd98] sm:$0xff] }
 0x12c   : > { %3076 = vmatpush3.msra.mxu0 %v697_v46  ;;  %3120 = vmatpush3.msra.mxu1 %v729_v47  ;;  %v688_v46 = vld [vmem:[%s3546_s30 + $0xc18] sm:$0xff] }
 0x12d   : > { %1802 = vmatmul.mubr.f32.gmra.mxu0 %v249_v48  ;;  %3077 = vmatprep.subr.mxu0 %v712_v49  ;;  %v720_v47 = vld [vmem:[%s3546_s30 + $0xd18] sm:$0xff]  ;;  %v703_v48 = vld [vmem:[%s3546_s30 + $0xc90] sm:$0xff] }
 0x12e   : > { %3121 = vmatprep.subr.mxu1 %v744_v50  ;;  %1886 = vmatprep.mubr.f32.mxu1 %v252_v51  ;;  %v2576_v59 = vpop.f32.mrf.mxu0  ;;  %v735_v49 = vld [vmem:[%s3546_s30 + $0xd90] sm:$0xff] }
 0x12f   : > { %3078 = vmatpush3.msra.mxu0 %v696_v52  ;;  %v2620_v60 = vpop.f32.mrf.mxu1  ;;  %3122 = vmatpush3.msra.mxu1 %v728_v53  ;;  %v687_v51 = vld [vmem:[%s3546_s30 + $0xc10] sm:$0xff] }
 0x130   : > { %3079 = vmatprep.subr.mxu0 %v711_v54  ;;  %1887 = vmatmul.mubr.f32.gmra.mxu1 %v251_v55  ;;  %v2577_v1 = vpop.f32.mrf.mxu0  ;;  %v719_v52 = vld [vmem:[%s3546_s30 + $0xd10] sm:$0xff]  ;;  %v702_v54 = vld [vmem:[%s3546_s30 + $0xc88] sm:$0xff] }
 0x131   : > { %3123 = vmatprep.subr.mxu1 %v743_v56  ;;  %v2621_v2 = vpop.f32.mrf.mxu1  ;;  %1806 = vmatprep.mubr.f32.mxu0 %v286_v57  ;;  %v2578_v5 = vadd.f32 %v2577_v1, %v2576_v59  ;;  %v734_v55 = vld [vmem:[%s3546_s30 + $0xd88] sm:$0xff] }
 0x132   : > { %3080 = vmatpush3.msra.mxu0 %v695_v58  ;;  %v2622_v6 = vadd.f32 %v2621_v2, %v2620_v60  ;;  %3124 = vmatpush3.msra.mxu1 %v727_v61  ;;  %v686_v56 = vld [vmem:[%s3546_s30 + $0xc08] sm:$0xff]  ;;  %v701_v60 = vld [vmem:[%s3546_s30 + $0xc80] sm:$0xff] }
 0x133   : > { %1807 = vmatmul.mubr.f32.gmra.mxu0 %v285_v62  ;;  %3081 = vmatprep.subr.mxu0 %v710_v63  ;;  %v718_v57 = vld [vmem:[%s3546_s30 + $0xd08] sm:$0xff]  ;;  %v733_v61 = vld [vmem:[%s3546_s30 + $0xd80] sm:$0xff] }
 0x134   : > { %3125 = vmatprep.subr.mxu1 %v742_v0  ;;  %v4256_v11 = vadd.f32 %v2622_v6, %v2578_v5  ;;  %1891 = vmatprep.mubr.f32.mxu1 %v288_v3  ;;  %v2579_v14 = vpop.f32.mrf.mxu0  ;;  %v685_v63 = vld [vmem:[%s3546_s30 + $0xc00] sm:$0xff]  ;;  %v182_v0 = vld [vmem:[%s4796_s0 + $0xc8] sm:$0xff]  ;;  %v184_v6 = vld [vmem:[%s4796_s0 + $0xd8] sm:$0xff] }
 0x135   : > { %3082 = vmatpush3.msra.mxu0 %v694_v4  ;;  %v2623_v15 = vpop.f32.mrf.mxu1  ;;  %3126 = vmatpush3.msra.mxu1 %v726_v7  ;;  %v717_v2 = vld [vmem:[%s3546_s30 + $0xd00] sm:$0xff]  ;;  %v780_v7 = vld [vmem:[%s3546_s30 + $0xef8] sm:$0xff] }
 0x136   : > { %3083 = vmatprep.subr.mxu0 %v709_v8  ;;  %1892 = vmatmul.mubr.f32.gmra.mxu1 %v287_v9  ;;  %v2580_v20 = vpop.f32.mrf.mxu0  ;;  %v181_v3 = vld [vmem:[%s4796_s0 + $0xc0] sm:$0xff]  ;;  %v812_v9 = vld [vmem:[%s3546_s30 + $0xff8] sm:$0xff] }
 0x137   : > { %3127 = vmatprep.subr.mxu1 %v741_v10  ;;  %v2624_v21 = vpop.f32.mrf.mxu1  ;;  %3084 = vmatpush3.msra.mxu0 %v693_v12  ;;  %v2581_v24 = vadd.f32 %v2580_v20, %v2579_v14  ;;  %v183_v10 = vld [vmem:[%s4796_s0 + $0xd0] sm:$0xff]  ;;  %v764_v12 = vld [vmem:[%s3546_s30 + $0xe78] sm:$0xff] }
 0x138   : > { %3128 = vmatpush3.msra.mxu1 %v725_v13  ;;  %v2625_v25 = vadd.f32 %v2624_v21, %v2623_v15  ;;  %3085 = vmatprep.subr.mxu0 %v708_v16  ;;  %v796_v13 = vld [vmem:[%s3546_s30 + $0xf78] sm:$0xff]  ;;  %v779_v15 = vld [vmem:[%s3546_s30 + $0xef0] sm:$0xff] }
 0x139   : > { %3129 = vmatprep.subr.mxu1 %v740_v17  ;;  %3086 = vmatpush3.msra.mxu0 %v692_v18  ;;  %v811_v16 = vld [vmem:[%s3546_s30 + $0xff0] sm:$0xff]  ;;  %v218_v18 = vld [vmem:[%s4796_s0 + $0x1e8] sm:$0xff] }
 0x13a   : > { %3130 = vmatpush3.msra.mxu1 %v724_v19  ;;  %v4270_v31 = vadd.f32 %v2625_v25, %v2581_v24  ;;  %3087 = vmatprep.subr.mxu0 %v707_v22  ;;  %v2582_v34 = vpop.f32.mrf.mxu0  ;;  %v763_v19 = vld [vmem:[%s3546_s30 + $0xe70] sm:$0xff]  ;;  %v217_v22 = vld [vmem:[%s4796_s0 + $0x1e0] sm:$0xff]  ;;  %v778_v24 = vld [vmem:[%s3546_s30 + $0xee8] sm:$0xff] }
 0x13b   : > { %3131 = vmatprep.subr.mxu1 %v739_v23  ;;  %v2626_v35 = vpop.f32.mrf.mxu1  ;;  %3088 = vmatpush3.msra.mxu0 %v691_v27  ;;  %v795_v21 = vld [vmem:[%s3546_s30 + $0xf70] sm:$0xff]  ;;  %v810_v25 = vld [vmem:[%s3546_s30 + $0xfe8] sm:$0xff] }
 0x13c   : > { %3132 = vmatpush3.msra.mxu1 %v723_v28  ;;  %3089 = vmatprep.subr.mxu0 %v706_v29  ;;  %v2583_v40 = vpop.f32.mrf.mxu0  ;;  %v220_v29 = vld [vmem:[%s4796_s0 + $0x1f8] sm:$0xff] }
 0x13d   : > { %3133 = vmatprep.subr.mxu1 %v738_v30  ;;  %v2627_v41 = vpop.f32.mrf.mxu1  ;;  %3090 = vmatpush3.msra.mxu0 %v690_v32  ;;  %v2584_v44 = vadd.f32 %v2583_v40, %v2582_v34  ;;  %v762_v30 = vld [vmem:[%s3546_s30 + $0xe68] sm:$0xff]  ;;  %v761_v40 = vld [vmem:[%s3546_s30 + $0xe60] sm:$0xff] }
 0x13e   : > { %3134 = vmatpush3.msra.mxu1 %v722_v33  ;;  %v2628_v45 = vadd.f32 %v2627_v41, %v2626_v35  ;;  %3091 = vmatprep.subr.mxu0 %v705_v36  ;;  %v794_v33 = vld [vmem:[%s3546_s30 + $0xf68] sm:$0xff]  ;;  %v219_v35 = vld [vmem:[%s4796_s0 + $0x1f0] sm:$0xff]  ;;  %v809_v36 = vld [vmem:[%s3546_s30 + $0xfe0] sm:$0xff] }
 0x13f   : > { %3135 = vmatprep.subr.mxu1 %v737_v37  ;;  %3092 = vmatpush3.msra.mxu0 %v689_v38 }
 0x140   : > { %3136 = vmatpush3.msra.mxu1 %v721_v39  ;;  %v4284_v50 = vadd.f32 %v2628_v45, %v2584_v44  ;;  %3093 = vmatprep.subr.mxu0 %v704_v42  ;;  %v254_v39 = vld [vmem:[%s4796_s0 + $0x308] sm:$0xff]  ;;  %v793_v42 = vld [vmem:[%s3546_s30 + $0xf60] sm:$0xff]  ;;  %v776_v45 = vld [vmem:[%s3546_s30 + $0xed8] sm:$0xff] }
 0x141   : > { %3137 = vmatprep.subr.mxu1 %v736_v43  ;;  %v2661_v53 = vpop.f32.mrf.mxu0  ;;  %3094 = vmatpush3.msra.mxu0 %v688_v46  ;;  %v253_v43 = vld [vmem:[%s4796_s0 + $0x300] sm:$0xff]  ;;  %v808_v46 = vld [vmem:[%s3546_s30 + $0xfd8] sm:$0xff] }
 0x142   : > { %3138 = vmatpush3.msra.mxu1 %v720_v47  ;;  %3095 = vmatprep.subr.mxu0 %v703_v48 }
 0x143   : > { %3139 = vmatprep.subr.mxu1 %v735_v49  ;;  %v2705_v58 = vpop.f32.mrf.mxu1  ;;  %v2662_v59 = vpop.f32.mrf.mxu0  ;;  %3096 = vmatpush3.msra.mxu0 %v687_v51  ;;  %v256_v49 = vld [vmem:[%s4796_s0 + $0x318] sm:$0xff] }
 0x144   : > { %3140 = vmatpush3.msra.mxu1 %v719_v52  ;;  %v2663_v62 = vadd.f32 %v2662_v59, %v2661_v53  ;;  %3097 = vmatprep.subr.mxu0 %v702_v54  ;;  %v760_v51 = vld [vmem:[%s3546_s30 + $0xe58] sm:$0xff]  ;;  %v290_v59 = vld [vmem:[%s4796_s0 + $0x428] sm:$0xff] }
 0x145   : > { %3141 = vmatprep.subr.mxu1 %v734_v55  ;;  %v2706_v1 = vpop.f32.mrf.mxu1  ;;  %3098 = vmatpush3.msra.mxu0 %v686_v56  ;;  %v792_v53 = vld [vmem:[%s3546_s30 + $0xf58] sm:$0xff]  ;;  %v255_v55 = vld [vmem:[%s4796_s0 + $0x310] sm:$0xff] }
 0x146   : > { %3142 = vmatpush3.msra.mxu1 %v718_v57  ;;  %v1114_v4 = vadd.f32 %v2663_v62, %v4186_v26  ;;  %v2707_v5 = vadd.f32 %v2706_v1, %v2705_v58  ;;  %3099 = vmatprep.subr.mxu0 %v701_v60  ;;  %v807_v56 = vld [vmem:[%s3546_s30 + $0xfd0] sm:$0xff]  ;;  %v774_v1 = vld [vmem:[%s3546_s30 + $0xec8] sm:$0xff] }
 0x147   : > { %3143 = vmatprep.subr.mxu1 %v733_v61  ;;  %v2664_v8 = vpop.f32.mrf.mxu0  ;;  %3100 = vmatpush3.msra.mxu0 %v685_v63  ;;  %v759_v60 = vld [vmem:[%s3546_s30 + $0xe50] sm:$0xff]  ;;  %v289_v63 = vld [vmem:[%s4796_s0 + $0x420] sm:$0xff] }
 0x148   : > { %1961 = vmatprep.mubr.f32.mxu0 %v182_v0  ;;  %v4311_v26 = vadd.f32 %v2707_v5, %v1114_v4  ;;  %3144 = vmatpush3.msra.mxu1 %v717_v2  ;;  %v791_v62 = vld [vmem:[%s3546_s30 + $0xf50] sm:$0xff]  ;;  %v806_v2 = vld [vmem:[%s3546_s30 + $0xfc8] sm:$0xff]  ;;  %v292_v4 = vld [vmem:[%s4796_s0 + $0x438] sm:$0xff] }
 0x149   : > { %1962 = vmatmul.mubr.f32.vlgmr.msra.gmra.mxu0 %v181_v3  ;;  %v2665_v14 = vpop.f32.mrf.mxu0  ;;  %2046 = vmatprep.mubr.f32.mxu1 %v184_v6  ;;  %v758_v5 = vld [vmem:[%s3546_s30 + $0xe48] sm:$0xff] }
 0x14a   : > { %3157 = vmatprep.subr.mxu0 %v780_v7  ;;  %v2666_v17 = vadd.f32 %v2665_v14, %v2664_v8  ;;  %3201 = vmatprep.subr.mxu1 %v812_v9  ;;  %v2708_v20 = vpop.f32.mrf.mxu1  ;;  %v773_v7 = vld [vmem:[%s3546_s30 + $0xec0] sm:$0xff]  ;;  %v291_v8 = vld [vmem:[%s4796_s0 + $0x430] sm:$0xff]  ;;  %v772_v14 = vld [vmem:[%s3546_s30 + $0xeb8] sm:$0xff] }
 0x14b   : > { %2047 = vmatmul.mubr.f32.vlgmr.msra.gmra.mxu1 %v183_v10  ;;  %3158 = vmatpush3.msra.mxu0 %v764_v12  ;;  %v805_v9 = vld [vmem:[%s3546_s30 + $0xfc0] sm:$0xff] }
 0x14c   : > { %3202 = vmatpush3.msra.mxu1 %v796_v13  ;;  %v1119_v23 = vadd.f32 %v2666_v17, %v4256_v11  ;;  %3159 = vmatprep.subr.mxu0 %v779_v15  ;;  %v2709_v28 = vpop.f32.mrf.mxu1  ;;  %v777_v11 = vld [vmem:[%s3546_s30 + $0xee0] sm:$0xff]  ;;  %v804_v15 = vld [vmem:[%s3546_s30 + $0xfb8] sm:$0xff] }
 0x14d   : > { %3203 = vmatprep.subr.mxu1 %v811_v16  ;;  %v2667_v27 = vpop.f32.mrf.mxu0  ;;  %1966 = vmatprep.mubr.f32.mxu0 %v218_v18  ;;  %v2710_v32 = vadd.f32 %v2709_v28, %v2708_v20  ;;  %v757_v12 = vld [vmem:[%s3546_s30 + $0xe40] sm:$0xff]  ;;  %v756_v16 = vld [vmem:[%s3546_s30 + $0xe38] sm:$0xff]  ;;  %v771_v18 = vld [vmem:[%s3546_s30 + $0xeb0] sm:$0xff] }
 0x14e   : > { %3160 = vmatpush3.msra.mxu0 %v763_v19  ;;  %3204 = vmatpush3.msra.mxu1 %v795_v21  ;;  %v789_v13 = vld [vmem:[%s3546_s30 + $0xf40] sm:$0xff]  ;;  %v788_v17 = vld [vmem:[%s3546_s30 + $0xf38] sm:$0xff]  ;;  %v803_v19 = vld [vmem:[%s3546_s30 + $0xfb0] sm:$0xff] }
 0x14f   : > { %1967 = vmatmul.mubr.f32.gmra.mxu0 %v217_v22  ;;  %v2668_v34 = vpop.f32.mrf.mxu0  ;;  %3161 = vmatprep.subr.mxu0 %v778_v24  ;;  %v4338_v37 = vadd.f32 %v2710_v32, %v1119_v23  ;;  %v755_v20 = vld [vmem:[%s3546_s30 + $0xe30] sm:$0xff]  ;;  %v770_v22 = vld [vmem:[%s3546_s30 + $0xea8] sm:$0xff]  ;;  %v801_v28 = vld [vmem:[%s3546_s30 + $0xfa0] sm:$0xff] }
 0x150   : > { %3205 = vmatprep.subr.mxu1 %v810_v25  ;;  %v2669_v38 = vadd.f32 %v2668_v34, %v2667_v27  ;;  %2051 = vmatprep.mubr.f32.mxu1 %v220_v29  ;;  %v2711_v41 = vpop.f32.mrf.mxu1  ;;  %v787_v21 = vld [vmem:[%s3546_s30 + $0xf30] sm:$0xff]  ;;  %v802_v23 = vld [vmem:[%s3546_s30 + $0xfa8] sm:$0xff]  ;;  %v769_v27 = vld [vmem:[%s3546_s30 + $0xea0] sm:$0xff] }
 0x151   : > { %3162 = vmatpush3.msra.mxu0 %v762_v30  ;;  %3206 = vmatpush3.msra.mxu1 %v794_v33  ;;  %v754_v24 = vld [vmem:[%s3546_s30 + $0xe28] sm:$0xff]  ;;  %v753_v29 = vld [vmem:[%s3546_s30 + $0xe20] sm:$0xff]  ;;  %v768_v32 = vld [vmem:[%s3546_s30 + $0xe98] sm:$0xff] }
 0x152   : > { %3163 = vmatprep.subr.mxu0 %v777_v11  ;;  %v1124_v44 = vadd.f32 %v2669_v38, %v4270_v31  ;;  %2052 = vmatmul.mubr.f32.gmra.mxu1 %v219_v35  ;;  %v2712_v48 = vpop.f32.mrf.mxu1  ;;  %v775_v31 = vld [vmem:[%s3546_s30 + $0xed0] sm:$0xff]  ;;  %v786_v25 = vld [vmem:[%s3546_s30 + $0xf28] sm:$0xff]  ;;  %v785_v30 = vld [vmem:[%s3546_s30 + $0xf20] sm:$0xff] }
 0x153   : > { %3207 = vmatprep.subr.mxu1 %v809_v36  ;;  %v2670_v47 = vpop.f32.mrf.mxu0  ;;  %1971 = vmatprep.mubr.f32.mxu0 %v254_v39  ;;  %v2713_v52 = vadd.f32 %v2712_v48, %v2711_v41  ;;  %v800_v33 = vld [vmem:[%s3546_s30 + $0xf98] sm:$0xff]  ;;  %v767_v35 = vld [vmem:[%s3546_s30 + $0xe90] sm:$0xff]  ;;  %v766_v41 = vld [vmem:[%s3546_s30 + $0xe88] sm:$0xff] }
 0x154   : > { %3164 = vmatpush3.msra.mxu0 %v761_v40  ;;  %3208 = vmatpush3.msra.mxu1 %v793_v42  ;;  %v752_v11 = vld [vmem:[%s3546_s30 + $0xe18] sm:$0xff]  ;;  %v799_v36 = vld [vmem:[%s3546_s30 + $0xf90] sm:$0xff]  ;;  %v798_v42 = vld [vmem:[%s3546_s30 + $0xf88] sm:$0xff] }
 0x155   : > { %1972 = vmatmul.mubr.f32.gmra.mxu0 %v253_v43  ;;  %v2671_v54 = vpop.f32.mrf.mxu0  ;;  %3165 = vmatprep.subr.mxu0 %v776_v45  ;;  %v4361_v57 = vadd.f32 %v2713_v52, %v1124_v44  ;;  %v784_v34 = vld [vmem:[%s3546_s30 + $0xf18] sm:$0xff]  ;;  %v751_v38 = vld [vmem:[%s3546_s30 + $0xe10] sm:$0xff]  ;;  %v750_v43 = vld [vmem:[%s3546_s30 + $0xe08] sm:$0xff] }
 0x156   : > { %3209 = vmatprep.subr.mxu1 %v808_v46  ;;  %v2672_v58 = vadd.f32 %v2671_v54, %v2670_v47  ;;  %2056 = vmatprep.mubr.f32.mxu1 %v256_v49  ;;  %v2714_v61 = vpop.f32.mrf.mxu1  ;;  %v783_v39 = vld [vmem:[%s3546_s30 + $0xf10] sm:$0xff]  ;;  %v782_v44 = vld [vmem:[%s3546_s30 + $0xf08] sm:$0xff]  ;;  %v765_v47 = vld [vmem:[%s3546_s30 + $0xe80] sm:$0xff] }
 0x157   : > { %3166 = vmatpush3.msra.mxu0 %v760_v51  ;;  %3210 = vmatpush3.msra.mxu1 %v792_v53  ;;  %v797_v48 = vld [vmem:[%s3546_s30 + $0xf80] sm:$0xff]  ;;  %v186_v52 = vld [vmem:[%s4796_s0 + $0xe8] sm:$0xff] }
 0x158   : > { %3167 = vmatprep.subr.mxu0 %v775_v31  ;;  %v1129_v0 = vadd.f32 %v2672_v58, %v4284_v50  ;;  %2057 = vmatmul.mubr.f32.gmra.mxu1 %v255_v55  ;;  %v2715_v3 = vpop.f32.mrf.mxu1  ;;  %v790_v50 = vld [vmem:[%s3546_s30 + $0xf48] sm:$0xff]  ;;  %v749_v51 = vld [vmem:[%s3546_s30 + $0xe00] sm:$0xff]  ;;  %v188_v58 = vld [vmem:[%s4796_s0 + $0xf8] sm:$0xff] }
 0x159   : > { %3211 = vmatprep.subr.mxu1 %v807_v56  ;;  %1976 = vmatprep.mubr.f32.mxu0 %v290_v59  ;;  %v2716_v6 = vadd.f32 %v2715_v3, %v2714_v61  ;;  %v781_v31 = vld [vmem:[%s3546_s30 + $0xf00] sm:$0xff]  ;;  %v844_v59 = vld [vmem:[%s3546_s30 + $0x10f8] sm:$0xff]  ;;  %v875_v3 = vld [vmem:[%s3546_s30 + $0x11f0] sm:$0xff] }
 0x15a   : > { %3168 = vmatpush3.msra.mxu0 %v759_v60  ;;  %3212 = vmatpush3.msra.mxu1 %v791_v62  ;;  %v185_v54 = vld [vmem:[%s4796_s0 + $0xe0] sm:$0xff]  ;;  %v876_v61 = vld [vmem:[%s3546_s30 + $0x11f8] sm:$0xff]  ;;  %v187_v62 = vld [vmem:[%s4796_s0 + $0xf0] sm:$0xff] }
 0x15b   : > { %1977 = vmatmul.mubr.f32.gmra.mxu0 %v289_v63  ;;  %3169 = vmatprep.subr.mxu0 %v774_v1  ;;  %v4384_v10 = vadd.f32 %v2716_v6, %v1129_v0  ;;  %v828_v63 = vld [vmem:[%s3546_s30 + $0x1078] sm:$0xff]  ;;  %v827_v6 = vld [vmem:[%s3546_s30 + $0x1070] sm:$0xff] }
 0x15c   : > { %3213 = vmatprep.subr.mxu1 %v806_v2  ;;  %2061 = vmatprep.mubr.f32.mxu1 %v292_v4  ;;  %v860_v0 = vld [vmem:[%s3546_s30 + $0x1178] sm:$0xff]  ;;  %v843_v2 = vld [vmem:[%s3546_s30 + $0x10f0] sm:$0xff] }
 0x15d   : > { %3170 = vmatpush3.msra.mxu0 %v758_v5  ;;  %3214 = vmatpush3.msra.mxu1 %v790_v50  ;;  %v222_v5 = vld [vmem:[%s4796_s0 + $0x208] sm:$0xff] }
 0x15e   : > { %3171 = vmatprep.subr.mxu0 %v773_v7  ;;  %2062 = vmatmul.mubr.f32.gmra.mxu1 %v291_v8  ;;  %v859_v7 = vld [vmem:[%s3546_s30 + $0x1170] sm:$0xff]  ;;  %v221_v8 = vld [vmem:[%s4796_s0 + $0x200] sm:$0xff] }
 0x15f   : > { %3215 = vmatprep.subr.mxu1 %v805_v9  ;;  %3172 = vmatpush3.msra.mxu0 %v757_v12  ;;  %v842_v12 = vld [vmem:[%s3546_s30 + $0x10e8] sm:$0xff] }
 0x160   : > { %3216 = vmatpush3.msra.mxu1 %v789_v13  ;;  %3173 = vmatprep.subr.mxu0 %v772_v14  ;;  %v874_v13 = vld [vmem:[%s3546_s30 + $0x11e8] sm:$0xff] }
 0x161   : > { %3217 = vmatprep.subr.mxu1 %v804_v15  ;;  %3174 = vmatpush3.msra.mxu0 %v756_v16  ;;  %v224_v16 = vld [vmem:[%s4796_s0 + $0x218] sm:$0xff] }
 0x162   : > { %3218 = vmatpush3.msra.mxu1 %v788_v17  ;;  %3175 = vmatprep.subr.mxu0 %v771_v18  ;;  %v826_v17 = vld [vmem:[%s3546_s30 + $0x1068] sm:$0xff] }
 0x163   : > { %3219 = vmatprep.subr.mxu1 %v803_v19  ;;  %3176 = vmatpush3.msra.mxu0 %v755_v20  ;;  %v858_v19 = vld [vmem:[%s3546_s30 + $0x1168] sm:$0xff] }
 0x164   : > { %3220 = vmatpush3.msra.mxu1 %v787_v21  ;;  %3177 = vmatprep.subr.mxu0 %v770_v22  ;;  %v223_v21 = vld [vmem:[%s4796_s0 + $0x210] sm:$0xff]  ;;  %v873_v22 = vld [vmem:[%s3546_s30 + $0x11e0] sm:$0xff] }
 0x165   : > { %3221 = vmatprep.subr.mxu1 %v802_v23  ;;  %3178 = vmatpush3.msra.mxu0 %v754_v24 }
 0x166   : > { %3222 = vmatpush3.msra.mxu1 %v786_v25  ;;  %3179 = vmatprep.subr.mxu0 %v769_v27  ;;  %v258_v25 = vld [vmem:[%s4796_s0 + $0x328] sm:$0xff]  ;;  %v825_v27 = vld [vmem:[%s3546_s30 + $0x1060] sm:$0xff] }
 0x167   : > { %3223 = vmatprep.subr.mxu1 %v801_v28  ;;  %3180 = vmatpush3.msra.mxu0 %v753_v29  ;;  %v857_v29 = vld [vmem:[%s3546_s30 + $0x1160] sm:$0xff] }
 0x168   : > { %3224 = vmatpush3.msra.mxu1 %v785_v30  ;;  %3181 = vmatprep.subr.mxu0 %v768_v32  ;;  %v257_v30 = vld [vmem:[%s4796_s0 + $0x320] sm:$0xff] }
 0x169   : > { %3225 = vmatprep.subr.mxu1 %v800_v33  ;;  %v2749_v40 = vpop.f32.mrf.mxu0  ;;  %3182 = vmatpush3.msra.mxu0 %v752_v11  ;;  %v840_v33 = vld [vmem:[%s3546_s30 + $0x10d8] sm:$0xff] }
 0x16a   : > { %3226 = vmatpush3.msra.mxu1 %v784_v34  ;;  %3183 = vmatprep.subr.mxu0 %v767_v35  ;;  %v872_v11 = vld [vmem:[%s3546_s30 + $0x11d8] sm:$0xff] }
 0x16b   : > { %3227 = vmatprep.subr.mxu1 %v799_v36  ;;  %v2793_v45 = vpop.f32.mrf.mxu1  ;;  %v2750_v46 = vpop.f32.mrf.mxu0  ;;  %3184 = vmatpush3.msra.mxu0 %v751_v38  ;;  %v260_v36 = vld [vmem:[%s4796_s0 + $0x338] sm:$0xff] }
 0x16c   : > { %3228 = vmatpush3.msra.mxu1 %v783_v39  ;;  %v2751_v49 = vadd.f32 %v2750_v46, %v2749_v40  ;;  %3185 = vmatprep.subr.mxu0 %v766_v41  ;;  %v824_v38 = vld [vmem:[%s3546_s30 + $0x1058] sm:$0xff]  ;;  %v294_v46 = vld [vmem:[%s4796_s0 + $0x448] sm:$0xff] }
 0x16d   : > { %3229 = vmatprep.subr.mxu1 %v798_v42  ;;  %v2794_v53 = vpop.f32.mrf.mxu1  ;;  %3186 = vmatpush3.msra.mxu0 %v750_v43  ;;  %v856_v40 = vld [vmem:[%s3546_s30 + $0x1158] sm:$0xff]  ;;  %v259_v42 = vld [vmem:[%s4796_s0 + $0x330] sm:$0xff] }
 0x16e   : > { %3230 = vmatpush3.msra.mxu1 %v782_v44  ;;  %v1284_v55 = vadd.f32 %v2751_v49, %v4311_v26  ;;  %v2795_v56 = vadd.f32 %v2794_v53, %v2793_v45  ;;  %3187 = vmatprep.subr.mxu0 %v765_v47  ;;  %v871_v43 = vld [vmem:[%s3546_s30 + $0x11d0] sm:$0xff]  ;;  %v838_v53 = vld [vmem:[%s3546_s30 + $0x10c8] sm:$0xff] }
 0x16f   : > { %3231 = vmatprep.subr.mxu1 %v797_v48  ;;  %v2752_v60 = vpop.f32.mrf.mxu0  ;;  %3188 = vmatpush3.msra.mxu0 %v749_v51  ;;  %v823_v47 = vld [vmem:[%s3546_s30 + $0x1050] sm:$0xff]  ;;  %v293_v51 = vld [vmem:[%s4796_s0 + $0x440] sm:$0xff] }
 0x170   : > { %2131 = vmatprep.mubr.f32.mxu0 %v186_v52  ;;  %v4435_v26 = vadd.f32 %v2795_v56, %v1284_v55  ;;  %3232 = vmatpush3.msra.mxu1 %v781_v31  ;;  %v855_v49 = vld [vmem:[%s3546_s30 + $0x1150] sm:$0xff]  ;;  %v870_v31 = vld [vmem:[%s3546_s30 + $0x11c8] sm:$0xff]  ;;  %v296_v55 = vld [vmem:[%s4796_s0 + $0x458] sm:$0xff] }
 0x171   : > { %2132 = vmatmul.mubr.f32.vlgmr.msra.gmra.mxu0 %v185_v54  ;;  %v2753_v1 = vpop.f32.mrf.mxu0  ;;  %2216 = vmatprep.mubr.f32.mxu1 %v188_v58  ;;  %v822_v56 = vld [vmem:[%s3546_s30 + $0x1048] sm:$0xff] }
 0x172   : > { %3245 = vmatprep.subr.mxu0 %v844_v59  ;;  %v2754_v4 = vadd.f32 %v2753_v1, %v2752_v60  ;;  %3289 = vmatprep.subr.mxu1 %v876_v61  ;;  %v2796_v50 = vpop.f32.mrf.mxu1  ;;  %v837_v59 = vld [vmem:[%s3546_s30 + $0x10c0] sm:$0xff]  ;;  %v295_v60 = vld [vmem:[%s4796_s0 + $0x450] sm:$0xff]  ;;  %v836_v1 = vld [vmem:[%s3546_s30 + $0x10b8] sm:$0xff] }
 0x173   : > { %2217 = vmatmul.mubr.f32.vlgmr.msra.gmra.mxu1 %v187_v62  ;;  %3246 = vmatpush3.msra.mxu0 %v828_v63  ;;  %v869_v61 = vld [vmem:[%s3546_s30 + $0x11c0] sm:$0xff] }
 0x174   : > { %3290 = vmatpush3.msra.mxu1 %v860_v0  ;;  %v1289_v9 = vadd.f32 %v2754_v4, %v4338_v37  ;;  %3247 = vmatprep.subr.mxu0 %v843_v2  ;;  %v2797_v15 = vpop.f32.mrf.mxu1  ;;  %v841_v37 = vld [vmem:[%s3546_s30 + $0x10e0] sm:$0xff]  ;;  %v868_v2 = vld [vmem:[%s3546_s30 + $0x11b8] sm:$0xff] }
 0x175   : > { %3291 = vmatprep.subr.mxu1 %v875_v3  ;;  %v2755_v14 = vpop.f32.mrf.mxu0  ;;  %2136 = vmatprep.mubr.f32.mxu0 %v222_v5  ;;  %v2798_v18 = vadd.f32 %v2797_v15, %v2796_v50  ;;  %v821_v63 = vld [vmem:[%s3546_s30 + $0x1040] sm:$0xff]  ;;  %v820_v3 = vld [vmem:[%s3546_s30 + $0x1038] sm:$0xff]  ;;  %v835_v5 = vld [vmem:[%s3546_s30 + $0x10b0] sm:$0xff] }
 0x176   : > { %3248 = vmatpush3.msra.mxu0 %v827_v6  ;;  %3292 = vmatpush3.msra.mxu1 %v859_v7  ;;  %v853_v0 = vld [vmem:[%s3546_s30 + $0x1140] sm:$0xff]  ;;  %v852_v4 = vld [vmem:[%s3546_s30 + $0x1138] sm:$0xff]  ;;  %v867_v6 = vld [vmem:[%s3546_s30 + $0x11b0] sm:$0xff] }
 0x177   : > { %2137 = vmatmul.mubr.f32.gmra.mxu0 %v221_v8  ;;  %v2756_v20 = vpop.f32.mrf.mxu0  ;;  %3249 = vmatprep.subr.mxu0 %v842_v12  ;;  %v4462_v23 = vadd.f32 %v2798_v18, %v1289_v9  ;;  %v819_v50 = vld [vmem:[%s3546_s30 + $0x1030] sm:$0xff]  ;;  %v834_v8 = vld [vmem:[%s3546_s30 + $0x10a8] sm:$0xff]  ;;  %v865_v15 = vld [vmem:[%s3546_s30 + $0x11a0] sm:$0xff] }
 0x178   : > { %3293 = vmatprep.subr.mxu1 %v874_v13  ;;  %v2757_v24 = vadd.f32 %v2756_v20, %v2755_v14  ;;  %2221 = vmatprep.mubr.f32.mxu1 %v224_v16  ;;  %v2799_v28 = vpop.f32.mrf.mxu1  ;;  %v851_v7 = vld [vmem:[%s3546_s30 + $0x1130] sm:$0xff]  ;;  %v866_v9 = vld [vmem:[%s3546_s30 + $0x11a8] sm:$0xff]  ;;  %v833_v14 = vld [vmem:[%s3546_s30 + $0x10a0] sm:$0xff] }
 0x179   : > { %3250 = vmatpush3.msra.mxu0 %v826_v17  ;;  %3294 = vmatpush3.msra.mxu1 %v858_v19  ;;  %v818_v12 = vld [vmem:[%s3546_s30 + $0x1028] sm:$0xff]  ;;  %v817_v16 = vld [vmem:[%s3546_s30 + $0x1020] sm:$0xff]  ;;  %v832_v18 = vld [vmem:[%s3546_s30 + $0x1098] sm:$0xff] }
 0x17a   : > { %3251 = vmatprep.subr.mxu0 %v841_v37  ;;  %v1294_v32 = vadd.f32 %v2757_v24, %v4361_v57  ;;  %2222 = vmatmul.mubr.f32.gmra.mxu1 %v223_v21  ;;  %v2800_v35 = vpop.f32.mrf.mxu1  ;;  %v839_v57 = vld [vmem:[%s3546_s30 + $0x10d0] sm:$0xff]  ;;  %v850_v13 = vld [vmem:[%s3546_s30 + $0x1128] sm:$0xff]  ;;  %v849_v17 = vld [vmem:[%s3546_s30 + $0x1120] sm:$0xff] }
 0x17b   : > { %3295 = vmatprep.subr.mxu1 %v873_v22  ;;  %v2758_v34 = vpop.f32.mrf.mxu0  ;;  %2141 = vmatprep.mubr.f32.mxu0 %v258_v25  ;;  %v2801_v39 = vadd.f32 %v2800_v35, %v2799_v28  ;;  %v864_v19 = vld [vmem:[%s3546_s30 + $0x1198] sm:$0xff]  ;;  %v831_v21 = vld [vmem:[%s3546_s30 + $0x1090] sm:$0xff]  ;;  %v862_v28 = vld [vmem:[%s3546_s30 + $0x1188] sm:$0xff] }
 0x17c   : > { %3252 = vmatpush3.msra.mxu0 %v825_v27  ;;  %3296 = vmatpush3.msra.mxu1 %v857_v29  ;;  %v816_v37 = vld [vmem:[%s3546_s30 + $0x1018] sm:$0xff]  ;;  %v863_v22 = vld [vmem:[%s3546_s30 + $0x1190] sm:$0xff]  ;;  %v830_v27 = vld [vmem:[%s3546_s30 + $0x1088] sm:$0xff] }
 0x17d   : > { %2142 = vmatmul.mubr.f32.gmra.mxu0 %v257_v30  ;;  %v2759_v41 = vpop.f32.mrf.mxu0  ;;  %3253 = vmatprep.subr.mxu0 %v840_v33  ;;  %v4485_v44 = vadd.f32 %v2801_v39, %v1294_v32  ;;  %v848_v20 = vld [vmem:[%s3546_s30 + $0x1118] sm:$0xff]  ;;  %v815_v24 = vld [vmem:[%s3546_s30 + $0x1010] sm:$0xff]  ;;  %v814_v29 = vld [vmem:[%s3546_s30 + $0x1008] sm:$0xff] }
 0x17e   : > { %3297 = vmatprep.subr.mxu1 %v872_v11  ;;  %v2760_v45 = vadd.f32 %v2759_v41, %v2758_v34  ;;  %2226 = vmatprep.mubr.f32.mxu1 %v260_v36  ;;  %v2802_v48 = vpop.f32.mrf.mxu1  ;;  %v847_v25 = vld [vmem:[%s3546_s30 + $0x1110] sm:$0xff]  ;;  %v846_v30 = vld [vmem:[%s3546_s30 + $0x1108] sm:$0xff]  ;;  %v829_v32 = vld [vmem:[%s3546_s30 + $0x1080] sm:$0xff] }
 0x17f   : > { %3254 = vmatpush3.msra.mxu0 %v824_v38  ;;  %3298 = vmatpush3.msra.mxu1 %v856_v40  ;;  %v861_v33 = vld [vmem:[%s3546_s30 + $0x1180] sm:$0xff]  ;;  %v190_v34 = vld [vmem:[%s4796_s0 + $0x108] sm:$0xff]  ;;  %v192_v36 = vld [vmem:[%s4796_s0 + $0x118] sm:$0xff] }
 0x180   : > { %3255 = vmatprep.subr.mxu0 %v839_v57  ;;  %v1299_v52 = vadd.f32 %v2760_v45, %v4384_v10  ;;  %2227 = vmatmul.mubr.f32.gmra.mxu1 %v259_v42  ;;  %v2803_v54 = vpop.f32.mrf.mxu1  ;;  %v854_v10 = vld [vmem:[%s3546_s30 + $0x1148] sm:$0xff]  ;;  %v813_v11 = vld [vmem:[%s3546_s30 + $0x1000] sm:$0xff]  ;;  %v191_v39 = vld [vmem:[%s4796_s0 + $0x110] sm:$0xff] }
 0x181   : > { %3299 = vmatprep.subr.mxu1 %v871_v43  ;;  %2146 = vmatprep.mubr.f32.mxu0 %v294_v46  ;;  %v2804_v58 = vadd.f32 %v2803_v54, %v2802_v48  ;;  %v845_v35 = vld [vmem:[%s3546_s30 + $0x1100] sm:$0xff]  ;;  %v226_v40 = vld [vmem:[%s4796_s0 + $0x228] sm:$0xff]  ;;  %v228_v57 = vld [vmem:[%s4796_s0 + $0x238] sm:$0xff] }
 0x182   : > { %3256 = vmatpush3.msra.mxu0 %v823_v47  ;;  %3300 = vmatpush3.msra.mxu1 %v855_v49  ;;  %v189_v38 = vld [vmem:[%s4796_s0 + $0x100] sm:$0xff]  ;;  %v227_v42 = vld [vmem:[%s4796_s0 + $0x230] sm:$0xff]  ;;  %v262_v43 = vld [vmem:[%s4796_s0 + $0x348] sm:$0xff] }
 0x183   : > { %2147 = vmatmul.mubr.f32.gmra.mxu0 %v293_v51  ;;  %3257 = vmatprep.subr.mxu0 %v838_v53  ;;  %v4508_v62 = vadd.f32 %v2804_v58, %v1299_v52  ;;  %v225_v41 = vld [vmem:[%s4796_s0 + $0x220] sm:$0xff]  ;;  %v264_v45 = vld [vmem:[%s4796_s0 + $0x358] sm:$0xff]  ;;  %v263_v47 = vld [vmem:[%s4796_s0 + $0x350] sm:$0xff] }
 0x184   : > { %3301 = vmatprep.subr.mxu1 %v870_v31  ;;  %2231 = vmatprep.mubr.f32.mxu1 %v296_v55  ;;  %v261_v46 = vld [vmem:[%s4796_s0 + $0x340] sm:$0xff]  ;;  %v298_v48 = vld [vmem:[%s4796_s0 + $0x468] sm:$0xff]  ;;  %v300_v49 = vld [vmem:[%s4796_s0 + $0x478] sm:$0xff] }
 0x185   : > { %3258 = vmatpush3.msra.mxu0 %v822_v56  ;;  %3302 = vmatpush3.msra.mxu1 %v854_v10  ;;  %v297_v51 = vld [vmem:[%s4796_s0 + $0x460] sm:$0xff]  ;;  %v299_v52 = vld [vmem:[%s4796_s0 + $0x470] sm:$0xff] }
 0x186   : > { %3259 = vmatprep.subr.mxu0 %v837_v59  ;;  %2232 = vmatmul.mubr.f32.gmra.mxu1 %v295_v60 }
 0x187   : > { %3303 = vmatprep.subr.mxu1 %v869_v61  ;;  %3260 = vmatpush3.msra.mxu0 %v821_v63 }
 0x188   : > { %3304 = vmatpush3.msra.mxu1 %v853_v0  ;;  %3261 = vmatprep.subr.mxu0 %v836_v1 }
 0x189   : > { %3305 = vmatprep.subr.mxu1 %v868_v2  ;;  %3262 = vmatpush3.msra.mxu0 %v820_v3 }
 0x18a   : > { %3306 = vmatpush3.msra.mxu1 %v852_v4  ;;  %3263 = vmatprep.subr.mxu0 %v835_v5 }
 0x18b   : > { %3307 = vmatprep.subr.mxu1 %v867_v6  ;;  %3264 = vmatpush3.msra.mxu0 %v819_v50 }
 0x18c   : > { %3308 = vmatpush3.msra.mxu1 %v851_v7  ;;  %3265 = vmatprep.subr.mxu0 %v834_v8 }
 0x18d   : > { %3309 = vmatprep.subr.mxu1 %v866_v9  ;;  %3266 = vmatpush3.msra.mxu0 %v818_v12 }
 0x18e   : > { %3310 = vmatpush3.msra.mxu1 %v850_v13  ;;  %3267 = vmatprep.subr.mxu0 %v833_v14 }
 0x18f   : > { %3311 = vmatprep.subr.mxu1 %v865_v15  ;;  %3268 = vmatpush3.msra.mxu0 %v817_v16 }
 0x190   : > { %3312 = vmatpush3.msra.mxu1 %v849_v17  ;;  %3269 = vmatprep.subr.mxu0 %v832_v18 }
 0x191   : > { %3313 = vmatprep.subr.mxu1 %v864_v19  ;;  %3270 = vmatpush3.msra.mxu0 %v816_v37  ;;  %v4592_v53 = vpop.f32.mrf.mxu0 }
 0x192   : > { %3314 = vmatpush3.msra.mxu1 %v848_v20  ;;  %3271 = vmatprep.subr.mxu0 %v831_v21 }
 0x193   : > { %3315 = vmatprep.subr.mxu1 %v863_v22  ;;  %3272 = vmatpush3.msra.mxu0 %v815_v24  ;;  %v4594_v31 = vpop.f32.mrf.mxu1  ;;  %v4596_v54 = vpop.f32.mrf.mxu0 }
 0x194   : > { %3316 = vmatpush3.msra.mxu1 %v847_v25  ;;  %3273 = vmatprep.subr.mxu0 %v830_v27 }
 0x195   : > { %3317 = vmatprep.subr.mxu1 %v862_v28  ;;  %3274 = vmatpush3.msra.mxu0 %v814_v29  ;;  %v4598_v55 = vpop.f32.mrf.mxu1 }
 0x196   : > { %3318 = vmatpush3.msra.mxu1 %v846_v30  ;;  %3275 = vmatprep.subr.mxu0 %v829_v32 }
 0x197   : > { %3319 = vmatprep.subr.mxu1 %v861_v33  ;;  %3276 = vmatpush3.msra.mxu0 %v813_v11  ;;  %v4600_v56 = vpop.f32.mrf.mxu0 }
 0x198   : > { %2301 = vmatprep.mubr.f32.mxu0 %v190_v34  ;;  %3320 = vmatpush3.msra.mxu1 %v845_v35 }
 0x199   : > { %2386 = vmatprep.mubr.f32.mxu1 %v192_v36  ;;  %2302 = vmatmul.mubr.f32.vlgmr.msra.gmra.mxu0 %v189_v38  ;;  %v4604_v10 = vpop.f32.mrf.mxu0 }
 0x19a   : > { %2387 = vmatmul.mubr.f32.vlgmr.msra.gmra.mxu1 %v191_v39  ;;  %2306 = vmatprep.mubr.f32.mxu0 %v226_v40  ;;  %v4602_v58 = vpop.f32.mrf.mxu1 }
 0x19b   : > { %2391 = vmatprep.mubr.f32.mxu1 %v228_v57 }
 0x19c   : > { %v4606_v59 = vpop.f32.mrf.mxu1 }
 0x19d   : > { %2307 = vmatmul.mubr.f32.gmra.mxu0 %v225_v41  ;;  %v4608_v60 = vpop.f32.mrf.mxu0 }
 0x19e   : > { %2392 = vmatmul.mubr.f32.gmra.mxu1 %v227_v42  ;;  %2311 = vmatprep.mubr.f32.mxu0 %v262_v43 }
 0x19f   : > { %2396 = vmatprep.mubr.f32.mxu1 %v264_v45  ;;  %v4612_v63 = vpop.f32.mrf.mxu0 }
 0x1a0   : > { %v4610_v61 = vpop.f32.mrf.mxu1 }
 0x1a1   : > { %2312 = vmatmul.mubr.f32.gmra.mxu0 %v261_v46 }
 0x1a2   : > { %2397 = vmatmul.mubr.f32.gmra.mxu1 %v263_v47  ;;  %2316 = vmatprep.mubr.f32.mxu0 %v298_v48  ;;  %v4614_v0 = vpop.f32.mrf.mxu1 }
 0x1a3   : > { %2401 = vmatprep.mubr.f32.mxu1 %v300_v49  ;;  %v4616_v1 = vpop.f32.mrf.mxu0 }
 0x1a5   : > { %2317 = vmatmul.mubr.f32.gmra.mxu0 %v297_v51  ;;  %v4620_v3 = vpop.f32.mrf.mxu0 }
 0x1a6   : > { %2402 = vmatmul.mubr.f32.gmra.mxu1 %v299_v52  ;;  %v4618_v2 = vpop.f32.mrf.mxu1 }
 0x1a8   : > { %v4622_v4 = vpop.f32.mrf.mxu1 }
 0x1b9   : > { %v2925_v5 = vpop.f32.mrf.mxu0 }
 0x1bb   : > { %v4624_v6 = vpop.f32.mrf.mxu1  ;;  %v2926_v50 = vpop.f32.mrf.mxu0 }
 0x1bd   : > { %v2970_v7 = vpop.f32.mrf.mxu1 }
 0x1bf   : > { %v2928_v8 = vpop.f32.mrf.mxu0 }
 0x1c1   : > { %v2929_v12 = vpop.f32.mrf.mxu0 }
 0x1c2   : > { %v4626_v9 = vpop.f32.mrf.mxu1 }
 0x1c4   : > { %v4628_v13 = vpop.f32.mrf.mxu1 }
 0x1c5   : > { %v4630_v14 = vpop.f32.mrf.mxu0 }
 0x1c7   : > { %v4634_v16 = vpop.f32.mrf.mxu0 }
 0x1c8   : > { %v4632_v15 = vpop.f32.mrf.mxu1 }
 0x1ca   : > { %v4636_v17 = vpop.f32.mrf.mxu1 }
 0x1cb   : > { %v4638_v18 = vpop.f32.mrf.mxu0 }
 0x1cd   : > { %v4642_v37 = vpop.f32.mrf.mxu0 }
 0x1ce   : > { %v4640_v19 = vpop.f32.mrf.mxu1 }
 0x1d0   : > { %v4644_v20 = vpop.f32.mrf.mxu1 }
 0x1e1   : > { %v3013_v21 = vpop.f32.mrf.mxu0 }
 0x1e3   : > { %v4646_v22 = vpop.f32.mrf.mxu1  ;;  %v3014_v24 = vpop.f32.mrf.mxu0 }
 0x1e5   : > { %v4648_v25 = vpop.f32.mrf.mxu1 }
 0x1e7   : > { %v4650_v27 = vpop.f32.mrf.mxu0 }
 0x1e9   : > { %v3017_v29 = vpop.f32.mrf.mxu0 }
 0x1ea   : > { %v4652_v28 = vpop.f32.mrf.mxu1 }
 0x1ec   : > { %v4654_v30 = vpop.f32.mrf.mxu1 }
 0x1ed   : > { %v4656_v32 = vpop.f32.mrf.mxu0 }
 0x1ef   : > { %v4660_v11 = vpop.f32.mrf.mxu0 }
 0x1f0   : > { %v4658_v33 = vpop.f32.mrf.mxu1 }
 0x1f2   : > { %v4662_v34 = vpop.f32.mrf.mxu1 }
 0x1f3   : > { %4804 = vst [vmem:[#allocation6_spill] sm:$0xff] %v4662_v34  ;;  %v4664_v35 = vpop.f32.mrf.mxu0 }
 0x1f4   : > { %4805 = vst [vmem:[#allocation7_spill] sm:$0xff] %v4664_v35 }
 0x1f5   : > { %v4668_v38 = vpop.f32.mrf.mxu0 }
 0x1f6   : > { %v4666_v36 = vpop.f32.mrf.mxu1  ;;  %4807 = vst [vmem:[#allocation9_spill] sm:$0xff] %v4668_v38 }
 0x1f7   : > { %4806 = vst [vmem:[#allocation8_spill] sm:$0xff] %v4666_v36 }
 0x1f8   : > { %v4670_v39 = vpop.f32.mrf.mxu1 }
 0x1f9   : > { %4808 = vst [vmem:[#allocation10_spill] sm:$0xff] %v4670_v39 }
 0x209   : > { %v3101_v40 = vpop.f32.mrf.mxu0 }
 0x20b   : > { %v4672_v57 = vpop.f32.mrf.mxu1  ;;  %v3102_v41 = vpop.f32.mrf.mxu0 }
 0x20d   : > { %v4674_v42 = vpop.f32.mrf.mxu1 }
 0x20f   : > { %v4676_v43 = vpop.f32.mrf.mxu0 }
 0x211   : > { %v4680_v46 = vpop.f32.mrf.mxu0 }
 0x212   : > { %v4678_v45 = vpop.f32.mrf.mxu1 }
 0x213   : > { %4809 = vst [vmem:[#allocation11_spill] sm:$0xff] %v4678_v45 }
 0x214   : > { %v4682_v47 = vpop.f32.mrf.mxu1 }
 0x215   : > { %4810 = vst [vmem:[#allocation12_spill] sm:$0xff] %v4682_v47  ;;  %v4684_v48 = vpop.f32.mrf.mxu0  ;;  %v2839_v47 = vadd.f32 %v4596_v54, %v4592_v53 }
 0x216   : > { %4811 = vst [vmem:[#allocation13_spill] sm:$0xff] %v4684_v48 }
 0x217   : > { %v4688_v51 = vpop.f32.mrf.mxu0 }
 0x218   : > { %v4686_v49 = vpop.f32.mrf.mxu1  ;;  %4813 = vst [vmem:[#allocation15_spill] sm:$0xff] %v4688_v51  ;;  %v1454_v51 = vadd.f32 %v2839_v47, %v4435_v26  ;;  %v2886_v26 = vadd.f32 %v4606_v59, %v4602_v58  ;;  %v2933_v58 = vadd.f32 %v4634_v16, %v4630_v14  ;;  %v2977_v16 = vadd.f32 %v4636_v17, %v4632_v15 }
 0x219   : > { %4812 = vst [vmem:[#allocation14_spill] sm:$0xff] %v4686_v49  ;;  %v2980_v15 = vadd.f32 %v4644_v20, %v4640_v19 }
 0x21a   : > { %v4690_v52 = vpop.f32.mrf.mxu1 }
 0x21b   : > { %4814 = vst [vmem:[#allocation16_spill] sm:$0xff] %v4690_v52  ;;  %v4692_v39 = vpop.f32.mrf.mxu0 }
 0x21c   : > { %4815 = vst [vmem:[#allocation17_spill] sm:$0xff] %v4692_v39  ;;  %v2883_v39 = vadd.f32 %v4598_v55, %v4594_v31  ;;  %v2971_v31 = vadd.f32 %v2970_v7, %v4624_v6  ;;  %v2930_v55 = vadd.f32 %v2929_v12, %v2928_v8  ;;  %v2974_v6 = vadd.f32 %v4628_v13, %v4626_v9 }
 0x21d   : > { %v4696_v38 = vpop.f32.mrf.mxu0  ;;  %v3059_v8 = vadd.f32 %v4648_v25, %v4646_v22  ;;  %v3018_v12 = vadd.f32 %v3017_v29, %v4650_v27  ;;  %v2936_v9 = vadd.f32 %v4642_v37, %v4638_v18  ;;  %v3103_v13 = vadd.f32 %v3102_v41, %v3101_v40  ;;  %v4822_v40 = vld [vmem:[#allocation9_spill] sm:$0xff] }
 0x21e   : > { %v4694_v36 = vpop.f32.mrf.mxu1  ;;  %4817 = vst [vmem:[#allocation19_spill] sm:$0xff] %v4696_v38  ;;  %v2927_v38 = vadd.f32 %v2926_v50, %v2925_v5  ;;  %v1539_v53 = vadd.f32 %v2883_v39, %v1454_v51  ;;  %v3062_v22 = vadd.f32 %v4654_v30, %v4652_v28  ;;  %v3147_v18 = vadd.f32 %v4674_v42, %v4672_v57  ;;  %v4821_v39 = vld [vmem:[#allocation7_spill] sm:$0xff]  ;;  %v4823_v19 = vld [vmem:[#allocation13_spill] sm:$0xff] }
 0x21f   : > { %4816 = vst [vmem:[#allocation18_spill] sm:$0xff] %v4694_v36  ;;  %v2842_v36 = vadd.f32 %v4604_v10, %v4600_v56  ;;  %v2889_v10 = vadd.f32 %v4614_v0, %v4610_v61  ;;  %v2892_v61 = vadd.f32 %v4622_v4, %v4618_v2  ;;  %v3021_v2 = vadd.f32 %v4660_v11, %v4656_v32  ;;  %v4820_v32 = vld [vmem:[#allocation6_spill] sm:$0xff]  ;;  %v4824_v20 = vld [vmem:[#allocation15_spill] sm:$0xff] }
 0x220   : > { %v4698_v35 = vpop.f32.mrf.mxu1  ;;  %v1624_v47 = vadd.f32 %v2927_v38, %v1539_v53  ;;  %v3106_v37 = vadd.f32 %v4680_v46, %v4676_v43  ;;  %v3065_v11 = vadd.f32 %v4820_v32, %v4658_v33  ;;  %v3024_v41 = vadd.f32 %v4822_v40, %v4821_v39  ;;  %v4825_v42 = vld [vmem:[#allocation11_spill] sm:$0xff]  ;;  %v4828_v33 = vld [vmem:[#allocation10_spill] sm:$0xff] }
 0x221   : > { %4818 = vst [vmem:[#allocation20_spill] sm:$0xff] %v4698_v35  ;;  %v2845_v35 = vadd.f32 %v4612_v63, %v4608_v60  ;;  %v1459_v54 = vadd.f32 %v2842_v36, %v4462_v23  ;;  %v2848_v60 = vadd.f32 %v4620_v3, %v4616_v1  ;;  %v3015_v23 = vadd.f32 %v3014_v24, %v3013_v21 }
 0x222   : > { %v1709_v59 = vadd.f32 %v2971_v31, %v1624_v47  ;;  %v4826_v31 = vld [vmem:[#allocation12_spill] sm:$0xff] }
 0x223   : > { %v1464_v56 = vadd.f32 %v2845_v35, %v4485_v44  ;;  %v1544_v50 = vadd.f32 %v2886_v26, %v1459_v54  ;;  %v1469_v7 = vadd.f32 %v2848_v60, %v4508_v62  ;;  %v3109_v26 = vadd.f32 %v4824_v20, %v4823_v19 }
 0x224   : > { %v1794_v3 = vadd.f32 %v3015_v23, %v1709_v59  ;;  %v3150_v43 = vadd.f32 %v4826_v31, %v4825_v42 }
 0x225   : > { %v1629_v36 = vadd.f32 %v2930_v55, %v1544_v50  ;;  %v1549_v44 = vadd.f32 %v2889_v10, %v1464_v56  ;;  %v1554_v21 = vadd.f32 %v2892_v61, %v1469_v7  ;;  %v4827_v56 = vld [vmem:[#allocation8_spill] sm:$0xff] }
 0x226   : > { %v1879_v35 = vadd.f32 %v3059_v8, %v1794_v3  ;;  %v3068_v10 = vadd.f32 %v4828_v33, %v4827_v56  ;;  %v4832_v8 = vld [vmem:[#allocation17_spill] sm:$0xff] }
 0x227   : > { %v1634_v14 = vadd.f32 %v2933_v58, %v1549_v44  ;;  %v1714_v62 = vadd.f32 %v2974_v6, %v1629_v36  ;;  %v1639_v27 = vadd.f32 %v2936_v9, %v1554_v21  ;;  %v4830_v36 = vld [vmem:[#allocation14_spill] sm:$0xff]  ;;  %v4831_v6 = vld [vmem:[#allocation16_spill] sm:$0xff] }
 0x228   : > { %v1964_v17 = vadd.f32 %v3103_v13, %v1879_v35  ;;  %v3153_v44 = vadd.f32 %v4831_v6, %v4830_v36 }
 0x229   : > { %v1799_v38 = vadd.f32 %v3018_v12, %v1714_v62  ;;  %v1719_v25 = vadd.f32 %v2977_v16, %v1634_v14  ;;  %v1724_v54 = vadd.f32 %v2980_v15, %v1639_v27  ;;  %v4833_v12 = vld [vmem:[#allocation19_spill] sm:$0xff]  ;;  %v4835_v27 = vld [vmem:[#allocation20_spill] sm:$0xff] }
 0x22a   : > { %v2049_v47 = vadd.f32 %v3147_v18, %v1964_v17  ;;  %v3112_v14 = vadd.f32 %v4833_v12, %v4832_v8 }
 0x22b   : > { %v1804_v29 = vadd.f32 %v3021_v2, %v1719_v25  ;;  %v1884_v51 = vadd.f32 %v3062_v22, %v1799_v38  ;;  %v1809_v55 = vadd.f32 %v3024_v41, %v1724_v54  ;;  %v4834_v25 = vld [vmem:[#allocation18_spill] sm:$0xff] }
 0x22c   : > { %v3156_v15 = vadd.f32 %v4835_v27, %v4834_v25 }
 0x22d   : > { %v1969_v57 = vadd.f32 %v3106_v37, %v1884_v51  ;;  %v1889_v46 = vadd.f32 %v3065_v11, %v1804_v29  ;;  %v1894_v16 = vadd.f32 %v3068_v10, %v1809_v55 }
 0x22f   : > { %v1974_v59 = vadd.f32 %v3109_v26, %v1889_v46  ;;  %v2054_v3 = vadd.f32 %v3150_v43, %v1969_v57  ;;  %v1979_v22 = vadd.f32 %v3112_v14, %v1894_v16 }
 0x231   : > { %v3189_v45 = vpop.f32.mrf.mxu0  ;;  %v2064_v41 = vadd.f32 %v3156_v15, %v1979_v22 }
 0x233   : > { %v4700_v34 = vpop.f32.mrf.mxu1  ;;  %v3190_v48 = vpop.f32.mrf.mxu0 }
 0x234   : > { %4819 = vst [vmem:[#allocation21_spill] sm:$0xff] %v4700_v34  ;;  %v3191_v53 = vadd.f32 %v3190_v48, %v3189_v45 }
 0x235   : > { %v4704_v49 = vpop.f32.mrf.mxu1 }
 0x236   : > { %v2134_v23 = vadd.f32 %v3191_v53, %v2049_v47 }
 0x237   : > { %v4713_v52 = vpop.f32.mrf.mxu0 }
 0x239   : > { %v3193_v63 = vpop.f32.mrf.mxu0 }
 0x23a   : > { %v4715_v34 = vpop.f32.mrf.mxu1  ;;  %v3194_v48 = vadd.f32 %v3193_v63, %v4713_v52  ;;  %v2059_v63 = vadd.f32 %v3153_v44, %v1974_v59 }
 0x23b   : > { %v4829_v58 = vld [vmem:[#allocation21_spill] sm:$0xff] }
 0x23c   : > { %v4726_v5 = vpop.f32.mrf.mxu1  ;;  %v3235_v45 = vadd.f32 %v4704_v49, %v4829_v58  ;;  %v2139_v2 = vadd.f32 %v3194_v48, %v2054_v3 }
 0x23d   : > { %v3195_v0 = vpop.f32.mrf.mxu0  ;;  %v3238_v49 = vadd.f32 %v4726_v5, %v4715_v34 }
 0x23e   : > { %v2219_v21 = vadd.f32 %v3235_v45, %v2134_v23 }
 0x23f   : > { %v3196_v4 = vpop.f32.mrf.mxu0  ;;  %v2224_v32 = vadd.f32 %v3238_v49, %v2139_v2 }
 0x240   : > { %v4735_v1 = vpop.f32.mrf.mxu1  ;;  %v3197_v9 = vadd.f32 %v3196_v4, %v3195_v0 }
 0x242   : > { %v3240_v24 = vpop.f32.mrf.mxu1  ;;  %v2144_v37 = vadd.f32 %v3197_v9, %v2059_v63 }
 0x243   : > { %v3198_v28 = vpop.f32.mrf.mxu0  ;;  %v3241_v0 = vadd.f32 %v3240_v24, %v4735_v1 }
 0x245   : > { %v3199_v60 = vpop.f32.mrf.mxu0  ;;  %v2229_v19 = vadd.f32 %v3241_v0, %v2144_v37 }
 0x246   : > { %v3242_v30 = vpop.f32.mrf.mxu1  ;;  %v3200_v11 = vadd.f32 %v3199_v60, %v3198_v28 }
 0x248   : > { %v3243_v50 = vpop.f32.mrf.mxu1  ;;  %v2149_v47 = vadd.f32 %v3200_v11, %v2064_v41 }
 0x249   : > { %v3244_v57 = vadd.f32 %v3243_v50, %v3242_v30 }
 0x24b   : > { %v2234_v33 = vadd.f32 %v3244_v57, %v2149_v47 }
 0x259   : > { %v3277_v7 = vpop.f32.mrf.mxu0 }
 0x25a   : > { %v3321_v61 = vpop.f32.mrf.mxu1 }
 0x25b   : > { %v3278_v62 = vpop.f32.mrf.mxu0 }
 0x25c   : > { %v3322_v13 = vpop.f32.mrf.mxu1  ;;  %v3279_v52 = vadd.f32 %v3278_v62, %v3277_v7 }
 0x25d   : > { %v3280_v35 = vpop.f32.mrf.mxu0  ;;  %v3323_v18 = vadd.f32 %v3322_v13, %v3321_v61 }
 0x25e   : > { %v3324_v38 = vpop.f32.mrf.mxu1  ;;  %v2304_v17 = vadd.f32 %v3279_v52, %v2219_v21 }
 0x25f   : > { %v3281_v4 = vpop.f32.mrf.mxu0 }
 0x260   : > { %v3325_v29 = vpop.f32.mrf.mxu1  ;;  %v2389_v39 = vadd.f32 %v3323_v18, %v2304_v17  ;;  %v3282_v34 = vadd.f32 %v3281_v4, %v3280_v35 }
 0x261   : > { %v3283_v5 = vpop.f32.mrf.mxu0  ;;  %v3326_v54 = vadd.f32 %v3325_v29, %v3324_v38 }
 0x262   : > { %v3327_v40 = vpop.f32.mrf.mxu1  ;;  %v2407_v51 = vmax.f32 %v2389_v39, 0.0  ;;  %v2309_v53 = vadd.f32 %v3282_v34, %v2224_v32 }
 0x263   : > { %v3284_v20 = vpop.f32.mrf.mxu0 }
 0x264   : > { %v3328_v26 = vpop.f32.mrf.mxu1  ;;  %2411 = vst [vmem:[%s156_s24] sm:$0xff] %v2407_v51  ;;  %v2394_v1 = vadd.f32 %v3326_v54, %v2309_v53  ;;  %v3285_v24 = vadd.f32 %v3284_v20, %v3283_v5 }
 0x265   : > { %v3286_v42 = vpop.f32.mrf.mxu0  ;;  %v3329_v46 = vadd.f32 %v3328_v26, %v3327_v40 }
 0x266   : > { %v3330_v31 = vpop.f32.mrf.mxu1  ;;  %v2408_v28 = vmax.f32 %v2394_v1, 0.0  ;;  %v2314_v43 = vadd.f32 %v3285_v24, %v2229_v19 }
 0x267   : > { %v3287_v55 = vpop.f32.mrf.mxu0 }
 0x268   : > { %v3331_v56 = vpop.f32.mrf.mxu1  ;;  %2412 = vst [vmem:[%s156_s24 + $0x8] sm:$0xff] %v2408_v28  ;;  %v2399_v10 = vadd.f32 %v3329_v46, %v2314_v43  ;;  %v3288_v60 = vadd.f32 %v3287_v55, %v3286_v42 }
 0x269   : > { %v3332_v45 = vadd.f32 %v3331_v56, %v3330_v31 }
 0x26a   : > { %v2409_v23 = vmax.f32 %v2399_v10, 0.0  ;;  %v2319_v58 = vadd.f32 %v3288_v60, %v2234_v33 }
 0x26b   : > { %v2458_v48 = vld [vmem:[%s156_s24] sm:$0xff] (%p4836_p9) }
 0x26c   : > { %2413 = vst [vmem:[%s156_s24 + $0x10] sm:$0xff] %v2409_v23  ;;  %v2404_v30 = vadd.f32 %v3332_v45, %v2319_v58  ;;  %2421 = sbr.rel (!%p4836_p9) target bundleno = 633 (0x279), region = 36  ;;  %2459 = vst [vmem:[%s2423_s7] sm:$0xff] (%p4836_p9), %v2458_v48 }
 0x26e   : > { %v2410_v50 = vmax.f32 %v2404_v30, 0.0 }
 0x26f   : > { %v2460_v59 = vld [vmem:[%s156_s24 + $0x8] sm:$0xff] (%p4836_p9) }
 0x270   : > { %2414 = vst [vmem:[%s156_s24 + $0x18] sm:$0xff] %v2410_v50  ;;  %2461 = vst [vmem:[%s2423_s7 + $0x20] sm:$0xff] (%p4836_p9), %v2460_v59 }
 0x273   : > { %v2462_v36 = vld [vmem:[%s156_s24 + $0x10] sm:$0xff] }
 0x274   : > { %2463 = vst [vmem:[%s2423_s7 + $0x40] sm:$0xff] %v2462_v36 }
 0x277   : > { %v2464_v6 = vld [vmem:[%s156_s24 + $0x18] sm:$0xff] }
 0x278   : > { %2465 = vst [vmem:[%s2423_s7 + $0x60] sm:$0xff] %v2464_v6 }
 0x279 PF: > { %p12_p10 = scmp.ge.s32.totalorder %s3482_s14, 6   ;;  %s4837_s9 = smov %s3431_s10 }
 0x27a   : > { %s4838_s10 = smov %s3435_s11  ;;  %s4839_s11 = smov %s3492_s17 }
 0x27b   : > { %s4840_s12 = smov %s3482_s14  ;;  %14 = sbr.rel (!%p12_p10) target bundleno = 3 (0x3), region = 106 }
 0x280   :  { %2481 = vsyncpa [#allocation3], 1 }
 0x281   :  { %2483 = vsyncpa [#allocation3 + $0x1], 1 }

</bundles_post_ra>
